<compile_context>
chip_gen: v7x
topology: tpu7x:2x2x1
jax: 0.10.0
libtpu: 0.0.40
codegen_flags: <defaults>
</compile_context>

<pallas_src>
import jax
import jax.numpy as jnp
import numpy as np
from jax.experimental import pallas as pl
from jax.experimental.pallas import tpu as pltpu

EPS = 0.001


def _round_up(x, m):
    return ((x + m - 1) // m) * m


def _detect_vmem_cap():
    try:
        return int(pltpu.get_tpu_info().vmem_capacity_bytes)
    except Exception:
        return 64 * 1024 * 1024          # conservative (v7x per-TC) fallback


_VMEM_CAP = _detect_vmem_cap()
VMEM_LIMIT = max(32 * 1024 * 1024, min(int(_VMEM_CAP * 0.70), 100 * 1024 * 1024))
TILE_BUDGET = max(16 * 1024 * 1024, min(int(_VMEM_CAP * 0.45), 48 * 1024 * 1024))


def _choose_tm(m, k_dim, cout_p, budget=None):
    """Pick an M-row tile (multiple of 8), padded M and grid size.

    Sized so the double-buffered pass-1/pass-2 working set (bf16 patches,
    f32 accumulator tile, pass-2 in/out tiles) stays under the VMEM budget,
    and (when M allows) grid_m >= 2 so the 'parallel' M axis can shard across
    both TensorCores on 2-TC parts (v7x)."""
    if budget is None:
        budget = TILE_BUDGET
    per_row = 2 * (2 * k_dim + 4 * cout_p) + 6 * cout_p      # bytes, rough
    fixed = 2 * k_dim * cout_p + 8 * cout_p                  # weights + scale/shift
    tm_cap = (budget - fixed) // max(per_row, 1)
    tm_cap = max(8, min(2048, (tm_cap // 8) * 8))
    m8 = _round_up(max(m, 8), 8)
    if m8 <= 16:
        tm = m8
    else:
        tm = min(tm_cap, _round_up((m8 + 1) // 2, 8))        # >= 2 tiles
    mp = _round_up(m8, tm)
    return tm, mp, mp // tm


def _pad_rows(p, mp):
    m = p.shape[0]
    if mp == m:
        return p
    return jnp.pad(p, ((0, mp - m),) + ((0, 0),) * (p.ndim - 1))


# ----------------------------------------------------------------------------
# Pallas kernels
# ----------------------------------------------------------------------------
def _matmul_stats_kernel(p_ref, w_ref, y_ref, stat_ref):
    # One folded matmul per M tile: K = KH*KW*Cin_p (window offsets folded
    # into the contraction). Weight block index is constant across the grid,
    # so Pallas keeps it resident instead of re-DMAing it per tile.
    y = jnp.dot(p_ref[...], w_ref[...], preferred_element_type=jnp.float32)
    y_ref[...] = y
    s = jnp.sum(y, axis=0, keepdims=True)
    ss = jnp.sum(y * y, axis=0, keepdims=True)
    stat_ref[...] = jnp.concatenate([s, ss], axis=0)   # single (2, Cout_p) store


def _scale_shift_relu_kernel(y_ref, scale_ref, shift_ref, o_ref):
    # One FMA + max per element; scale/shift precomputed from global stats.
    o_ref[...] = jnp.maximum(
        y_ref[...] * scale_ref[...] + shift_ref[...], 0.0).astype(o_ref.dtype)


def _maxpool_kernel(p_ref, o_ref):
    # p_ref: (TM, KK, C) window-stacked slices; unrolled running max over KK.
    kk = p_ref.shape[1]
    m = p_ref[:, 0, :].astype(jnp.float32)
    for k in range(1, kk):
        m = jnp.maximum(m, p_ref[:, k, :].astype(jnp.float32))
    o_ref[...] = m


# ----------------------------------------------------------------------------
# Wrappers
# ----------------------------------------------------------------------------
def conv_bn_relu(p_pad, m_true, tm, w_hwio, gamma, beta, out_dtype=jnp.float32):
    """Conv (folded im2col matmul) + BatchNorm(batch stats, eps=1e-3) + ReLU.

    p_pad : (Mp, K) bf16 im2col matrix, K = KH*KW*Cin_p; rows >= m_true are
            zero padding (they contribute nothing to the BN statistics).
    Returns (Mp, Cout_p), Cout_p = round_up(Cout, 128); channels >= Cout are
    exact zeros. Caller slices off padded rows.
    """
    Mp, K = p_pad.shape
    KH, KW, Cin_w, Cout = w_hwio.shape
    KK = KH * KW
    assert K % KK == 0
    Cin_p = K // KK
    assert Cin_w <= Cin_p and Mp % tm == 0
    Cout_p = _round_up(Cout, 128)
    grid_m = Mp // tm

    w = w_hwio.astype(jnp.float32)
    if Cin_w != Cin_p or Cout_p != Cout:
        w = jnp.pad(w, ((0, 0), (0, 0), (0, Cin_p - Cin_w), (0, Cout_p - Cout)))
    w = w.reshape(K, Cout_p).astype(jnp.bfloat16)

    # ---- pass 1: matmul + per-tile partial BN sums ----
    y, stats = pl.pallas_call(
        _matmul_stats_kernel,
        out_shape=(
            jax.ShapeDtypeStruct((Mp, Cout_p), jnp.float32),
            jax.ShapeDtypeStruct((grid_m, 2, Cout_p), jnp.float32),
        ),
        grid=(grid_m,),
        in_specs=[
            pl.BlockSpec((tm, K), lambda i: (i, 0)),
            pl.BlockSpec((K, Cout_p), lambda i: (0, 0)),   # constant -> resident
        ],
        out_specs=(
            pl.BlockSpec((tm, Cout_p), lambda i: (i, 0)),
            pl.BlockSpec((None, 2, Cout_p), lambda i: (i, 0, 0)),
        ),
        compiler_params=pltpu.CompilerParams(
            dimension_semantics=("parallel",),
            vmem_limit_bytes=VMEM_LIMIT,
        ),
    )(p_pad, w)

    # ---- BN finalize (tiny, plain JAX): global stats over the true M rows ----
    s = jnp.sum(stats[:, 0, :], axis=0)
    ss = jnp.sum(stats[:, 1, :], axis=0)
    mean = s / m_true
    var = jnp.maximum(ss / m_true - mean * mean, 0.0)       # biased variance
    gamma_p = jnp.pad(gamma.astype(jnp.float32), (0, Cout_p - Cout))
    beta_p = jnp.pad(beta.astype(jnp.float32), (0, Cout_p - Cout))
    scale_v = gamma_p * jax.lax.rsqrt(var + EPS)
    shift_v = beta_p - mean * scale_v
    scale = scale_v.reshape(1, Cout_p)
    shift = shift_v.reshape(1, Cout_p)

    # ---- pass 2: y*scale + shift -> ReLU (bf16 out for chained activations) ----
    out = pl.pallas_call(
        _scale_shift_relu_kernel,
        out_shape=jax.ShapeDtypeStruct((Mp, Cout_p), out_dtype),
        grid=(grid_m,),
        in_specs=[
            pl.BlockSpec((tm, Cout_p), lambda i: (i, 0)),
            pl.BlockSpec((1, Cout_p), lambda i: (0, 0)),
            pl.BlockSpec((1, Cout_p), lambda i: (0, 0)),
        ],
        out_specs=pl.BlockSpec((tm, Cout_p), lambda i: (i, 0)),
        compiler_params=pltpu.CompilerParams(
            dimension_semantics=("parallel",),
            vmem_limit_bytes=VMEM_LIMIT,
        ),
    )(y, scale, shift)
    return out


def maxpool_from_patches(p_pad, tm):
    """p_pad: (Mp, KK, C) window-stacked slices -> (Mp, C) f32 max over KK."""
    Mp, KK, C = p_pad.shape
    assert Mp % tm == 0
    grid_m = Mp // tm
    return pl.pallas_call(
        _maxpool_kernel,
        out_shape=jax.ShapeDtypeStruct((Mp, C), jnp.float32),
        grid=(grid_m,),
        in_specs=[pl.BlockSpec((tm, KK, C), lambda i: (i, 0, 0))],
        out_specs=pl.BlockSpec((tm, C), lambda i: (i, 0)),
        compiler_params=pltpu.CompilerParams(
            dimension_semantics=("parallel",),
            vmem_limit_bytes=VMEM_LIMIT,
        ),
    )(p_pad)


# ----------------------------------------------------------------------------
# Glue: window-offset slices stacked along an INNER axis (free im2col reshape)
# ----------------------------------------------------------------------------
def extract_patches(x_nhwc, ksize, stride, pad):
    """(N,H,W,C) -> ((N*OH*OW, KK, C) window-offset slices, OH, OW)."""
    N, H, W, C = x_nhwc.shape
    xp = jnp.pad(x_nhwc, ((0, 0), (pad, pad), (pad, pad), (0, 0))) if pad else x_nhwc
    OH = (H + 2 * pad - ksize) // stride + 1
    OW = (W + 2 * pad - ksize) // stride + 1
    cols = []
    for kh in range(ksize):
        for kw in range(ksize):
            cols.append(
                xp[:, kh:kh + stride * OH:stride, kw:kw + stride * OW:stride, :])
    stacked = jnp.stack(cols, axis=3)                    # (N, OH, OW, KK, C)
    return stacked.reshape(N * OH * OW, ksize * ksize, C), OH, OW


# ----------------------------------------------------------------------------
# InceptionB forward
# ----------------------------------------------------------------------------
def inception_b_forward(x_nchw, params):
    x = jnp.transpose(x_nchw, (0, 2, 3, 1)).astype(jnp.float32)   # NHWC
    N, H, W, C = x.shape
    xb = x.astype(jnp.bfloat16)            # bf16 BEFORE im2col (halves traffic)

    # ---- shared 3x3 / stride-2 slices (branch3x3 + branch_pool, one buffer) ----
    st1, OH1, OW1 = extract_patches(xb, 3, 2, 0)         # (M1, 9, C) bf16
    M1 = st1.shape[0]
    tm1, mp1, _ = _choose_tm(M1, 9 * C, _round_up(384, 128))
    st1 = _pad_rows(st1, mp1)

    # branch3x3: conv 3x3 stride 2 -> BN -> ReLU (Cout = 384)
    b3 = conv_bn_relu(st1.reshape(mp1, 9 * C), M1, tm1,
                      params["b3_w"], params["b3_g"], params["b3_b"])
    b3 = b3[:M1, :384].reshape(N, OH1, OW1, 384)

    # branch_pool: max_pool2d 3x3 stride 2 (reads the same stacked slices)
    bp = maxpool_from_patches(st1, tm1)[:M1].reshape(N, OH1, OW1, C)

    # branch3x3dbl_1: 1x1 conv -> BN -> ReLU (64 -> padded 128, bf16 out)
    M0 = N * H * W
    tm0, mp0, _ = _choose_tm(M0, C, 128)
    p1 = _pad_rows(xb.reshape(M0, C), mp0)
    d1 = conv_bn_relu(p1, M0, tm0, params["d1_w"], params["d1_g"],
                      params["d1_b"], out_dtype=jnp.bfloat16)
    d1 = d1[:M0].reshape(N, H, W, d1.shape[-1])    # padded channels are zeros

    # branch3x3dbl_2: 3x3 conv pad 1 -> BN -> ReLU (96 -> padded 128, bf16 out)
    # TODO(synk): stream d1 via memory_space=pl.ANY + in-kernel halo loads
    # instead of materializing these 9x bf16 slices.
    st2, OH2, OW2 = extract_patches(d1, 3, 1, 1)
    M2, C1 = st2.shape[0], d1.shape[-1]
    tm2, mp2, _ = _choose_tm(M2, 9 * C1, 128)
    st2 = _pad_rows(st2, mp2)
    d2 = conv_bn_relu(st2.reshape(mp2, 9 * C1), M2, tm2,
                      params["d2_w"], params["d2_g"], params["d2_b"],
                      out_dtype=jnp.bfloat16)
    d2 = d2[:M2].reshape(N, OH2, OW2, d2.shape[-1])

    # branch3x3dbl_3: 3x3 conv stride 2 -> BN -> ReLU (Cout = 96)
    st3, OH3, OW3 = extract_patches(d2, 3, 2, 0)
    M3, C2 = st3.shape[0], d2.shape[-1]
    tm3, mp3, _ = _choose_tm(M3, 9 * C2, 128)
    st3 = _pad_rows(st3, mp3)
    d3 = conv_bn_relu(st3.reshape(mp3, 9 * C2), M3, tm3,
                      params["d3_w"], params["d3_g"], params["d3_b"])
    d3 = d3[:M3, :96].reshape(N, OH3, OW3, 96)

    out = jnp.concatenate([b3, d3, bp], axis=-1)          # NHWC
    return jnp.transpose(out, (0, 3, 1, 2))               # back to NCHW


# ----------------------------------------------------------------------------
# Deterministic parameter init (BasicConv2d; training-mode BN => batch stats)
# ----------------------------------------------------------------------------
def init_params(key, in_channels):
    ks = jax.random.split(key, 12)

    def conv_w(k, cout, cin, kh, kw):
        return jax.random.normal(k, (kh, kw, cin, cout), jnp.float32) * 0.1

    p = {}
    p["b3_w"] = conv_w(ks[0], 384, in_channels, 3, 3)
    p["b3_g"] = jax.random.uniform(ks[1], (384,), jnp.float32, 0.5, 1.5)
    p["b3_b"] = jax.random.normal(ks[2], (384,), jnp.float32) * 0.1

    p["d1_w"] = conv_w(ks[3], 64, in_channels, 1, 1)
    p["d1_g"] = jax.random.uniform(ks[4], (64,), jnp.float32, 0.5, 1.5)
    p["d1_b"] = jax.random.normal(ks[5], (64,), jnp.float32) * 0.1

    p["d2_w"] = conv_w(ks[6], 96, 64, 3, 3)
    p["d2_g"] = jax.random.uniform(ks[7], (96,), jnp.float32, 0.5, 1.5)
    p["d2_b"] = jax.random.normal(ks[8], (96,), jnp.float32) * 0.1

    p["d3_w"] = conv_w(ks[9], 96, 96, 3, 3)
    p["d3_g"] = jax.random.uniform(ks[10], (96,), jnp.float32, 0.5, 1.5)
    p["d3_b"] = jax.random.normal(ks[11], (96,), jnp.float32) * 0.1
    return p


# ----------------------------------------------------------------------------
# Pure-JAX f32 reference (numerical sanity check; kernel uses bf16 MXU inputs
# and bf16 chained intermediates, hence the loose tolerance)
# ----------------------------------------------------------------------------
def _ref_basic_conv(x, w_hwio, gamma, beta, stride, pad):
    y = jax.lax.conv_general_dilated(
        x, w_hwio, (stride, stride), [(pad, pad), (pad, pad)],
        dimension_numbers=("NHWC", "HWIO", "NHWC"),
        preferred_element_type=jnp.float32)
    mean = jnp.mean(y, axis=(0, 1, 2), keepdims=True)
    var = jnp.mean(jnp.square(y - mean), axis=(0, 1, 2), keepdims=True)
    yhat = (y - mean) * jax.lax.rsqrt(var + EPS) * gamma + beta
    return jnp.maximum(yhat, 0.0)


def _ref_forward(x_nchw, p):
    x = jnp.transpose(x_nchw, (0, 2, 3, 1)).astype(jnp.float32)
    b3 = _ref_basic_conv(x, p["b3_w"], p["b3_g"], p["b3_b"], 2, 0)
    d = _ref_basic_conv(x, p["d1_w"], p["d1_g"], p["d1_b"], 1, 0)
    d = _ref_basic_conv(d, p["d2_w"], p["d2_g"], p["d2_b"], 1, 1)
    d = _ref_basic_conv(d, p["d3_w"], p["d3_g"], p["d3_b"], 2, 0)
    bp = jax.lax.reduce_window(x, -jnp.inf, jax.lax.max,
                               (1, 3, 3, 1), (1, 2, 2, 1), "VALID")
    out = jnp.concatenate([b3, d, bp], axis=-1)
    return jnp.transpose(out, (0, 3, 1, 2))


# ----------------------------------------------------------------------------
if __name__ == "__main__":
    key = jax.random.PRNGKey(0)
    k_x, k_p = jax.random.split(key)

    N, C_in, H, W = 2, 4, 16, 16
    x = jax.random.normal(k_x, (N, C_in, H, W), jnp.float32)
    params = init_params(k_p, C_in)

    fwd = jax.jit(inception_b_forward)
    out = jax.block_until_ready(fwd(x, params))

    assert out.shape == (N, 384 + 96 + C_in, 7, 7), out.shape

    ref = jax.block_until_ready(_ref_forward(x, params))
    np.testing.assert_allclose(np.asarray(out), np.asarray(ref),
                               rtol=5e-2, atol=5e-2)

    print("KERNEL_OK")
</pallas_src>

<mosaic_0001>
module attributes {stable_mosaic.version = 11 : i64} {
  func.func @_matmul_stats_kernel(%arg0: i32, %arg1: memref<256x4xbf16, #tpu.memory_space<vmem>>, %arg2: memref<4x128xbf16, #tpu.memory_space<vmem>>, %arg3: memref<256x128xf32, #tpu.memory_space<vmem>>, %arg4: memref<1x2x128xf32, #tpu.memory_space<vmem>>) attributes {dimension_semantics = [#tpu.dimension_semantics<parallel>], iteration_bounds = array<i64: 2>, scalar_prefetch = 0 : i64, scratch_operands = 0 : i64, tpu.core_type = #tpu.core_type<tc>, window_params = [{transform_indices = @transform_0, window_bounds = array<i64: 256, 4>}, {pipeline_mode = #tpu.pipeline_mode<synchronous>, transform_indices = @transform_1, window_bounds = array<i64: 4, 128>}, {transform_indices = @transform_2, window_bounds = array<i64: 256, 128>}, {transform_indices = @transform_3, window_bounds = array<i64: 1, 2, 128>}]} {
    %c0 = arith.constant 0 : index
    %c0_0 = arith.constant 0 : index
    %0 = vector.load %arg1[%c0, %c0_0] : memref<256x4xbf16, #tpu.memory_space<vmem>>, vector<256x4xbf16>
    %c0_1 = arith.constant 0 : index
    %c0_2 = arith.constant 0 : index
    %1 = vector.load %arg2[%c0_1, %c0_2] : memref<4x128xbf16, #tpu.memory_space<vmem>>, vector<4x128xbf16>
    %cst = arith.constant dense<0.000000e+00> : vector<256x128xf32>
    %2 = tpu.matmul %0, %1, %cst {dimension_numbers = #tpu.dot_dimension_numbers<[1], [0], [0], [1], [0, 0, 1, 1], [], []>} : vector<256x4xbf16>, vector<4x128xbf16>, vector<256x128xf32> -> vector<256x128xf32>
    %c0_3 = arith.constant 0 : index
    %c0_4 = arith.constant 0 : index
    %3 = vector.load %arg3[%c0_3, %c0_4] : memref<256x128xf32, #tpu.memory_space<vmem>>, vector<256x128xf32>
    tpu.vector_store %arg3[%c0_3, %c0_4], %2 {strides = array<i32>} : memref<256x128xf32, #tpu.memory_space<vmem>>, vector<256x128xf32>,
    %cst_5 = arith.constant dense<0.000000e+00> : vector<128xf32>
    %4 = vector.multi_reduction <add>, %2, %cst_5 [0] : vector<256x128xf32> to vector<128xf32>
    %5 = vector.shape_cast %4 : vector<128xf32> to vector<1x128xf32>
    %6 = arith.mulf %2, %2 : vector<256x128xf32>
    %cst_6 = arith.constant dense<0.000000e+00> : vector<128xf32>
    %7 = vector.multi_reduction <add>, %6, %cst_6 [0] : vector<256x128xf32> to vector<128xf32>
    %8 = vector.shape_cast %7 : vector<128xf32> to vector<1x128xf32>
    %9 = tpu.concatenate %5, %8 in 0 : vector<1x128xf32>, vector<1x128xf32> -> vector<2x128xf32>
    %c0_7 = arith.constant 0 : index
    %c0_8 = arith.constant 0 : index
    %c0_9 = arith.constant 0 : index
    %10 = vector.load %arg4[%c0_7, %c0_8, %c0_9] : memref<1x2x128xf32, #tpu.memory_space<vmem>>, vector<1x2x128xf32>
    %11 = vector.shape_cast %10 : vector<1x2x128xf32> to vector<2x128xf32>
    %12 = vector.shape_cast %9 : vector<2x128xf32> to vector<1x2x128xf32>
    tpu.vector_store %arg4[%c0_7, %c0_8, %c0_9], %12 {strides = array<i32>} : memref<1x2x128xf32, #tpu.memory_space<vmem>>, vector<1x2x128xf32>,
    return
  }
  func.func @transform_0(%arg0: i32) -> (i32, i32) {
    %c0_i32 = arith.constant 0 : i32
    %c0_i32_0 = arith.constant 0 : i32
    return %arg0, %c0_i32 : i32, i32
  }
  func.func @transform_1(%arg0: i32) -> (i32, i32) {
    %c0_i32 = arith.constant 0 : i32
    %c0_i32_0 = arith.constant 0 : i32
    %c0_i32_1 = arith.constant 0 : i32
    return %c0_i32, %c0_i32_0 : i32, i32
  }
  func.func @transform_2(%arg0: i32) -> (i32, i32) {
    %c0_i32 = arith.constant 0 : i32
    %c0_i32_0 = arith.constant 0 : i32
    return %arg0, %c0_i32 : i32, i32
  }
  func.func @transform_3(%arg0: i32) -> (i32, i32, i32) {
    %c0_i32 = arith.constant 0 : i32
    %c0_i32_0 = arith.constant 0 : i32
    %c0_i32_1 = arith.constant 0 : i32
    return %arg0, %c0_i32, %c0_i32_0 : i32, i32, i32
  }
}

module attributes {stable_mosaic.version = 11 : i64} {
  func.func @_scale_shift_relu_kernel(%arg0: i32, %arg1: memref<256x128xf32, #tpu.memory_space<vmem>>, %arg2: memref<1x128xf32, #tpu.memory_space<vmem>>, %arg3: memref<1x128xf32, #tpu.memory_space<vmem>>, %arg4: memref<256x128xbf16, #tpu.memory_space<vmem>>) attributes {dimension_semantics = [#tpu.dimension_semantics<parallel>], iteration_bounds = array<i64: 2>, scalar_prefetch = 0 : i64, scratch_operands = 0 : i64, tpu.core_type = #tpu.core_type<tc>, window_params = [{transform_indices = @transform_0, window_bounds = array<i64: 256, 128>}, {pipeline_mode = #tpu.pipeline_mode<synchronous>, transform_indices = @transform_1, window_bounds = array<i64: 1, 128>}, {pipeline_mode = #tpu.pipeline_mode<synchronous>, transform_indices = @transform_2, window_bounds = array<i64: 1, 128>}, {transform_indices = @transform_3, window_bounds = array<i64: 256, 128>}]} {
    %c0 = arith.constant 0 : index
    %c0_0 = arith.constant 0 : index
    %0 = vector.load %arg1[%c0, %c0_0] : memref<256x128xf32, #tpu.memory_space<vmem>>, vector<256x128xf32>
    %c0_1 = arith.constant 0 : index
    %c0_2 = arith.constant 0 : index
    %1 = vector.load %arg2[%c0_1, %c0_2] : memref<1x128xf32, #tpu.memory_space<vmem>>, vector<1x128xf32>
    %2 = vector.broadcast %1 : vector<1x128xf32> to vector<256x128xf32>
    %3 = arith.mulf %0, %2 : vector<256x128xf32>
    %c0_3 = arith.constant 0 : index
    %c0_4 = arith.constant 0 : index
    %4 = vector.load %arg3[%c0_3, %c0_4] : memref<1x128xf32, #tpu.memory_space<vmem>>, vector<1x128xf32>
    %5 = vector.broadcast %4 : vector<1x128xf32> to vector<256x128xf32>
    %6 = arith.addf %3, %5 : vector<256x128xf32>
    %cst = arith.constant 0.000000e+00 : f32
    %7 = vector.broadcast %cst : f32 to vector<256x128xf32>
    %8 = arith.maximumf %6, %7 : vector<256x128xf32>
    %9 = arith.truncf %8 : vector<256x128xf32> to vector<256x128xbf16>
    %c0_5 = arith.constant 0 : index
    %c0_6 = arith.constant 0 : index
    %10 = vector.load %arg4[%c0_5, %c0_6] : memref<256x128xbf16, #tpu.memory_space<vmem>>, vector<256x128xbf16>
    tpu.vector_store %arg4[%c0_5, %c0_6], %9 {strides = array<i32>} : memref<256x128xbf16, #tpu.memory_space<vmem>>, vector<256x128xbf16>,
    return
  }
  func.func @transform_0(%arg0: i32) -> (i32, i32) {
    %c0_i32 = arith.constant 0 : i32
    %c0_i32_0 = arith.constant 0 : i32
    return %arg0, %c0_i32 : i32, i32
  }
  func.func @transform_1(%arg0: i32) -> (i32, i32) {
    %c0_i32 = arith.constant 0 : i32
    %c0_i32_0 = arith.constant 0 : i32
    %c0_i32_1 = arith.constant 0 : i32
    return %c0_i32, %c0_i32_0 : i32, i32
  }
  func.func @transform_2(%arg0: i32) -> (i32, i32) {
    %c0_i32 = arith.constant 0 : i32
    %c0_i32_0 = arith.constant 0 : i32
    %c0_i32_1 = arith.constant 0 : i32
    return %c0_i32, %c0_i32_0 : i32, i32
  }
  func.func @transform_3(%arg0: i32) -> (i32, i32) {
    %c0_i32 = arith.constant 0 : i32
    %c0_i32_0 = arith.constant 0 : i32
    return %arg0, %c0_i32 : i32, i32
  }
}

module attributes {stable_mosaic.version = 11 : i64} {
  func.func @_matmul_stats_kernel(%arg0: i32, %arg1: memref<256x1152xbf16, #tpu.memory_space<vmem>>, %arg2: memref<1152x128xbf16, #tpu.memory_space<vmem>>, %arg3: memref<256x128xf32, #tpu.memory_space<vmem>>, %arg4: memref<1x2x128xf32, #tpu.memory_space<vmem>>) attributes {dimension_semantics = [#tpu.dimension_semantics<parallel>], iteration_bounds = array<i64: 2>, scalar_prefetch = 0 : i64, scratch_operands = 0 : i64, tpu.core_type = #tpu.core_type<tc>, window_params = [{transform_indices = @transform_0, window_bounds = array<i64: 256, 1152>}, {pipeline_mode = #tpu.pipeline_mode<synchronous>, transform_indices = @transform_1, window_bounds = array<i64: 1152, 128>}, {transform_indices = @transform_2, window_bounds = array<i64: 256, 128>}, {transform_indices = @transform_3, window_bounds = array<i64: 1, 2, 128>}]} {
    %c0 = arith.constant 0 : index
    %c0_0 = arith.constant 0 : index
    %0 = vector.load %arg1[%c0, %c0_0] : memref<256x1152xbf16, #tpu.memory_space<vmem>>, vector<256x1152xbf16>
    %c0_1 = arith.constant 0 : index
    %c0_2 = arith.constant 0 : index
    %1 = vector.load %arg2[%c0_1, %c0_2] : memref<1152x128xbf16, #tpu.memory_space<vmem>>, vector<1152x128xbf16>
    %cst = arith.constant dense<0.000000e+00> : vector<256x128xf32>
    %2 = tpu.matmul %0, %1, %cst {dimension_numbers = #tpu.dot_dimension_numbers<[1], [0], [0], [1], [0, 0, 1, 1], [], []>} : vector<256x1152xbf16>, vector<1152x128xbf16>, vector<256x128xf32> -> vector<256x128xf32>
    %c0_3 = arith.constant 0 : index
    %c0_4 = arith.constant 0 : index
    %3 = vector.load %arg3[%c0_3, %c0_4] : memref<256x128xf32, #tpu.memory_space<vmem>>, vector<256x128xf32>
    tpu.vector_store %arg3[%c0_3, %c0_4], %2 {strides = array<i32>} : memref<256x128xf32, #tpu.memory_space<vmem>>, vector<256x128xf32>,
    %cst_5 = arith.constant dense<0.000000e+00> : vector<128xf32>
    %4 = vector.multi_reduction <add>, %2, %cst_5 [0] : vector<256x128xf32> to vector<128xf32>
    %5 = vector.shape_cast %4 : vector<128xf32> to vector<1x128xf32>
    %6 = arith.mulf %2, %2 : vector<256x128xf32>
    %cst_6 = arith.constant dense<0.000000e+00> : vector<128xf32>
    %7 = vector.multi_reduction <add>, %6, %cst_6 [0] : vector<256x128xf32> to vector<128xf32>
    %8 = vector.shape_cast %7 : vector<128xf32> to vector<1x128xf32>
    %9 = tpu.concatenate %5, %8 in 0 : vector<1x128xf32>, vector<1x128xf32> -> vector<2x128xf32>
    %c0_7 = arith.constant 0 : index
    %c0_8 = arith.constant 0 : index
    %c0_9 = arith.constant 0 : index
    %10 = vector.load %arg4[%c0_7, %c0_8, %c0_9] : memref<1x2x128xf32, #tpu.memory_space<vmem>>, vector<1x2x128xf32>
    %11 = vector.shape_cast %10 : vector<1x2x128xf32> to vector<2x128xf32>
    %12 = vector.shape_cast %9 : vector<2x128xf32> to vector<1x2x128xf32>
    tpu.vector_store %arg4[%c0_7, %c0_8, %c0_9], %12 {strides = array<i32>} : memref<1x2x128xf32, #tpu.memory_space<vmem>>, vector<1x2x128xf32>,
    return
  }
  func.func @transform_0(%arg0: i32) -> (i32, i32) {
    %c0_i32 = arith.constant 0 : i32
    %c0_i32_0 = arith.constant 0 : i32
    return %arg0, %c0_i32 : i32, i32
  }
  func.func @transform_1(%arg0: i32) -> (i32, i32) {
    %c0_i32 = arith.constant 0 : i32
    %c0_i32_0 = arith.constant 0 : i32
    %c0_i32_1 = arith.constant 0 : i32
    return %c0_i32, %c0_i32_0 : i32, i32
  }
  func.func @transform_2(%arg0: i32) -> (i32, i32) {
    %c0_i32 = arith.constant 0 : i32
    %c0_i32_0 = arith.constant 0 : i32
    return %arg0, %c0_i32 : i32, i32
  }
  func.func @transform_3(%arg0: i32) -> (i32, i32, i32) {
    %c0_i32 = arith.constant 0 : i32
    %c0_i32_0 = arith.constant 0 : i32
    %c0_i32_1 = arith.constant 0 : i32
    return %arg0, %c0_i32, %c0_i32_0 : i32, i32, i32
  }
}

module attributes {stable_mosaic.version = 11 : i64} {
  func.func @_matmul_stats_kernel(%arg0: i32, %arg1: memref<56x1152xbf16, #tpu.memory_space<vmem>>, %arg2: memref<1152x128xbf16, #tpu.memory_space<vmem>>, %arg3: memref<56x128xf32, #tpu.memory_space<vmem>>, %arg4: memref<1x2x128xf32, #tpu.memory_space<vmem>>) attributes {dimension_semantics = [#tpu.dimension_semantics<parallel>], iteration_bounds = array<i64: 2>, scalar_prefetch = 0 : i64, scratch_operands = 0 : i64, tpu.core_type = #tpu.core_type<tc>, window_params = [{transform_indices = @transform_0, window_bounds = array<i64: 56, 1152>}, {pipeline_mode = #tpu.pipeline_mode<synchronous>, transform_indices = @transform_1, window_bounds = array<i64: 1152, 128>}, {transform_indices = @transform_2, window_bounds = array<i64: 56, 128>}, {transform_indices = @transform_3, window_bounds = array<i64: 1, 2, 128>}]} {
    %c0 = arith.constant 0 : index
    %c0_0 = arith.constant 0 : index
    %0 = vector.load %arg1[%c0, %c0_0] : memref<56x1152xbf16, #tpu.memory_space<vmem>>, vector<56x1152xbf16>
    %c0_1 = arith.constant 0 : index
    %c0_2 = arith.constant 0 : index
    %1 = vector.load %arg2[%c0_1, %c0_2] : memref<1152x128xbf16, #tpu.memory_space<vmem>>, vector<1152x128xbf16>
    %cst = arith.constant dense<0.000000e+00> : vector<56x128xf32>
    %2 = tpu.matmul %0, %1, %cst {dimension_numbers = #tpu.dot_dimension_numbers<[1], [0], [0], [1], [0, 0, 1, 1], [], []>} : vector<56x1152xbf16>, vector<1152x128xbf16>, vector<56x128xf32> -> vector<56x128xf32>
    %c0_3 = arith.constant 0 : index
    %c0_4 = arith.constant 0 : index
    %3 = vector.load %arg3[%c0_3, %c0_4] : memref<56x128xf32, #tpu.memory_space<vmem>>, vector<56x128xf32>
    tpu.vector_store %arg3[%c0_3, %c0_4], %2 {strides = array<i32>} : memref<56x128xf32, #tpu.memory_space<vmem>>, vector<56x128xf32>,
    %cst_5 = arith.constant dense<0.000000e+00> : vector<128xf32>
    %4 = vector.multi_reduction <add>, %2, %cst_5 [0] : vector<56x128xf32> to vector<128xf32>
    %5 = vector.shape_cast %4 : vector<128xf32> to vector<1x128xf32>
    %6 = arith.mulf %2, %2 : vector<56x128xf32>
    %cst_6 = arith.constant dense<0.000000e+00> : vector<128xf32>
    %7 = vector.multi_reduction <add>, %6, %cst_6 [0] : vector<56x128xf32> to vector<128xf32>
    %8 = vector.shape_cast %7 : vector<128xf32> to vector<1x128xf32>
    %9 = tpu.concatenate %5, %8 in 0 : vector<1x128xf32>, vector<1x128xf32> -> vector<2x128xf32>
    %c0_7 = arith.constant 0 : index
    %c0_8 = arith.constant 0 : index
    %c0_9 = arith.constant 0 : index
    %10 = vector.load %arg4[%c0_7, %c0_8, %c0_9] : memref<1x2x128xf32, #tpu.memory_space<vmem>>, vector<1x2x128xf32>
    %11 = vector.shape_cast %10 : vector<1x2x128xf32> to vector<2x128xf32>
    %12 = vector.shape_cast %9 : vector<2x128xf32> to vector<1x2x128xf32>
    tpu.vector_store %arg4[%c0_7, %c0_8, %c0_9], %12 {strides = array<i32>} : memref<1x2x128xf32, #tpu.memory_space<vmem>>, vector<1x2x128xf32>,
    return
  }
  func.func @transform_0(%arg0: i32) -> (i32, i32) {
    %c0_i32 = arith.constant 0 : i32
    %c0_i32_0 = arith.constant 0 : i32
    return %arg0, %c0_i32 : i32, i32
  }
  func.func @transform_1(%arg0: i32) -> (i32, i32) {
    %c0_i32 = arith.constant 0 : i32
    %c0_i32_0 = arith.constant 0 : i32
    %c0_i32_1 = arith.constant 0 : i32
    return %c0_i32, %c0_i32_0 : i32, i32
  }
  func.func @transform_2(%arg0: i32) -> (i32, i32) {
    %c0_i32 = arith.constant 0 : i32
    %c0_i32_0 = arith.constant 0 : i32
    return %arg0, %c0_i32 : i32, i32
  }
  func.func @transform_3(%arg0: i32) -> (i32, i32, i32) {
    %c0_i32 = arith.constant 0 : i32
    %c0_i32_0 = arith.constant 0 : i32
    %c0_i32_1 = arith.constant 0 : i32
    return %arg0, %c0_i32, %c0_i32_0 : i32, i32, i32
  }
}

module attributes {stable_mosaic.version = 11 : i64} {
  func.func @_scale_shift_relu_kernel(%arg0: i32, %arg1: memref<56x128xf32, #tpu.memory_space<vmem>>, %arg2: memref<1x128xf32, #tpu.memory_space<vmem>>, %arg3: memref<1x128xf32, #tpu.memory_space<vmem>>, %arg4: memref<56x128xf32, #tpu.memory_space<vmem>>) attributes {dimension_semantics = [#tpu.dimension_semantics<parallel>], iteration_bounds = array<i64: 2>, scalar_prefetch = 0 : i64, scratch_operands = 0 : i64, tpu.core_type = #tpu.core_type<tc>, window_params = [{transform_indices = @transform_0, window_bounds = array<i64: 56, 128>}, {pipeline_mode = #tpu.pipeline_mode<synchronous>, transform_indices = @transform_1, window_bounds = array<i64: 1, 128>}, {pipeline_mode = #tpu.pipeline_mode<synchronous>, transform_indices = @transform_2, window_bounds = array<i64: 1, 128>}, {transform_indices = @transform_3, window_bounds = array<i64: 56, 128>}]} {
    %c0 = arith.constant 0 : index
    %c0_0 = arith.constant 0 : index
    %0 = vector.load %arg1[%c0, %c0_0] : memref<56x128xf32, #tpu.memory_space<vmem>>, vector<56x128xf32>
    %c0_1 = arith.constant 0 : index
    %c0_2 = arith.constant 0 : index
    %1 = vector.load %arg2[%c0_1, %c0_2] : memref<1x128xf32, #tpu.memory_space<vmem>>, vector<1x128xf32>
    %2 = vector.broadcast %1 : vector<1x128xf32> to vector<56x128xf32>
    %3 = arith.mulf %0, %2 : vector<56x128xf32>
    %c0_3 = arith.constant 0 : index
    %c0_4 = arith.constant 0 : index
    %4 = vector.load %arg3[%c0_3, %c0_4] : memref<1x128xf32, #tpu.memory_space<vmem>>, vector<1x128xf32>
    %5 = vector.broadcast %4 : vector<1x128xf32> to vector<56x128xf32>
    %6 = arith.addf %3, %5 : vector<56x128xf32>
    %cst = arith.constant 0.000000e+00 : f32
    %7 = vector.broadcast %cst : f32 to vector<56x128xf32>
    %8 = arith.maximumf %6, %7 : vector<56x128xf32>
    %c0_5 = arith.constant 0 : index
    %c0_6 = arith.constant 0 : index
    %9 = vector.load %arg4[%c0_5, %c0_6] : memref<56x128xf32, #tpu.memory_space<vmem>>, vector<56x128xf32>
    tpu.vector_store %arg4[%c0_5, %c0_6], %8 {strides = array<i32>} : memref<56x128xf32, #tpu.memory_space<vmem>>, vector<56x128xf32>,
    return
  }
  func.func @transform_0(%arg0: i32) -> (i32, i32) {
    %c0_i32 = arith.constant 0 : i32
    %c0_i32_0 = arith.constant 0 : i32
    return %arg0, %c0_i32 : i32, i32
  }
  func.func @transform_1(%arg0: i32) -> (i32, i32) {
    %c0_i32 = arith.constant 0 : i32
    %c0_i32_0 = arith.constant 0 : i32
    %c0_i32_1 = arith.constant 0 : i32
    return %c0_i32, %c0_i32_0 : i32, i32
  }
  func.func @transform_2(%arg0: i32) -> (i32, i32) {
    %c0_i32 = arith.constant 0 : i32
    %c0_i32_0 = arith.constant 0 : i32
    %c0_i32_1 = arith.constant 0 : i32
    return %c0_i32, %c0_i32_0 : i32, i32
  }
  func.func @transform_3(%arg0: i32) -> (i32, i32) {
    %c0_i32 = arith.constant 0 : i32
    %c0_i32_0 = arith.constant 0 : i32
    return %arg0, %c0_i32 : i32, i32
  }
}

module attributes {stable_mosaic.version = 11 : i64} {
  func.func @_matmul_stats_kernel(%arg0: i32, %arg1: memref<56x36xbf16, #tpu.memory_space<vmem>>, %arg2: memref<36x384xbf16, #tpu.memory_space<vmem>>, %arg3: memref<56x384xf32, #tpu.memory_space<vmem>>, %arg4: memref<1x2x384xf32, #tpu.memory_space<vmem>>) attributes {dimension_semantics = [#tpu.dimension_semantics<parallel>], iteration_bounds = array<i64: 2>, scalar_prefetch = 0 : i64, scratch_operands = 0 : i64, tpu.core_type = #tpu.core_type<tc>, window_params = [{transform_indices = @transform_0, window_bounds = array<i64: 56, 36>}, {pipeline_mode = #tpu.pipeline_mode<synchronous>, transform_indices = @transform_1, window_bounds = array<i64: 36, 384>}, {transform_indices = @transform_2, window_bounds = array<i64: 56, 384>}, {transform_indices = @transform_3, window_bounds = array<i64: 1, 2, 384>}]} {
    %c0 = arith.constant 0 : index
    %c0_0 = arith.constant 0 : index
    %0 = vector.load %arg1[%c0, %c0_0] : memref<56x36xbf16, #tpu.memory_space<vmem>>, vector<56x36xbf16>
    %c0_1 = arith.constant 0 : index
    %c0_2 = arith.constant 0 : index
    %1 = vector.load %arg2[%c0_1, %c0_2] : memref<36x384xbf16, #tpu.memory_space<vmem>>, vector<36x384xbf16>
    %cst = arith.constant dense<0.000000e+00> : vector<56x384xf32>
    %2 = tpu.matmul %0, %1, %cst {dimension_numbers = #tpu.dot_dimension_numbers<[1], [0], [0], [1], [0, 0, 1, 1], [], []>} : vector<56x36xbf16>, vector<36x384xbf16>, vector<56x384xf32> -> vector<56x384xf32>
    %c0_3 = arith.constant 0 : index
    %c0_4 = arith.constant 0 : index
    %3 = vector.load %arg3[%c0_3, %c0_4] : memref<56x384xf32, #tpu.memory_space<vmem>>, vector<56x384xf32>
    tpu.vector_store %arg3[%c0_3, %c0_4], %2 {strides = array<i32>} : memref<56x384xf32, #tpu.memory_space<vmem>>, vector<56x384xf32>,
    %cst_5 = arith.constant dense<0.000000e+00> : vector<384xf32>
    %4 = vector.multi_reduction <add>, %2, %cst_5 [0] : vector<56x384xf32> to vector<384xf32>
    %5 = vector.shape_cast %4 : vector<384xf32> to vector<1x384xf32>
    %6 = arith.mulf %2, %2 : vector<56x384xf32>
    %cst_6 = arith.constant dense<0.000000e+00> : vector<384xf32>
    %7 = vector.multi_reduction <add>, %6, %cst_6 [0] : vector<56x384xf32> to vector<384xf32>
    %8 = vector.shape_cast %7 : vector<384xf32> to vector<1x384xf32>
    %9 = tpu.concatenate %5, %8 in 0 : vector<1x384xf32>, vector<1x384xf32> -> vector<2x384xf32>
    %c0_7 = arith.constant 0 : index
    %c0_8 = arith.constant 0 : index
    %c0_9 = arith.constant 0 : index
    %10 = vector.load %arg4[%c0_7, %c0_8, %c0_9] : memref<1x2x384xf32, #tpu.memory_space<vmem>>, vector<1x2x384xf32>
    %11 = vector.shape_cast %10 : vector<1x2x384xf32> to vector<2x384xf32>
    %12 = vector.shape_cast %9 : vector<2x384xf32> to vector<1x2x384xf32>
    tpu.vector_store %arg4[%c0_7, %c0_8, %c0_9], %12 {strides = array<i32>} : memref<1x2x384xf32, #tpu.memory_space<vmem>>, vector<1x2x384xf32>,
    return
  }
  func.func @transform_0(%arg0: i32) -> (i32, i32) {
    %c0_i32 = arith.constant 0 : i32
    %c0_i32_0 = arith.constant 0 : i32
    return %arg0, %c0_i32 : i32, i32
  }
  func.func @transform_1(%arg0: i32) -> (i32, i32) {
    %c0_i32 = arith.constant 0 : i32
    %c0_i32_0 = arith.constant 0 : i32
    %c0_i32_1 = arith.constant 0 : i32
    return %c0_i32, %c0_i32_0 : i32, i32
  }
  func.func @transform_2(%arg0: i32) -> (i32, i32) {
    %c0_i32 = arith.constant 0 : i32
    %c0_i32_0 = arith.constant 0 : i32
    return %arg0, %c0_i32 : i32, i32
  }
  func.func @transform_3(%arg0: i32) -> (i32, i32, i32) {
    %c0_i32 = arith.constant 0 : i32
    %c0_i32_0 = arith.constant 0 : i32
    %c0_i32_1 = arith.constant 0 : i32
    return %arg0, %c0_i32, %c0_i32_0 : i32, i32, i32
  }
}

module attributes {stable_mosaic.version = 11 : i64} {
  func.func @_scale_shift_relu_kernel(%arg0: i32, %arg1: memref<56x384xf32, #tpu.memory_space<vmem>>, %arg2: memref<1x384xf32, #tpu.memory_space<vmem>>, %arg3: memref<1x384xf32, #tpu.memory_space<vmem>>, %arg4: memref<56x384xf32, #tpu.memory_space<vmem>>) attributes {dimension_semantics = [#tpu.dimension_semantics<parallel>], iteration_bounds = array<i64: 2>, scalar_prefetch = 0 : i64, scratch_operands = 0 : i64, tpu.core_type = #tpu.core_type<tc>, window_params = [{transform_indices = @transform_0, window_bounds = array<i64: 56, 384>}, {pipeline_mode = #tpu.pipeline_mode<synchronous>, transform_indices = @transform_1, window_bounds = array<i64: 1, 384>}, {pipeline_mode = #tpu.pipeline_mode<synchronous>, transform_indices = @transform_2, window_bounds = array<i64: 1, 384>}, {transform_indices = @transform_3, window_bounds = array<i64: 56, 384>}]} {
    %c0 = arith.constant 0 : index
    %c0_0 = arith.constant 0 : index
    %0 = vector.load %arg1[%c0, %c0_0] : memref<56x384xf32, #tpu.memory_space<vmem>>, vector<56x384xf32>
    %c0_1 = arith.constant 0 : index
    %c0_2 = arith.constant 0 : index
    %1 = vector.load %arg2[%c0_1, %c0_2] : memref<1x384xf32, #tpu.memory_space<vmem>>, vector<1x384xf32>
    %2 = vector.broadcast %1 : vector<1x384xf32> to vector<56x384xf32>
    %3 = arith.mulf %0, %2 : vector<56x384xf32>
    %c0_3 = arith.constant 0 : index
    %c0_4 = arith.constant 0 : index
    %4 = vector.load %arg3[%c0_3, %c0_4] : memref<1x384xf32, #tpu.memory_space<vmem>>, vector<1x384xf32>
    %5 = vector.broadcast %4 : vector<1x384xf32> to vector<56x384xf32>
    %6 = arith.addf %3, %5 : vector<56x384xf32>
    %cst = arith.constant 0.000000e+00 : f32
    %7 = vector.broadcast %cst : f32 to vector<56x384xf32>
    %8 = arith.maximumf %6, %7 : vector<56x384xf32>
    %c0_5 = arith.constant 0 : index
    %c0_6 = arith.constant 0 : index
    %9 = vector.load %arg4[%c0_5, %c0_6] : memref<56x384xf32, #tpu.memory_space<vmem>>, vector<56x384xf32>
    tpu.vector_store %arg4[%c0_5, %c0_6], %8 {strides = array<i32>} : memref<56x384xf32, #tpu.memory_space<vmem>>, vector<56x384xf32>,
    return
  }
  func.func @transform_0(%arg0: i32) -> (i32, i32) {
    %c0_i32 = arith.constant 0 : i32
    %c0_i32_0 = arith.constant 0 : i32
    return %arg0, %c0_i32 : i32, i32
  }
  func.func @transform_1(%arg0: i32) -> (i32, i32) {
    %c0_i32 = arith.constant 0 : i32
    %c0_i32_0 = arith.constant 0 : i32
    %c0_i32_1 = arith.constant 0 : i32
    return %c0_i32, %c0_i32_0 : i32, i32
  }
  func.func @transform_2(%arg0: i32) -> (i32, i32) {
    %c0_i32 = arith.constant 0 : i32
    %c0_i32_0 = arith.constant 0 : i32
    %c0_i32_1 = arith.constant 0 : i32
    return %c0_i32, %c0_i32_0 : i32, i32
  }
  func.func @transform_3(%arg0: i32) -> (i32, i32) {
    %c0_i32 = arith.constant 0 : i32
    %c0_i32_0 = arith.constant 0 : i32
    return %arg0, %c0_i32 : i32, i32
  }
}

module attributes {stable_mosaic.version = 11 : i64} {
  func.func @_maxpool_kernel(%arg0: i32, %arg1: memref<56x9x4xbf16, #tpu.memory_space<vmem>>, %arg2: memref<56x4xf32, #tpu.memory_space<vmem>>) attributes {dimension_semantics = [#tpu.dimension_semantics<parallel>], iteration_bounds = array<i64: 2>, scalar_prefetch = 0 : i64, scratch_operands = 0 : i64, tpu.core_type = #tpu.core_type<tc>, window_params = [{transform_indices = @transform_0, window_bounds = array<i64: 56, 9, 4>}, {transform_indices = @transform_1, window_bounds = array<i64: 56, 4>}]} {
    %c0 = arith.constant 0 : index
    %c0_0 = arith.constant 0 : index
    %c0_1 = arith.constant 0 : index
    %0 = vector.load %arg1[%c0, %c0_0, %c0_1] : memref<56x9x4xbf16, #tpu.memory_space<vmem>>, vector<56x1x4xbf16>
    %1 = vector.shape_cast %0 : vector<56x1x4xbf16> to vector<56x4xbf16>
    %2 = arith.extf %1 : vector<56x4xbf16> to vector<56x4xf32>
    %c0_2 = arith.constant 0 : index
    %c1 = arith.constant 1 : index
    %c0_3 = arith.constant 0 : index
    %3 = vector.load %arg1[%c0_2, %c1, %c0_3] : memref<56x9x4xbf16, #tpu.memory_space<vmem>>, vector<56x1x4xbf16>
    %4 = vector.shape_cast %3 : vector<56x1x4xbf16> to vector<56x4xbf16>
    %5 = arith.extf %4 : vector<56x4xbf16> to vector<56x4xf32>
    %6 = arith.maximumf %2, %5 : vector<56x4xf32>
    %c0_4 = arith.constant 0 : index
    %c2 = arith.constant 2 : index
    %c0_5 = arith.constant 0 : index
    %7 = vector.load %arg1[%c0_4, %c2, %c0_5] : memref<56x9x4xbf16, #tpu.memory_space<vmem>>, vector<56x1x4xbf16>
    %8 = vector.shape_cast %7 : vector<56x1x4xbf16> to vector<56x4xbf16>
    %9 = arith.extf %8 : vector<56x4xbf16> to vector<56x4xf32>
    %10 = arith.maximumf %6, %9 : vector<56x4xf32>
    %c0_6 = arith.constant 0 : index
    %c3 = arith.constant 3 : index
    %c0_7 = arith.constant 0 : index
    %11 = vector.load %arg1[%c0_6, %c3, %c0_7] : memref<56x9x4xbf16, #tpu.memory_space<vmem>>, vector<56x1x4xbf16>
    %12 = vector.shape_cast %11 : vector<56x1x4xbf16> to vector<56x4xbf16>
    %13 = arith.extf %12 : vector<56x4xbf16> to vector<56x4xf32>
    %14 = arith.maximumf %10, %13 : vector<56x4xf32>
    %c0_8 = arith.constant 0 : index
    %c4 = arith.constant 4 : index
    %c0_9 = arith.constant 0 : index
    %15 = vector.load %arg1[%c0_8, %c4, %c0_9] : memref<56x9x4xbf16, #tpu.memory_space<vmem>>, vector<56x1x4xbf16>
    %16 = vector.shape_cast %15 : vector<56x1x4xbf16> to vector<56x4xbf16>
    %17 = arith.extf %16 : vector<56x4xbf16> to vector<56x4xf32>
    %18 = arith.maximumf %14, %17 : vector<56x4xf32>
    %c0_10 = arith.constant 0 : index
    %c5 = arith.constant 5 : index
    %c0_11 = arith.constant 0 : index
    %19 = vector.load %arg1[%c0_10, %c5, %c0_11] : memref<56x9x4xbf16, #tpu.memory_space<vmem>>, vector<56x1x4xbf16>
    %20 = vector.shape_cast %19 : vector<56x1x4xbf16> to vector<56x4xbf16>
    %21 = arith.extf %20 : vector<56x4xbf16> to vector<56x4xf32>
    %22 = arith.maximumf %18, %21 : vector<56x4xf32>
    %c0_12 = arith.constant 0 : index
    %c6 = arith.constant 6 : index
    %c0_13 = arith.constant 0 : index
    %23 = vector.load %arg1[%c0_12, %c6, %c0_13] : memref<56x9x4xbf16, #tpu.memory_space<vmem>>, vector<56x1x4xbf16>
    %24 = vector.shape_cast %23 : vector<56x1x4xbf16> to vector<56x4xbf16>
    %25 = arith.extf %24 : vector<56x4xbf16> to vector<56x4xf32>
    %26 = arith.maximumf %22, %25 : vector<56x4xf32>
    %c0_14 = arith.constant 0 : index
    %c7 = arith.constant 7 : index
    %c0_15 = arith.constant 0 : index
    %27 = vector.load %arg1[%c0_14, %c7, %c0_15] : memref<56x9x4xbf16, #tpu.memory_space<vmem>>, vector<56x1x4xbf16>
    %28 = vector.shape_cast %27 : vector<56x1x4xbf16> to vector<56x4xbf16>
    %29 = arith.extf %28 : vector<56x4xbf16> to vector<56x4xf32>
    %30 = arith.maximumf %26, %29 : vector<56x4xf32>
    %c0_16 = arith.constant 0 : index
    %c8 = arith.constant 8 : index
    %c0_17 = arith.constant 0 : index
    %31 = vector.load %arg1[%c0_16, %c8, %c0_17] : memref<56x9x4xbf16, #tpu.memory_space<vmem>>, vector<56x1x4xbf16>
    %32 = vector.shape_cast %31 : vector<56x1x4xbf16> to vector<56x4xbf16>
    %33 = arith.extf %32 : vector<56x4xbf16> to vector<56x4xf32>
    %34 = arith.maximumf %30, %33 : vector<56x4xf32>
    %c0_18 = arith.constant 0 : index
    %c0_19 = arith.constant 0 : index
    %35 = vector.load %arg2[%c0_18, %c0_19] : memref<56x4xf32, #tpu.memory_space<vmem>>, vector<56x4xf32>
    tpu.vector_store %arg2[%c0_18, %c0_19], %34 {strides = array<i32>} : memref<56x4xf32, #tpu.memory_space<vmem>>, vector<56x4xf32>,
    return
  }
  func.func @transform_0(%arg0: i32) -> (i32, i32, i32) {
    %c0_i32 = arith.constant 0 : i32
    %c0_i32_0 = arith.constant 0 : i32
    %c0_i32_1 = arith.constant 0 : i32
    return %arg0, %c0_i32, %c0_i32_0 : i32, i32, i32
  }
  func.func @transform_1(%arg0: i32) -> (i32, i32) {
    %c0_i32 = arith.constant 0 : i32
    %c0_i32_0 = arith.constant 0 : i32
    return %arg0, %c0_i32 : i32, i32
  }
}

</mosaic_0001>

<bundles_post_ra>
// kernel: inception_b_forward.13
= control target key start
LH: loop header
LB: loop body
LE: loop exit
PB: predicated region body
PF: predicated region fallthrough
CT: control target
= control target key end

     0   :  { %s740_s12 = smov 0   ;;  %s887_s0 = inlined_call_operand.vmem [shape: f32[512,128], index: 0, kind: input, shape index: {}]   ;;  %s888_s1 = inlined_call_operand.vmem [shape: f32[1,128], index: 1, kind: input, shape index: {}]   ;;  %s889_s2 = inlined_call_operand.vmem [shape: f32[1,128], index: 2, kind: input, shape index: {}]   ;;  %s890_s3 = inlined_call_operand.vmem [shape: bf16[512,128], index: 3, kind: output, shape index: {}]  }
   0x1 LB: > { %s532_s13 = sadd.s32 4294967295, %s718_s12   ;;  %p536_p0 = scmp.ge.s32.totalorder %s718_s12, 1  ;;  %s718_s12 = sphi %s740_s12, %s13_s12  }
   0x2   : > { %p138_p1 = scmp.lt.s32.totalorder %s718_s12, 3 }
   0x4   : > { %p139_p2 = pnand %p536_p0, %p138_p1 }
   0x5   : > { %s537_s14 = sshll.u32 (!%p139_p2), %s532_s13, 5  ;;  %v754_v0 = vld [vmem:[%s888_s1] ss:$0 sm:$0xff] (!%p139_p2) }
   0x6   : > { %142 = sbr.rel (%p139_p2) target bundleno = 51 (0x33), region = 32  ;;  %p163_p3 = scmp.lt.s32.totalorder (!%p139_p2), %s537_s14, 63  ;;  %v764_v1 = vld [vmem:[%s889_s2] ss:$0 sm:$0xff] (!%p139_p2) }
   0xd   : > { %s892_s14 = smov (!%p163_p3, %s537_s14), 63 }
   0xe   : > { %s538_s15 = sshll.u32 %s892_s14, 3  ;;  %s540_s23 = sshll.u32 %s892_s14, 2 }
   0xf   : > { %s759_s20 = scalar_lea.vmem %s887_s0, %s538_s15  ;;  %s796_s26 = scalar_lea.vmem %s890_s3, %s540_s23 }
  0x10   : > { %v174_v2 = vld [vmem:[%s759_s20] sm:$0xff]  ;;  %v175_v3 = vld [vmem:[%s759_s20 + $0x8] sm:$0xff]  ;;  %v176_v4 = vld [vmem:[%s759_s20 + $0x10] sm:$0xff] }
  0x11   : > { %v213_v5 = vmul.f32 %v754_v0, %v174_v2  ;;  %v214_v6 = vmul.f32 %v754_v0, %v175_v3  ;;  %v177_v7 = vld [vmem:[%s759_s20 + $0x18] sm:$0xff]  ;;  %v215_v8 = vmul.f32 %v754_v0, %v176_v4  ;;  %v178_v9 = vld [vmem:[%s759_s20 + $0x20] sm:$0xff]  ;;  %v179_v10 = vld [vmem:[%s759_s20 + $0x28] sm:$0xff] }
  0x12   : > { %v216_v11 = vmul.f32 %v754_v0, %v177_v7  ;;  %v217_v12 = vmul.f32 %v754_v0, %v178_v9  ;;  %v218_v13 = vmul.f32 %v754_v0, %v179_v10  ;;  %v180_v14 = vld [vmem:[%s759_s20 + $0x30] sm:$0xff]  ;;  %v181_v15 = vld [vmem:[%s759_s20 + $0x38] sm:$0xff]  ;;  %v182_v24 = vld [vmem:[%s759_s20 + $0x40] sm:$0xff] }
  0x13   : > { %v252_v16 = vadd.f32 %v764_v1, %v213_v5  ;;  %v253_v17 = vadd.f32 %v764_v1, %v214_v6  ;;  %v254_v18 = vadd.f32 %v764_v1, %v215_v8  ;;  %v219_v19 = vmul.f32 %v754_v0, %v180_v14  ;;  %v183_v25 = vld [vmem:[%s759_s20 + $0x48] sm:$0xff]  ;;  %v184_v30 = vld [vmem:[%s759_s20 + $0x50] sm:$0xff]  ;;  %v185_v35 = vld [vmem:[%s759_s20 + $0x58] sm:$0xff] }
  0x14   : > { %v255_v20 = vadd.f32 %v764_v1, %v216_v11  ;;  %v256_v21 = vadd.f32 %v764_v1, %v217_v12  ;;  %v257_v22 = vadd.f32 %v764_v1, %v218_v13  ;;  %v220_v23 = vmul.f32 %v754_v0, %v181_v15  ;;  %v186_v36 = vld [vmem:[%s759_s20 + $0x60] sm:$0xff]  ;;  %v187_v41 = vld [vmem:[%s759_s20 + $0x68] sm:$0xff]  ;;  %v188_v42 = vld [vmem:[%s759_s20 + $0x70] sm:$0xff] }
  0x15   : > { %v284_v26 = vmax.f32 %v252_v16, 0.0  ;;  %v285_v27 = vmax.f32 %v253_v17, 0.0  ;;  %v286_v28 = vmax.f32 %v254_v18, 0.0  ;;  %v258_v29 = vadd.f32 %v764_v1, %v219_v19  ;;  %v189_v51 = vld [vmem:[%s759_s20 + $0x78] sm:$0xff]  ;;  %v190_v56 = vld [vmem:[%s759_s20 + $0x80] sm:$0xff]  ;;  %v191_v61 = vld [vmem:[%s759_s20 + $0x88] sm:$0xff] }
  0x16   : > { %v287_v31 = vmax.f32 %v255_v20, 0.0  ;;  %v288_v32 = vmax.f32 %v256_v21, 0.0  ;;  %v289_v33 = vmax.f32 %v257_v22, 0.0  ;;  %v259_v34 = vadd.f32 %v764_v1, %v220_v23  ;;  %v192_v4 = vld [vmem:[%s759_s20 + $0x90] sm:$0xff]  ;;  %v193_v5 = vld [vmem:[%s759_s20 + $0x98] sm:$0xff]  ;;  %v194_v10 = vld [vmem:[%s759_s20 + $0xa0] sm:$0xff] }
  0x17   : > { %v612_v37 = vpack.c.bf16 %v285_v27, %v284_v26  ;;  %v290_v38 = vmax.f32 %v258_v29, 0.0  ;;  %v221_v39 = vmul.f32 %v754_v0, %v182_v24  ;;  %v222_v40 = vmul.f32 %v754_v0, %v183_v25  ;;  %v195_v15 = vld [vmem:[%s759_s20 + $0xa8] sm:$0xff]  ;;  %v196_v20 = vld [vmem:[%s759_s20 + $0xb0] sm:$0xff]  ;;  %v197_v25 = vld [vmem:[%s759_s20 + $0xb8] sm:$0xff] }
  0x18   : > { %v617_v43 = vpack.c.bf16 %v287_v31, %v286_v28  ;;  %v622_v44 = vpack.c.bf16 %v289_v33, %v288_v32  ;;  %v291_v45 = vmax.f32 %v259_v34, 0.0  ;;  %v223_v46 = vmul.f32 %v754_v0, %v184_v30  ;;  %v198_v30 = vld [vmem:[%s759_s20 + $0xc0] sm:$0xff] }
  0x19   : > { %613 = vst [vmem:[%s796_s26] sm:$0xff] %v612_v37   ;;  %v260_v47 = vadd.f32 %v764_v1, %v221_v39  ;;  %v261_v48 = vadd.f32 %v764_v1, %v222_v40  ;;  %v224_v49 = vmul.f32 %v754_v0, %v185_v35  ;;  %v225_v50 = vmul.f32 %v754_v0, %v186_v36  ;;  %v199_v35 = vld [vmem:[%s759_s20 + $0xc8] sm:$0xff]  ;;  %v200_v40 = vld [vmem:[%s759_s20 + $0xd0] sm:$0xff] }
  0x1a   : > { %689 = vst [vmem:[%s796_s26 + $0x8] sm:$0xff] %v617_v43   ;;  %690 = vst [vmem:[%s796_s26 + $0x10] sm:$0xff] %v622_v44   ;;  %v627_v52 = vpack.c.bf16 %v291_v45, %v290_v38  ;;  %v262_v53 = vadd.f32 %v764_v1, %v223_v46  ;;  %v226_v54 = vmul.f32 %v754_v0, %v187_v41  ;;  %v201_v41 = vld [vmem:[%s759_s20 + $0xd8] sm:$0xff]  ;;  %v202_v46 = vld [vmem:[%s759_s20 + $0xe0] sm:$0xff] }
  0x1b   : > { %v227_v55 = vmul.f32 %v754_v0, %v188_v42  ;;  %v292_v57 = vmax.f32 %v260_v47, 0.0  ;;  %v293_v58 = vmax.f32 %v261_v48, 0.0  ;;  %v263_v59 = vadd.f32 %v764_v1, %v224_v49 }
  0x1c   : > { %v264_v60 = vadd.f32 %v764_v1, %v225_v50  ;;  %691 = vst [vmem:[%s796_s26 + $0x18] sm:$0xff] %v627_v52   ;;  %v294_v62 = vmax.f32 %v262_v53, 0.0  ;;  %v265_v63 = vadd.f32 %v764_v1, %v226_v54  ;;  %v228_v2 = vmul.f32 %v754_v0, %v189_v51  ;;  %v203_v51 = vld [vmem:[%s759_s20 + $0xe8] sm:$0xff] }
  0x1d   : > { %v266_v3 = vadd.f32 %v764_v1, %v227_v55  ;;  %v632_v6 = vpack.c.bf16 %v293_v58, %v292_v57  ;;  %v295_v7 = vmax.f32 %v263_v59, 0.0  ;;  %v229_v9 = vmul.f32 %v754_v0, %v190_v56  ;;  %v204_v56 = vld [vmem:[%s759_s20 + $0xf0] sm:$0xff] }
  0x1e   : > { %v296_v8 = vmax.f32 %v264_v60, 0.0  ;;  %v297_v11 = vmax.f32 %v265_v63, 0.0  ;;  %v267_v12 = vadd.f32 %v764_v1, %v228_v2  ;;  %v230_v14 = vmul.f32 %v754_v0, %v191_v61  ;;  %v205_v61 = vld [vmem:[%s759_s20 + $0xf8] sm:$0xff] }
  0x1f   : > { %v298_v13 = vmax.f32 %v266_v3, 0.0  ;;  %692 = vst [vmem:[%s796_s26 + $0x20] sm:$0xff] %v632_v6   ;;  %v637_v16 = vpack.c.bf16 %v295_v7, %v294_v62  ;;  %v268_v17 = vadd.f32 %v764_v1, %v229_v9  ;;  %v231_v18 = vmul.f32 %v754_v0, %v192_v4 }
  0x20   : > { %v232_v19 = vmul.f32 %v754_v0, %v193_v5  ;;  %v642_v21 = vpack.c.bf16 %v297_v11, %v296_v8  ;;  %v299_v22 = vmax.f32 %v267_v12, 0.0  ;;  %v269_v23 = vadd.f32 %v764_v1, %v230_v14 }
  0x21   : > { %v233_v24 = vmul.f32 %v754_v0, %v194_v10  ;;  %693 = vst [vmem:[%s796_s26 + $0x28] sm:$0xff] %v637_v16   ;;  %v300_v26 = vmax.f32 %v268_v17, 0.0  ;;  %v270_v27 = vadd.f32 %v764_v1, %v231_v18  ;;  %v234_v29 = vmul.f32 %v754_v0, %v195_v15 }
  0x22   : > { %v271_v28 = vadd.f32 %v764_v1, %v232_v19  ;;  %694 = vst [vmem:[%s796_s26 + $0x30] sm:$0xff] %v642_v21   ;;  %v647_v31 = vpack.c.bf16 %v299_v22, %v298_v13  ;;  %v301_v32 = vmax.f32 %v269_v23, 0.0  ;;  %v235_v34 = vmul.f32 %v754_v0, %v196_v20 }
  0x23   : > { %v272_v33 = vadd.f32 %v764_v1, %v233_v24  ;;  %v302_v36 = vmax.f32 %v270_v27, 0.0  ;;  %v273_v38 = vadd.f32 %v764_v1, %v234_v29  ;;  %v236_v39 = vmul.f32 %v754_v0, %v197_v25 }
  0x24   : > { %v303_v37 = vmax.f32 %v271_v28, 0.0  ;;  %695 = vst [vmem:[%s796_s26 + $0x38] sm:$0xff] %v647_v31   ;;  %v652_v42 = vpack.c.bf16 %v301_v32, %v300_v26  ;;  %v274_v44 = vadd.f32 %v764_v1, %v235_v34  ;;  %v237_v45 = vmul.f32 %v754_v0, %v198_v30 }
  0x25   : > { %v304_v43 = vmax.f32 %v272_v33, 0.0  ;;  %v305_v48 = vmax.f32 %v273_v38, 0.0  ;;  %v275_v49 = vadd.f32 %v764_v1, %v236_v39  ;;  %v238_v50 = vmul.f32 %v754_v0, %v199_v35 }
  0x26   : > { %v657_v47 = vpack.c.bf16 %v303_v37, %v302_v36  ;;  %696 = vst [vmem:[%s796_s26 + $0x40] sm:$0xff] %v652_v42   ;;  %v306_v52 = vmax.f32 %v274_v44, 0.0  ;;  %v276_v53 = vadd.f32 %v764_v1, %v237_v45  ;;  %v239_v54 = vmul.f32 %v754_v0, %v200_v40 }
  0x27   : > { %v240_v55 = vmul.f32 %v754_v0, %v201_v41  ;;  %v662_v57 = vpack.c.bf16 %v305_v48, %v304_v43  ;;  %v307_v58 = vmax.f32 %v275_v49, 0.0  ;;  %v277_v59 = vadd.f32 %v764_v1, %v238_v50 }
  0x28   : > { %697 = vst [vmem:[%s796_s26 + $0x48] sm:$0xff] %v657_v47   ;;  %v241_v60 = vmul.f32 %v754_v0, %v202_v46  ;;  %v308_v62 = vmax.f32 %v276_v53, 0.0  ;;  %v278_v63 = vadd.f32 %v764_v1, %v239_v54  ;;  %v242_v3 = vmul.f32 %v754_v0, %v203_v51 }
  0x29   : > { %v279_v2 = vadd.f32 %v764_v1, %v240_v55  ;;  %698 = vst [vmem:[%s796_s26 + $0x50] sm:$0xff] %v662_v57   ;;  %v667_v4 = vpack.c.bf16 %v307_v58, %v306_v52  ;;  %v309_v5 = vmax.f32 %v277_v59, 0.0  ;;  %v243_v7 = vmul.f32 %v754_v0, %v204_v56 }
  0x2a   : > { %v280_v6 = vadd.f32 %v764_v1, %v241_v60  ;;  %v310_v8 = vmax.f32 %v278_v63, 0.0  ;;  %v281_v10 = vadd.f32 %v764_v1, %v242_v3  ;;  %v244_v11 = vmul.f32 %v754_v0, %v205_v61 }
  0x2b   : > { %v311_v9 = vmax.f32 %v279_v2, 0.0  ;;  %699 = vst [vmem:[%s796_s26 + $0x58] sm:$0xff] %v667_v4   ;;  %v672_v12 = vpack.c.bf16 %v309_v5, %v308_v62  ;;  %v282_v14 = vadd.f32 %v764_v1, %v243_v7 }
  0x2c   : > { %v312_v13 = vmax.f32 %v280_v6, 0.0  ;;  %v313_v16 = vmax.f32 %v281_v10, 0.0  ;;  %v283_v17 = vadd.f32 %v764_v1, %v244_v11 }
  0x2d   : > { %v677_v15 = vpack.c.bf16 %v311_v9, %v310_v8  ;;  %700 = vst [vmem:[%s796_s26 + $0x60] sm:$0xff] %v672_v12   ;;  %v314_v18 = vmax.f32 %v282_v14, 0.0 }
  0x2e   : > { %v682_v19 = vpack.c.bf16 %v313_v16, %v312_v13  ;;  %v315_v20 = vmax.f32 %v283_v17, 0.0 }
  0x2f   : > { %701 = vst [vmem:[%s796_s26 + $0x68] sm:$0xff] %v677_v15  }
  0x30   : > { %702 = vst [vmem:[%s796_s26 + $0x70] sm:$0xff] %v682_v19   ;;  %v687_v21 = vpack.c.bf16 %v315_v20, %v314_v18 }
  0x32   : > { %703 = vst [vmem:[%s796_s26 + $0x78] sm:$0xff] %v687_v21  }
  0x33 PF: > { %s13_s12 = sadd.s32 1, %s718_s12  }
  0x34   : > { %p10_p4 = scmp.ge.s32.totalorder %s13_s12, 4  }
  0x36   :  { %12 = sbr.rel (!%p10_p4) target bundleno = 1 (0x1), region = 62 }

// kernel: inception_b_forward.12
= control target key start
LH: loop header
LB: loop body
LE: loop exit
PB: predicated region body
PF: predicated region fallthrough
CT: control target
= control target key end

     0   :  { %s892_s12 = smov 0   ;;  %s1046_s0 = inlined_call_operand.vmem [shape: bf16[512,4], index: 0, kind: input, shape index: {}]   ;;  %s1047_s1 = inlined_call_operand.vmem [shape: bf16[4,128], index: 1, kind: input, shape index: {}]   ;;  %s1048_s2 = inlined_call_operand.vmem [shape: f32[512,128], index: 2, kind: output, shape index: {0}]   ;;  %s1049_s3 = inlined_call_operand.vmem [shape: f32[2,2,128], index: 3, kind: output, shape index: {1}]  }
   0x1 LB: > { %s898_s13 = sadd.s32 4294967295, %s870_s12   ;;  %p745_p0 = scmp.ge.s32.totalorder %s870_s12, 1  ;;  %s870_s12 = sphi %s892_s12, %s14_s12  }
   0x2   : > { %p141_p1 = scmp.lt.s32.totalorder %s870_s12, 3 }
   0x4   : > { %p142_p2 = pnand %p745_p0, %p141_p1 }
   0x5   : > { %v218_v0 = vld [vmem:[%s1047_s1] sm:$0x3] (!%p142_p2)  ;;  %vm348_vm0 = vcmask (!%p142_p2), 1041408   ;;  %s746_s16 = sshll.u32 (!%p142_p2), %s898_s13, 5  ;;  %vm299_vm1 = vcmask (!%p142_p2), 31744   ;;  %p181_p4 = scmp.lt.s32.totalorder (!%p142_p2), %s898_s13, 1 }
   0x6   : > { %145 = sbr.rel (%p142_p2) target bundleno = 311 (0x137), region = 28  ;;  %838 = vmatprep.subr.msk.bf16.mxu0 (!%p142_p2), %vm348_vm0, %v218_v0  ;;  %v350_v1 = vsel (!%p142_p2), %vm348_vm0, %v218_v0, 0  ;;  %p170_p3 = scmp.lt.s32.totalorder (!%p142_p2), %s746_s16, 63  ;;  %839 = vmatprep.subr.msk.bf16.mxu1 (!%p142_p2), %vm348_vm0, %v218_v0  ;;  %vm651_vm2 = vcmask (!%p142_p2), 1040384  }
   0x7   : > { %803 = vmatpush3.bf16.msra.mxu0 (!%p142_p2), %v350_v1  ;;  %837 = vmatpush3.bf16.msra.mxu1 (!%p142_p2), %v350_v1 }
   0xd   : > { %s1051_s16 = smov (!%p170_p3, %s746_s16), 63  ;;  %s1053_s13 = smov (!%p181_p4, %s898_s13), 1 }
   0xe   : > { %s747_s17 = sshll.u32 %s1051_s16, 2  ;;  %s749_s21 = sshll.u32 %s1051_s16, 3 }
   0xf   : > { %s912_s20 = scalar_lea.vmem %s1046_s0, %s747_s17  ;;  %s950_s24 = scalar_lea.vmem %s1048_s2, %s749_s21 }
  0x10   : > { %v848_v2 = vld [vmem:[%s912_s20] sm:$0xff]   ;;  %v849_v3 = vld [vmem:[%s912_s20 + $0x8] sm:$0xff]   ;;  %v850_v4 = vld [vmem:[%s912_s20 + $0x10] sm:$0xff]   ;;  %s750_s25 = sshll.u32 %s1053_s13, 1 }
  0x11   : > { %804 = vmatprep.mubr.msk.bf16.mxu0 %vm299_vm1, %v848_v2  ;;  %v851_v5 = vld [vmem:[%s912_s20 + $0x18] sm:$0xff]   ;;  %v852_v6 = vld [vmem:[%s912_s20 + $0x20] sm:$0xff]   ;;  %v857_v8 = vld [vmem:[%s912_s20 + $0x48] sm:$0xff]   ;;  %s184_s28 = scalar_lea.vmem %s1049_s3, %s750_s25 }
  0x12   : > { %805 = vmatmul.mubr.msk.bf16.vlgmr.msra.gmra.mrb[0].mxu0 %vm299_vm1, %v849_v3  ;;  %v856_v7 = vld [vmem:[%s912_s20 + $0x40] sm:$0xff]   ;;  %v858_v9 = vld [vmem:[%s912_s20 + $0x50] sm:$0xff]   ;;  %v853_v10 = vld [vmem:[%s912_s20 + $0x28] sm:$0xff]  }
  0x13   : > { %808 = vmatprep.mubr.msk.bf16.mxu0 %vm299_vm1, %v850_v4  ;;  %820 = vmatprep.mubr.msk.bf16.mxu1 %vm299_vm1, %v856_v7  ;;  %v859_v11 = vld [vmem:[%s912_s20 + $0x58] sm:$0xff]   ;;  %v854_v12 = vld [vmem:[%s912_s20 + $0x30] sm:$0xff]   ;;  %v860_v13 = vld [vmem:[%s912_s20 + $0x60] sm:$0xff]  }
  0x14   : > { %821 = vmatmul.mubr.msk.bf16.vlgmr.msra.gmra.mrb[0].mxu1 %vm299_vm1, %v857_v8  ;;  %v855_v14 = vld [vmem:[%s912_s20 + $0x38] sm:$0xff]   ;;  %v861_v15 = vld [vmem:[%s912_s20 + $0x68] sm:$0xff]   ;;  %v862_v16 = vld [vmem:[%s912_s20 + $0x70] sm:$0xff]  }
  0x15   : > { %824 = vmatprep.mubr.msk.bf16.mxu1 %vm299_vm1, %v858_v9  ;;  %v863_v17 = vld [vmem:[%s912_s20 + $0x78] sm:$0xff]  }
  0x1a   : > { %809 = vmatmul.mubr.msk.bf16.gmra.mrb[4].mxu0 %vm299_vm1, %v851_v5 }
  0x1b   : > { %812 = vmatprep.mubr.msk.bf16.mxu0 %vm299_vm1, %v852_v6 }
  0x1c   : > { %825 = vmatmul.mubr.msk.bf16.gmra.mrb[4].mxu1 %vm299_vm1, %v859_v11 }
  0x1d   : > { %828 = vmatprep.mubr.msk.bf16.mxu1 %vm299_vm1, %v860_v13 }
  0x22   : > { %813 = vmatmul.mubr.msk.bf16.gmra.mrb[8].mxu0 %vm299_vm1, %v853_v10 }
  0x23   : > { %816 = vmatprep.mubr.msk.bf16.mxu0 %vm299_vm1, %v854_v12 }
  0x24   : > { %829 = vmatmul.mubr.msk.bf16.gmra.mrb[8].mxu1 %vm299_vm1, %v861_v15 }
  0x25   : > { %832 = vmatprep.mubr.msk.bf16.mxu1 %vm299_vm1, %v862_v16 }
  0x2a   : > { %817 = vmatmul.mubr.msk.bf16.gmra.mrb[12].mxu0 %vm299_vm1, %v855_v14 }
  0x2c   : > { %833 = vmatmul.mubr.msk.bf16.gmra.mrb[12].mxu1 %vm299_vm1, %v863_v17 }
  0xe5   : > { %v806_v18 = vpop.f32.mrb[0].mxu0 }
  0xe6   : > { %515 = vst [vmem:[%s950_s24 + $0x10] sm:$0xff] %v806_v18  ;;  %v386_v19 = vpop.f32.mrb[1].mxu0  ;;  %v584_v25 = vmul.f32 %v806_v18, %v806_v18 }
  0xe7   : > { %513 = vst [vmem:[%s950_s24] sm:$0xff] %v386_v19  ;;  %v807_v20 = vpop.f32.mrb[2].mxu0  ;;  %v582_v22 = vmul.f32 %v386_v19, %v386_v19  ;;  %v956_v32 = vpop.f32.mrb[0].mxu1 }
  0xe8   : > { %516 = vst [vmem:[%s950_s24 + $0x18] sm:$0xff] %v807_v20  ;;  %v389_v21 = vpop.f32.mrb[3].mxu0  ;;  %v585_v28 = vmul.f32 %v807_v20, %v807_v20  ;;  %531 = vst [vmem:[%s950_s24 + $0x90] sm:$0xff] %v956_v32  ;;  %v961_v34 = vpop.f32.mrb[1].mxu1 }
  0xe9   : > { %514 = vst [vmem:[%s950_s24 + $0x8] sm:$0xff] %v389_v21  ;;  %v545_v23 = vadd.f32 %v389_v21, %v386_v19  ;;  %v583_v24 = vmul.f32 %v389_v21, %v389_v21  ;;  %529 = vst [vmem:[%s950_s24 + $0x80] sm:$0xff] %v961_v34  ;;  %v966_v39 = vpop.f32.mrb[2].mxu1 }
  0xea   : > { %532 = vst [vmem:[%s950_s24 + $0x98] sm:$0xff] %v966_v39  ;;  %v971_v41 = vpop.f32.mrb[3].mxu1 }
  0xeb   : > { %v546_v26 = vadd.f32 %v806_v18, %v545_v23  ;;  %v614_v27 = vadd.f32 %v583_v24, %v582_v22  ;;  %530 = vst [vmem:[%s950_s24 + $0x88] sm:$0xff] %v971_v41 }
  0xed   : > { %v615_v29 = vadd.f32 %v614_v27, %v584_v25  ;;  %v810_v30 = vpop.f32.mrb[4].mxu0  ;;  %v547_v31 = vadd.f32 %v807_v20, %v546_v26  ;;  %v598_v27 = vmul.f32 %v961_v34, %v961_v34 }
  0xee   : > { %519 = vst [vmem:[%s950_s24 + $0x30] sm:$0xff] %v810_v30  ;;  %v402_v33 = vpop.f32.mrb[5].mxu0  ;;  %v588_v45 = vmul.f32 %v810_v30, %v810_v30 }
  0xef   : > { %517 = vst [vmem:[%s950_s24 + $0x20] sm:$0xff] %v402_v33  ;;  %v548_v35 = vadd.f32 %v547_v31, %v402_v33  ;;  %v586_v36 = vmul.f32 %v402_v33, %v402_v33  ;;  %v616_v37 = vadd.f32 %v615_v29, %v585_v28  ;;  %v811_v38 = vpop.f32.mrb[6].mxu0  ;;  %v976_v52 = vpop.f32.mrb[4].mxu1 }
  0xf0   : > { %520 = vst [vmem:[%s950_s24 + $0x38] sm:$0xff] %v811_v38  ;;  %v405_v40 = vpop.f32.mrb[7].mxu0  ;;  %v589_v48 = vmul.f32 %v811_v38, %v811_v38  ;;  %535 = vst [vmem:[%s950_s24 + $0xb0] sm:$0xff] %v976_v52  ;;  %v981_v54 = vpop.f32.mrb[5].mxu1 }
  0xf1   : > { %v617_v42 = vadd.f32 %v616_v37, %v586_v36  ;;  %518 = vst [vmem:[%s950_s24 + $0x28] sm:$0xff] %v405_v40  ;;  %v549_v43 = vadd.f32 %v548_v35, %v405_v40  ;;  %v587_v44 = vmul.f32 %v405_v40, %v405_v40  ;;  %533 = vst [vmem:[%s950_s24 + $0xa0] sm:$0xff] %v981_v54  ;;  %v986_v59 = vpop.f32.mrb[6].mxu1 }
  0xf2   : > { %536 = vst [vmem:[%s950_s24 + $0xb8] sm:$0xff] %v986_v59  ;;  %v991_v61 = vpop.f32.mrb[7].mxu1  ;;  %v600_v40 = vmul.f32 %v956_v32, %v956_v32 }
  0xf3   : > { %v550_v46 = vadd.f32 %v810_v30, %v549_v43  ;;  %v618_v47 = vadd.f32 %v617_v42, %v587_v44  ;;  %534 = vst [vmem:[%s950_s24 + $0xa8] sm:$0xff] %v991_v61 }
  0xf5   : > { %v619_v49 = vadd.f32 %v618_v47, %v588_v45  ;;  %v814_v50 = vpop.f32.mrb[8].mxu0  ;;  %v551_v51 = vadd.f32 %v811_v38, %v550_v46  ;;  %v599_v38 = vmul.f32 %v971_v41, %v971_v41  ;;  %v602_v46 = vmul.f32 %v981_v54, %v981_v54 }
  0xf6   : > { %523 = vst [vmem:[%s950_s24 + $0x50] sm:$0xff] %v814_v50  ;;  %v418_v53 = vpop.f32.mrb[9].mxu0  ;;  %v592_v1 = vmul.f32 %v814_v50, %v814_v50 }
  0xf7   : > { %521 = vst [vmem:[%s950_s24 + $0x40] sm:$0xff] %v418_v53  ;;  %v552_v55 = vadd.f32 %v551_v51, %v418_v53  ;;  %v590_v56 = vmul.f32 %v418_v53, %v418_v53  ;;  %v620_v57 = vadd.f32 %v619_v49, %v589_v48  ;;  %v815_v58 = vpop.f32.mrb[10].mxu0  ;;  %v996_v8 = vpop.f32.mrb[8].mxu1 }
  0xf8   : > { %524 = vst [vmem:[%s950_s24 + $0x58] sm:$0xff] %v815_v58  ;;  %v421_v60 = vpop.f32.mrb[11].mxu0  ;;  %v593_v4 = vmul.f32 %v815_v58, %v815_v58  ;;  %539 = vst [vmem:[%s950_s24 + $0xd0] sm:$0xff] %v996_v8  ;;  %v482_v10 = vpop.f32.mrb[9].mxu1 }
  0xf9   : > { %v621_v62 = vadd.f32 %v620_v57, %v590_v56  ;;  %522 = vst [vmem:[%s950_s24 + $0x48] sm:$0xff] %v421_v60  ;;  %v553_v63 = vadd.f32 %v552_v55, %v421_v60  ;;  %v591_v0 = vmul.f32 %v421_v60, %v421_v60  ;;  %537 = vst [vmem:[%s950_s24 + $0xc0] sm:$0xff] %v482_v10  ;;  %v831_v15 = vpop.f32.mrb[10].mxu1 }
  0xfa   : > { %540 = vst [vmem:[%s950_s24 + $0xd8] sm:$0xff] %v831_v15  ;;  %v485_v17 = vpop.f32.mrb[11].mxu1 }
  0xfb   : > { %v554_v2 = vadd.f32 %v814_v50, %v553_v63  ;;  %v622_v3 = vadd.f32 %v621_v62, %v591_v0  ;;  %538 = vst [vmem:[%s950_s24 + $0xc8] sm:$0xff] %v485_v17  ;;  %v603_v50 = vmul.f32 %v991_v61, %v991_v61  ;;  %v607_v63 = vmul.f32 %v485_v17, %v485_v17 }
  0xfd   : > { %v623_v5 = vadd.f32 %v622_v3, %v592_v1  ;;  %v818_v6 = vpop.f32.mrb[12].mxu0  ;;  %v555_v7 = vadd.f32 %v815_v58, %v554_v2 }
  0xfe   : > { %527 = vst [vmem:[%s950_s24 + $0x70] sm:$0xff] %v818_v6  ;;  %v434_v9 = vpop.f32.mrb[13].mxu0  ;;  %v596_v21 = vmul.f32 %v818_v6, %v818_v6 }
  0xff   : > { %525 = vst [vmem:[%s950_s24 + $0x60] sm:$0xff] %v434_v9  ;;  %v556_v11 = vadd.f32 %v555_v7, %v434_v9  ;;  %v594_v12 = vmul.f32 %v434_v9, %v434_v9  ;;  %v624_v13 = vadd.f32 %v623_v5, %v593_v4  ;;  %v819_v14 = vpop.f32.mrb[14].mxu0  ;;  %v834_v28 = vpop.f32.mrb[12].mxu1 }
 0x100   : > { %528 = vst [vmem:[%s950_s24 + $0x78] sm:$0xff] %v819_v14  ;;  %v437_v16 = vpop.f32.mrb[15].mxu0  ;;  %v597_v24 = vmul.f32 %v819_v14, %v819_v14  ;;  %543 = vst [vmem:[%s950_s24 + $0xf0] sm:$0xff] %v834_v28  ;;  %v498_v29 = vpop.f32.mrb[13].mxu1 }
 0x101   : > { %v625_v18 = vadd.f32 %v624_v13, %v594_v12  ;;  %526 = vst [vmem:[%s950_s24 + $0x68] sm:$0xff] %v437_v16  ;;  %v557_v19 = vadd.f32 %v556_v11, %v437_v16  ;;  %v595_v20 = vmul.f32 %v437_v16, %v437_v16  ;;  %541 = vst [vmem:[%s950_s24 + $0xe0] sm:$0xff] %v498_v29  ;;  %v835_v33 = vpop.f32.mrb[14].mxu1 }
 0x102   : > { %544 = vst [vmem:[%s950_s24 + $0xf8] sm:$0xff] %v835_v33  ;;  %v501_v35 = vpop.f32.mrb[15].mxu1  ;;  %v610_v4 = vmul.f32 %v498_v29, %v498_v29  ;;  %v613_v13 = vmul.f32 %v835_v33, %v835_v33 }
 0x103   : > { %v558_v22 = vadd.f32 %v818_v6, %v557_v19  ;;  %v626_v23 = vadd.f32 %v625_v18, %v595_v20  ;;  %542 = vst [vmem:[%s950_s24 + $0xe8] sm:$0xff] %v501_v35  ;;  %v611_v9 = vmul.f32 %v501_v35, %v501_v35 }
 0x105   : > { %v627_v25 = vadd.f32 %v626_v23, %v596_v21  ;;  %v559_v26 = vadd.f32 %v819_v14, %v558_v22 }
 0x107   : > { %v560_v30 = vadd.f32 %v559_v26, %v961_v34  ;;  %v628_v31 = vadd.f32 %v627_v25, %v597_v24  ;;  %v601_v34 = vmul.f32 %v966_v39, %v966_v39 }
 0x109   : > { %v629_v36 = vadd.f32 %v628_v31, %v598_v27  ;;  %v561_v37 = vadd.f32 %v560_v30, %v971_v41 }
 0x10b   : > { %v562_v42 = vadd.f32 %v956_v32, %v561_v37  ;;  %v630_v43 = vadd.f32 %v629_v36, %v599_v38  ;;  %v604_v32 = vmul.f32 %v976_v52, %v976_v52 }
 0x10d   : > { %v631_v44 = vadd.f32 %v630_v43, %v600_v40  ;;  %v563_v45 = vadd.f32 %v966_v39, %v562_v42  ;;  %v605_v39 = vmul.f32 %v986_v59, %v986_v59 }
 0x10f   : > { %v564_v47 = vadd.f32 %v563_v45, %v981_v54  ;;  %v632_v48 = vadd.f32 %v631_v44, %v601_v34  ;;  %v606_v54 = vmul.f32 %v482_v10, %v482_v10 }
 0x111   : > { %v633_v41 = vadd.f32 %v632_v48, %v602_v46  ;;  %v565_v49 = vadd.f32 %v564_v47, %v991_v61  ;;  %v608_v61 = vmul.f32 %v996_v8, %v996_v8 }
 0x113   : > { %v566_v51 = vadd.f32 %v976_v52, %v565_v49  ;;  %v634_v53 = vadd.f32 %v633_v41, %v603_v50  ;;  %v609_v52 = vmul.f32 %v831_v15, %v831_v15 }
 0x115   : > { %v635_v55 = vadd.f32 %v634_v53, %v604_v32  ;;  %v567_v56 = vadd.f32 %v986_v59, %v566_v51 }
 0x117   : > { %v568_v57 = vadd.f32 %v567_v56, %v482_v10  ;;  %v636_v58 = vadd.f32 %v635_v55, %v605_v39  ;;  %v612_v10 = vmul.f32 %v834_v28, %v834_v28 }
 0x119   : > { %v637_v60 = vadd.f32 %v636_v58, %v606_v54  ;;  %v569_v62 = vadd.f32 %v568_v57, %v485_v17 }
 0x11b   : > { %v570_v0 = vadd.f32 %v996_v8, %v569_v62  ;;  %v638_v1 = vadd.f32 %v637_v60, %v607_v63 }
 0x11d   : > { %v639_v2 = vadd.f32 %v638_v1, %v608_v61  ;;  %v571_v3 = vadd.f32 %v831_v15, %v570_v0 }
 0x11f   : > { %v572_v5 = vadd.f32 %v571_v3, %v498_v29  ;;  %v640_v6 = vadd.f32 %v639_v2, %v609_v52 }
 0x121   : > { %v641_v59 = vadd.f32 %v640_v6, %v610_v4  ;;  %v573_v7 = vadd.f32 %v572_v5, %v501_v35 }
 0x123   : > { %v574_v11 = vadd.f32 %v834_v28, %v573_v7  ;;  %v642_v12 = vadd.f32 %v641_v59, %v611_v9 }
 0x125   : > { %v575_v14 = vadd.f32 %v835_v33, %v574_v11  ;;  %v643_v16 = vadd.f32 %v642_v12, %v612_v10 }
 0x127   : > { %v576_v17 = vrot.slane %v575_v14, 4  ;;  %v644_v8 = vadd.f32 %v643_v16, %v613_v13 }
 0x129   : > { %v577_v18 = vadd.f32 %v576_v17, %v575_v14  ;;  %v645_v19 = vrot.slane %v644_v8, 4 }
 0x12b   : > { %v578_v20 = vrot.slane %v577_v18, 2  ;;  %v646_v15 = vadd.f32 %v645_v19, %v644_v8 }
 0x12d   : > { %v579_v21 = vadd.f32 %v578_v20, %v577_v18  ;;  %v647_v22 = vrot.slane %v646_v15, 2 }
 0x12f   : > { %v580_v23 = vrot.slane %v579_v21, 1  ;;  %v648_v24 = vadd.f32 %v647_v22, %v646_v15 }
 0x131   : > { %v649_v25 = vrot.slane %v648_v24, 1  ;;  %v581_v26 = vadd.f32 %v580_v23, %v579_v21 }
 0x133   : > { %v650_v27 = vadd.f32 %v649_v25, %v648_v24 }
 0x135   : > { %v652_v28 = vsel %vm651_vm2, %v581_v26, %v650_v27 }
 0x136   : > { %653 = vst [vmem:[%s184_s28] sm:$0x3] %v652_v28 }
 0x137 PF: > { %s14_s12 = sadd.s32 1, %s870_s12  }
 0x138   : > { %p11_p5 = scmp.ge.s32.totalorder %s14_s12, 4  }
 0x13a   :  { %13 = sbr.rel (!%p11_p5) target bundleno = 1 (0x1), region = 70 }

// kernel: inception_b_forward.14
= control target key start
LH: loop header
LB: loop body
LE: loop exit
PB: predicated region body
PF: predicated region fallthrough
CT: control target
= control target key end

     0   :  { %s3775_s12 = smov 0   ;;  %s4548_s0 = inlined_call_operand.vmem [shape: bf16[512,1152], index: 0, kind: input, shape index: {}]   ;;  %s4549_s1 = inlined_call_operand.vmem [shape: bf16[1152,128], index: 1, kind: input, shape index: {}]   ;;  %s4550_s2 = inlined_call_operand.vmem [shape: f32[512,128], index: 2, kind: output, shape index: {0}]   ;;  %s4551_s3 = inlined_call_operand.vmem [shape: f32[2,2,128], index: 3, kind: output, shape index: {1}]  }
   0x1 LB: > { %s3781_s13 = sadd.s32 4294967295, %s3753_s12   ;;  %p2698_p0 = scmp.ge.s32.totalorder %s3753_s12, 1  ;;  %s3753_s12 = sphi %s3775_s12, %s14_s12  }
   0x2   : > { %p142_p1 = scmp.lt.s32.totalorder %s3753_s12, 3 }
   0x4   : > { %p143_p2 = pnand %p2698_p0, %p142_p1 }
   0x5   : > { %v3467_v0 = vld [vmem:[%s4549_s1 + $0x40] sm:$0xff] (!%p143_p2)   ;;  %s2699_s16 = sshll.u32 (!%p143_p2), %s3781_s13, 5  ;;  %v3469_v2 = vld [vmem:[%s4549_s1 + $0x48] sm:$0xff] (!%p143_p2)   ;;  %v3471_v4 = vld [vmem:[%s4549_s1 + $0x50] sm:$0xff] (!%p143_p2)   ;;  %p184_p4 = scmp.lt.s32.totalorder (!%p143_p2), %s3781_s13, 1  ;;  %vm2604_vm0 = vcmask (!%p143_p2), 1040384  }
   0x6   : > { %146 = sbr.rel (%p143_p2) target bundleno = 558 (0x22e), region = 28  ;;  %v3468_v1 = vld [vmem:[%s4549_s1] sm:$0xff] (!%p143_p2)   ;;  %2922 = vmatprep.subr.bf16.mxu0 (!%p143_p2), %v3467_v0  ;;  %3442 = vmatprep.subr.bf16.mxu1 (!%p143_p2), %v3467_v0  ;;  %p172_p3 = scmp.lt.s32.totalorder (!%p143_p2), %s2699_s16, 63  ;;  %v3470_v3 = vld [vmem:[%s4549_s1 + $0x8] sm:$0xff] (!%p143_p2)   ;;  %v3472_v5 = vld [vmem:[%s4549_s1 + $0x10] sm:$0xff] (!%p143_p2)  }
   0x7   : > { %2923 = vmatpush3.bf16.msra.mxu0 (!%p143_p2), %v3468_v1  ;;  %3450 = vmatpush3.bf16.msra.mxu1 (!%p143_p2), %v3468_v1  ;;  %v3473_v6 = vld [vmem:[%s4549_s1 + $0x58] sm:$0xff] (!%p143_p2)   ;;  %v3475_v8 = vld [vmem:[%s4549_s1 + $0x60] sm:$0xff] (!%p143_p2)   ;;  %v3477_v10 = vld [vmem:[%s4549_s1 + $0x68] sm:$0xff] (!%p143_p2)  }
   0x8   : > { %2924 = vmatprep.subr.bf16.mxu0 (!%p143_p2), %v3469_v2  ;;  %3443 = vmatprep.subr.bf16.mxu1 (!%p143_p2), %v3469_v2  ;;  %v3474_v7 = vld [vmem:[%s4549_s1 + $0x18] sm:$0xff] (!%p143_p2)   ;;  %v3476_v9 = vld [vmem:[%s4549_s1 + $0x20] sm:$0xff] (!%p143_p2)   ;;  %v3478_v13 = vld [vmem:[%s4549_s1 + $0x28] sm:$0xff] (!%p143_p2)  }
   0x9   : > { %v3479_v14 = vld [vmem:[%s4549_s1 + $0x70] sm:$0xff] (!%p143_p2)   ;;  %v3481_v16 = vld [vmem:[%s4549_s1 + $0x78] sm:$0xff] (!%p143_p2)   ;;  %v3489_v18 = vld [vmem:[%s4549_s1 + $0xc0] sm:$0xff] (!%p143_p2)  }
   0xa   : > { %v3480_v15 = vld [vmem:[%s4549_s1 + $0x30] sm:$0xff] (!%p143_p2)   ;;  %v3482_v17 = vld [vmem:[%s4549_s1 + $0x38] sm:$0xff] (!%p143_p2)   ;;  %v3490_v21 = vld [vmem:[%s4549_s1 + $0x140] sm:$0xff] (!%p143_p2)  }
   0xb   : > { %2925 = vmatpush3.bf16.msra.mxu0 (!%p143_p2), %v3470_v3  ;;  %3451 = vmatpush3.bf16.msra.mxu1 (!%p143_p2), %v3470_v3  ;;  %v3491_v22 = vld [vmem:[%s4549_s1 + $0x80] sm:$0xff] (!%p143_p2)   ;;  %v3493_v24 = vld [vmem:[%s4549_s1 + $0xc8] sm:$0xff] (!%p143_p2)   ;;  %v3501_v32 = vld [vmem:[%s4549_s1 + $0xd0] sm:$0xff] (!%p143_p2)  }
   0xc   : > { %2926 = vmatprep.subr.bf16.mxu0 (!%p143_p2), %v3471_v4  ;;  %3444 = vmatprep.subr.bf16.mxu1 (!%p143_p2), %v3471_v4  ;;  %v3492_v23 = vld [vmem:[%s4549_s1 + $0x100] sm:$0xff] (!%p143_p2)   ;;  %v3504_v27 = vld [vmem:[%s4549_s1 + $0x148] sm:$0xff] (!%p143_p2)   ;;  %v3502_v33 = vld [vmem:[%s4549_s1 + $0x90] sm:$0xff] (!%p143_p2)  }
   0xd   : > { %s4553_s16 = smov (!%p172_p3, %s2699_s16), 63  ;;  %v3494_v28 = vld [vmem:[%s4549_s1 + $0x88] sm:$0xff]   ;;  %v3503_v34 = vld [vmem:[%s4549_s1 + $0xd8] sm:$0xff]   ;;  %v3513_v38 = vld [vmem:[%s4549_s1 + $0xe0] sm:$0xff]   ;;  %s4555_s13 = smov (!%p184_p4, %s3781_s13), 1 }
   0xe   : > { %s3458_s29 = smul.u32 36, %s4553_s16  ;;  %v3506_v29 = vld [vmem:[%s4549_s1 + $0x108] sm:$0xff]   ;;  %v3505_v37 = vld [vmem:[%s4549_s1 + $0x98] sm:$0xff]   ;;  %v3524_v41 = vld [vmem:[%s4549_s1 + $0x150] sm:$0xff]  }
   0xf   : > { %2927 = vmatpush3.bf16.msra.mxu0 %v3472_v5  ;;  %3452 = vmatpush3.bf16.msra.mxu1 %v3472_v5  ;;  %v3514_v42 = vld [vmem:[%s4549_s1 + $0xa0] sm:$0xff]   ;;  %v3515_v43 = vld [vmem:[%s4549_s1 + $0xe8] sm:$0xff]   ;;  %v3526_v44 = vld [vmem:[%s4549_s1 + $0x110] sm:$0xff]  }
  0x10   : > { %2928 = vmatprep.subr.bf16.mxu0 %v3473_v6  ;;  %3445 = vmatprep.subr.bf16.mxu1 %v3473_v6  ;;  %s3819_s9 = scalar_lea.vmem %s4548_s0, %s3458_s29  ;;  %v3516_v47 = vld [vmem:[%s4549_s1 + $0xa8] sm:$0xff]   ;;  %v3523_v50 = vld [vmem:[%s4549_s1 + $0xf0] sm:$0xff]   ;;  %v3527_v53 = vld [vmem:[%s4549_s1 + $0xf8] sm:$0xff]  }
  0x11   : > { %v3485_v11 = vld [vmem:[%s3819_s9 + $0x4] ss:$36 sps:$4 sm:$0xff]   ;;  %v3495_v25 = vld [vmem:[%s3819_s9 + $0x4c] ss:$36 sps:$4 sm:$0xff]   ;;  %v3507_v35 = vld [vmem:[%s3819_s9 + $0x94] ss:$36 sps:$4 sm:$0xff]  }
  0x12   : > { %v3488_v12 = vld [vmem:[%s3819_s9 + $0x364] ss:$36 sps:$4 sm:$0xff]   ;;  %1693 = vmatprep.mubr.bf16.mxu0 %v3485_v11  ;;  %v3497_v26 = vld [vmem:[%s3819_s9 + $0x3ac] ss:$36 sps:$4 sm:$0xff]   ;;  %v3509_v36 = vld [vmem:[%s3819_s9 + $0x3f4] ss:$36 sps:$4 sm:$0xff]  }
  0x13   : > { %2929 = vmatpush3.bf16.msra.mxu0 %v3474_v7  ;;  %3453 = vmatpush3.bf16.msra.mxu1 %v3474_v7  ;;  %v3483_v19 = vld [vmem:[%s3819_s9] ss:$36 sps:$4 sm:$0xff]   ;;  %v3499_v30 = vld [vmem:[%s3819_s9 + $0x48] ss:$36 sps:$4 sm:$0xff]   ;;  %v3511_v39 = vld [vmem:[%s3819_s9 + $0x90] ss:$36 sps:$4 sm:$0xff]  }
  0x14   : > { %2930 = vmatprep.subr.bf16.mxu0 %v3475_v8  ;;  %3446 = vmatprep.subr.bf16.mxu1 %v3475_v8  ;;  %v3486_v20 = vld [vmem:[%s3819_s9 + $0x360] ss:$36 sps:$4 sm:$0xff]   ;;  %v3500_v31 = vld [vmem:[%s3819_s9 + $0x3a8] ss:$36 sps:$4 sm:$0xff]   ;;  %v3512_v40 = vld [vmem:[%s3819_s9 + $0x3f0] ss:$36 sps:$4 sm:$0xff]  }
  0x15   : > { %1789 = vmatprep.mubr.bf16.mxu1 %v3488_v12  ;;  %v3517_v45 = vld [vmem:[%s3819_s9 + $0xdc] ss:$36 sps:$4 sm:$0xff]   ;;  %v3525_v51 = vld [vmem:[%s4549_s1 + $0xb0] sm:$0xff]   ;;  %v3529_v52 = vld [vmem:[%s3819_s9 + $0x124] ss:$36 sps:$4 sm:$0xff]  }
  0x16   : > { %v3519_v46 = vld [vmem:[%s3819_s9 + $0x43c] ss:$36 sps:$4 sm:$0xff]   ;;  %v3533_v56 = vld [vmem:[%s3819_s9 + $0xc] ss:$36 sps:$4 sm:$0xff]   ;;  %v3541_v0 = vld [vmem:[%s3819_s9 + $0x54] ss:$36 sps:$4 sm:$0xff]  }
  0x17   : > { %2931 = vmatpush3.bf16.msra.mxu0 %v3476_v9  ;;  %3454 = vmatpush3.bf16.msra.mxu1 %v3476_v9  ;;  %v3521_v48 = vld [vmem:[%s3819_s9 + $0xd8] ss:$36 sps:$4 sm:$0xff]   ;;  %v3531_v58 = vld [vmem:[%s3819_s9 + $0x8] ss:$36 sps:$4 sm:$0xff]   ;;  %v3534_v59 = vld [vmem:[%s3819_s9 + $0x120] ss:$36 sps:$4 sm:$0xff]  }
  0x18   : > { %2932 = vmatprep.subr.bf16.mxu0 %v3477_v10  ;;  %3447 = vmatprep.subr.bf16.mxu1 %v3477_v10  ;;  %v3522_v49 = vld [vmem:[%s3819_s9 + $0x438] ss:$36 sps:$4 sm:$0xff]   ;;  %v3535_v60 = vld [vmem:[%s4549_s1 + $0x1c0] sm:$0xff]   ;;  %v3539_v62 = vld [vmem:[%s3819_s9 + $0x16c] ss:$36 sps:$4 sm:$0xff]  }
  0x19   : > { %v3537_v54 = vld [vmem:[%s4549_s1 + $0x158] sm:$0xff]   ;;  %v3536_v61 = vld [vmem:[%s4549_s1 + $0x180] sm:$0xff]   ;;  %v3552_v2 = vld [vmem:[%s4549_s1 + $0x1c8] sm:$0xff]  }
  0x1a   : > { %v3538_v55 = vld [vmem:[%s4549_s1 + $0x118] sm:$0xff]   ;;  %v3551_v63 = vld [vmem:[%s4549_s1 + $0x160] sm:$0xff]   ;;  %v3554_v3 = vld [vmem:[%s4549_s1 + $0x188] sm:$0xff]  }
  0x1b   : > { %2933 = vmatpush3.bf16.msra.mxu0 %v3478_v13  ;;  %3455 = vmatpush3.bf16.msra.mxu1 %v3478_v13  ;;  %v3528_v57 = vld [vmem:[%s4549_s1 + $0xb8] sm:$0xff]   ;;  %v3553_v1 = vld [vmem:[%s4549_s1 + $0x120] sm:$0xff]   ;;  %v3543_v4 = vld [vmem:[%s3819_s9 + $0x168] ss:$36 sps:$4 sm:$0xff]  }
  0x1c   : > { %2934 = vmatprep.subr.bf16.mxu0 %v3479_v14  ;;  %3448 = vmatprep.subr.bf16.mxu1 %v3479_v14  ;;  %v3561_v5 = vld [vmem:[%s4549_s1 + $0x168] sm:$0xff]   ;;  %v3544_v7 = vld [vmem:[%s3819_s9 + $0x50] ss:$36 sps:$4 sm:$0xff]   ;;  %v3547_v9 = vld [vmem:[%s3819_s9 + $0x9c] ss:$36 sps:$4 sm:$0xff]  }
  0x1d   : > { %v3562_v6 = vld [vmem:[%s4549_s1 + $0x128] sm:$0xff]   ;;  %v3545_v8 = vld [vmem:[%s3819_s9 + $0x1b4] ss:$36 sps:$4 sm:$0xff]   ;;  %v3555_v14 = vld [vmem:[%s3819_s9 + $0x1fc] ss:$36 sps:$4 sm:$0xff]  }
  0x1e   : > { %v3569_v10 = vld [vmem:[%s4549_s1 + $0x1d0] sm:$0xff]   ;;  %v3550_v13 = vld [vmem:[%s3819_s9 + $0x98] ss:$36 sps:$4 sm:$0xff]  }
  0x1f   : > { %2935 = vmatpush3.bf16.msra.mxu0 %v3480_v15  ;;  %3456 = vmatpush3.bf16.msra.mxu1 %v3480_v15  ;;  %v3570_v11 = vld [vmem:[%s4549_s1 + $0x190] sm:$0xff]  }
  0x20   : > { %2936 = vmatprep.subr.bf16.mxu0 %v3481_v16  ;;  %3449 = vmatprep.subr.bf16.mxu1 %v3481_v16  ;;  %v3549_v12 = vld [vmem:[%s3819_s9 + $0x1b0] ss:$36 sps:$4 sm:$0xff]  }
  0x21   : > { %v3577_v15 = vld [vmem:[%s4549_s1 + $0x170] sm:$0xff]  }
  0x22   : > { %v3578_v16 = vld [vmem:[%s4549_s1 + $0x130] sm:$0xff]  }
  0x23   : > { %2937 = vmatpush3.bf16.msra.mxu0 %v3482_v17  ;;  %3457 = vmatpush3.bf16.msra.mxu1 %v3482_v17  ;;  %v3557_v17 = vld [vmem:[%s3819_s9 + $0xe4] ss:$36 sps:$4 sm:$0xff]  }
  0x24   : > { %3034 = vmatprep.subr.bf16.mxu1 %v3489_v18  ;;  %3146 = vmatprep.subr.bf16.mxu0 %v3490_v21  ;;  %v3585_v18 = vld [vmem:[%s4549_s1 + $0x1d8] sm:$0xff]  }
  0x25   : > { %v3587_v21 = vld [vmem:[%s4549_s1 + $0x178] sm:$0xff]  }
  0x26   : > { %1694 = vmatmul.mubr.bf16.vlgmr.msra.gmra.mrb[0].mxu0 %v3483_v19  ;;  %1790 = vmatmul.mubr.bf16.vlgmr.msra.gmra.mrb[0].mxu1 %v3486_v20  ;;  %v3586_v19 = vld [vmem:[%s4549_s1 + $0x198] sm:$0xff]  }
  0x27   : > { %3035 = vmatpush3.bf16.msra.mxu1 %v3491_v22  ;;  %3147 = vmatpush3.bf16.msra.mxu0 %v3492_v23  ;;  %v3559_v20 = vld [vmem:[%s3819_s9 + $0x1f8] ss:$36 sps:$4 sm:$0xff]   ;;  %v3560_v23 = vld [vmem:[%s3819_s9 + $0xe0] ss:$36 sps:$4 sm:$0xff]  }
  0x28   : > { %3036 = vmatprep.subr.bf16.mxu1 %v3493_v24  ;;  %1701 = vmatprep.mubr.bf16.mxu0 %v3495_v25  ;;  %v3588_v22 = vld [vmem:[%s4549_s1 + $0x138] sm:$0xff]   ;;  %v3563_v24 = vld [vmem:[%s3819_s9 + $0x244] ss:$36 sps:$4 sm:$0xff]   ;;  %v3565_v25 = vld [vmem:[%s3819_s9 + $0x12c] ss:$36 sps:$4 sm:$0xff]  }
  0x29   : > { %1797 = vmatprep.mubr.bf16.mxu1 %v3497_v26  ;;  %3148 = vmatprep.subr.bf16.mxu0 %v3504_v27  ;;  %v3601_v26 = vld [vmem:[%s4549_s1 + $0x1e0] sm:$0xff]  }
  0x2a   : > { %v3567_v27 = vld [vmem:[%s3819_s9 + $0x240] ss:$36 sps:$4 sm:$0xff]  }
  0x2b   : > { %3037 = vmatpush3.bf16.msra.mxu1 %v3494_v28  ;;  %3149 = vmatpush3.bf16.msra.mxu0 %v3506_v29  ;;  %v3602_v28 = vld [vmem:[%s4549_s1 + $0x200] sm:$0xff]  }
  0x2c   : > { %3038 = vmatprep.subr.bf16.mxu1 %v3501_v32  ;;  %3150 = vmatprep.subr.bf16.mxu0 %v3524_v41  ;;  %v3603_v29 = vld [vmem:[%s4549_s1 + $0x1a0] sm:$0xff]   ;;  %v3573_v32 = vld [vmem:[%s3819_s9 + $0x174] ss:$36 sps:$4 sm:$0xff]  }
  0x2d   : > { %v3631_v41 = vld [vmem:[%s4549_s1 + $0x1f0] sm:$0xff]  }
  0x2e   : > { %1702 = vmatmul.mubr.bf16.gmra.mrb[4].mxu0 %v3499_v30  ;;  %1798 = vmatmul.mubr.bf16.gmra.mrb[4].mxu1 %v3500_v31  ;;  %v3568_v30 = vld [vmem:[%s3819_s9 + $0x128] ss:$36 sps:$4 sm:$0xff]  }
  0x2f   : > { %3039 = vmatpush3.bf16.msra.mxu1 %v3502_v33  ;;  %1709 = vmatprep.mubr.bf16.mxu0 %v3507_v35  ;;  %v3571_v31 = vld [vmem:[%s3819_s9 + $0x28c] ss:$36 sps:$4 sm:$0xff]  }
  0x30   : > { %3040 = vmatprep.subr.bf16.mxu1 %v3503_v34  ;;  %1805 = vmatprep.mubr.bf16.mxu1 %v3509_v36  ;;  %v3616_v33 = vld [vmem:[%s4549_s1 + $0x1e8] sm:$0xff]   ;;  %v3576_v35 = vld [vmem:[%s3819_s9 + $0x170] ss:$36 sps:$4 sm:$0xff]  }
  0x31   : > { %3151 = vmatpush3.bf16.msra.mxu0 %v3526_v44  ;;  %v3575_v34 = vld [vmem:[%s3819_s9 + $0x288] ss:$36 sps:$4 sm:$0xff]  }
  0x32   : > { %3152 = vmatprep.subr.bf16.mxu0 %v3537_v54  ;;  %v3618_v36 = vld [vmem:[%s4549_s1 + $0x1a8] sm:$0xff]   ;;  %v3606_v54 = vld [vmem:[%s3819_s9 + $0x5c] ss:$36 sps:$4 sm:$0xff]  }
  0x33   : > { %3041 = vmatpush3.bf16.msra.mxu1 %v3505_v37  ;;  %v3579_v37 = vld [vmem:[%s3819_s9 + $0x2d4] ss:$36 sps:$4 sm:$0xff]   ;;  %v3591_v44 = vld [vmem:[%s3819_s9 + $0x204] ss:$36 sps:$4 sm:$0xff]  }
  0x34   : > { %3042 = vmatprep.subr.bf16.mxu1 %v3513_v38  ;;  %v3581_v38 = vld [vmem:[%s3819_s9 + $0x1bc] ss:$36 sps:$4 sm:$0xff]  }
  0x35   : > { %3153 = vmatpush3.bf16.msra.mxu0 %v3538_v55  ;;  %v3617_v55 = vld [vmem:[%s4549_s1 + $0x208] sm:$0xff]  }
  0x36   : > { %1710 = vmatmul.mubr.bf16.gmra.mrb[8].mxu0 %v3511_v39  ;;  %1806 = vmatmul.mubr.bf16.gmra.mrb[8].mxu1 %v3512_v40  ;;  %v3583_v39 = vld [vmem:[%s3819_s9 + $0x2d0] ss:$36 sps:$4 sm:$0xff]   ;;  %v3584_v40 = vld [vmem:[%s3819_s9 + $0x1b8] ss:$36 sps:$4 sm:$0xff]  }
  0x37   : > { %3043 = vmatpush3.bf16.msra.mxu1 %v3514_v42  ;;  %1717 = vmatprep.mubr.bf16.mxu0 %v3517_v45  ;;  %v3589_v42 = vld [vmem:[%s3819_s9 + $0x31c] ss:$36 sps:$4 sm:$0xff]  }
  0x38   : > { %3044 = vmatprep.subr.bf16.mxu1 %v3515_v43  ;;  %1813 = vmatprep.mubr.bf16.mxu1 %v3519_v46  ;;  %v3633_v43 = vld [vmem:[%s4549_s1 + $0x1b0] sm:$0xff]   ;;  %v3593_v45 = vld [vmem:[%s3819_s9 + $0x318] ss:$36 sps:$4 sm:$0xff]   ;;  %v3594_v46 = vld [vmem:[%s3819_s9 + $0x200] ss:$36 sps:$4 sm:$0xff]  }
  0x39   : > { %3154 = vmatprep.subr.bf16.mxu0 %v3551_v63  ;;  %v3614_v63 = vld [vmem:[%s3819_s9 + $0x2d8] ss:$36 sps:$4 sm:$0xff]  }
  0x3a   : > { %3155 = vmatpush3.bf16.msra.mxu0 %v3553_v1  ;;  %v3619_v1 = vld [vmem:[%s3819_s9 + $0x324] ss:$36 sps:$4 sm:$0xff]  }
  0x3b   : > { %3045 = vmatpush3.bf16.msra.mxu1 %v3516_v47  ;;  %3156 = vmatprep.subr.bf16.mxu0 %v3561_v5  ;;  %v3646_v47 = vld [vmem:[%s4549_s1 + $0x1f8] sm:$0xff]   ;;  %v3624_v5 = vld [vmem:[%s3819_s9 + $0xe8] ss:$36 sps:$4 sm:$0xff]  }
  0x3c   : > { %3046 = vmatprep.subr.bf16.mxu1 %v3523_v50  ;;  %v3599_v50 = vld [vmem:[%s3819_s9 + $0x14] ss:$36 sps:$4 sm:$0xff]  }
  0x3e   : > { %1718 = vmatmul.mubr.bf16.gmra.mrb[12].mxu0 %v3521_v48  ;;  %1814 = vmatmul.mubr.bf16.gmra.mrb[12].mxu1 %v3522_v49  ;;  %v3595_v48 = vld [vmem:[%s3819_s9 + $0x24c] ss:$36 sps:$4 sm:$0xff]   ;;  %v3648_v49 = vld [vmem:[%s4549_s1 + $0x1b8] sm:$0xff]  }
  0x3f   : > { %3047 = vmatpush3.bf16.msra.mxu1 %v3525_v51  ;;  %1725 = vmatprep.mubr.bf16.mxu0 %v3529_v52  ;;  %v3597_v51 = vld [vmem:[%s3819_s9 + $0x10] ss:$36 sps:$4 sm:$0xff]   ;;  %v3600_v52 = vld [vmem:[%s3819_s9 + $0x248] ss:$36 sps:$4 sm:$0xff]  }
  0x40   : > { %3048 = vmatprep.subr.bf16.mxu1 %v3527_v53  ;;  %1854 = vmatprep.mubr.bf16.mxu1 %v3533_v56  ;;  %v3604_v53 = vld [vmem:[%s3819_s9 + $0x294] ss:$36 sps:$4 sm:$0xff]  }
  0x41   : > { %3157 = vmatpush3.bf16.msra.mxu0 %v3562_v6  ;;  %v3632_v56 = vld [vmem:[%s4549_s1 + $0x210] sm:$0xff]  }
  0x42   : > { %3158 = vmatprep.subr.bf16.mxu0 %v3577_v15  ;;  %v3687_v6 = vld [vmem:[%s4549_s1 + $0x230] sm:$0xff]   ;;  %v3639_v15 = vld [vmem:[%s3819_s9 + $0x178] ss:$36 sps:$4 sm:$0xff]  }
  0x43   : > { %3049 = vmatpush3.bf16.msra.mxu1 %v3528_v57  ;;  %v3608_v57 = vld [vmem:[%s3819_s9 + $0x290] ss:$36 sps:$4 sm:$0xff]  }
  0x44   : > { %3258 = vmatprep.subr.bf16.mxu1 %v3535_v60  ;;  %v3612_v60 = vld [vmem:[%s3819_s9 + $0xa4] ss:$36 sps:$4 sm:$0xff]  }
  0x45   : > { %3159 = vmatpush3.bf16.msra.mxu0 %v3578_v16  ;;  %v3640_v16 = vld [vmem:[%s3819_s9 + $0x3fc] ss:$36 sps:$4 sm:$0xff]  }
  0x46   : > { %1726 = vmatmul.mubr.bf16.gmra.mrb[16].mxu0 %v3534_v59  ;;  %1855 = vmatmul.mubr.bf16.vlgmr.msra.gmra.mrb[16].mxu1 %v3531_v58  ;;  %v3609_v58 = vld [vmem:[%s3819_s9 + $0x58] ss:$36 sps:$4 sm:$0xff]  }
  0x47   : > { %3259 = vmatpush3.bf16.msra.mxu1 %v3536_v61  ;;  %1733 = vmatprep.mubr.bf16.mxu0 %v3539_v62  ;;  %v3610_v59 = vld [vmem:[%s3819_s9 + $0x2dc] ss:$36 sps:$4 sm:$0xff]  }
  0x48   : > { %1862 = vmatprep.mubr.bf16.mxu1 %v3541_v0  ;;  %3260 = vmatprep.subr.bf16.mxu1 %v3552_v2  ;;  %v3647_v61 = vld [vmem:[%s4549_s1 + $0x218] sm:$0xff]   ;;  %v3661_v62 = vld [vmem:[%s4549_s1 + $0x220] sm:$0xff]   ;;  %v3621_v2 = vld [vmem:[%s3819_s9 + $0xec] ss:$36 sps:$4 sm:$0xff]  }
  0x49   : > { %3160 = vmatprep.subr.bf16.mxu0 %v3587_v21  ;;  %v3615_v0 = vld [vmem:[%s3819_s9 + $0xa0] ss:$36 sps:$4 sm:$0xff]   ;;  %v3651_v21 = vld [vmem:[%s3819_s9 + $0x20c] ss:$36 sps:$4 sm:$0xff]  }
  0x4a   : > { %3161 = vmatpush3.bf16.msra.mxu0 %v3588_v22  ;;  %v3653_v22 = vld [vmem:[%s3819_s9 + $0x440] ss:$36 sps:$4 sm:$0xff]  }
  0x4b   : > { %3261 = vmatpush3.bf16.msra.mxu1 %v3554_v3  ;;  %3394 = vmatprep.subr.bf16.mxu0 %v3602_v28  ;;  %v3674_v3 = vld [vmem:[%s4549_s1 + $0x228] sm:$0xff]  }
  0x4c   : > { %3262 = vmatprep.subr.bf16.mxu1 %v3569_v10  ;;  %v3629_v10 = vld [vmem:[%s3819_s9 + $0x368] ss:$36 sps:$4 sm:$0xff]  }
  0x4e   : > { %1734 = vmatmul.mubr.bf16.gmra.mrb[20].mxu0 %v3543_v4  ;;  %1863 = vmatmul.mubr.bf16.gmra.mrb[20].mxu1 %v3544_v7  ;;  %v3623_v4 = vld [vmem:[%s3819_s9 + $0x320] ss:$36 sps:$4 sm:$0xff]   ;;  %v3625_v7 = vld [vmem:[%s3819_s9 + $0x36c] ss:$36 sps:$4 sm:$0xff]  }
  0x4f   : > { %1741 = vmatprep.mubr.bf16.mxu0 %v3545_v8  ;;  %1870 = vmatprep.mubr.bf16.mxu1 %v3547_v9  ;;  %v3627_v8 = vld [vmem:[%s3819_s9 + $0x134] ss:$36 sps:$4 sm:$0xff]  }
  0x50   : > { %3263 = vmatpush3.bf16.msra.mxu1 %v3570_v11  ;;  %v3700_v9 = vld [vmem:[%s4549_s1 + $0x238] sm:$0xff]   ;;  %v3630_v11 = vld [vmem:[%s3819_s9 + $0x130] ss:$36 sps:$4 sm:$0xff]  }
  0x51   : > { %3264 = vmatprep.subr.bf16.mxu1 %v3585_v18  ;;  %v3644_v18 = vld [vmem:[%s3819_s9 + $0x3f8] ss:$36 sps:$4 sm:$0xff]  }
  0x54   : > { %3265 = vmatpush3.bf16.msra.mxu1 %v3586_v19  ;;  %v3645_v19 = vld [vmem:[%s3819_s9 + $0x1c0] ss:$36 sps:$4 sm:$0xff]  }
  0x55   : > { %3266 = vmatprep.subr.bf16.mxu1 %v3601_v26  ;;  %v3657_v26 = vld [vmem:[%s3819_s9 + $0x18] ss:$36 sps:$4 sm:$0xff]  }
  0x56   : > { %1742 = vmatmul.mubr.bf16.gmra.mrb[24].mxu0 %v3549_v12  ;;  %1871 = vmatmul.mubr.bf16.gmra.mrb[24].mxu1 %v3550_v13  ;;  %v3634_v12 = vld [vmem:[%s3819_s9 + $0x3b4] ss:$36 sps:$4 sm:$0xff]   ;;  %v3636_v13 = vld [vmem:[%s3819_s9 + $0x17c] ss:$36 sps:$4 sm:$0xff]  }
  0x57   : > { %1749 = vmatprep.mubr.bf16.mxu0 %v3555_v14  ;;  %1878 = vmatprep.mubr.bf16.mxu1 %v3557_v17  ;;  %v3638_v14 = vld [vmem:[%s3819_s9 + $0x3b0] ss:$36 sps:$4 sm:$0xff]   ;;  %v3642_v17 = vld [vmem:[%s3819_s9 + $0x1c4] ss:$36 sps:$4 sm:$0xff]  }
  0x58   : > { %3267 = vmatpush3.bf16.msra.mxu1 %v3603_v29  ;;  %v3664_v29 = vld [vmem:[%s3819_s9 + $0x64] ss:$36 sps:$4 sm:$0xff]  }
  0x59   : > { %3268 = vmatprep.subr.bf16.mxu1 %v3616_v33  ;;  %v3670_v33 = vld [vmem:[%s3819_s9 + $0xac] ss:$36 sps:$4 sm:$0xff]  }
  0x5c   : > { %3269 = vmatpush3.bf16.msra.mxu1 %v3618_v36  ;;  %v3675_v36 = vld [vmem:[%s3819_s9 + $0x32c] ss:$36 sps:$4 sm:$0xff]  }
  0x5d   : > { %3270 = vmatprep.subr.bf16.mxu1 %v3631_v41  ;;  %v3683_v41 = vld [vmem:[%s3819_s9 + $0x13c] ss:$36 sps:$4 sm:$0xff]  }
  0x5e   : > { %1750 = vmatmul.mubr.bf16.gmra.mrb[28].mxu0 %v3559_v20  ;;  %1879 = vmatmul.mubr.bf16.gmra.mrb[28].mxu1 %v3560_v23  ;;  %v3649_v20 = vld [vmem:[%s3819_s9 + $0x444] ss:$36 sps:$4 sm:$0xff]  }
  0x5f   : > { %1757 = vmatprep.mubr.bf16.mxu0 %v3563_v24  ;;  %1886 = vmatprep.mubr.bf16.mxu1 %v3565_v25  ;;  %v3654_v23 = vld [vmem:[%s3819_s9 + $0x208] ss:$36 sps:$4 sm:$0xff]   ;;  %v3655_v24 = vld [vmem:[%s3819_s9 + $0x254] ss:$36 sps:$4 sm:$0xff]   ;;  %v3659_v25 = vld [vmem:[%s3819_s9 + $0x1c] ss:$36 sps:$4 sm:$0xff]  }
  0x60   : > { %3271 = vmatpush3.bf16.msra.mxu1 %v3633_v43  ;;  %v3686_v43 = vld [vmem:[%s3819_s9 + $0x138] ss:$36 sps:$4 sm:$0xff]  }
  0x61   : > { %3272 = vmatprep.subr.bf16.mxu1 %v3646_v47  ;;  %v3693_v47 = vld [vmem:[%s3819_s9 + $0x180] ss:$36 sps:$4 sm:$0xff]  }
  0x64   : > { %3273 = vmatpush3.bf16.msra.mxu1 %v3648_v49  ;;  %v3696_v49 = vld [vmem:[%s3819_s9 + $0x1cc] ss:$36 sps:$4 sm:$0xff]  }
  0x66   : > { %1758 = vmatmul.mubr.bf16.gmra.mrb[32].mxu0 %v3567_v27  ;;  %1887 = vmatmul.mubr.bf16.gmra.mrb[32].mxu1 %v3568_v30  ;;  %v3660_v27 = vld [vmem:[%s3819_s9 + $0x250] ss:$36 sps:$4 sm:$0xff]   ;;  %v3666_v30 = vld [vmem:[%s3819_s9 + $0x298] ss:$36 sps:$4 sm:$0xff]  }
  0x67   : > { %1765 = vmatprep.mubr.bf16.mxu0 %v3571_v31  ;;  %1894 = vmatprep.mubr.bf16.mxu1 %v3573_v32  ;;  %v3667_v31 = vld [vmem:[%s3819_s9 + $0x60] ss:$36 sps:$4 sm:$0xff]  }
  0x68   : > { %v3668_v32 = vld [vmem:[%s3819_s9 + $0x2e4] ss:$36 sps:$4 sm:$0xff]  }
  0x6e   : > { %1766 = vmatmul.mubr.bf16.gmra.mrb[36].mxu0 %v3575_v34  ;;  %1895 = vmatmul.mubr.bf16.gmra.mrb[36].mxu1 %v3576_v35  ;;  %v3672_v34 = vld [vmem:[%s3819_s9 + $0x2e0] ss:$36 sps:$4 sm:$0xff]   ;;  %v3673_v35 = vld [vmem:[%s3819_s9 + $0xa8] ss:$36 sps:$4 sm:$0xff]  }
  0x6f   : > { %1773 = vmatprep.mubr.bf16.mxu0 %v3579_v37  ;;  %1902 = vmatprep.mubr.bf16.mxu1 %v3581_v38  ;;  %v3677_v37 = vld [vmem:[%s3819_s9 + $0xf4] ss:$36 sps:$4 sm:$0xff]   ;;  %v3679_v38 = vld [vmem:[%s3819_s9 + $0x328] ss:$36 sps:$4 sm:$0xff]  }
  0x76   : > { %1774 = vmatmul.mubr.bf16.gmra.mrb[40].mxu0 %v3583_v39  ;;  %1903 = vmatmul.mubr.bf16.gmra.mrb[40].mxu1 %v3584_v40  ;;  %v3680_v39 = vld [vmem:[%s3819_s9 + $0xf0] ss:$36 sps:$4 sm:$0xff]  }
  0x77   : > { %1781 = vmatprep.mubr.bf16.mxu0 %v3589_v42  ;;  %1910 = vmatprep.mubr.bf16.mxu1 %v3591_v44  ;;  %v3681_v40 = vld [vmem:[%s3819_s9 + $0x374] ss:$36 sps:$4 sm:$0xff]   ;;  %v3688_v44 = vld [vmem:[%s3819_s9 + $0x3bc] ss:$36 sps:$4 sm:$0xff]  }
  0x78   : > { %v3685_v42 = vld [vmem:[%s3819_s9 + $0x370] ss:$36 sps:$4 sm:$0xff]  }
  0x7e   : > { %1782 = vmatmul.mubr.bf16.gmra.mrb[44].mxu0 %v3593_v45  ;;  %1911 = vmatmul.mubr.bf16.gmra.mrb[44].mxu1 %v3594_v46  ;;  %v3690_v45 = vld [vmem:[%s3819_s9 + $0x184] ss:$36 sps:$4 sm:$0xff]   ;;  %v3692_v46 = vld [vmem:[%s3819_s9 + $0x3b8] ss:$36 sps:$4 sm:$0xff]  }
  0x7f   : > { %1918 = vmatprep.mubr.bf16.mxu1 %v3595_v48  ;;  %2015 = vmatprep.mubr.bf16.mxu0 %v3599_v50  ;;  %v3694_v48 = vld [vmem:[%s3819_s9 + $0x404] ss:$36 sps:$4 sm:$0xff]  }
  0x80   : > { %v3698_v50 = vld [vmem:[%s3819_s9 + $0x400] ss:$36 sps:$4 sm:$0xff]  }
  0x86   : > { %1919 = vmatmul.mubr.bf16.gmra.mrb[48].mxu1 %v3600_v52  ;;  %2016 = vmatmul.mubr.bf16.vlgmr.msra.gmra.mrb[48].mxu0 %v3597_v51  ;;  %v3699_v51 = vld [vmem:[%s3819_s9 + $0x1c8] ss:$36 sps:$4 sm:$0xff]  }
  0x87   : > { %3395 = vmatpush3.bf16.msra.mxu0 %v3602_v28  ;;  %1926 = vmatprep.mubr.bf16.mxu1 %v3604_v53  ;;  %v3662_v28 = vld [vmem:[%s3819_s9 + $0x29c] ss:$36 sps:$4 sm:$0xff]   ;;  %v3701_v52 = vld [vmem:[%s3819_s9 + $0x44c] ss:$36 sps:$4 sm:$0xff]   ;;  %v3703_v53 = vld [vmem:[%s3819_s9 + $0x214] ss:$36 sps:$4 sm:$0xff]  }
  0x88   : > { %2023 = vmatprep.mubr.bf16.mxu0 %v3606_v54  ;;  %3396 = vmatprep.subr.bf16.mxu0 %v3617_v55 }
  0x8b   : > { %3397 = vmatpush3.bf16.msra.mxu0 %v3617_v55 }
  0x8c   : > { %3398 = vmatprep.subr.bf16.mxu0 %v3632_v56 }
  0x8e   : > { %1927 = vmatmul.mubr.bf16.gmra.mrb[52].mxu1 %v3608_v57  ;;  %2024 = vmatmul.mubr.bf16.gmra.mrb[52].mxu0 %v3609_v58  ;;  %v3705_v58 = vld [vmem:[%s3819_s9 + $0x448] ss:$36 sps:$4 sm:$0xff]  }
  0x8f   : > { %1934 = vmatprep.mubr.bf16.mxu1 %v3610_v59  ;;  %2031 = vmatprep.mubr.bf16.mxu0 %v3612_v60  ;;  %v3706_v59 = vld [vmem:[%s3819_s9 + $0x210] ss:$36 sps:$4 sm:$0xff]  }
  0x90   : > { %3399 = vmatpush3.bf16.msra.mxu0 %v3632_v56 }
  0x91   : > { %3400 = vmatprep.subr.bf16.mxu0 %v3647_v61 }
  0x94   : > { %3401 = vmatpush3.bf16.msra.mxu0 %v3647_v61 }
  0x95   : > { %3402 = vmatprep.subr.bf16.mxu0 %v3661_v62 }
  0x96   : > { %1935 = vmatmul.mubr.bf16.gmra.mrb[56].mxu1 %v3614_v63  ;;  %2032 = vmatmul.mubr.bf16.gmra.mrb[56].mxu0 %v3615_v0  ;;  %v3707_v0 = vld [vmem:[%s3819_s9 + $0x25c] ss:$36 sps:$4 sm:$0xff]  }
  0x97   : > { %1942 = vmatprep.mubr.bf16.mxu1 %v3619_v1  ;;  %2039 = vmatprep.mubr.bf16.mxu0 %v3621_v2  ;;  %v3709_v1 = vld [vmem:[%s3819_s9 + $0x20] ss:$36 sps:$4 sm:$0xff]  }
  0x98   : > { %3403 = vmatpush3.bf16.msra.mxu0 %v3661_v62 }
  0x99   : > { %3404 = vmatprep.subr.bf16.mxu0 %v3674_v3 }
  0x9c   : > { %3405 = vmatpush3.bf16.msra.mxu0 %v3674_v3 }
  0x9d   : > { %3406 = vmatprep.subr.bf16.mxu0 %v3687_v6 }
  0x9e   : > { %1943 = vmatmul.mubr.bf16.gmra.mrb[60].mxu1 %v3623_v4  ;;  %2040 = vmatmul.mubr.bf16.gmra.mrb[60].mxu0 %v3624_v5 }
  0x9f   : > { %1950 = vmatprep.mubr.bf16.mxu1 %v3625_v7  ;;  %2047 = vmatprep.mubr.bf16.mxu0 %v3627_v8 }
  0xa0   : > { %3407 = vmatpush3.bf16.msra.mxu0 %v3687_v6 }
  0xa1   : > { %3408 = vmatprep.subr.bf16.mxu0 %v3700_v9 }
  0xa4   : > { %3409 = vmatpush3.bf16.msra.mxu0 %v3700_v9 }
  0xa6   : > { %1951 = vmatmul.mubr.bf16.gmra.mrb[64].mxu1 %v3629_v10  ;;  %2048 = vmatmul.mubr.bf16.gmra.mrb[64].mxu0 %v3630_v11  ;;  %v3710_v10 = vld [vmem:[%s3819_s9 + $0x258] ss:$36 sps:$4 sm:$0xff]   ;;  %v3711_v11 = vld [vmem:[%s3819_s9 + $0x68] ss:$36 sps:$4 sm:$0xff]  }
  0xa7   : > { %1958 = vmatprep.mubr.bf16.mxu1 %v3634_v12  ;;  %2055 = vmatprep.mubr.bf16.mxu0 %v3636_v13 }
  0xae   : > { %1959 = vmatmul.mubr.bf16.gmra.mrb[68].mxu1 %v3638_v14  ;;  %2056 = vmatmul.mubr.bf16.gmra.mrb[68].mxu0 %v3639_v15 }
  0xaf   : > { %1966 = vmatprep.mubr.bf16.mxu1 %v3640_v16  ;;  %2063 = vmatprep.mubr.bf16.mxu0 %v3642_v17  ;;  %v3712_v16 = vld [vmem:[%s3819_s9 + $0x2a4] ss:$36 sps:$4 sm:$0xff]   ;;  %v3714_v17 = vld [vmem:[%s3819_s9 + $0xb0] ss:$36 sps:$4 sm:$0xff]  }
  0xb6   : > { %1967 = vmatmul.mubr.bf16.gmra.mrb[72].mxu1 %v3644_v18  ;;  %2064 = vmatmul.mubr.bf16.gmra.mrb[72].mxu0 %v3645_v19 }
  0xb7   : > { %1974 = vmatprep.mubr.bf16.mxu1 %v3649_v20  ;;  %2071 = vmatprep.mubr.bf16.mxu0 %v3651_v21 }
  0xbe   : > { %1975 = vmatmul.mubr.bf16.gmra.mrb[76].mxu1 %v3653_v22  ;;  %2072 = vmatmul.mubr.bf16.gmra.mrb[76].mxu0 %v3654_v23 }
  0xbf   : > { %2079 = vmatprep.mubr.bf16.mxu0 %v3655_v24  ;;  %2176 = vmatprep.mubr.bf16.mxu1 %v3659_v25 }
  0xc6   : > { %2080 = vmatmul.mubr.bf16.gmra.mrb[80].mxu0 %v3660_v27  ;;  %2177 = vmatmul.mubr.bf16.vlgmr.msra.gmra.mrb[80].mxu1 %v3657_v26  ;;  %v3715_v26 = vld [vmem:[%s3819_s9 + $0x2a0] ss:$36 sps:$4 sm:$0xff]   ;;  %v3716_v27 = vld [vmem:[%s3819_s9 + $0xf8] ss:$36 sps:$4 sm:$0xff]  }
  0xc7   : > { %2087 = vmatprep.mubr.bf16.mxu0 %v3662_v28  ;;  %2184 = vmatprep.mubr.bf16.mxu1 %v3664_v29 }
  0xce   : > { %2088 = vmatmul.mubr.bf16.gmra.mrb[84].mxu0 %v3666_v30  ;;  %2185 = vmatmul.mubr.bf16.gmra.mrb[84].mxu1 %v3667_v31 }
  0xcf   : > { %2095 = vmatprep.mubr.bf16.mxu0 %v3668_v32  ;;  %2192 = vmatprep.mubr.bf16.mxu1 %v3670_v33  ;;  %v3717_v32 = vld [vmem:[%s3819_s9 + $0x2ec] ss:$36 sps:$4 sm:$0xff]   ;;  %v3719_v33 = vld [vmem:[%s3819_s9 + $0x140] ss:$36 sps:$4 sm:$0xff]  }
  0xd6   : > { %2096 = vmatmul.mubr.bf16.gmra.mrb[88].mxu0 %v3672_v34  ;;  %2193 = vmatmul.mubr.bf16.gmra.mrb[88].mxu1 %v3673_v35 }
  0xd7   : > { %2103 = vmatprep.mubr.bf16.mxu0 %v3675_v36  ;;  %2200 = vmatprep.mubr.bf16.mxu1 %v3677_v37 }
  0xde   : > { %2104 = vmatmul.mubr.bf16.gmra.mrb[92].mxu0 %v3679_v38  ;;  %2201 = vmatmul.mubr.bf16.gmra.mrb[92].mxu1 %v3680_v39 }
  0xdf   : > { %2111 = vmatprep.mubr.bf16.mxu0 %v3681_v40  ;;  %2208 = vmatprep.mubr.bf16.mxu1 %v3683_v41 }
  0xe6   : > { %2112 = vmatmul.mubr.bf16.gmra.mrb[96].mxu0 %v3685_v42  ;;  %2209 = vmatmul.mubr.bf16.gmra.mrb[96].mxu1 %v3686_v43  ;;  %v3720_v42 = vld [vmem:[%s3819_s9 + $0x2e8] ss:$36 sps:$4 sm:$0xff]  }
  0xe7   : > { %2119 = vmatprep.mubr.bf16.mxu0 %v3688_v44  ;;  %2216 = vmatprep.mubr.bf16.mxu1 %v3690_v45  ;;  %v3721_v43 = vld [vmem:[%s3819_s9 + $0x188] ss:$36 sps:$4 sm:$0xff]  }
  0xee   : > { %2120 = vmatmul.mubr.bf16.gmra.mrb[100].mxu0 %v3692_v46  ;;  %2217 = vmatmul.mubr.bf16.gmra.mrb[100].mxu1 %v3693_v47 }
  0xef   : > { %2127 = vmatprep.mubr.bf16.mxu0 %v3694_v48  ;;  %2224 = vmatprep.mubr.bf16.mxu1 %v3696_v49  ;;  %v3722_v48 = vld [vmem:[%s3819_s9 + $0x334] ss:$36 sps:$4 sm:$0xff]  }
  0xf0   : > { %v3724_v49 = vld [vmem:[%s3819_s9 + $0x1d0] ss:$36 sps:$4 sm:$0xff]  }
  0xf6   : > { %2128 = vmatmul.mubr.bf16.gmra.mrb[104].mxu0 %v3698_v50  ;;  %2225 = vmatmul.mubr.bf16.gmra.mrb[104].mxu1 %v3699_v51 }
  0xf7   : > { %2135 = vmatprep.mubr.bf16.mxu0 %v3701_v52  ;;  %2232 = vmatprep.mubr.bf16.mxu1 %v3703_v53 }
  0xf9   : > { %v2938_v54 = vpop.f32.mrb[0].mxu0  ;;  %v3010_v55 = vpop.f32.mrb[0].mxu1 }
  0xfa   : > { %v2939_v56 = vpop.f32.mrb[1].mxu0  ;;  %v3011_v57 = vpop.f32.mrb[1].mxu1 }
  0xfb   : > { %v4122_v60 = vadd.f32 %v2939_v56, %v2938_v54  ;;  %v4124_v61 = vadd.f32 %v3011_v57, %v3010_v55  ;;  %v2941_v62 = vpop.f32.mrb[2].mxu0  ;;  %v3013_v63 = vpop.f32.mrb[2].mxu1 }
  0xfc   : > { %v2942_v2 = vpop.f32.mrb[3].mxu0  ;;  %v3014_v3 = vpop.f32.mrb[3].mxu1 }
  0xfd   : > { %v4128_v4 = vadd.f32 %v2942_v2, %v2941_v62  ;;  %v4130_v5 = vadd.f32 %v3014_v3, %v3013_v63  ;;  %v3727_v2 = vld [vmem:[%s3819_s9 + $0x37c] ss:$36 sps:$4 sm:$0xff]  }
  0xfe   : > { %2136 = vmatmul.mubr.bf16.gmra.mrb[108].mxu0 %v3705_v58  ;;  %2233 = vmatmul.mubr.bf16.gmra.mrb[108].mxu1 %v3706_v59  ;;  %v3725_v58 = vld [vmem:[%s3819_s9 + $0x330] ss:$36 sps:$4 sm:$0xff]   ;;  %v3726_v59 = vld [vmem:[%s3819_s9 + $0x218] ss:$36 sps:$4 sm:$0xff]   ;;  %v3729_v3 = vld [vmem:[%s3819_s9 + $0x260] ss:$36 sps:$4 sm:$0xff]  }
  0xff   : > { %2240 = vmatprep.mubr.bf16.mxu1 %v3707_v0  ;;  %3410 = vmatprep.mubr.bf16.mxu0 %v3709_v1 }
 0x101   : > { %v2944_v6 = vpop.f32.mrb[4].mxu0  ;;  %v3016_v7 = vpop.f32.mrb[4].mxu1 }
 0x102   : > { %v2945_v8 = vpop.f32.mrb[5].mxu0  ;;  %v3017_v9 = vpop.f32.mrb[5].mxu1 }
 0x103   : > { %v4134_v12 = vadd.f32 %v2945_v8, %v2944_v6  ;;  %v4136_v13 = vadd.f32 %v3017_v9, %v3016_v7  ;;  %v2947_v14 = vpop.f32.mrb[6].mxu0  ;;  %v3019_v15 = vpop.f32.mrb[6].mxu1 }
 0x104   : > { %v2948_v18 = vpop.f32.mrb[7].mxu0  ;;  %v3020_v19 = vpop.f32.mrb[7].mxu1 }
 0x105   : > { %v4140_v20 = vadd.f32 %v2948_v18, %v2947_v14  ;;  %v4142_v21 = vadd.f32 %v3020_v19, %v3019_v15  ;;  %v3730_v18 = vld [vmem:[%s3819_s9 + $0x378] ss:$36 sps:$4 sm:$0xff]   ;;  %v3731_v19 = vld [vmem:[%s3819_s9 + $0x2a8] ss:$36 sps:$4 sm:$0xff]  }
 0x106   : > { %2241 = vmatmul.mubr.bf16.gmra.mrb[112].mxu1 %v3710_v10  ;;  %3411 = vmatmul.mubr.bf16.vlgmr.msra.gmra.mrb[112].mxu0 %v3711_v11 }
 0x107   : > { %2248 = vmatprep.mubr.bf16.mxu1 %v3712_v16  ;;  %3414 = vmatprep.mubr.bf16.mxu0 %v3714_v17 }
 0x109   : > { %v2950_v22 = vpop.f32.mrb[8].mxu0  ;;  %v3022_v23 = vpop.f32.mrb[8].mxu1 }
 0x10a   : > { %v2951_v24 = vpop.f32.mrb[9].mxu0  ;;  %v3023_v25 = vpop.f32.mrb[9].mxu1 }
 0x10b   : > { %v4146_v28 = vadd.f32 %v2951_v24, %v2950_v22  ;;  %v4148_v29 = vadd.f32 %v3023_v25, %v3022_v23  ;;  %v2953_v30 = vpop.f32.mrb[10].mxu0  ;;  %v3025_v31 = vpop.f32.mrb[10].mxu1  ;;  %v3732_v25 = vld [vmem:[%s3819_s9 + $0x3c4] ss:$36 sps:$4 sm:$0xff]  }
 0x10c   : > { %v2954_v34 = vpop.f32.mrb[11].mxu0  ;;  %v3026_v35 = vpop.f32.mrb[11].mxu1 }
 0x10d   : > { %v4152_v36 = vadd.f32 %v2954_v34, %v2953_v30  ;;  %v4154_v37 = vadd.f32 %v3026_v35, %v3025_v31 }
 0x10e   : > { %2249 = vmatmul.mubr.bf16.gmra.mrb[116].mxu1 %v3715_v26  ;;  %3415 = vmatmul.mubr.bf16.gmra.mrb[116].mxu0 %v3716_v27  ;;  %v3734_v26 = vld [vmem:[%s3819_s9 + $0x2f0] ss:$36 sps:$4 sm:$0xff]  }
 0x10f   : > { %2256 = vmatprep.mubr.bf16.mxu1 %v3717_v32  ;;  %3418 = vmatprep.mubr.bf16.mxu0 %v3719_v33 }
 0x111   : > { %v2956_v38 = vpop.f32.mrb[12].mxu0  ;;  %v3028_v39 = vpop.f32.mrb[12].mxu1 }
 0x112   : > { %v2957_v40 = vpop.f32.mrb[13].mxu0  ;;  %v3029_v41 = vpop.f32.mrb[13].mxu1 }
 0x113   : > { %v4158_v44 = vadd.f32 %v2957_v40, %v2956_v38  ;;  %v4160_v45 = vadd.f32 %v3029_v41, %v3028_v39  ;;  %v2959_v46 = vpop.f32.mrb[14].mxu0  ;;  %v3031_v47 = vpop.f32.mrb[14].mxu1  ;;  %v3735_v40 = vld [vmem:[%s3819_s9 + $0x3c0] ss:$36 sps:$4 sm:$0xff]   ;;  %v3736_v41 = vld [vmem:[%s3819_s9 + $0x338] ss:$36 sps:$4 sm:$0xff]  }
 0x114   : > { %v2960_v50 = vpop.f32.mrb[15].mxu0  ;;  %v3032_v51 = vpop.f32.mrb[15].mxu1 }
 0x115   : > { %v4164_v52 = vadd.f32 %v2960_v50, %v2959_v46  ;;  %v4166_v53 = vadd.f32 %v3032_v51, %v3031_v47  ;;  %v3737_v47 = vld [vmem:[%s3819_s9 + $0x40c] ss:$36 sps:$4 sm:$0xff]  }
 0x116   : > { %2257 = vmatmul.mubr.bf16.gmra.mrb[120].mxu1 %v3720_v42  ;;  %3419 = vmatmul.mubr.bf16.gmra.mrb[120].mxu0 %v3721_v43 }
 0x117   : > { %2264 = vmatprep.mubr.bf16.mxu1 %v3722_v48  ;;  %3422 = vmatprep.mubr.bf16.mxu0 %v3724_v49  ;;  %v3739_v48 = vld [vmem:[%s3819_s9 + $0x380] ss:$36 sps:$4 sm:$0xff]  }
 0x119   : > { %v2962_v54 = vpop.f32.mrb[16].mxu0  ;;  %v3050_v55 = vpop.f32.mrb[16].mxu1 }
 0x11a   : > { %v2963_v56 = vpop.f32.mrb[17].mxu0  ;;  %v3051_v57 = vpop.f32.mrb[17].mxu1 }
 0x11b   : > { %v4170_v62 = vadd.f32 %v2963_v56, %v2962_v54  ;;  %v3052_v63 = vadd.f32 %v3051_v57, %v3050_v55  ;;  %v2965_v0 = vpop.f32.mrb[18].mxu0  ;;  %v3053_v1 = vpop.f32.mrb[18].mxu1 }
 0x11c   : > { %v2966_v6 = vpop.f32.mrb[19].mxu0  ;;  %v3054_v7 = vpop.f32.mrb[19].mxu1 }
 0x11d   : > { %v4175_v8 = vadd.f32 %v3052_v63, %v4122_v60  ;;  %v4177_v9 = vadd.f32 %v2966_v6, %v2965_v0  ;;  %v3055_v10 = vadd.f32 %v3054_v7, %v3053_v1  ;;  %v3740_v63 = vld [vmem:[%s3819_s9 + $0x408] ss:$36 sps:$4 sm:$0xff]   ;;  %v3742_v6 = vld [vmem:[%s3819_s9 + $0x454] ss:$36 sps:$4 sm:$0xff]  }
 0x11e   : > { %2265 = vmatmul.mubr.bf16.gmra.mrb[124].mxu1 %v3725_v58  ;;  %3423 = vmatmul.mubr.bf16.gmra.mrb[124].mxu0 %v3726_v59  ;;  %v3741_v0 = vld [vmem:[%s3819_s9 + $0x3c8] ss:$36 sps:$4 sm:$0xff]   ;;  %v3744_v7 = vld [vmem:[%s3819_s9 + $0x410] ss:$36 sps:$4 sm:$0xff]  }
 0x11f   : > { %v4180_v11 = vadd.f32 %v3055_v10, %v4128_v4  ;;  %2272 = vmatprep.mubr.bf16.mxu1 %v3727_v2  ;;  %3426 = vmatprep.mubr.bf16.mxu0 %v3729_v3 }
 0x121   : > { %v2968_v14 = vpop.f32.mrb[20].mxu0  ;;  %v3056_v15 = vpop.f32.mrb[20].mxu1 }
 0x122   : > { %v2969_v16 = vpop.f32.mrb[21].mxu0  ;;  %v3057_v17 = vpop.f32.mrb[21].mxu1 }
 0x123   : > { %v4184_v60 = vadd.f32 %v2969_v16, %v2968_v14  ;;  %v3058_v22 = vadd.f32 %v3057_v17, %v3056_v15  ;;  %v2971_v23 = vpop.f32.mrb[22].mxu0  ;;  %v3059_v24 = vpop.f32.mrb[22].mxu1 }
 0x124   : > { %v2972_v27 = vpop.f32.mrb[23].mxu0  ;;  %v3060_v4 = vpop.f32.mrb[23].mxu1 }
 0x125   : > { %v4189_v30 = vadd.f32 %v3058_v22, %v4134_v12  ;;  %v4191_v31 = vadd.f32 %v2972_v27, %v2971_v23  ;;  %v3061_v32 = vadd.f32 %v3060_v4, %v3059_v24  ;;  %v3745_v24 = vld [vmem:[%s3819_s9 + $0x450] ss:$36 sps:$4 sm:$0xff]  }
 0x126   : > { %2273 = vmatmul.mubr.bf16.gmra.mrb[128].mxu1 %v3730_v18  ;;  %3427 = vmatmul.mubr.bf16.gmra.mrb[128].mxu0 %v3731_v19 }
 0x127   : > { %v4194_v33 = vadd.f32 %v3061_v32, %v4140_v20  ;;  %2280 = vmatprep.mubr.bf16.mxu1 %v3732_v25  ;;  %3430 = vmatprep.mubr.bf16.mxu0 %v3734_v26  ;;  %v3746_v25 = vld [vmem:[%s3819_s9 + $0x458] ss:$36 sps:$4 sm:$0xff]   ;;  %s2702_s9 = sshll.u32 %s4553_s16, 3  ;;  %s2703_s16 = sshll.u32 %s4555_s13, 1 }
 0x128   : > { %s4456_s26 = scalar_lea.vmem %s4550_s2, %s2702_s9  ;;  %s187_s29 = scalar_lea.vmem %s4551_s3, %s2703_s16 }
 0x129   : > { %v2974_v34 = vpop.f32.mrb[24].mxu0  ;;  %v3062_v35 = vpop.f32.mrb[24].mxu1 }
 0x12a   : > { %v2975_v38 = vpop.f32.mrb[25].mxu0  ;;  %v3063_v39 = vpop.f32.mrb[25].mxu1 }
 0x12b   : > { %v4198_v12 = vadd.f32 %v2975_v38, %v2974_v34  ;;  %v3064_v42 = vadd.f32 %v3063_v39, %v3062_v35  ;;  %v2977_v43 = vpop.f32.mrb[26].mxu0  ;;  %v3065_v46 = vpop.f32.mrb[26].mxu1 }
 0x12c   : > { %v2978_v49 = vpop.f32.mrb[27].mxu0  ;;  %v3066_v20 = vpop.f32.mrb[27].mxu1 }
 0x12d   : > { %v4203_v50 = vadd.f32 %v3064_v42, %v4146_v28  ;;  %v4205_v51 = vadd.f32 %v2978_v49, %v2977_v43  ;;  %v3067_v54 = vadd.f32 %v3066_v20, %v3065_v46 }
 0x12e   : > { %2281 = vmatmul.mubr.bf16.gmra.mrb[132].mxu1 %v3735_v40  ;;  %3431 = vmatmul.mubr.bf16.gmra.mrb[132].mxu0 %v3736_v41 }
 0x12f   : > { %v4208_v55 = vadd.f32 %v3067_v54, %v4152_v36  ;;  %2288 = vmatprep.mubr.bf16.mxu1 %v3737_v47  ;;  %3434 = vmatprep.mubr.bf16.mxu0 %v3739_v48 }
 0x131   : > { %v2980_v56 = vpop.f32.mrb[28].mxu0  ;;  %v3068_v57 = vpop.f32.mrb[28].mxu1 }
 0x132   : > { %v2981_v58 = vpop.f32.mrb[29].mxu0  ;;  %v3069_v59 = vpop.f32.mrb[29].mxu1 }
 0x133   : > { %v4212_v28 = vadd.f32 %v2981_v58, %v2980_v56  ;;  %v3070_v1 = vadd.f32 %v3069_v59, %v3068_v57  ;;  %v2983_v2 = vpop.f32.mrb[30].mxu0  ;;  %v3071_v3 = vpop.f32.mrb[30].mxu1 }
 0x134   : > { %v2984_v10 = vpop.f32.mrb[31].mxu0  ;;  %v3072_v36 = vpop.f32.mrb[31].mxu1 }
 0x135   : > { %v4217_v14 = vadd.f32 %v3070_v1, %v4158_v44  ;;  %v4219_v15 = vadd.f32 %v2984_v10, %v2983_v2  ;;  %v3073_v16 = vadd.f32 %v3072_v36, %v3071_v3 }
 0x136   : > { %2289 = vmatmul.mubr.bf16.gmra.mrb[136].mxu1 %v3740_v63  ;;  %3435 = vmatmul.mubr.bf16.gmra.mrb[136].mxu0 %v3741_v0 }
 0x137   : > { %v4222_v17 = vadd.f32 %v3073_v16, %v4164_v52  ;;  %2296 = vmatprep.mubr.bf16.mxu1 %v3742_v6  ;;  %3438 = vmatprep.mubr.bf16.mxu0 %v3744_v7 }
 0x139   : > { %v2986_v18 = vpop.f32.mrb[32].mxu0  ;;  %v3074_v19 = vpop.f32.mrb[32].mxu1 }
 0x13a   : > { %v2987_v22 = vpop.f32.mrb[33].mxu0  ;;  %v3075_v23 = vpop.f32.mrb[33].mxu1 }
 0x13b   : > { %v4226_v26 = vadd.f32 %v2987_v22, %v2986_v18  ;;  %v3076_v44 = vadd.f32 %v3075_v23, %v3074_v19  ;;  %v2989_v27 = vpop.f32.mrb[34].mxu0  ;;  %v3077_v4 = vpop.f32.mrb[34].mxu1 }
 0x13c   : > { %v2990_v32 = vpop.f32.mrb[35].mxu0  ;;  %v3078_v34 = vpop.f32.mrb[35].mxu1 }
 0x13d   : > { %v4229_v35 = vadd.f32 %v3076_v44, %v4170_v62  ;;  %v2991_v52 = vadd.f32 %v2990_v32, %v2989_v27  ;;  %v3079_v38 = vadd.f32 %v3078_v34, %v3077_v4 }
 0x13e   : > { %2297 = vmatmul.mubr.bf16.gmra.mrb[140].mxu1 %v3745_v24  ;;  %3439 = vmatmul.mubr.bf16.gmra.mrb[140].mxu0 %v3746_v25 }
 0x13f   : > { %v4232_v39 = vadd.f32 %v3079_v38, %v4177_v9 }
 0x141   : > { %v2992_v40 = vpop.f32.mrb[36].mxu0  ;;  %v3080_v41 = vpop.f32.mrb[36].mxu1 }
 0x142   : > { %v2993_v42 = vpop.f32.mrb[37].mxu0  ;;  %v3081_v43 = vpop.f32.mrb[37].mxu1 }
 0x143   : > { %v4234_v46 = vadd.f32 %v2993_v42, %v2992_v40  ;;  %v3082_v47 = vadd.f32 %v3081_v43, %v3080_v41  ;;  %v2995_v48 = vpop.f32.mrb[38].mxu0  ;;  %v3083_v49 = vpop.f32.mrb[38].mxu1 }
 0x144   : > { %v2996_v20 = vpop.f32.mrb[39].mxu0  ;;  %v3084_v54 = vpop.f32.mrb[39].mxu1 }
 0x145   : > { %v4237_v62 = vadd.f32 %v3082_v47, %v4184_v60  ;;  %v2997_v56 = vadd.f32 %v2996_v20, %v2995_v48  ;;  %v3085_v57 = vadd.f32 %v3084_v54, %v3083_v49 }
 0x147   : > { %v4240_v58 = vadd.f32 %v3085_v57, %v4191_v31 }
 0x149   : > { %v2998_v9 = vpop.f32.mrb[40].mxu0  ;;  %v3086_v59 = vpop.f32.mrb[40].mxu1 }
 0x14a   : > { %v2999_v63 = vpop.f32.mrb[41].mxu0  ;;  %v3087_v0 = vpop.f32.mrb[41].mxu1 }
 0x14b   : > { %v4242_v1 = vadd.f32 %v2999_v63, %v2998_v9  ;;  %v3088_v2 = vadd.f32 %v3087_v0, %v3086_v59  ;;  %v3001_v3 = vpop.f32.mrb[42].mxu0  ;;  %v3089_v6 = vpop.f32.mrb[42].mxu1 }
 0x14c   : > { %v3002_v7 = vpop.f32.mrb[43].mxu0  ;;  %v3090_v10 = vpop.f32.mrb[43].mxu1 }
 0x14d   : > { %v4245_v36 = vadd.f32 %v3088_v2, %v4198_v12  ;;  %v4247_v60 = vadd.f32 %v3002_v7, %v3001_v3  ;;  %v3091_v16 = vadd.f32 %v3090_v10, %v3089_v6 }
 0x14f   : > { %v4250_v31 = vadd.f32 %v3091_v16, %v4205_v51 }
 0x151   : > { %v3004_v18 = vpop.f32.mrb[44].mxu0  ;;  %v3092_v19 = vpop.f32.mrb[44].mxu1 }
 0x152   : > { %v3005_v22 = vpop.f32.mrb[45].mxu0  ;;  %v3093_v23 = vpop.f32.mrb[45].mxu1 }
 0x153   : > { %v4252_v24 = vadd.f32 %v3005_v22, %v3004_v18  ;;  %v3094_v25 = vadd.f32 %v3093_v23, %v3092_v19  ;;  %v3007_v44 = vpop.f32.mrb[46].mxu0  ;;  %v3095_v27 = vpop.f32.mrb[46].mxu1 }
 0x154   : > { %v3008_v4 = vpop.f32.mrb[47].mxu0  ;;  %v3096_v32 = vpop.f32.mrb[47].mxu1 }
 0x155   : > { %v4255_v12 = vadd.f32 %v3094_v25, %v4212_v28  ;;  %v4257_v34 = vadd.f32 %v3008_v4, %v3007_v44  ;;  %v3097_v38 = vadd.f32 %v3096_v32, %v3095_v27 }
 0x157   : > { %v4260_v51 = vadd.f32 %v3097_v38, %v4219_v15 }
 0x159   : > { %v3098_v40 = vpop.f32.mrb[48].mxu1  ;;  %v3162_v41 = vpop.f32.mrb[48].mxu0 }
 0x15a   : > { %v3099_v42 = vpop.f32.mrb[49].mxu1  ;;  %v3163_v43 = vpop.f32.mrb[49].mxu0 }
 0x15b   : > { %v3100_v47 = vadd.f32 %v3099_v42, %v3098_v40  ;;  %v3164_v48 = vadd.f32 %v3163_v43, %v3162_v41  ;;  %v3101_v49 = vpop.f32.mrb[50].mxu1  ;;  %v3165_v20 = vpop.f32.mrb[50].mxu0 }
 0x15c   : > { %v3102_v54 = vpop.f32.mrb[51].mxu1  ;;  %v3166_v57 = vpop.f32.mrb[51].mxu0 }
 0x15d   : > { %v4263_v9 = vadd.f32 %v3100_v47, %v4226_v26  ;;  %v4266_v28 = vadd.f32 %v3164_v48, %v4175_v8  ;;  %v3103_v59 = vadd.f32 %v3102_v54, %v3101_v49  ;;  %v3167_v63 = vadd.f32 %v3166_v57, %v3165_v20 }
 0x15f   : > { %v4268_v15 = vadd.f32 %v3103_v59, %v2991_v52  ;;  %v4271_v0 = vadd.f32 %v3167_v63, %v4180_v11 }
 0x161   : > { %v3104_v2 = vpop.f32.mrb[52].mxu1  ;;  %v3168_v3 = vpop.f32.mrb[52].mxu0 }
 0x162   : > { %v3105_v6 = vpop.f32.mrb[53].mxu1  ;;  %v3169_v7 = vpop.f32.mrb[53].mxu0 }
 0x163   : > { %v3106_v10 = vadd.f32 %v3105_v6, %v3104_v2  ;;  %v3170_v16 = vadd.f32 %v3169_v7, %v3168_v3  ;;  %v3107_v18 = vpop.f32.mrb[54].mxu1  ;;  %v3171_v19 = vpop.f32.mrb[54].mxu0 }
 0x164   : > { %v3108_v26 = vpop.f32.mrb[55].mxu1  ;;  %v3172_v22 = vpop.f32.mrb[55].mxu0 }
 0x165   : > { %v4274_v8 = vadd.f32 %v3106_v10, %v4234_v46  ;;  %v4277_v23 = vadd.f32 %v3170_v16, %v4189_v30  ;;  %v3109_v52 = vadd.f32 %v3108_v26, %v3107_v18  ;;  %v3173_v25 = vadd.f32 %v3172_v22, %v3171_v19 }
 0x167   : > { %v4279_v11 = vadd.f32 %v3109_v52, %v2997_v56  ;;  %v4282_v44 = vadd.f32 %v3173_v25, %v4194_v33 }
 0x169   : > { %v3110_v27 = vpop.f32.mrb[56].mxu1  ;;  %v3174_v4 = vpop.f32.mrb[56].mxu0 }
 0x16a   : > { %v3111_v32 = vpop.f32.mrb[57].mxu1  ;;  %v3175_v38 = vpop.f32.mrb[57].mxu0 }
 0x16b   : > { %v3112_v40 = vadd.f32 %v3111_v32, %v3110_v27  ;;  %v3176_v41 = vadd.f32 %v3175_v38, %v3174_v4  ;;  %v3113_v42 = vpop.f32.mrb[58].mxu1  ;;  %v3177_v43 = vpop.f32.mrb[58].mxu0 }
 0x16c   : > { %v3114_v46 = vpop.f32.mrb[59].mxu1  ;;  %v3178_v47 = vpop.f32.mrb[59].mxu0 }
 0x16d   : > { %v4285_v30 = vadd.f32 %v3112_v40, %v4242_v1  ;;  %v4288_v48 = vadd.f32 %v3176_v41, %v4203_v50  ;;  %v3115_v56 = vadd.f32 %v3114_v46, %v3113_v42  ;;  %v3179_v49 = vadd.f32 %v3178_v47, %v3177_v43 }
 0x16f   : > { %v4291_v33 = vadd.f32 %v3115_v56, %v4247_v60  ;;  %v4294_v20 = vadd.f32 %v3179_v49, %v4208_v55 }
 0x171   : > { %v3116_v54 = vpop.f32.mrb[60].mxu1  ;;  %v3180_v57 = vpop.f32.mrb[60].mxu0 }
 0x172   : > { %v3117_v59 = vpop.f32.mrb[61].mxu1  ;;  %v3181_v63 = vpop.f32.mrb[61].mxu0 }
 0x173   : > { %v3118_v2 = vadd.f32 %v3117_v59, %v3116_v54  ;;  %v3182_v3 = vadd.f32 %v3181_v63, %v3180_v57  ;;  %v3119_v6 = vpop.f32.mrb[62].mxu1  ;;  %v3183_v1 = vpop.f32.mrb[62].mxu0 }
 0x174   : > { %v3120_v7 = vpop.f32.mrb[63].mxu1  ;;  %v3184_v10 = vpop.f32.mrb[63].mxu0 }
 0x175   : > { %v4297_v50 = vadd.f32 %v3118_v2, %v4252_v24  ;;  %v4300_v16 = vadd.f32 %v3182_v3, %v4217_v14  ;;  %v3121_v60 = vadd.f32 %v3120_v7, %v3119_v6  ;;  %v3185_v18 = vadd.f32 %v3184_v10, %v3183_v1 }
 0x177   : > { %v4303_v55 = vadd.f32 %v3121_v60, %v4257_v34  ;;  %v4306_v19 = vadd.f32 %v3185_v18, %v4222_v17 }
 0x179   : > { %v3122_v26 = vpop.f32.mrb[64].mxu1  ;;  %v3186_v22 = vpop.f32.mrb[64].mxu0 }
 0x17a   : > { %v3123_v52 = vpop.f32.mrb[65].mxu1  ;;  %v3187_v25 = vpop.f32.mrb[65].mxu0 }
 0x17b   : > { %v3124_v27 = vadd.f32 %v3123_v52, %v3122_v26  ;;  %v3188_v4 = vadd.f32 %v3187_v25, %v3186_v22  ;;  %v3125_v32 = vpop.f32.mrb[66].mxu1  ;;  %v3189_v24 = vpop.f32.mrb[66].mxu0 }
 0x17c   : > { %v3126_v38 = vpop.f32.mrb[67].mxu1  ;;  %v3190_v40 = vpop.f32.mrb[67].mxu0 }
 0x17d   : > { %v4309_v14 = vadd.f32 %v3124_v27, %v4124_v61  ;;  %v4312_v41 = vadd.f32 %v3188_v4, %v4229_v35  ;;  %v3127_v34 = vadd.f32 %v3126_v38, %v3125_v32  ;;  %v3191_v42 = vadd.f32 %v3190_v40, %v3189_v24 }
 0x17f   : > { %v4315_v17 = vadd.f32 %v3127_v34, %v4130_v5  ;;  %v4318_v43 = vadd.f32 %v3191_v42, %v4232_v39 }
 0x181   : > { %v3128_v46 = vpop.f32.mrb[68].mxu1  ;;  %v3192_v47 = vpop.f32.mrb[68].mxu0 }
 0x182   : > { %v3129_v56 = vpop.f32.mrb[69].mxu1  ;;  %v3193_v49 = vpop.f32.mrb[69].mxu0 }
 0x183   : > { %v3130_v54 = vadd.f32 %v3129_v56, %v3128_v46  ;;  %v3194_v57 = vadd.f32 %v3193_v49, %v3192_v47  ;;  %v3131_v59 = vpop.f32.mrb[70].mxu1  ;;  %v3195_v61 = vpop.f32.mrb[70].mxu0 }
 0x184   : > { %v3132_v63 = vpop.f32.mrb[71].mxu1  ;;  %v3196_v2 = vpop.f32.mrb[71].mxu0 }
 0x185   : > { %v4321_v35 = vadd.f32 %v3130_v54, %v4136_v13  ;;  %v4324_v3 = vadd.f32 %v3194_v57, %v4237_v62  ;;  %v3133_v5 = vadd.f32 %v3132_v63, %v3131_v59  ;;  %v3197_v6 = vadd.f32 %v3196_v2, %v3195_v61 }
 0x187   : > { %v4327_v39 = vadd.f32 %v3133_v5, %v4142_v21  ;;  %v4330_v1 = vadd.f32 %v3197_v6, %v4240_v58 }
 0x189   : > { %v3134_v7 = vpop.f32.mrb[72].mxu1  ;;  %v3198_v10 = vpop.f32.mrb[72].mxu0 }
 0x18a   : > { %v3135_v60 = vpop.f32.mrb[73].mxu1  ;;  %v3199_v18 = vpop.f32.mrb[73].mxu0 }
 0x18b   : > { %v3136_v26 = vadd.f32 %v3135_v60, %v3134_v7  ;;  %v3200_v22 = vadd.f32 %v3199_v18, %v3198_v10  ;;  %v3137_v52 = vpop.f32.mrb[74].mxu1  ;;  %v3201_v13 = vpop.f32.mrb[74].mxu0 }
 0x18c   : > { %v3138_v25 = vpop.f32.mrb[75].mxu1  ;;  %v3202_v27 = vpop.f32.mrb[75].mxu0 }
 0x18d   : > { %v4333_v62 = vadd.f32 %v3136_v26, %v4148_v29  ;;  %v4336_v4 = vadd.f32 %v3200_v22, %v4245_v36  ;;  %v3139_v21 = vadd.f32 %v3138_v25, %v3137_v52  ;;  %v3203_v32 = vadd.f32 %v3202_v27, %v3201_v13 }
 0x18f   : > { %v4339_v58 = vadd.f32 %v3139_v21, %v4154_v37  ;;  %v4342_v24 = vadd.f32 %v3203_v32, %v4250_v31 }
 0x191   : > { %v3140_v38 = vpop.f32.mrb[76].mxu1  ;;  %v3204_v40 = vpop.f32.mrb[76].mxu0 }
 0x192   : > { %v3141_v34 = vpop.f32.mrb[77].mxu1  ;;  %v3205_v42 = vpop.f32.mrb[77].mxu0 }
 0x193   : > { %v3142_v46 = vadd.f32 %v3141_v34, %v3140_v38  ;;  %v3206_v47 = vadd.f32 %v3205_v42, %v3204_v40  ;;  %v3143_v56 = vpop.f32.mrb[78].mxu1  ;;  %v3207_v29 = vpop.f32.mrb[78].mxu0 }
 0x194   : > { %v3144_v49 = vpop.f32.mrb[79].mxu1  ;;  %v3208_v54 = vpop.f32.mrb[79].mxu0 }
 0x195   : > { %v4345_v36 = vadd.f32 %v3142_v46, %v4160_v45  ;;  %v4348_v57 = vadd.f32 %v3206_v47, %v4255_v12  ;;  %v3145_v37 = vadd.f32 %v3144_v49, %v3143_v56  ;;  %v3209_v59 = vadd.f32 %v3208_v54, %v3207_v29 }
 0x197   : > { %v4351_v31 = vadd.f32 %v3145_v37, %v4166_v53  ;;  %v4354_v61 = vadd.f32 %v3209_v59, %v4260_v51 }
 0x199   : > { %v3210_v63 = vpop.f32.mrb[80].mxu0  ;;  %v3274_v2 = vpop.f32.mrb[80].mxu1 }
 0x19a   : > { %v3211_v5 = vpop.f32.mrb[81].mxu0  ;;  %v3275_v6 = vpop.f32.mrb[81].mxu1 }
 0x19b   : > { %v3212_v7 = vadd.f32 %v3211_v5, %v3210_v63  ;;  %v3276_v10 = vadd.f32 %v3275_v6, %v3274_v2  ;;  %v3213_v60 = vpop.f32.mrb[82].mxu0  ;;  %v3277_v45 = vpop.f32.mrb[82].mxu1 }
 0x19c   : > { %v3214_v18 = vpop.f32.mrb[83].mxu0  ;;  %v3278_v26 = vpop.f32.mrb[83].mxu1 }
 0x19d   : > { %v4357_v12 = vadd.f32 %v3212_v7, %v4263_v9  ;;  %v3215_v22 = vadd.f32 %v3214_v18, %v3213_v60  ;;  %v3279_v52 = vadd.f32 %v3278_v26, %v3277_v45  ;;  %v4360_v53 = vadd.f32 %v3276_v10, %v4266_v28 }
 0x19f   : > { %v4363_v51 = vadd.f32 %v3215_v22, %v4268_v15  ;;  %v4366_v13 = vadd.f32 %v3279_v52, %v4271_v0 }
 0x1a1   : > { %v3216_v25 = vpop.f32.mrb[84].mxu0  ;;  %v3280_v27 = vpop.f32.mrb[84].mxu1 }
 0x1a2   : > { %v3217_v21 = vpop.f32.mrb[85].mxu0  ;;  %v3281_v32 = vpop.f32.mrb[85].mxu1 }
 0x1a3   : > { %v3218_v38 = vadd.f32 %v3217_v21, %v3216_v25  ;;  %v3282_v40 = vadd.f32 %v3281_v32, %v3280_v27  ;;  %v3219_v34 = vpop.f32.mrb[86].mxu0  ;;  %v3283_v9 = vpop.f32.mrb[86].mxu1 }
 0x1a4   : > { %v3220_v42 = vpop.f32.mrb[87].mxu0  ;;  %v3284_v46 = vpop.f32.mrb[87].mxu1 }
 0x1a5   : > { %v4369_v47 = vadd.f32 %v3218_v38, %v4274_v8  ;;  %v3221_v28 = vadd.f32 %v3220_v42, %v3219_v34  ;;  %v3285_v56 = vadd.f32 %v3284_v46, %v3283_v9  ;;  %v4372_v15 = vadd.f32 %v3282_v40, %v4277_v23 }
 0x1a7   : > { %v4375_v0 = vadd.f32 %v3221_v28, %v4279_v11  ;;  %v4378_v29 = vadd.f32 %v3285_v56, %v4282_v44 }
 0x1a9   : > { %v3222_v49 = vpop.f32.mrb[88].mxu0  ;;  %v3286_v54 = vpop.f32.mrb[88].mxu1 }
 0x1aa   : > { %v3223_v37 = vpop.f32.mrb[89].mxu0  ;;  %v3287_v59 = vpop.f32.mrb[89].mxu1 }
 0x1ab   : > { %v3224_v63 = vadd.f32 %v3223_v37, %v3222_v49  ;;  %v3288_v2 = vadd.f32 %v3287_v59, %v3286_v54  ;;  %v3225_v5 = vpop.f32.mrb[90].mxu0  ;;  %v3289_v8 = vpop.f32.mrb[90].mxu1 }
 0x1ac   : > { %v3226_v6 = vpop.f32.mrb[91].mxu0  ;;  %v3290_v7 = vpop.f32.mrb[91].mxu1 }
 0x1ad   : > { %v4381_v10 = vadd.f32 %v3224_v63, %v4285_v30  ;;  %v3227_v23 = vadd.f32 %v3226_v6, %v3225_v5  ;;  %v3291_v60 = vadd.f32 %v3290_v7, %v3289_v8  ;;  %v4384_v11 = vadd.f32 %v3288_v2, %v4288_v48 }
 0x1af   : > { %v4387_v44 = vadd.f32 %v3227_v23, %v4291_v33  ;;  %v4390_v45 = vadd.f32 %v3291_v60, %v4294_v20 }
 0x1b1   : > { %v3228_v18 = vpop.f32.mrb[92].mxu0  ;;  %v3292_v26 = vpop.f32.mrb[92].mxu1 }
 0x1b2   : > { %v3229_v22 = vpop.f32.mrb[93].mxu0  ;;  %v3293_v52 = vpop.f32.mrb[93].mxu1 }
 0x1b3   : > { %v3230_v25 = vadd.f32 %v3229_v22, %v3228_v18  ;;  %v3294_v27 = vadd.f32 %v3293_v52, %v3292_v26  ;;  %v3231_v21 = vpop.f32.mrb[94].mxu0  ;;  %v3295_v30 = vpop.f32.mrb[94].mxu1 }
 0x1b4   : > { %v3232_v32 = vpop.f32.mrb[95].mxu0  ;;  %v3296_v38 = vpop.f32.mrb[95].mxu1 }
 0x1b5   : > { %v4393_v40 = vadd.f32 %v3230_v25, %v4297_v50  ;;  %v3233_v48 = vadd.f32 %v3232_v32, %v3231_v21  ;;  %v3297_v34 = vadd.f32 %v3296_v38, %v3295_v30  ;;  %v4396_v33 = vadd.f32 %v3294_v27, %v4300_v16 }
 0x1b7   : > { %v4399_v20 = vadd.f32 %v3233_v48, %v4303_v55  ;;  %v4402_v9 = vadd.f32 %v3297_v34, %v4306_v19 }
 0x1b9   : > { %v3234_v42 = vpop.f32.mrb[96].mxu0  ;;  %v3298_v46 = vpop.f32.mrb[96].mxu1 }
 0x1ba   : > { %v3235_v28 = vpop.f32.mrb[97].mxu0  ;;  %v3299_v56 = vpop.f32.mrb[97].mxu1 }
 0x1bb   : > { %v3236_v49 = vadd.f32 %v3235_v28, %v3234_v42  ;;  %v3300_v54 = vadd.f32 %v3299_v56, %v3298_v46  ;;  %v3237_v37 = vpop.f32.mrb[98].mxu0  ;;  %v3301_v50 = vpop.f32.mrb[98].mxu1 }
 0x1bc   : > { %v3238_v59 = vpop.f32.mrb[99].mxu0  ;;  %v3302_v63 = vpop.f32.mrb[99].mxu1 }
 0x1bd   : > { %v4405_v2 = vadd.f32 %v3236_v49, %v4309_v14  ;;  %v3239_v16 = vadd.f32 %v3238_v59, %v3237_v37  ;;  %v3303_v5 = vadd.f32 %v3302_v63, %v3301_v50  ;;  %v4408_v55 = vadd.f32 %v3300_v54, %v4312_v41 }
 0x1bf   : > { %v4411_v19 = vadd.f32 %v3239_v16, %v4315_v17  ;;  %v4414_v8 = vadd.f32 %v3303_v5, %v4318_v43 }
 0x1c1   : > { %v3240_v6 = vpop.f32.mrb[100].mxu0  ;;  %v3304_v7 = vpop.f32.mrb[100].mxu1 }
 0x1c2   : > { %v3241_v23 = vpop.f32.mrb[101].mxu0  ;;  %v3305_v60 = vpop.f32.mrb[101].mxu1 }
 0x1c3   : > { %v3242_v18 = vadd.f32 %v3241_v23, %v3240_v6  ;;  %v3306_v26 = vadd.f32 %v3305_v60, %v3304_v7  ;;  %v3243_v22 = vpop.f32.mrb[102].mxu0  ;;  %v3307_v14 = vpop.f32.mrb[102].mxu1 }
 0x1c4   : > { %v3244_v52 = vpop.f32.mrb[103].mxu0  ;;  %v3308_v25 = vpop.f32.mrb[103].mxu1 }
 0x1c5   : > { %v4417_v27 = vadd.f32 %v3242_v18, %v4321_v35  ;;  %v3245_v41 = vadd.f32 %v3244_v52, %v3243_v22  ;;  %v3309_v21 = vadd.f32 %v3308_v25, %v3307_v14  ;;  %v4420_v17 = vadd.f32 %v3306_v26, %v4324_v3 }
 0x1c7   : > { %v4423_v43 = vadd.f32 %v3245_v41, %v4327_v39  ;;  %v4426_v30 = vadd.f32 %v3309_v21, %v4330_v1 }
 0x1c9   : > { %v3246_v32 = vpop.f32.mrb[104].mxu0  ;;  %v3310_v38 = vpop.f32.mrb[104].mxu1 }
 0x1ca   : > { %v3247_v48 = vpop.f32.mrb[105].mxu0  ;;  %v3311_v34 = vpop.f32.mrb[105].mxu1 }
 0x1cb   : > { %v3248_v42 = vadd.f32 %v3247_v48, %v3246_v32  ;;  %v3312_v46 = vadd.f32 %v3311_v34, %v3310_v38  ;;  %v3249_v28 = vpop.f32.mrb[106].mxu0  ;;  %v3313_v35 = vpop.f32.mrb[106].mxu1 }
 0x1cc   : > { %v3250_v56 = vpop.f32.mrb[107].mxu0  ;;  %v3314_v49 = vpop.f32.mrb[107].mxu1 }
 0x1cd   : > { %v4429_v54 = vadd.f32 %v3248_v42, %v4333_v62  ;;  %v3251_v3 = vadd.f32 %v3250_v56, %v3249_v28  ;;  %v3315_v37 = vadd.f32 %v3314_v49, %v3313_v35  ;;  %v4432_v39 = vadd.f32 %v3312_v46, %v4336_v4 }
 0x1cf   : > { %v4435_v1 = vadd.f32 %v3251_v3, %v4339_v58  ;;  %v4438_v50 = vadd.f32 %v3315_v37, %v4342_v24 }
 0x1d1   : > { %v3252_v59 = vpop.f32.mrb[108].mxu0  ;;  %v3316_v63 = vpop.f32.mrb[108].mxu1 }
 0x1d2   : > { %v3253_v16 = vpop.f32.mrb[109].mxu0  ;;  %v3317_v5 = vpop.f32.mrb[109].mxu1 }
 0x1d3   : > { %v3254_v6 = vadd.f32 %v3253_v16, %v3252_v59  ;;  %v3318_v7 = vadd.f32 %v3317_v5, %v3316_v63  ;;  %v3255_v62 = vpop.f32.mrb[110].mxu0  ;;  %v3319_v23 = vpop.f32.mrb[110].mxu1 }
 0x1d4   : > { %v3256_v60 = vpop.f32.mrb[111].mxu0  ;;  %v3320_v18 = vpop.f32.mrb[111].mxu1 }
 0x1d5   : > { %v4441_v4 = vadd.f32 %v3254_v6, %v4345_v36  ;;  %v3257_v26 = vadd.f32 %v3256_v60, %v3255_v62  ;;  %v3321_v58 = vadd.f32 %v3320_v18, %v3319_v23  ;;  %v4444_v22 = vadd.f32 %v3318_v7, %v4348_v57 }
 0x1d7   : > { %v4448_v24 = vadd.f32 %v3257_v26, %v4351_v31  ;;  %v4451_v14 = vadd.f32 %v3321_v58, %v4354_v61 }
 0x1d9   : > { %v3322_v52 = vpop.f32.mrb[112].mxu1  ;;  %v3412_v36 = vpop.f32.mrb[112].mxu0 }
 0x1da   : > { %v2348_v57 = vadd.f32 %v3412_v36, %v4372_v15  ;;  %v3323_v25 = vpop.f32.mrb[113].mxu1  ;;  %v2339_v41 = vpop.f32.mrb[113].mxu0 }
 0x1db   : > { %v3324_v31 = vadd.f32 %v3323_v25, %v3322_v52  ;;  %v2340_v21 = vadd.f32 %v2339_v41, %v4360_v53  ;;  %v3325_v61 = vpop.f32.mrb[114].mxu1  ;;  %v3413_v32 = vpop.f32.mrb[114].mxu0 }
 0x1dc   : > { %2468 = vst [vmem:[%s4456_s26 + $0x10] sm:$0xff] %v2348_v57  ;;  %v2351_v38 = vadd.f32 %v3413_v32, %v4378_v29  ;;  %v3326_v48 = vpop.f32.mrb[115].mxu1  ;;  %v2342_v34 = vpop.f32.mrb[115].mxu0  ;;  %v2537_v49 = vmul.f32 %v2348_v57, %v2348_v57 }
 0x1dd   : > { %2466 = vst [vmem:[%s4456_s26] sm:$0xff] %v2340_v21  ;;  %v3327_v42 = vadd.f32 %v3326_v48, %v3325_v61  ;;  %v2343_v46 = vadd.f32 %v2342_v34, %v4366_v13  ;;  %v4465_v28 = vadd.f32 %v3324_v31, %v4357_v12  ;;  %v2535_v15 = vmul.f32 %v2340_v21, %v2340_v21 }
 0x1de   : > { %2469 = vst [vmem:[%s4456_s26 + $0x18] sm:$0xff] %v2351_v38  ;;  %v2538_v63 = vmul.f32 %v2351_v38, %v2351_v38 }
 0x1df   : > { %2467 = vst [vmem:[%s4456_s26 + $0x8] sm:$0xff] %v2343_v46  ;;  %v2498_v35 = vadd.f32 %v2343_v46, %v2340_v21  ;;  %v2536_v56 = vmul.f32 %v2343_v46, %v2343_v46  ;;  %v4470_v53 = vadd.f32 %v3327_v42, %v4363_v51 }
 0x1e1   : > { %v2499_v29 = vadd.f32 %v2498_v35, %v2348_v57  ;;  %v2567_v3 = vadd.f32 %v2536_v56, %v2535_v15  ;;  %v3328_v37 = vpop.f32.mrb[116].mxu1  ;;  %v3416_v59 = vpop.f32.mrb[116].mxu0 }
 0x1e2   : > { %v2364_v13 = vadd.f32 %v3416_v59, %v4396_v33  ;;  %v3329_v12 = vpop.f32.mrb[117].mxu1  ;;  %v2355_v16 = vpop.f32.mrb[117].mxu0 }
 0x1e3   : > { %v2568_v5 = vadd.f32 %v2567_v3, %v2537_v49  ;;  %v3330_v6 = vadd.f32 %v3329_v12, %v3328_v37  ;;  %v2356_v7 = vadd.f32 %v2355_v16, %v4384_v11  ;;  %v2500_v62 = vadd.f32 %v2499_v29, %v2351_v38  ;;  %v3331_v51 = vpop.f32.mrb[118].mxu1  ;;  %v3417_v23 = vpop.f32.mrb[118].mxu0 }
 0x1e4   : > { %2472 = vst [vmem:[%s4456_s26 + $0x30] sm:$0xff] %v2364_v13  ;;  %v2367_v60 = vadd.f32 %v3417_v23, %v4402_v9  ;;  %v3332_v18 = vpop.f32.mrb[119].mxu1  ;;  %v2358_v26 = vpop.f32.mrb[119].mxu0  ;;  %v2541_v32 = vmul.f32 %v2364_v13, %v2364_v13 }
 0x1e5   : > { %2470 = vst [vmem:[%s4456_s26 + $0x20] sm:$0xff] %v2356_v7  ;;  %v2501_v58 = vadd.f32 %v2500_v62, %v2356_v7  ;;  %v2539_v52 = vmul.f32 %v2356_v7, %v2356_v7  ;;  %v2569_v33 = vadd.f32 %v2568_v5, %v2538_v63  ;;  %v3333_v36 = vadd.f32 %v3332_v18, %v3331_v51 }
 0x1e6   : > { %2473 = vst [vmem:[%s4456_s26 + $0x38] sm:$0xff] %v2367_v60  ;;  %v2359_v57 = vadd.f32 %v2358_v26, %v4390_v45  ;;  %v4480_v25 = vadd.f32 %v3330_v6, %v4369_v47  ;;  %v2542_v35 = vmul.f32 %v2367_v60, %v2367_v60 }
 0x1e7   : > { %v2570_v11 = vadd.f32 %v2569_v33, %v2539_v52  ;;  %v4483_v41 = vadd.f32 %v3333_v36, %v4375_v0 }
 0x1e8   : > { %2471 = vst [vmem:[%s4456_s26 + $0x28] sm:$0xff] %v2359_v57  ;;  %v2502_v31 = vadd.f32 %v2501_v58, %v2359_v57  ;;  %v2540_v9 = vmul.f32 %v2359_v57, %v2359_v57 }
 0x1e9   : > { %v3334_v21 = vpop.f32.mrb[120].mxu1  ;;  %v3420_v61 = vpop.f32.mrb[120].mxu0 }
 0x1ea   : > { %v2503_v38 = vadd.f32 %v2502_v31, %v2364_v13  ;;  %v2571_v48 = vadd.f32 %v2570_v11, %v2540_v9  ;;  %v2380_v34 = vadd.f32 %v3420_v61, %v4420_v17  ;;  %v3335_v45 = vpop.f32.mrb[121].mxu1  ;;  %v2371_v42 = vpop.f32.mrb[121].mxu0 }
 0x1eb   : > { %v3336_v47 = vadd.f32 %v3335_v45, %v3334_v21  ;;  %v2372_v46 = vadd.f32 %v2371_v42, %v4408_v55  ;;  %v3337_v15 = vpop.f32.mrb[122].mxu1  ;;  %v3421_v0 = vpop.f32.mrb[122].mxu0 }
 0x1ec   : > { %v2572_v56 = vadd.f32 %v2571_v48, %v2541_v32  ;;  %2476 = vst [vmem:[%s4456_s26 + $0x50] sm:$0xff] %v2380_v34  ;;  %v2504_v49 = vadd.f32 %v2503_v38, %v2367_v60  ;;  %v2383_v29 = vadd.f32 %v3421_v0, %v4426_v30  ;;  %v3338_v3 = vpop.f32.mrb[123].mxu1  ;;  %v2374_v37 = vpop.f32.mrb[123].mxu0  ;;  %v2545_v51 = vmul.f32 %v2380_v34, %v2380_v34 }
 0x1ed   : > { %2474 = vst [vmem:[%s4456_s26 + $0x40] sm:$0xff] %v2372_v46  ;;  %v2543_v59 = vmul.f32 %v2372_v46, %v2372_v46  ;;  %v3339_v17 = vadd.f32 %v3338_v3, %v3337_v15  ;;  %v2375_v63 = vadd.f32 %v2374_v37, %v4414_v8  ;;  %v4493_v13 = vadd.f32 %v3336_v47, %v4381_v10 }
 0x1ee   : > { %v2505_v55 = vadd.f32 %v2504_v49, %v2372_v46  ;;  %v2573_v12 = vadd.f32 %v2572_v56, %v2542_v35  ;;  %2477 = vst [vmem:[%s4456_s26 + $0x58] sm:$0xff] %v2383_v29  ;;  %v2546_v33 = vmul.f32 %v2383_v29, %v2383_v29 }
 0x1ef   : > { %2475 = vst [vmem:[%s4456_s26 + $0x48] sm:$0xff] %v2375_v63  ;;  %v2544_v16 = vmul.f32 %v2375_v63, %v2375_v63  ;;  %v4498_v5 = vadd.f32 %v3339_v17, %v4387_v44 }
 0x1f0   : > { %v2574_v6 = vadd.f32 %v2573_v12, %v2543_v59  ;;  %v2506_v30 = vadd.f32 %v2505_v55, %v2375_v63 }
 0x1f1   : > { %v3340_v7 = vpop.f32.mrb[124].mxu1  ;;  %v3424_v62 = vpop.f32.mrb[124].mxu0 }
 0x1f2   : > { %v2507_v23 = vadd.f32 %v2506_v30, %v2380_v34  ;;  %v2575_v8 = vadd.f32 %v2574_v6, %v2544_v16  ;;  %v2396_v10 = vadd.f32 %v3424_v62, %v4444_v22  ;;  %v3341_v60 = vpop.f32.mrb[125].mxu1  ;;  %v2387_v18 = vpop.f32.mrb[125].mxu0 }
 0x1f3   : > { %v3342_v26 = vadd.f32 %v3341_v60, %v3340_v7  ;;  %v2388_v58 = vadd.f32 %v2387_v18, %v4432_v39  ;;  %v3343_v52 = vpop.f32.mrb[126].mxu1  ;;  %v3425_v44 = vpop.f32.mrb[126].mxu0 }
 0x1f4   : > { %v2576_v36 = vadd.f32 %v2575_v8, %v2545_v51  ;;  %2480 = vst [vmem:[%s4456_s26 + $0x70] sm:$0xff] %v2396_v10  ;;  %v2508_v57 = vadd.f32 %v2507_v23, %v2383_v29  ;;  %v2399_v11 = vadd.f32 %v3425_v44, %v4451_v14  ;;  %v3344_v31 = vpop.f32.mrb[127].mxu1  ;;  %v2390_v9 = vpop.f32.mrb[127].mxu0  ;;  %v2549_v46 = vmul.f32 %v2396_v10, %v2396_v10 }
 0x1f5   : > { %2478 = vst [vmem:[%s4456_s26 + $0x60] sm:$0xff] %v2388_v58  ;;  %v2547_v21 = vmul.f32 %v2388_v58, %v2388_v58  ;;  %v3345_v22 = vadd.f32 %v3344_v31, %v3343_v52  ;;  %v2391_v61 = vadd.f32 %v2390_v9, %v4438_v50  ;;  %v2267_v32 = vadd.f32 %v3342_v26, %v4393_v40 }
 0x1f6   : > { %v2509_v39 = vadd.f32 %v2508_v57, %v2388_v58  ;;  %v2577_v38 = vadd.f32 %v2576_v36, %v2546_v33  ;;  %2481 = vst [vmem:[%s4456_s26 + $0x78] sm:$0xff] %v2399_v11 }
 0x1f7   : > { %2479 = vst [vmem:[%s4456_s26 + $0x68] sm:$0xff] %v2391_v61  ;;  %v2548_v48 = vmul.f32 %v2391_v61, %v2391_v61  ;;  %v2270_v34 = vadd.f32 %v3345_v22, %v4399_v20  ;;  %v2550_v20 = vmul.f32 %v2399_v11, %v2399_v11 }
 0x1f8   : > { %v2578_v45 = vadd.f32 %v2577_v38, %v2547_v21  ;;  %v2510_v42 = vadd.f32 %v2509_v39, %v2391_v61 }
 0x1f9   : > { %v3346_v14 = vpop.f32.mrb[128].mxu1  ;;  %v3428_v47 = vpop.f32.mrb[128].mxu0 }
 0x1fa   : > { %v2511_v15 = vadd.f32 %v2510_v42, %v2396_v10  ;;  %v2579_v0 = vadd.f32 %v2578_v45, %v2548_v48  ;;  %v2412_v50 = vadd.f32 %v3428_v47, %v4480_v25  ;;  %v3347_v35 = vpop.f32.mrb[129].mxu1  ;;  %v2403_v40 = vpop.f32.mrb[129].mxu0 }
 0x1fb   : > { %v3348_v56 = vadd.f32 %v3347_v35, %v3346_v14  ;;  %v2404_v49 = vadd.f32 %v2403_v40, %v4465_v28  ;;  %v3349_v29 = vpop.f32.mrb[130].mxu1  ;;  %v3429_v3 = vpop.f32.mrb[130].mxu0 }
 0x1fc   : > { %v2580_v37 = vadd.f32 %v2579_v0, %v2549_v46  ;;  %2484 = vst [vmem:[%s4456_s26 + $0x90] sm:$0xff] %v2412_v50  ;;  %v2512_v59 = vadd.f32 %v2511_v15, %v2399_v11  ;;  %v2415_v17 = vadd.f32 %v3429_v3, %v4483_v41  ;;  %v3350_v63 = vpop.f32.mrb[131].mxu1  ;;  %v2406_v55 = vpop.f32.mrb[131].mxu0  ;;  %v2553_v10 = vmul.f32 %v2412_v50, %v2412_v50 }
 0x1fd   : > { %2482 = vst [vmem:[%s4456_s26 + $0x80] sm:$0xff] %v2404_v49  ;;  %v2551_v12 = vmul.f32 %v2404_v49, %v2404_v49  ;;  %v3351_v25 = vadd.f32 %v3350_v63, %v3349_v29  ;;  %v2407_v16 = vadd.f32 %v2406_v55, %v4470_v53  ;;  %v2275_v6 = vadd.f32 %v3348_v56, %v4405_v2 }
 0x1fe   : > { %v2513_v28 = vadd.f32 %v2512_v59, %v2404_v49  ;;  %v2581_v30 = vadd.f32 %v2580_v37, %v2550_v20  ;;  %2485 = vst [vmem:[%s4456_s26 + $0x98] sm:$0xff] %v2415_v17 }
 0x1ff   : > { %2483 = vst [vmem:[%s4456_s26 + $0x88] sm:$0xff] %v2407_v16  ;;  %v2552_v7 = vmul.f32 %v2407_v16, %v2407_v16  ;;  %v2278_v62 = vadd.f32 %v3351_v25, %v4411_v19  ;;  %v2554_v19 = vmul.f32 %v2415_v17, %v2415_v17 }
 0x200   : > { %v2582_v51 = vadd.f32 %v2581_v30, %v2551_v12  ;;  %v2514_v23 = vadd.f32 %v2513_v28, %v2407_v16 }
 0x201   : > { %v3352_v41 = vpop.f32.mrb[132].mxu1  ;;  %v3432_v8 = vpop.f32.mrb[132].mxu0 }
 0x202   : > { %v2515_v60 = vadd.f32 %v2514_v23, %v2412_v50  ;;  %v2583_v18 = vadd.f32 %v2582_v51, %v2552_v7  ;;  %v2428_v26 = vadd.f32 %v3432_v8, %v2267_v32  ;;  %v3353_v53 = vpop.f32.mrb[133].mxu1  ;;  %v2419_v58 = vpop.f32.mrb[133].mxu0 }
 0x203   : > { %v3354_v2 = vadd.f32 %v3353_v53, %v3352_v41  ;;  %v2420_v52 = vadd.f32 %v2419_v58, %v4493_v13  ;;  %v3355_v44 = vpop.f32.mrb[134].mxu1  ;;  %v3433_v33 = vpop.f32.mrb[134].mxu0 }
 0x204   : > { %v2584_v36 = vadd.f32 %v2583_v18, %v2553_v10  ;;  %2488 = vst [vmem:[%s4456_s26 + $0xb0] sm:$0xff] %v2428_v26  ;;  %v2516_v57 = vadd.f32 %v2515_v60, %v2415_v17  ;;  %v2431_v11 = vadd.f32 %v3433_v33, %v2270_v34  ;;  %v3356_v31 = vpop.f32.mrb[135].mxu1  ;;  %v2422_v9 = vpop.f32.mrb[135].mxu0  ;;  %v2557_v47 = vmul.f32 %v2428_v26, %v2428_v26 }
 0x205   : > { %2486 = vst [vmem:[%s4456_s26 + $0xa0] sm:$0xff] %v2420_v52  ;;  %v2555_v21 = vmul.f32 %v2420_v52, %v2420_v52  ;;  %v3357_v22 = vadd.f32 %v3356_v31, %v3355_v44  ;;  %v2423_v61 = vadd.f32 %v2422_v9, %v4498_v5  ;;  %v2283_v32 = vadd.f32 %v3354_v2, %v4417_v27 }
 0x206   : > { %v2517_v39 = vadd.f32 %v2516_v57, %v2420_v52  ;;  %v2585_v13 = vadd.f32 %v2584_v36, %v2554_v19  ;;  %2489 = vst [vmem:[%s4456_s26 + $0xb8] sm:$0xff] %v2431_v11  ;;  %v2558_v49 = vmul.f32 %v2431_v11, %v2431_v11 }
 0x207   : > { %2487 = vst [vmem:[%s4456_s26 + $0xa8] sm:$0xff] %v2423_v61  ;;  %v2556_v38 = vmul.f32 %v2423_v61, %v2423_v61  ;;  %v2286_v48 = vadd.f32 %v3357_v22, %v4423_v43 }
 0x208   : > { %v2586_v45 = vadd.f32 %v2585_v13, %v2555_v21  ;;  %v2518_v42 = vadd.f32 %v2517_v39, %v2423_v61 }
 0x209   : > { %v3358_v34 = vpop.f32.mrb[136].mxu1  ;;  %v3436_v14 = vpop.f32.mrb[136].mxu0 }
 0x20a   : > { %v2519_v46 = vadd.f32 %v2518_v42, %v2428_v26  ;;  %v2587_v15 = vadd.f32 %v2586_v45, %v2556_v38  ;;  %v2444_v0 = vadd.f32 %v3436_v14, %v2283_v32  ;;  %v3359_v5 = vpop.f32.mrb[137].mxu1  ;;  %v2435_v50 = vpop.f32.mrb[137].mxu0 }
 0x20b   : > { %v3360_v27 = vadd.f32 %v3359_v5, %v3358_v34  ;;  %v2436_v35 = vadd.f32 %v2435_v50, %v2275_v6  ;;  %v3361_v40 = vpop.f32.mrb[138].mxu1  ;;  %v3437_v56 = vpop.f32.mrb[138].mxu0 }
 0x20c   : > { %v2588_v43 = vadd.f32 %v2587_v15, %v2557_v47  ;;  %2492 = vst [vmem:[%s4456_s26 + $0xd0] sm:$0xff] %v2444_v0  ;;  %v2520_v29 = vadd.f32 %v2519_v46, %v2431_v11  ;;  %v2447_v3 = vadd.f32 %v3437_v56, %v2286_v48  ;;  %v3362_v20 = vpop.f32.mrb[139].mxu1  ;;  %v2438_v37 = vpop.f32.mrb[139].mxu0  ;;  %v2561_v23 = vmul.f32 %v2444_v0, %v2444_v0 }
 0x20d   : > { %2490 = vst [vmem:[%s4456_s26 + $0xc0] sm:$0xff] %v2436_v35  ;;  %v2559_v59 = vmul.f32 %v2436_v35, %v2436_v35  ;;  %v3363_v17 = vadd.f32 %v3362_v20, %v3361_v40  ;;  %v2439_v63 = vadd.f32 %v2438_v37, %v2278_v62  ;;  %v2291_v55 = vadd.f32 %v3360_v27, %v4429_v54 }
 0x20e   : > { %v2521_v12 = vadd.f32 %v2520_v29, %v2436_v35  ;;  %v2589_v25 = vadd.f32 %v2588_v43, %v2558_v49  ;;  %2493 = vst [vmem:[%s4456_s26 + $0xd8] sm:$0xff] %v2447_v3  ;;  %v2562_v53 = vmul.f32 %v2447_v3, %v2447_v3 }
 0x20f   : > { %2491 = vst [vmem:[%s4456_s26 + $0xc8] sm:$0xff] %v2439_v63  ;;  %v2560_v16 = vmul.f32 %v2439_v63, %v2439_v63  ;;  %v2294_v6 = vadd.f32 %v3363_v17, %v4435_v1 }
 0x210   : > { %v2590_v28 = vadd.f32 %v2589_v25, %v2559_v59  ;;  %v2522_v30 = vadd.f32 %v2521_v12, %v2439_v63 }
 0x211   : > { %v3364_v7 = vpop.f32.mrb[140].mxu1  ;;  %v3440_v51 = vpop.f32.mrb[140].mxu0 }
 0x212   : > { %v2523_v41 = vadd.f32 %v2522_v30, %v2444_v0  ;;  %v2591_v8 = vadd.f32 %v2590_v28, %v2560_v16  ;;  %v3365_v10 = vpop.f32.mrb[141].mxu1  ;;  %v2451_v60 = vpop.f32.mrb[141].mxu0 }
 0x213   : > { %v3366_v62 = vadd.f32 %v3365_v10, %v3364_v7  ;;  %v2452_v18 = vadd.f32 %v2451_v60, %v2291_v55  ;;  %v3367_v54 = vpop.f32.mrb[142].mxu1  ;;  %v3441_v26 = vpop.f32.mrb[142].mxu0 }
 0x214   : > { %v2592_v58 = vadd.f32 %v2591_v8, %v2561_v23  ;;  %v2524_v2 = vadd.f32 %v2523_v41, %v2447_v3  ;;  %v3368_v1 = vpop.f32.mrb[143].mxu1  ;;  %v2454_v52 = vpop.f32.mrb[143].mxu0 }
 0x215   : > { %v2299_v44 = vadd.f32 %v3366_v62, %v4441_v4  ;;  %2494 = vst [vmem:[%s4456_s26 + $0xe0] sm:$0xff] %v2452_v18  ;;  %v2563_v33 = vmul.f32 %v2452_v18, %v2452_v18  ;;  %v3369_v19 = vadd.f32 %v3368_v1, %v3367_v54  ;;  %v2455_v36 = vadd.f32 %v2454_v52, %v2294_v6 }
 0x216   : > { %v2525_v57 = vadd.f32 %v2524_v2, %v2452_v18  ;;  %v2593_v11 = vadd.f32 %v2592_v58, %v2562_v53 }
 0x217   : > { %v2460_v31 = vadd.f32 %v3440_v51, %v2299_v44  ;;  %v2302_v9 = vadd.f32 %v3369_v19, %v4448_v24  ;;  %2495 = vst [vmem:[%s4456_s26 + $0xe8] sm:$0xff] %v2455_v36  ;;  %v2564_v21 = vmul.f32 %v2455_v36, %v2455_v36 }
 0x218   : > { %v2594_v22 = vadd.f32 %v2593_v11, %v2563_v33  ;;  %v2526_v61 = vadd.f32 %v2525_v57, %v2455_v36 }
 0x219   : > { %2496 = vst [vmem:[%s4456_s26 + $0xf0] sm:$0xff] %v2460_v31  ;;  %v2565_v32 = vmul.f32 %v2460_v31, %v2460_v31  ;;  %v2463_v39 = vadd.f32 %v3441_v26, %v2302_v9 }
 0x21a   : > { %v2527_v4 = vadd.f32 %v2526_v61, %v2460_v31  ;;  %v2595_v13 = vadd.f32 %v2594_v22, %v2564_v21 }
 0x21b   : > { %2497 = vst [vmem:[%s4456_s26 + $0xf8] sm:$0xff] %v2463_v39  ;;  %v2566_v38 = vmul.f32 %v2463_v39, %v2463_v39 }
 0x21c   : > { %v2528_v48 = vadd.f32 %v2527_v4, %v2463_v39  ;;  %v2596_v45 = vadd.f32 %v2595_v13, %v2565_v32 }
 0x21e   : > { %v2529_v42 = vrot.slane %v2528_v48, 4  ;;  %v2597_v34 = vadd.f32 %v2596_v45, %v2566_v38 }
 0x220   : > { %v2530_v14 = vadd.f32 %v2529_v42, %v2528_v48  ;;  %v2598_v24 = vrot.slane %v2597_v34, 4 }
 0x222   : > { %v2531_v47 = vrot.slane %v2530_v14, 2  ;;  %v2599_v46 = vadd.f32 %v2598_v24, %v2597_v34 }
 0x224   : > { %v2532_v15 = vadd.f32 %v2531_v47, %v2530_v14  ;;  %v2600_v0 = vrot.slane %v2599_v46, 2 }
 0x226   : > { %v2533_v5 = vrot.slane %v2532_v15, 1  ;;  %v2601_v50 = vadd.f32 %v2600_v0, %v2599_v46 }
 0x228   : > { %v2602_v27 = vrot.slane %v2601_v50, 1  ;;  %v2534_v35 = vadd.f32 %v2533_v5, %v2532_v15 }
 0x22a   : > { %v2603_v40 = vadd.f32 %v2602_v27, %v2601_v50 }
 0x22c   : > { %v2605_v56 = vsel %vm2604_vm0, %v2534_v35, %v2603_v40 }
 0x22d   : > { %2606 = vst [vmem:[%s187_s29] sm:$0x3] %v2605_v56 }
 0x22e PF: > { %s14_s12 = sadd.s32 1, %s3753_s12  }
 0x22f   : > { %p11_p5 = scmp.ge.s32.totalorder %s14_s12, 4  }
 0x231   :  { %13 = sbr.rel (!%p11_p5) target bundleno = 1 (0x1), region = 70 }

// kernel: inception_b_forward.17
= control target key start
LH: loop header
LB: loop body
LE: loop exit
PB: predicated region body
PF: predicated region fallthrough
CT: control target
= control target key end

     0   :  { %s326_s12 = smov 0   ;;  %s349_s0 = inlined_call_operand.vmem [shape: f32[112,128], index: 0, kind: input, shape index: {}]   ;;  %s350_s1 = inlined_call_operand.vmem [shape: f32[1,128], index: 1, kind: input, shape index: {}]   ;;  %s351_s2 = inlined_call_operand.vmem [shape: f32[1,128], index: 2, kind: input, shape index: {}]   ;;  %s352_s3 = inlined_call_operand.vmem [shape: f32[112,128], index: 3, kind: output, shape index: {}]  }
   0x1 LB: > { %s279_s13 = sadd.s32 4294967295, %s304_s12   ;;  %p283_p0 = scmp.ge.s32.totalorder %s304_s12, 1  ;;  %s304_s12 = sphi %s326_s12, %s13_s12  }
   0x2   : > { %p138_p1 = scmp.lt.s32.totalorder %s304_s12, 3 }
   0x4   : > { %p139_p2 = pnand %p283_p0, %p138_p1 }
   0x5   : > { %s162_s14 = smul.u32 (!%p139_p2), 7, %s279_s13  ;;  %v286_v0 = vld [vmem:[%s350_s1] ss:$0 sm:$0xff] (!%p139_p2) }
   0x6   : > { %142 = sbr.rel (%p139_p2) target bundleno = 27 (0x1b), region = 32  ;;  %v287_v1 = vld [vmem:[%s351_s2] ss:$0 sm:$0xff] (!%p139_p2) }
   0x7   : > { %p163_p3 = scmp.lt.s32.totalorder (!%p139_p2), %s162_s14, 13 }
   0xd   : > { %s354_s14 = smov (!%p163_p3, %s162_s14), 13 }
   0xe   : > { %s284_s15 = sshll.u32 %s354_s14, 3 }
   0xf   : > { %s166_s20 = scalar_lea.vmem %s349_s0, %s284_s15  ;;  %s172_s25 = scalar_lea.vmem %s352_s3, %s284_s15 }
  0x10   : > { %v174_v2 = vld [vmem:[%s166_s20] sm:$0xff]  ;;  %v175_v3 = vld [vmem:[%s166_s20 + $0x8] sm:$0xff]  ;;  %v176_v4 = vld [vmem:[%s166_s20 + $0x10] sm:$0xff] }
  0x11   : > { %v188_v5 = vmul.f32 %v286_v0, %v174_v2  ;;  %v189_v6 = vmul.f32 %v286_v0, %v175_v3  ;;  %v190_v7 = vmul.f32 %v286_v0, %v176_v4  ;;  %v177_v8 = vld [vmem:[%s166_s20 + $0x18] sm:$0xff]  ;;  %v178_v9 = vld [vmem:[%s166_s20 + $0x20] sm:$0xff]  ;;  %v179_v10 = vld [vmem:[%s166_s20 + $0x28] sm:$0xff] }
  0x12   : > { %v191_v11 = vmul.f32 %v286_v0, %v177_v8  ;;  %v192_v12 = vmul.f32 %v286_v0, %v178_v9  ;;  %v193_v13 = vmul.f32 %v286_v0, %v179_v10  ;;  %v180_v14 = vld [vmem:[%s166_s20 + $0x30] sm:$0xff] }
  0x13   : > { %v202_v15 = vadd.f32 %v287_v1, %v188_v5  ;;  %v203_v16 = vadd.f32 %v287_v1, %v189_v6  ;;  %v204_v17 = vadd.f32 %v287_v1, %v190_v7  ;;  %v194_v18 = vmul.f32 %v286_v0, %v180_v14 }
  0x14   : > { %v205_v19 = vadd.f32 %v287_v1, %v191_v11  ;;  %v206_v20 = vadd.f32 %v287_v1, %v192_v12  ;;  %v207_v21 = vadd.f32 %v287_v1, %v193_v13 }
  0x15   : > { %v209_v22 = vmax.f32 %v202_v15, 0.0  ;;  %v210_v23 = vmax.f32 %v203_v16, 0.0  ;;  %v211_v24 = vmax.f32 %v204_v17, 0.0  ;;  %v208_v25 = vadd.f32 %v287_v1, %v194_v18 }
  0x16   : > { %v212_v26 = vmax.f32 %v205_v19, 0.0  ;;  %v213_v27 = vmax.f32 %v206_v20, 0.0  ;;  %v214_v28 = vmax.f32 %v207_v21, 0.0 }
  0x17   : > { %216 = vst [vmem:[%s172_s25] sm:$0xff] %v209_v22  ;;  %217 = vst [vmem:[%s172_s25 + $0x8] sm:$0xff] %v210_v23  ;;  %v215_v29 = vmax.f32 %v208_v25, 0.0 }
  0x18   : > { %218 = vst [vmem:[%s172_s25 + $0x10] sm:$0xff] %v211_v24  ;;  %219 = vst [vmem:[%s172_s25 + $0x18] sm:$0xff] %v212_v26 }
  0x19   : > { %220 = vst [vmem:[%s172_s25 + $0x20] sm:$0xff] %v213_v27  ;;  %221 = vst [vmem:[%s172_s25 + $0x28] sm:$0xff] %v214_v28 }
  0x1a   : > { %222 = vst [vmem:[%s172_s25 + $0x30] sm:$0xff] %v215_v29 }
  0x1b PF: > { %s13_s12 = sadd.s32 1, %s304_s12  }
  0x1c   : > { %p10_p4 = scmp.ge.s32.totalorder %s13_s12, 4  }
  0x1e   :  { %12 = sbr.rel (!%p10_p4) target bundleno = 1 (0x1), region = 62 }

// kernel: inception_b_forward.16
= control target key start
LH: loop header
LB: loop body
LE: loop exit
PB: predicated region body
PF: predicated region fallthrough
CT: control target
= control target key end

     0   :  { %s1905_s12 = smov 0   ;;  %s2184_s0 = inlined_call_operand.vmem [shape: bf16[112,1152], index: 0, kind: input, shape index: {}]   ;;  %s2185_s1 = inlined_call_operand.vmem [shape: bf16[1152,128], index: 1, kind: input, shape index: {}]   ;;  %s2186_s2 = inlined_call_operand.vmem [shape: f32[112,128], index: 2, kind: output, shape index: {0}]   ;;  %s2187_s3 = inlined_call_operand.vmem [shape: f32[2,2,128], index: 3, kind: output, shape index: {1}]  }
   0x1 LB: > { %s1911_s13 = sadd.s32 4294967295, %s1883_s12   ;;  %p1422_p0 = scmp.ge.s32.totalorder %s1883_s12, 1  ;;  %s1883_s12 = sphi %s1905_s12, %s14_s12  }
   0x2   : > { %p142_p1 = scmp.lt.s32.totalorder %s1883_s12, 3 }
   0x4   : > { %p143_p2 = pnand %p1422_p0, %p142_p1 }
   0x5   : > { %v1757_v0 = vld [vmem:[%s2185_s1 + $0x40] sm:$0xff] (!%p143_p2)   ;;  %v1761_v4 = vld [vmem:[%s2185_s1 + $0x48] sm:$0xff] (!%p143_p2)   ;;  %v1765_v8 = vld [vmem:[%s2185_s1 + $0x50] sm:$0xff] (!%p143_p2)   ;;  %s171_s17 = smul.u32 (!%p143_p2), 7, %s1911_s13  ;;  %p184_p4 = scmp.lt.s32.totalorder (!%p143_p2), %s1911_s13, 1  ;;  %vm1328_vm0 = vcmask (!%p143_p2), 1040384  }
   0x6   : > { %146 = sbr.rel (%p143_p2) target bundleno = 349 (0x15d), region = 28  ;;  %v1758_v1 = vld [vmem:[%s2185_s1 + $0xc0] sm:$0xff] (!%p143_p2)   ;;  %1536 = vmatprep.subr.bf16.mxu0 (!%p143_p2), %v1757_v0  ;;  %v1762_v5 = vld [vmem:[%s2185_s1 + $0xc8] sm:$0xff] (!%p143_p2)   ;;  %v1766_v9 = vld [vmem:[%s2185_s1 + $0xd0] sm:$0xff] (!%p143_p2)  }
   0x7   : > { %v1759_v2 = vld [vmem:[%s2185_s1] sm:$0xff] (!%p143_p2)   ;;  %1576 = vmatprep.subr.bf16.mxu1 (!%p143_p2), %v1758_v1  ;;  %v1763_v6 = vld [vmem:[%s2185_s1 + $0x8] sm:$0xff] (!%p143_p2)   ;;  %v1767_v10 = vld [vmem:[%s2185_s1 + $0x10] sm:$0xff] (!%p143_p2)   ;;  %p172_p3 = scmp.lt.s32.totalorder (!%p143_p2), %s171_s17, 13 }
   0x8   : > { %v1760_v3 = vld [vmem:[%s2185_s1 + $0x80] sm:$0xff] (!%p143_p2)   ;;  %1537 = vmatpush3.bf16.msra.mxu0 (!%p143_p2), %v1759_v2  ;;  %v1764_v7 = vld [vmem:[%s2185_s1 + $0x88] sm:$0xff] (!%p143_p2)   ;;  %v1768_v11 = vld [vmem:[%s2185_s1 + $0x90] sm:$0xff] (!%p143_p2)  }
   0x9   : > { %1577 = vmatpush3.bf16.msra.mxu1 (!%p143_p2), %v1760_v3  ;;  %1538 = vmatprep.subr.bf16.mxu0 (!%p143_p2), %v1761_v4  ;;  %v1769_v12 = vld [vmem:[%s2185_s1 + $0x58] sm:$0xff] (!%p143_p2)   ;;  %v1773_v16 = vld [vmem:[%s2185_s1 + $0x60] sm:$0xff] (!%p143_p2)   ;;  %v1777_v20 = vld [vmem:[%s2185_s1 + $0x68] sm:$0xff] (!%p143_p2)  }
   0xa   : > { %1578 = vmatprep.subr.bf16.mxu1 (!%p143_p2), %v1762_v5  ;;  %v1770_v13 = vld [vmem:[%s2185_s1 + $0xd8] sm:$0xff] (!%p143_p2)   ;;  %v1774_v17 = vld [vmem:[%s2185_s1 + $0xe0] sm:$0xff] (!%p143_p2)   ;;  %v1778_v21 = vld [vmem:[%s2185_s1 + $0xe8] sm:$0xff] (!%p143_p2)  }
   0xb   : > { %v1771_v14 = vld [vmem:[%s2185_s1 + $0x18] sm:$0xff] (!%p143_p2)   ;;  %v1775_v18 = vld [vmem:[%s2185_s1 + $0x20] sm:$0xff] (!%p143_p2)   ;;  %v1779_v22 = vld [vmem:[%s2185_s1 + $0x28] sm:$0xff] (!%p143_p2)  }
   0xc   : > { %1539 = vmatpush3.bf16.msra.mxu0 (!%p143_p2), %v1763_v6  ;;  %v1772_v15 = vld [vmem:[%s2185_s1 + $0x98] sm:$0xff] (!%p143_p2)   ;;  %v1776_v19 = vld [vmem:[%s2185_s1 + $0xa0] sm:$0xff] (!%p143_p2)   ;;  %v1780_v23 = vld [vmem:[%s2185_s1 + $0xa8] sm:$0xff] (!%p143_p2)  }
   0xd   : > { %1579 = vmatpush3.bf16.msra.mxu1 %v1764_v7  ;;  %1540 = vmatprep.subr.bf16.mxu0 %v1765_v8  ;;  %s2189_s17 = smov (!%p172_p3, %s171_s17), 13  ;;  %v1781_v24 = vld [vmem:[%s2185_s1 + $0x70] sm:$0xff]   ;;  %v1785_v28 = vld [vmem:[%s2185_s1 + $0x78] sm:$0xff]   ;;  %v1795_v36 = vld [vmem:[%s2185_s1 + $0x140] sm:$0xff]   ;;  %s2191_s13 = smov (!%p184_p4, %s1911_s13), 1 }
   0xe   : > { %1580 = vmatprep.subr.bf16.mxu1 %v1766_v9  ;;  %v1782_v25 = vld [vmem:[%s2185_s1 + $0xf0] sm:$0xff]   ;;  %s1748_s18 = smul.u32 36, %s2189_s17  ;;  %v1786_v29 = vld [vmem:[%s2185_s1 + $0xf8] sm:$0xff]   ;;  %v1796_v37 = vld [vmem:[%s2185_s1 + $0x1c0] sm:$0xff]  }
   0xf   : > { %v1783_v26 = vld [vmem:[%s2185_s1 + $0x30] sm:$0xff]   ;;  %v1787_v30 = vld [vmem:[%s2185_s1 + $0x38] sm:$0xff]   ;;  %v1797_v38 = vld [vmem:[%s2185_s1 + $0x100] sm:$0xff]  }
  0x10   : > { %1541 = vmatpush3.bf16.msra.mxu0 %v1767_v10  ;;  %v1784_v27 = vld [vmem:[%s2185_s1 + $0xb0] sm:$0xff]   ;;  %s2012_s29 = scalar_lea.vmem %s2184_s0, %s1748_s18  ;;  %v1788_v31 = vld [vmem:[%s2185_s1 + $0xb8] sm:$0xff]   ;;  %v1798_v39 = vld [vmem:[%s2185_s1 + $0x180] sm:$0xff]  }
  0x11   : > { %1581 = vmatpush3.bf16.msra.mxu1 %v1768_v11  ;;  %1542 = vmatprep.subr.bf16.mxu0 %v1769_v12  ;;  %v1789_v32 = vld [vmem:[%s2012_s29] ss:$36 sps:$4 sm:$0xff]   ;;  %v1792_v34 = vld [vmem:[%s2012_s29 + $0x8] ss:$36 sps:$4 sm:$0xff]   ;;  %v1805_v45 = vld [vmem:[%s2012_s29 + $0x54] ss:$36 sps:$4 sm:$0xff]  }
  0x12   : > { %1582 = vmatprep.subr.bf16.mxu1 %v1770_v13  ;;  %v1791_v33 = vld [vmem:[%s2012_s29 + $0x4] ss:$36 sps:$4 sm:$0xff]   ;;  %v1794_v35 = vld [vmem:[%s2012_s29 + $0xc] ss:$36 sps:$4 sm:$0xff]   ;;  %v1813_v52 = vld [vmem:[%s2185_s1 + $0x158] sm:$0xff]  }
  0x13   : > { %1002 = vmatprep.mubr.bf16.mxu0 %v1791_v33  ;;  %1066 = vmatprep.mubr.bf16.mxu1 %v1794_v35  ;;  %v1799_v40 = vld [vmem:[%s2185_s1 + $0x148] sm:$0xff]   ;;  %v1808_v47 = vld [vmem:[%s2012_s29 + $0x50] ss:$36 sps:$4 sm:$0xff]   ;;  %v1814_v53 = vld [vmem:[%s2185_s1 + $0x1d8] sm:$0xff]  }
  0x14   : > { %1543 = vmatpush3.bf16.msra.mxu0 %v1771_v14  ;;  %v1800_v41 = vld [vmem:[%s2185_s1 + $0x1c8] sm:$0xff]   ;;  %v1809_v48 = vld [vmem:[%s2185_s1 + $0x150] sm:$0xff]   ;;  %v1815_v54 = vld [vmem:[%s2185_s1 + $0x118] sm:$0xff]  }
  0x15   : > { %1583 = vmatpush3.bf16.msra.mxu1 %v1772_v15  ;;  %1544 = vmatprep.subr.bf16.mxu0 %v1773_v16  ;;  %v1801_v42 = vld [vmem:[%s2185_s1 + $0x108] sm:$0xff]   ;;  %v1810_v49 = vld [vmem:[%s2185_s1 + $0x1d0] sm:$0xff]   ;;  %v1816_v55 = vld [vmem:[%s2185_s1 + $0x198] sm:$0xff]  }
  0x16   : > { %1584 = vmatprep.subr.bf16.mxu1 %v1774_v17  ;;  %v1802_v43 = vld [vmem:[%s2185_s1 + $0x188] sm:$0xff]   ;;  %v1811_v50 = vld [vmem:[%s2185_s1 + $0x110] sm:$0xff]   ;;  %v1819_v57 = vld [vmem:[%s2012_s29 + $0x9c] ss:$36 sps:$4 sm:$0xff]  }
  0x17   : > { %v1803_v44 = vld [vmem:[%s2012_s29 + $0x4c] ss:$36 sps:$4 sm:$0xff]   ;;  %v1817_v56 = vld [vmem:[%s2012_s29 + $0x94] ss:$36 sps:$4 sm:$0xff]   ;;  %v1823_v60 = vld [vmem:[%s2185_s1 + $0x160] sm:$0xff]  }
  0x18   : > { %1545 = vmatpush3.bf16.msra.mxu0 %v1775_v18  ;;  %v1807_v46 = vld [vmem:[%s2012_s29 + $0x48] ss:$36 sps:$4 sm:$0xff]   ;;  %v1812_v51 = vld [vmem:[%s2185_s1 + $0x190] sm:$0xff]   ;;  %v1822_v59 = vld [vmem:[%s2012_s29 + $0x98] ss:$36 sps:$4 sm:$0xff]  }
  0x19   : > { %1585 = vmatpush3.bf16.msra.mxu1 %v1776_v19  ;;  %1546 = vmatprep.subr.bf16.mxu0 %v1777_v20  ;;  %v1821_v58 = vld [vmem:[%s2012_s29 + $0x90] ss:$36 sps:$4 sm:$0xff]   ;;  %v1824_v61 = vld [vmem:[%s2185_s1 + $0x1e0] sm:$0xff]   ;;  %v1827_v0 = vld [vmem:[%s2185_s1 + $0x168] sm:$0xff]  }
  0x1a   : > { %1586 = vmatprep.subr.bf16.mxu1 %v1778_v21  ;;  %v1825_v62 = vld [vmem:[%s2185_s1 + $0x120] sm:$0xff]   ;;  %v1828_v1 = vld [vmem:[%s2185_s1 + $0x1e8] sm:$0xff]   ;;  %v219_v4 = vld [vmem:[%s2012_s29 + $0xd8] sm:$0xff] }
  0x1b   : > { %v1826_v63 = vld [vmem:[%s2185_s1 + $0x1a0] sm:$0xff]   ;;  %v1829_v2 = vld [vmem:[%s2185_s1 + $0x128] sm:$0xff]   ;;  %v1454_v6 = vcombine.high %v219_v4, %v219_v4  ;;  %v1453_v8 = vcombine.low %v219_v4, %v219_v4  ;;  %v1835_v10 = vld [vmem:[%s2185_s1 + $0x170] sm:$0xff]  }
  0x1c   : > { %1547 = vmatpush3.bf16.msra.mxu0 %v1779_v22  ;;  %v1830_v3 = vld [vmem:[%s2185_s1 + $0x1a8] sm:$0xff]   ;;  %v220_v5 = vld [vmem:[%s2012_s29 + $0xe0] sm:$0xff]  ;;  %v1836_v11 = vld [vmem:[%s2185_s1 + $0x1f0] sm:$0xff]  }
  0x1d   : > { %1587 = vmatpush3.bf16.msra.mxu1 %v1780_v23  ;;  %1548 = vmatprep.subr.bf16.mxu0 %v1781_v24  ;;  %v1456_v7 = vcombine.high %v220_v5, %v220_v5  ;;  %v1455_v9 = vcombine.low %v220_v5, %v220_v5  ;;  %v1837_v12 = vld [vmem:[%s2185_s1 + $0x130] sm:$0xff]   ;;  %v1839_v14 = vld [vmem:[%s2185_s1 + $0x178] sm:$0xff]   ;;  %v1849_v22 = vld [vmem:[%s2185_s1 + $0x200] sm:$0xff]  }
  0x1e   : > { %1588 = vmatprep.subr.bf16.mxu1 %v1782_v25  ;;  %v1838_v13 = vld [vmem:[%s2185_s1 + $0x1b0] sm:$0xff]   ;;  %v1840_v15 = vld [vmem:[%s2185_s1 + $0x1f8] sm:$0xff]   ;;  %v1850_v23 = vld [vmem:[%s2185_s1 + $0x208] sm:$0xff]  }
  0x1f   : > { %v1841_v16 = vld [vmem:[%s2185_s1 + $0x138] sm:$0xff]   ;;  %v1843_v18 = vld [vmem:[%s2012_s29 + $0x10] ss:$36 sps:$4 sm:$0xff]   ;;  %v1853_v25 = vld [vmem:[%s2012_s29 + $0x64] ss:$36 sps:$4 sm:$0xff]  }
  0x20   : > { %1549 = vmatpush3.bf16.msra.mxu0 %v1783_v26  ;;  %v1842_v17 = vld [vmem:[%s2185_s1 + $0x1b8] sm:$0xff]   ;;  %v221_v33 = vld [vmem:[%s2012_s29 + $0xe8] sm:$0xff]  ;;  %v1863_v35 = vld [vmem:[%s2012_s29 + $0xa0] ss:$36 sps:$4 sm:$0xff]  }
  0x21   : > { %1589 = vmatpush3.bf16.msra.mxu1 %v1784_v27  ;;  %1550 = vmatprep.subr.bf16.mxu0 %v1785_v28  ;;  %v1845_v19 = vld [vmem:[%s2012_s29 + $0x14] ss:$36 sps:$4 sm:$0xff]   ;;  %v1848_v21 = vld [vmem:[%s2012_s29 + $0x1c] ss:$36 sps:$4 sm:$0xff]  }
  0x22   : > { %1590 = vmatprep.subr.bf16.mxu1 %v1786_v29  ;;  %v1846_v20 = vld [vmem:[%s2012_s29 + $0x18] ss:$36 sps:$4 sm:$0xff]   ;;  %v1857_v27 = vld [vmem:[%s2185_s1 + $0x210] sm:$0xff]   ;;  %v1856_v28 = vld [vmem:[%s2012_s29 + $0x60] ss:$36 sps:$4 sm:$0xff]  }
  0x23   : > { %v1851_v24 = vld [vmem:[%s2012_s29 + $0x5c] ss:$36 sps:$4 sm:$0xff]   ;;  %v1859_v29 = vld [vmem:[%s2012_s29 + $0xa4] ss:$36 sps:$4 sm:$0xff]  }
  0x24   : > { %1551 = vmatpush3.bf16.msra.mxu0 %v1787_v30  ;;  %v1855_v26 = vld [vmem:[%s2012_s29 + $0x58] ss:$36 sps:$4 sm:$0xff]   ;;  %v1861_v30 = vld [vmem:[%s2012_s29 + $0xac] ss:$36 sps:$4 sm:$0xff]  }
  0x25   : > { %1591 = vmatpush3.bf16.msra.mxu1 %v1788_v31  ;;  %1616 = vmatprep.subr.bf16.mxu0 %v1795_v36  ;;  %v1858_v31 = vld [vmem:[%s2185_s1 + $0x218] sm:$0xff]   ;;  %v1864_v36 = vld [vmem:[%s2012_s29 + $0xa8] ss:$36 sps:$4 sm:$0xff]  }
  0x26   : > { %1656 = vmatprep.subr.bf16.mxu1 %v1796_v37  ;;  %v1458_v37 = vcombine.high %v221_v33, %v221_v33 }
  0x27   : > { %1003 = vmatmul.mubr.bf16.vlgmr.msra.gmra.mrb[0].mxu0 %v1789_v32  ;;  %v1865_v32 = vld [vmem:[%s2185_s1 + $0x220] sm:$0xff]  }
  0x28   : > { %1067 = vmatmul.mubr.bf16.vlgmr.msra.gmra.mrb[0].mxu1 %v1792_v34  ;;  %1617 = vmatpush3.bf16.msra.mxu0 %v1797_v38  ;;  %v222_v34 = vld [vmem:[%s2012_s29 + $0xf0] sm:$0xff] }
  0x29   : > { %1657 = vmatpush3.bf16.msra.mxu1 %v1798_v39  ;;  %1618 = vmatprep.subr.bf16.mxu0 %v1799_v40  ;;  %v1460_v38 = vcombine.high %v222_v34, %v222_v34  ;;  %v1866_v39 = vld [vmem:[%s2185_s1 + $0x228] sm:$0xff]   ;;  %v1871_v40 = vld [vmem:[%s2185_s1 + $0x230] sm:$0xff]  }
  0x2a   : > { %1658 = vmatprep.subr.bf16.mxu1 %v1800_v41  ;;  %1010 = vmatprep.mubr.bf16.mxu0 %v1803_v44  ;;  %v1457_v41 = vcombine.low %v221_v33, %v221_v33  ;;  %v1874_v44 = vld [vmem:[%s2012_s29 + $0xb0] ss:$36 sps:$4 sm:$0xff]  }
  0x2b   : > { %1074 = vmatprep.mubr.bf16.mxu1 %v1805_v45  ;;  %v1872_v45 = vld [vmem:[%s2185_s1 + $0x238] sm:$0xff]  }
  0x2c   : > { %1619 = vmatpush3.bf16.msra.mxu0 %v1801_v42  ;;  %v1459_v42 = vcombine.low %v222_v34, %v222_v34 }
  0x2d   : > { %1659 = vmatpush3.bf16.msra.mxu1 %v1802_v43  ;;  %1620 = vmatprep.subr.bf16.mxu0 %v1809_v48  ;;  %v1873_v43 = vld [vmem:[%s2012_s29 + $0x20] ss:$36 sps:$4 sm:$0xff]  }
  0x2e   : > { %1660 = vmatprep.subr.bf16.mxu1 %v1810_v49 }
  0x2f   : > { %1011 = vmatmul.mubr.bf16.gmra.mrb[4].mxu0 %v1807_v46  ;;  %v1875_v46 = vld [vmem:[%s2012_s29 + $0x68] ss:$36 sps:$4 sm:$0xff]  }
  0x30   : > { %1075 = vmatmul.mubr.bf16.gmra.mrb[4].mxu1 %v1808_v47  ;;  %1621 = vmatpush3.bf16.msra.mxu0 %v1811_v50  ;;  %v1876_v47 = vld [vmem:[%s2012_s29 + $0xf8] ss:$0 sps:$4 sm:$0xff]   ;;  %s1424_s29 = sshll.u32 %s2189_s17, 3  ;;  %s1425_s17 = sshll.u32 %s2191_s13, 1 }
  0x31   : > { %1661 = vmatpush3.bf16.msra.mxu1 %v1812_v51  ;;  %1622 = vmatprep.subr.bf16.mxu0 %v1813_v52  ;;  %s182_s23 = scalar_lea.vmem %s2186_s2, %s1424_s29  ;;  %s187_s26 = scalar_lea.vmem %s2187_s3, %s1425_s17 }
  0x32   : > { %1662 = vmatprep.subr.bf16.mxu1 %v1814_v53  ;;  %1018 = vmatprep.mubr.bf16.mxu0 %v1817_v56 }
  0x33   : > { %1082 = vmatprep.mubr.bf16.mxu1 %v1819_v57 }
  0x34   : > { %1623 = vmatpush3.bf16.msra.mxu0 %v1815_v54 }
  0x35   : > { %1663 = vmatpush3.bf16.msra.mxu1 %v1816_v55  ;;  %1624 = vmatprep.subr.bf16.mxu0 %v1823_v60 }
  0x36   : > { %1664 = vmatprep.subr.bf16.mxu1 %v1824_v61 }
  0x37   : > { %1019 = vmatmul.mubr.bf16.gmra.mrb[8].mxu0 %v1821_v58 }
  0x38   : > { %1083 = vmatmul.mubr.bf16.gmra.mrb[8].mxu1 %v1822_v59  ;;  %1625 = vmatpush3.bf16.msra.mxu0 %v1825_v62 }
  0x39   : > { %1665 = vmatpush3.bf16.msra.mxu1 %v1826_v63  ;;  %1626 = vmatprep.subr.bf16.mxu0 %v1827_v0 }
  0x3a   : > { %1666 = vmatprep.subr.bf16.mxu1 %v1828_v1  ;;  %1026 = vmatprep.mubr.bf16.mxu0 %v1454_v6 }
  0x3b   : > { %1090 = vmatprep.mubr.bf16.mxu1 %v1456_v7 }
  0x3c   : > { %1627 = vmatpush3.bf16.msra.mxu0 %v1829_v2 }
  0x3d   : > { %1667 = vmatpush3.bf16.msra.mxu1 %v1830_v3  ;;  %1628 = vmatprep.subr.bf16.mxu0 %v1835_v10 }
  0x3e   : > { %1668 = vmatprep.subr.bf16.mxu1 %v1836_v11 }
  0x3f   : > { %1027 = vmatmul.mubr.bf16.gmra.mrb[12].mxu0 %v1453_v8 }
  0x40   : > { %1091 = vmatmul.mubr.bf16.gmra.mrb[12].mxu1 %v1455_v9  ;;  %1629 = vmatpush3.bf16.msra.mxu0 %v1837_v12 }
  0x41   : > { %1669 = vmatpush3.bf16.msra.mxu1 %v1838_v13  ;;  %1630 = vmatprep.subr.bf16.mxu0 %v1839_v14 }
  0x42   : > { %1670 = vmatprep.subr.bf16.mxu1 %v1840_v15  ;;  %1130 = vmatprep.mubr.bf16.mxu0 %v1845_v19 }
  0x43   : > { %1194 = vmatprep.mubr.bf16.mxu1 %v1848_v21 }
  0x44   : > { %1631 = vmatpush3.bf16.msra.mxu0 %v1841_v16 }
  0x45   : > { %1671 = vmatpush3.bf16.msra.mxu1 %v1842_v17  ;;  %1708 = vmatprep.subr.bf16.mxu0 %v1849_v22 }
  0x46   : > { %1732 = vmatprep.subr.bf16.mxu1 %v1849_v22 }
  0x47   : > { %1131 = vmatmul.mubr.bf16.vlgmr.msra.gmra.mrb[16].mxu0 %v1843_v18 }
  0x48   : > { %1195 = vmatmul.mubr.bf16.vlgmr.msra.gmra.mrb[16].mxu1 %v1846_v20  ;;  %1709 = vmatpush3.bf16.msra.mxu0 %v1849_v22 }
  0x49   : > { %1740 = vmatpush3.bf16.msra.mxu1 %v1849_v22  ;;  %1710 = vmatprep.subr.bf16.mxu0 %v1850_v23 }
  0x4a   : > { %1733 = vmatprep.subr.bf16.mxu1 %v1850_v23  ;;  %1138 = vmatprep.mubr.bf16.mxu0 %v1851_v24 }
  0x4b   : > { %1202 = vmatprep.mubr.bf16.mxu1 %v1853_v25 }
  0x4c   : > { %1711 = vmatpush3.bf16.msra.mxu0 %v1850_v23 }
  0x4d   : > { %1741 = vmatpush3.bf16.msra.mxu1 %v1850_v23  ;;  %1712 = vmatprep.subr.bf16.mxu0 %v1857_v27 }
  0x4e   : > { %1734 = vmatprep.subr.bf16.mxu1 %v1857_v27 }
  0x4f   : > { %1139 = vmatmul.mubr.bf16.gmra.mrb[20].mxu0 %v1855_v26 }
  0x50   : > { %1203 = vmatmul.mubr.bf16.gmra.mrb[20].mxu1 %v1856_v28  ;;  %1146 = vmatprep.mubr.bf16.mxu0 %v1859_v29 }
  0x51   : > { %1713 = vmatpush3.bf16.msra.mxu0 %v1857_v27  ;;  %1210 = vmatprep.mubr.bf16.mxu1 %v1861_v30 }
  0x52   : > { %1742 = vmatpush3.bf16.msra.mxu1 %v1857_v27  ;;  %1714 = vmatprep.subr.bf16.mxu0 %v1858_v31 }
  0x53   : > { %1735 = vmatprep.subr.bf16.mxu1 %v1858_v31 }
  0x55   : > { %1715 = vmatpush3.bf16.msra.mxu0 %v1858_v31 }
  0x56   : > { %1743 = vmatpush3.bf16.msra.mxu1 %v1858_v31  ;;  %1716 = vmatprep.subr.bf16.mxu0 %v1865_v32 }
  0x57   : > { %1147 = vmatmul.mubr.bf16.gmra.mrb[24].mxu0 %v1863_v35  ;;  %1736 = vmatprep.subr.bf16.mxu1 %v1865_v32 }
  0x58   : > { %1211 = vmatmul.mubr.bf16.gmra.mrb[24].mxu1 %v1864_v36  ;;  %1154 = vmatprep.mubr.bf16.mxu0 %v1458_v37 }
  0x59   : > { %1717 = vmatpush3.bf16.msra.mxu0 %v1865_v32  ;;  %1218 = vmatprep.mubr.bf16.mxu1 %v1460_v38 }
  0x5a   : > { %1744 = vmatpush3.bf16.msra.mxu1 %v1865_v32  ;;  %1718 = vmatprep.subr.bf16.mxu0 %v1866_v39 }
  0x5b   : > { %1737 = vmatprep.subr.bf16.mxu1 %v1866_v39 }
  0x5d   : > { %1719 = vmatpush3.bf16.msra.mxu0 %v1866_v39 }
  0x5e   : > { %1745 = vmatpush3.bf16.msra.mxu1 %v1866_v39  ;;  %1720 = vmatprep.subr.bf16.mxu0 %v1871_v40 }
  0x5f   : > { %1155 = vmatmul.mubr.bf16.gmra.mrb[28].mxu0 %v1457_v41  ;;  %1738 = vmatprep.subr.bf16.mxu1 %v1871_v40 }
  0x60   : > { %1219 = vmatmul.mubr.bf16.gmra.mrb[28].mxu1 %v1459_v42  ;;  %1724 = vmatprep.mubr.bf16.mxu0 %v1873_v43 }
  0x61   : > { %1721 = vmatpush3.bf16.msra.mxu0 %v1871_v40  ;;  %1728 = vmatprep.mubr.bf16.mxu1 %v1874_v44 }
  0x62   : > { %1746 = vmatpush3.bf16.msra.mxu1 %v1871_v40  ;;  %1722 = vmatprep.subr.bf16.mxu0 %v1872_v45 }
  0x63   : > { %1739 = vmatprep.subr.bf16.mxu1 %v1872_v45 }
  0x65   : > { %1723 = vmatpush3.bf16.msra.mxu0 %v1872_v45 }
  0x66   : > { %1747 = vmatpush3.bf16.msra.mxu1 %v1872_v45 }
  0x68   : > { %1725 = vmatmul.mubr.bf16.vlgmr.msra.gmra.mrb[32].mxu0 %v1875_v46 }
  0x69   : > { %1729 = vmatmul.mubr.bf16.vlgmr.msra.gmra.mrb[32].mxu1 %v1876_v47 }
  0xfa   : > { %v1552_v48 = vpop.f32.mrb[0].mxu0 }
  0xfb   : > { %v1592_v49 = vpop.f32.mrb[0].mxu1  ;;  %v1553_v50 = vpop.f32.mrb[1].mxu0 }
  0xfc   : > { %v1554_v51 = vadd.f32 %v1553_v50, %v1552_v48  ;;  %v1593_v52 = vpop.f32.mrb[1].mxu1  ;;  %v1555_v53 = vpop.f32.mrb[2].mxu0 }
  0xfd   : > { %v1594_v54 = vadd.f32 %v1593_v52, %v1592_v49  ;;  %v1595_v55 = vpop.f32.mrb[2].mxu1  ;;  %v1556_v56 = vpop.f32.mrb[3].mxu0 }
  0xfe   : > { %v1557_v57 = vadd.f32 %v1556_v56, %v1555_v53  ;;  %v1596_v58 = vpop.f32.mrb[3].mxu1 }
  0xff   : > { %v1069_v59 = vadd.f32 %v1594_v54, %v1554_v51  ;;  %v1597_v60 = vadd.f32 %v1596_v58, %v1595_v55 }
 0x101   : > { %v1072_v61 = vadd.f32 %v1597_v60, %v1557_v57 }
 0x102   : > { %v1558_v62 = vpop.f32.mrb[4].mxu0 }
 0x103   : > { %v1598_v63 = vpop.f32.mrb[4].mxu1  ;;  %v1559_v0 = vpop.f32.mrb[5].mxu0 }
 0x104   : > { %v1560_v1 = vadd.f32 %v1559_v0, %v1558_v62  ;;  %v1599_v2 = vpop.f32.mrb[5].mxu1  ;;  %v1561_v3 = vpop.f32.mrb[6].mxu0 }
 0x105   : > { %v1600_v4 = vadd.f32 %v1599_v2, %v1598_v63  ;;  %v1601_v5 = vpop.f32.mrb[6].mxu1  ;;  %v1562_v6 = vpop.f32.mrb[7].mxu0 }
 0x106   : > { %v1563_v7 = vadd.f32 %v1562_v6, %v1561_v3  ;;  %v1602_v8 = vpop.f32.mrb[7].mxu1 }
 0x107   : > { %v1077_v9 = vadd.f32 %v1600_v4, %v1560_v1  ;;  %v1603_v10 = vadd.f32 %v1602_v8, %v1601_v5 }
 0x109   : > { %v1080_v11 = vadd.f32 %v1603_v10, %v1563_v7 }
 0x10a   : > { %v1564_v12 = vpop.f32.mrb[8].mxu0 }
 0x10b   : > { %v1604_v13 = vpop.f32.mrb[8].mxu1  ;;  %v1565_v14 = vpop.f32.mrb[9].mxu0 }
 0x10c   : > { %v1566_v15 = vadd.f32 %v1565_v14, %v1564_v12  ;;  %v1605_v16 = vpop.f32.mrb[9].mxu1  ;;  %v1567_v17 = vpop.f32.mrb[10].mxu0 }
 0x10d   : > { %v1606_v18 = vadd.f32 %v1605_v16, %v1604_v13  ;;  %v1607_v19 = vpop.f32.mrb[10].mxu1  ;;  %v1568_v20 = vpop.f32.mrb[11].mxu0 }
 0x10e   : > { %v1569_v21 = vadd.f32 %v1568_v20, %v1567_v17  ;;  %v1608_v22 = vpop.f32.mrb[11].mxu1 }
 0x10f   : > { %v1085_v23 = vadd.f32 %v1606_v18, %v1566_v15  ;;  %v1609_v24 = vadd.f32 %v1608_v22, %v1607_v19 }
 0x111   : > { %v1088_v25 = vadd.f32 %v1609_v24, %v1569_v21 }
 0x112   : > { %v1570_v26 = vpop.f32.mrb[12].mxu0 }
 0x113   : > { %v1610_v27 = vpop.f32.mrb[12].mxu1  ;;  %v1571_v28 = vpop.f32.mrb[13].mxu0 }
 0x114   : > { %v1611_v29 = vpop.f32.mrb[13].mxu1  ;;  %v1572_v30 = vadd.f32 %v1571_v28, %v1570_v26  ;;  %v1573_v32 = vpop.f32.mrb[14].mxu0 }
 0x115   : > { %v1612_v31 = vadd.f32 %v1611_v29, %v1610_v27  ;;  %v1613_v33 = vpop.f32.mrb[14].mxu1  ;;  %v1574_v34 = vpop.f32.mrb[15].mxu0 }
 0x116   : > { %v1614_v35 = vpop.f32.mrb[15].mxu1 }
 0x117   : > { %v1093_v36 = vadd.f32 %v1612_v31, %v1572_v30 }
 0x11a   : > { %v1632_v37 = vpop.f32.mrb[16].mxu0 }
 0x11b   : > { %v1633_v38 = vpop.f32.mrb[17].mxu0  ;;  %v1672_v39 = vpop.f32.mrb[16].mxu1 }
 0x11c   : > { %v1634_v40 = vadd.f32 %v1633_v38, %v1632_v37  ;;  %v1635_v41 = vpop.f32.mrb[18].mxu0  ;;  %v1673_v42 = vpop.f32.mrb[17].mxu1 }
 0x11d   : > { %v1636_v43 = vpop.f32.mrb[19].mxu0  ;;  %v1674_v44 = vadd.f32 %v1673_v42, %v1672_v39  ;;  %v1675_v45 = vpop.f32.mrb[18].mxu1 }
 0x11e   : > { %v1133_v46 = vadd.f32 %v1634_v40, %v1069_v59  ;;  %v1637_v47 = vadd.f32 %v1636_v43, %v1635_v41  ;;  %v1676_v48 = vpop.f32.mrb[19].mxu1 }
 0x11f   : > { %v1677_v49 = vadd.f32 %v1676_v48, %v1675_v45 }
 0x120   : > { %v1136_v50 = vadd.f32 %v1637_v47, %v1072_v61  ;;  %v1197_v51 = vadd.f32 %v1674_v44, %v1133_v46 }
 0x122   : > { %v1638_v52 = vpop.f32.mrb[20].mxu0  ;;  %v1200_v53 = vadd.f32 %v1677_v49, %v1136_v50 }
 0x123   : > { %v1639_v54 = vpop.f32.mrb[21].mxu0  ;;  %v1678_v55 = vpop.f32.mrb[20].mxu1 }
 0x124   : > { %v1640_v56 = vadd.f32 %v1639_v54, %v1638_v52  ;;  %v1641_v57 = vpop.f32.mrb[22].mxu0  ;;  %v1679_v58 = vpop.f32.mrb[21].mxu1 }
 0x125   : > { %v1642_v60 = vpop.f32.mrb[23].mxu0  ;;  %v1680_v62 = vadd.f32 %v1679_v58, %v1678_v55  ;;  %v1681_v63 = vpop.f32.mrb[22].mxu1 }
 0x126   : > { %v1141_v0 = vadd.f32 %v1640_v56, %v1077_v9  ;;  %v1643_v1 = vadd.f32 %v1642_v60, %v1641_v57  ;;  %v1682_v2 = vpop.f32.mrb[23].mxu1 }
 0x127   : > { %v1683_v3 = vadd.f32 %v1682_v2, %v1681_v63 }
 0x128   : > { %v1144_v59 = vadd.f32 %v1643_v1, %v1080_v11  ;;  %v1205_v4 = vadd.f32 %v1680_v62, %v1141_v0 }
 0x12a   : > { %v1644_v5 = vpop.f32.mrb[24].mxu0  ;;  %v1208_v6 = vadd.f32 %v1683_v3, %v1144_v59 }
 0x12b   : > { %v1645_v61 = vpop.f32.mrb[25].mxu0  ;;  %v1684_v7 = vpop.f32.mrb[24].mxu1 }
 0x12c   : > { %v1646_v8 = vadd.f32 %v1645_v61, %v1644_v5  ;;  %v1647_v10 = vpop.f32.mrb[26].mxu0  ;;  %v1685_v12 = vpop.f32.mrb[25].mxu1 }
 0x12d   : > { %v1648_v13 = vpop.f32.mrb[27].mxu0  ;;  %v1686_v14 = vadd.f32 %v1685_v12, %v1684_v7  ;;  %v1687_v15 = vpop.f32.mrb[26].mxu1 }
 0x12e   : > { %v1149_v16 = vadd.f32 %v1646_v8, %v1085_v23  ;;  %v1649_v17 = vadd.f32 %v1648_v13, %v1647_v10  ;;  %v1688_v18 = vpop.f32.mrb[27].mxu1 }
 0x12f   : > { %v1689_v9 = vadd.f32 %v1688_v18, %v1687_v15 }
 0x130   : > { %v1152_v19 = vadd.f32 %v1649_v17, %v1088_v25  ;;  %v1213_v20 = vadd.f32 %v1686_v14, %v1149_v16 }
 0x132   : > { %v1650_v21 = vpop.f32.mrb[28].mxu0  ;;  %v1216_v11 = vadd.f32 %v1689_v9, %v1152_v19 }
 0x133   : > { %v1651_v22 = vpop.f32.mrb[29].mxu0  ;;  %v1690_v24 = vpop.f32.mrb[28].mxu1 }
 0x134   : > { %v1652_v26 = vadd.f32 %v1651_v22, %v1650_v21  ;;  %v1653_v27 = vpop.f32.mrb[30].mxu0  ;;  %v1691_v28 = vpop.f32.mrb[29].mxu1 }
 0x135   : > { %v1654_v29 = vpop.f32.mrb[31].mxu0  ;;  %v1692_v30 = vadd.f32 %v1691_v28, %v1690_v24  ;;  %v1693_v31 = vpop.f32.mrb[30].mxu1 }
 0x136   : > { %v1157_v32 = vadd.f32 %v1652_v26, %v1093_v36  ;;  %v1694_v33 = vpop.f32.mrb[31].mxu1 }
 0x138   : > { %v1221_v23 = vadd.f32 %v1692_v30, %v1157_v32 }
 0x13b   : > { %v1726_v25 = vpop.f32.mrb[32].mxu0 }
 0x13c   : > { %v1269_v34 = vadd.f32 %v1726_v25, %v1205_v4  ;;  %v1730_v35 = vpop.f32.mrb[32].mxu1  ;;  %v1260_v37 = vpop.f32.mrb[33].mxu0 }
 0x13d   : > { %v1285_v38 = vadd.f32 %v1730_v35, %v1221_v23  ;;  %v1261_v39 = vadd.f32 %v1260_v37, %v1197_v51  ;;  %v1276_v40 = vpop.f32.mrb[33].mxu1  ;;  %v1727_v41 = vpop.f32.mrb[34].mxu0 }
 0x13e   : > { %1292 = vst [vmem:[%s182_s23 + $0x10] sm:$0xff] %v1269_v34  ;;  %v1277_v42 = vadd.f32 %v1276_v40, %v1213_v20  ;;  %v1272_v43 = vadd.f32 %v1727_v41, %v1208_v6  ;;  %v1731_v44 = vpop.f32.mrb[34].mxu1  ;;  %v1263_v36 = vpop.f32.mrb[35].mxu0  ;;  %v1311_v51 = vmul.f32 %v1269_v34, %v1269_v34 }
 0x13f   : > { %1296 = vst [vmem:[%s182_s23 + $0x30] sm:$0xff] %v1285_v38  ;;  %1290 = vst [vmem:[%s182_s23] sm:$0xff] %v1261_v39  ;;  %v1264_v45 = vadd.f32 %v1263_v36, %v1200_v53  ;;  %v1279_v46 = vpop.f32.mrb[35].mxu1  ;;  %v1309_v48 = vmul.f32 %v1261_v39, %v1261_v39  ;;  %v1315_v1 = vmul.f32 %v1285_v38, %v1285_v38 }
 0x140   : > { %1294 = vst [vmem:[%s182_s23 + $0x20] sm:$0xff] %v1277_v42  ;;  %1293 = vst [vmem:[%s182_s23 + $0x18] sm:$0xff] %v1272_v43  ;;  %v1280_v47 = vadd.f32 %v1279_v46, %v1216_v11  ;;  %v1312_v55 = vmul.f32 %v1272_v43, %v1272_v43  ;;  %v1313_v58 = vmul.f32 %v1277_v42, %v1277_v42 }
 0x141   : > { %1291 = vst [vmem:[%s182_s23 + $0x8] sm:$0xff] %v1264_v45  ;;  %v1297_v49 = vadd.f32 %v1264_v45, %v1261_v39  ;;  %v1310_v50 = vmul.f32 %v1264_v45, %v1264_v45 }
 0x142   : > { %1295 = vst [vmem:[%s182_s23 + $0x28] sm:$0xff] %v1280_v47  ;;  %v1314_v63 = vmul.f32 %v1280_v47, %v1280_v47 }
 0x143   : > { %v1298_v52 = vadd.f32 %v1297_v49, %v1269_v34  ;;  %v1316_v54 = vadd.f32 %v1310_v50, %v1309_v48 }
 0x145   : > { %v1317_v56 = vadd.f32 %v1316_v54, %v1311_v51  ;;  %v1299_v57 = vadd.f32 %v1298_v52, %v1272_v43 }
 0x147   : > { %v1300_v60 = vadd.f32 %v1299_v57, %v1277_v42  ;;  %v1318_v53 = vadd.f32 %v1317_v56, %v1312_v55 }
 0x149   : > { %v1301_v62 = vadd.f32 %v1300_v60, %v1280_v47  ;;  %v1319_v0 = vadd.f32 %v1318_v53, %v1313_v58 }
 0x14b   : > { %v1302_v2 = vadd.f32 %v1301_v62, %v1285_v38  ;;  %v1320_v3 = vadd.f32 %v1319_v0, %v1314_v63 }
 0x14d   : > { %v1303_v59 = vrot.slane %v1302_v2, 4  ;;  %v1321_v4 = vadd.f32 %v1320_v3, %v1315_v1 }
 0x14f   : > { %v1304_v5 = vadd.f32 %v1303_v59, %v1302_v2  ;;  %v1322_v6 = vrot.slane %v1321_v4, 4 }
 0x151   : > { %v1305_v61 = vrot.slane %v1304_v5, 2  ;;  %v1323_v7 = vadd.f32 %v1322_v6, %v1321_v4 }
 0x153   : > { %v1306_v8 = vadd.f32 %v1305_v61, %v1304_v5  ;;  %v1324_v10 = vrot.slane %v1323_v7, 2 }
 0x155   : > { %v1307_v12 = vrot.slane %v1306_v8, 1  ;;  %v1325_v13 = vadd.f32 %v1324_v10, %v1323_v7 }
 0x157   : > { %v1326_v14 = vrot.slane %v1325_v13, 1  ;;  %v1308_v15 = vadd.f32 %v1307_v12, %v1306_v8 }
 0x159   : > { %v1327_v16 = vadd.f32 %v1326_v14, %v1325_v13 }
 0x15b   : > { %v1329_v17 = vsel %vm1328_vm0, %v1308_v15, %v1327_v16 }
 0x15c   : > { %1330 = vst [vmem:[%s187_s26] sm:$0x3] %v1329_v17 }
 0x15d PF: > { %s14_s12 = sadd.s32 1, %s1883_s12  }
 0x15e   : > { %p11_p5 = scmp.ge.s32.totalorder %s14_s12, 4  }
 0x160   :  { %13 = sbr.rel (!%p11_p5) target bundleno = 1 (0x1), region = 70 }

// kernel: inception_b_forward.9
= control target key start
LH: loop header
LB: loop body
LE: loop exit
PB: predicated region body
PF: predicated region fallthrough
CT: control target
= control target key end

     0   :  { %s764_s12 = smov 0   ;;  %s851_s0 = inlined_call_operand.vmem [shape: bf16[112,36], index: 0, kind: input, shape index: {}]   ;;  %s852_s1 = inlined_call_operand.vmem [shape: bf16[36,384], index: 1, kind: input, shape index: {}]   ;;  %s853_s2 = inlined_call_operand.vmem [shape: f32[112,384], index: 2, kind: output, shape index: {0}]   ;;  %s854_s3 = inlined_call_operand.vmem [shape: f32[2,2,384], index: 3, kind: output, shape index: {1}]  }
   0x1 LB: > { %s770_s13 = sadd.s32 4294967295, %s740_s12   ;;  %p657_p0 = scmp.ge.s32.totalorder %s740_s12, 1  ;;  %s740_s12 = sphi %s764_s12, %s14_s12  }
   0x2   : > { %p141_p1 = scmp.lt.s32.totalorder %s740_s12, 3 }
   0x4   : > { %p142_p2 = pnand %p657_p0, %p141_p1 }
   0x5   : > { %v719_v0 = vld [vmem:[%s852_s1 + $0x4] ss:$12 sps:$4 sm:$0xff] (!%p142_p2)   ;;  %v721_v1 = vld [vmem:[%s852_s1 + $0x8] ss:$12 sps:$4 sm:$0xff] (!%p142_p2)   ;;  %v742_v2 = vmov (!%p142_p2), 0   ;;  %s171_s20 = smul.u32 (!%p142_p2), 7, %s770_s13 }
   0x6   : > { %145 = sbr.rel (%p142_p2) target bundleno = 279 (0x117), region = 28  ;;  %320 = vmatprep.mubr.bf16.mxu0 (!%p142_p2), %v742_v2  ;;  %288 = vmatprep.subr.bf16.mxu0 (!%p142_p2), %v719_v0  ;;  %v722_v3 = vld [vmem:[%s852_s1] ss:$12 sps:$4 sm:$0xff] (!%p142_p2)   ;;  %v723_v4 = vld [vmem:[%s852_s1 + $0x1c] ss:$12 sps:$4 sm:$0xff] (!%p142_p2)   ;;  %vm278_vm0 = vcmask (!%p142_p2), 1041408  }
   0x7   : > { %692 = vmatprep.subr.bf16.mxu1 (!%p142_p2), %v721_v1  ;;  %289 = vmatpush1.bf16.msra.mxu0 (!%p142_p2), %v722_v3  ;;  %v725_v5 = vld [vmem:[%s852_s1 + $0x20] ss:$12 sps:$4 sm:$0xff] (!%p142_p2)   ;;  %v726_v6 = vld [vmem:[%s852_s1 + $0x18] ss:$12 sps:$4 sm:$0xff] (!%p142_p2)   ;;  %v205_v7 = vld [vmem:[%s852_s1 + $0x30] sm:$0x33] (!%p142_p2) }
   0x8   : > { %693 = vmatpush3.bf16.msra.mxu1 (!%p142_p2), %v721_v1  ;;  %290 = vmatprep.subr.bf16.mxu0 (!%p142_p2), %v723_v4  ;;  %v672_v8 = vcombine.high (!%p142_p2), %v205_v7, %v205_v7  ;;  %v728_v9 = vld [vmem:[%s852_s1 + $0x38] ss:$0 sps:$4 sm:$0x33] (!%p142_p2)   ;;  %v671_v10 = vcombine.low (!%p142_p2), %v205_v7, %v205_v7  ;;  %p172_p3 = scmp.lt.s32.totalorder (!%p142_p2), %s171_s20, 13  ;;  %vm265_vm1 = vcmask (!%p142_p2), 293888   ;;  %vm537_vm2 = vcmask (!%p142_p2), 1040384  }
   0x9   : > { %694 = vmatprep.subr.bf16.mxu1 (!%p142_p2), %v725_v5  ;;  %v286_v12 = vsel (!%p142_p2), %vm278_vm0, %v728_v9, 0  ;;  %p184_p4 = scmp.lt.s32.totalorder (!%p142_p2), %s770_s13, 1 }
   0xa   : > { %v280_v11 = vsel (!%p142_p2), %vm278_vm0, %v671_v10, 0 }
   0xb   : > { %291 = vmatpush1.bf16.msra.mxu0 (!%p142_p2), %v726_v6 }
   0xc   : > { %695 = vmatpush3.bf16.msra.mxu1 (!%p142_p2), %v725_v5  ;;  %674 = vmatprep.subr.msk.bf16.mxu0 (!%p142_p2), %vm278_vm0, %v672_v8 }
   0xd   : > { %s856_s20 = smov (!%p172_p3, %s171_s20), 13  ;;  %706 = vmatprep.subr.msk.bf16.mxu1 %vm278_vm0, %v728_v9  ;;  %s858_s13 = smov (!%p184_p4, %s770_s13), 1 }
   0xe   : > { %s658_s4 = sshll.u32 %s856_s20, 2  ;;  %s707_s8 = smul.u32 24, %s856_s20 }
   0xf   : > { %s175_s7 = scalar_lea.vmem %s851_s0, %s658_s4  ;;  %293 = vmatpush1.bf16.msra.mxu0 %v280_v11  ;;  %s708_s14 = smul.u32 6, %s858_s13 }
  0x10   : > { %v730_v13 = vld [vmem:[%s175_s7] sm:$0xff]   ;;  %697 = vmatpush3.bf16.msra.mxu1 %v286_v12  ;;  %v731_v14 = vld [vmem:[%s175_s7 + $0x8] sm:$0xff]   ;;  %v732_v15 = vld [vmem:[%s175_s7 + $0x10] sm:$0xff]   ;;  %s817_s11 = scalar_lea.vmem %s853_s2, %s707_s8 }
  0x11   : > { %698 = vmatprep.mubr.msk.bf16.mxu1 %vm265_vm1, %v730_v13  ;;  %v733_v16 = vld [vmem:[%s175_s7 + $0x18] ss:$0 sps:$4 sm:$0xff]   ;;  %s188_s17 = scalar_lea.vmem %s854_s3, %s708_s14 }
  0x12   : > { %675 = vmatmul.mubr.msk.bf16.vlgmr.msra.gmra.mrb[0].mxu0 %vm265_vm1, %v730_v13 }
  0x13   : > { %699 = vmatmul.mubr.msk.bf16.vlgmr.msra.gmra.mrb[0].mxu1 %vm265_vm1, %v731_v14  ;;  %330 = vmatprep.mubr.bf16.mxu0 %v742_v2 }
  0x14   : > { %702 = vmatprep.mubr.msk.bf16.mxu1 %vm265_vm1, %v732_v15 }
  0x1a   : > { %676 = vmatmul.mubr.msk.bf16.gmra.mrb[4].mxu0 %vm265_vm1, %v731_v14 }
  0x1b   : > { %703 = vmatmul.mubr.msk.bf16.gmra.mrb[4].mxu1 %vm265_vm1, %v733_v16  ;;  %340 = vmatprep.mubr.bf16.mxu0 %v742_v2 }
  0x22   : > { %677 = vmatmul.mubr.msk.bf16.gmra.mrb[8].mxu0 %vm265_vm1, %v732_v15 }
  0x23   : > { %350 = vmatprep.mubr.bf16.mxu0 %v742_v2 }
  0x2a   : > { %678 = vmatmul.mubr.msk.bf16.gmra.mrb[12].mxu0 %vm265_vm1, %v733_v16 }
  0xe5   : > { %v322_v17 = vpop.f32.mrb[0].mxu0 }
  0xe6   : > { %v700_v18 = vpop.f32.mrb[0].mxu1  ;;  %423 = vst [vmem:[%s817_s11] sm:$0xff] %v322_v17  ;;  %v324_v19 = vpop.f32.mrb[1].mxu0  ;;  %v480_v21 = vmul.f32 %v322_v17, %v322_v17 }
  0xe7   : > { %431 = vst [vmem:[%s817_s11 + $0x40] sm:$0xff] %v700_v18  ;;  %v393_v20 = vpop.f32.mrb[1].mxu1  ;;  %424 = vst [vmem:[%s817_s11 + $0x8] sm:$0xff] %v324_v19  ;;  %v326_v23 = vpop.f32.mrb[2].mxu0  ;;  %v488_v25 = vmul.f32 %v700_v18, %v700_v18  ;;  %v481_v26 = vmul.f32 %v324_v19, %v324_v19 }
  0xe8   : > { %425 = vst [vmem:[%s817_s11 + $0x10] sm:$0xff] %v393_v20  ;;  %v482_v22 = vmul.f32 %v393_v20, %v393_v20  ;;  %v701_v24 = vpop.f32.mrb[2].mxu1  ;;  %426 = vst [vmem:[%s817_s11 + $0x18] sm:$0xff] %v326_v23  ;;  %v444_v27 = vadd.f32 %v326_v23, %v322_v17  ;;  %v483_v28 = vmul.f32 %v326_v23, %v326_v23  ;;  %v328_v29 = vpop.f32.mrb[3].mxu0 }
  0xe9   : > { %434 = vst [vmem:[%s817_s11 + $0x58] sm:$0xff] %v701_v24  ;;  %v396_v30 = vpop.f32.mrb[3].mxu1  ;;  %427 = vst [vmem:[%s817_s11 + $0x20] sm:$0xff] %v328_v29  ;;  %v456_v31 = vadd.f32 %v328_v29, %v324_v19  ;;  %v484_v32 = vmul.f32 %v328_v29, %v328_v29  ;;  %v491_v39 = vmul.f32 %v701_v24, %v701_v24 }
  0xea   : > { %428 = vst [vmem:[%s817_s11 + $0x28] sm:$0xff] %v396_v30  ;;  %v468_v33 = vadd.f32 %v396_v30, %v393_v20  ;;  %v485_v34 = vmul.f32 %v396_v30, %v396_v30  ;;  %v501_v35 = vadd.f32 %v483_v28, %v480_v21 }
  0xeb   : > { %v513_v36 = vadd.f32 %v484_v32, %v481_v26 }
  0xec   : > { %v469_v37 = vadd.f32 %v700_v18, %v468_v33  ;;  %v525_v38 = vadd.f32 %v485_v34, %v482_v22 }
  0xed   : > { %v332_v41 = vpop.f32.mrb[4].mxu0 }
  0xee   : > { %v526_v40 = vadd.f32 %v525_v38, %v488_v25  ;;  %v704_v42 = vpop.f32.mrb[4].mxu1  ;;  %v470_v43 = vadd.f32 %v701_v24, %v469_v37  ;;  %429 = vst [vmem:[%s817_s11 + $0x30] sm:$0xff] %v332_v41  ;;  %v445_v44 = vadd.f32 %v444_v27, %v332_v41  ;;  %v486_v45 = vmul.f32 %v332_v41, %v332_v41  ;;  %v334_v46 = vpop.f32.mrb[5].mxu0 }
  0xef   : > { %443 = vst [vmem:[%s817_s11 + $0xa0] sm:$0xff] %v704_v42  ;;  %v409_v47 = vpop.f32.mrb[5].mxu1  ;;  %430 = vst [vmem:[%s817_s11 + $0x38] sm:$0xff] %v334_v46  ;;  %v457_v48 = vadd.f32 %v456_v31, %v334_v46  ;;  %v487_v49 = vmul.f32 %v334_v46, %v334_v46  ;;  %v336_v52 = vpop.f32.mrb[6].mxu0  ;;  %v500_v0 = vmul.f32 %v704_v42, %v704_v42 }
  0xf0   : > { %437 = vst [vmem:[%s817_s11 + $0x70] sm:$0xff] %v409_v47  ;;  %v471_v50 = vadd.f32 %v470_v43, %v409_v47  ;;  %v494_v51 = vmul.f32 %v409_v47, %v409_v47  ;;  %v705_v53 = vpop.f32.mrb[6].mxu1  ;;  %v502_v54 = vadd.f32 %v501_v35, %v486_v45  ;;  %v527_v55 = vadd.f32 %v526_v40, %v491_v39  ;;  %v338_v58 = vpop.f32.mrb[7].mxu0 }
  0xf1   : > { %432 = vst [vmem:[%s817_s11 + $0x48] sm:$0xff] %v336_v52  ;;  %v446_v56 = vadd.f32 %v445_v44, %v336_v52  ;;  %v489_v57 = vmul.f32 %v336_v52, %v336_v52  ;;  %v412_v59 = vpop.f32.mrb[7].mxu1  ;;  %v514_v60 = vadd.f32 %v513_v36, %v487_v49  ;;  %433 = vst [vmem:[%s817_s11 + $0x50] sm:$0xff] %v338_v58 }
  0xf2   : > { %v458_v61 = vadd.f32 %v457_v48, %v338_v58  ;;  %v490_v62 = vmul.f32 %v338_v58, %v338_v58  ;;  %440 = vst [vmem:[%s817_s11 + $0x88] sm:$0xff] %v412_v59  ;;  %v472_v63 = vadd.f32 %v471_v50, %v412_v59  ;;  %v528_v1 = vadd.f32 %v527_v55, %v494_v51 }
  0xf3   : > { %v503_v2 = vadd.f32 %v502_v54, %v489_v57  ;;  %v497_v3 = vmul.f32 %v412_v59, %v412_v59  ;;  %v743_v57 = vmov 1983009808   ;;  %v548_v59 = vlaneseq }
  0xf4   : > { %v515_v4 = vadd.f32 %v514_v60, %v490_v62  ;;  %v473_v5 = vadd.f32 %v704_v42, %v472_v63  ;;  %v546_v58 = vunpack.c.l.s4 %v743_v57 }
  0xf5   : > { %v529_v6 = vadd.f32 %v528_v1, %v497_v3  ;;  %v342_v8 = vpop.f32.mrb[8].mxu0 }
  0xf6   : > { %v474_v7 = vrot.slane %v473_v5, 4  ;;  %435 = vst [vmem:[%s817_s11 + $0x60] sm:$0xff] %v342_v8  ;;  %v447_v10 = vadd.f32 %v446_v56, %v342_v8  ;;  %v492_v11 = vmul.f32 %v342_v8, %v342_v8  ;;  %v344_v12 = vpop.f32.mrb[9].mxu0 }
  0xf7   : > { %v530_v9 = vadd.f32 %v529_v6, %v500_v0  ;;  %436 = vst [vmem:[%s817_s11 + $0x68] sm:$0xff] %v344_v12  ;;  %v459_v14 = vadd.f32 %v458_v61, %v344_v12  ;;  %v493_v15 = vmul.f32 %v344_v12, %v344_v12  ;;  %v346_v16 = vpop.f32.mrb[10].mxu0 }
  0xf8   : > { %v475_v13 = vadd.f32 %v474_v7, %v473_v5  ;;  %v504_v18 = vadd.f32 %v503_v2, %v492_v11  ;;  %438 = vst [vmem:[%s817_s11 + $0x78] sm:$0xff] %v346_v16  ;;  %v448_v19 = vadd.f32 %v447_v10, %v346_v16  ;;  %v495_v20 = vmul.f32 %v346_v16, %v346_v16  ;;  %v348_v21 = vpop.f32.mrb[11].mxu0 }
  0xf9   : > { %v531_v17 = vrot.slane %v530_v9, 4  ;;  %v516_v23 = vadd.f32 %v515_v4, %v493_v15  ;;  %439 = vst [vmem:[%s817_s11 + $0x80] sm:$0xff] %v348_v21  ;;  %v460_v24 = vadd.f32 %v459_v14, %v348_v21  ;;  %v496_v25 = vmul.f32 %v348_v21, %v348_v21 }
  0xfa   : > { %v476_v22 = vrot.slane %v475_v13, 2  ;;  %v505_v27 = vadd.f32 %v504_v18, %v495_v20  ;;  %v547_v4 = vunpack.c.0.s8 %v546_v58  ;;  %v549_v5 = vshrl.u32 %v548_v59, 7 }
  0xfb   : > { %v532_v26 = vadd.f32 %v531_v17, %v530_v9  ;;  %v517_v29 = vadd.f32 %v516_v23, %v496_v25 }
  0xfc   : > { %v477_v28 = vadd.f32 %v476_v22, %v475_v13  ;;  %v550_v12 = vsub.s32 %v547_v4, %v549_v5 }
  0xfd   : > { %v533_v30 = vrot.slane %v532_v26, 2  ;;  %v352_v32 = vpop.f32.mrb[12].mxu0 }
  0xfe   : > { %v478_v31 = vrot.slane %v477_v28, 1  ;;  %441 = vst [vmem:[%s817_s11 + $0x90] sm:$0xff] %v352_v32  ;;  %v449_v34 = vadd.f32 %v448_v19, %v352_v32  ;;  %v498_v35 = vmul.f32 %v352_v32, %v352_v32  ;;  %v354_v36 = vpop.f32.mrb[13].mxu0 }
  0xff   : > { %v534_v33 = vadd.f32 %v533_v30, %v532_v26  ;;  %442 = vst [vmem:[%s817_s11 + $0x98] sm:$0xff] %v354_v36  ;;  %v461_v37 = vadd.f32 %v460_v24, %v354_v36  ;;  %v499_v38 = vmul.f32 %v354_v36, %v354_v36  ;;  %v356_v39 = vpop.f32.mrb[14].mxu0 }
 0x100   : > { %v479_v40 = vadd.f32 %v478_v31, %v477_v28  ;;  %v450_v42 = vrot.slane %v449_v34, 4  ;;  %v506_v43 = vadd.f32 %v505_v27, %v498_v35  ;;  %v357_v44 = vpop.f32.mrb[15].mxu0 }
 0x101   : > { %v535_v41 = vrot.slane %v534_v33, 1  ;;  %v462_v45 = vrot.slane %v461_v37, 4  ;;  %v518_v46 = vadd.f32 %v517_v29, %v499_v38 }
 0x102   : > { %v451_v48 = vadd.f32 %v450_v42, %v449_v34  ;;  %v507_v49 = vrot.slane %v506_v43, 4 }
 0x103   : > { %v536_v47 = vadd.f32 %v535_v41, %v534_v33  ;;  %v463_v50 = vadd.f32 %v462_v45, %v461_v37  ;;  %v519_v51 = vrot.slane %v518_v46, 4 }
 0x104   : > { %v452_v53 = vrot.slane %v451_v48, 2  ;;  %v508_v54 = vadd.f32 %v507_v49, %v506_v43 }
 0x105   : > { %v540_v52 = vsel %vm537_vm2, %v479_v40, %v536_v47  ;;  %v464_v55 = vrot.slane %v463_v50, 2  ;;  %v520_v56 = vadd.f32 %v519_v51, %v518_v46 }
 0x106   : > { %v453_v60 = vadd.f32 %v452_v53, %v451_v48  ;;  %v509_v61 = vrot.slane %v508_v54, 2  ;;  %v558_v16 = vrot.slane %v540_v52, %v550_v12 }
 0x107   : > { %v465_v62 = vadd.f32 %v464_v55, %v463_v50  ;;  %v521_v63 = vrot.slane %v520_v56, 2 }
 0x108   : > { %v454_v0 = vrot.slane %v453_v60, 1  ;;  %v510_v1 = vadd.f32 %v509_v61, %v508_v54 }
 0x109   : > { %v466_v2 = vrot.slane %v465_v62, 1  ;;  %v522_v3 = vadd.f32 %v521_v63, %v520_v56 }
 0x10a   : > { %v511_v6 = vrot.slane %v510_v1, 1  ;;  %v455_v8 = vadd.f32 %v454_v0, %v453_v60 }
 0x10b   : > { %v523_v7 = vrot.slane %v522_v3, 1  ;;  %v467_v10 = vadd.f32 %v466_v2, %v465_v62 }
 0x10c   : > { %v512_v9 = vadd.f32 %v511_v6, %v510_v1 }
 0x10d   : > { %v524_v11 = vadd.f32 %v523_v7, %v522_v3 }
 0x10e   : > { %v538_v13 = vsel %vm537_vm2, %v455_v8, %v512_v9 }
 0x10f   : > { %v539_v14 = vsel %vm537_vm2, %v467_v10, %v524_v11 }
 0x110   : > { %v544_v15 = vcombine.low %v538_v13, %v539_v14 }
 0x112   : > { %v551_v17 = vrot.slane %v544_v15, %v550_v12 }
 0x114   : > { %v559_v18 = vcombine.low %v551_v17, %v558_v16 }
 0x116   : > { %561 = vst [vmem:[%s188_s17] sm:$0x3f] %v559_v18 }
 0x117 PF: > { %s14_s12 = sadd.s32 1, %s740_s12  }
 0x118   : > { %p11_p5 = scmp.ge.s32.totalorder %s14_s12, 4  }
 0x11a   :  { %13 = sbr.rel (!%p11_p5) target bundleno = 1 (0x1), region = 70 }

// kernel: inception_b_forward.10
= control target key start
LH: loop header
LB: loop body
LE: loop exit
PB: predicated region body
PF: predicated region fallthrough
CT: control target
= control target key end

     0   :  { %s422_s12 = smov 0   ;;  %s548_s0 = inlined_call_operand.vmem [shape: f32[112,384], index: 0, kind: input, shape index: {}]   ;;  %s549_s1 = inlined_call_operand.vmem [shape: f32[1,384], index: 1, kind: input, shape index: {}]   ;;  %s550_s2 = inlined_call_operand.vmem [shape: f32[1,384], index: 2, kind: input, shape index: {}]   ;;  %s551_s3 = inlined_call_operand.vmem [shape: f32[112,384], index: 3, kind: output, shape index: {}]  }
   0x1 LB: > { %s376_s13 = sadd.s32 4294967295, %s400_s12   ;;  %p380_p0 = scmp.ge.s32.totalorder %s400_s12, 1  ;;  %s400_s12 = sphi %s422_s12, %s13_s12  }
   0x2   : > { %p139_p1 = scmp.lt.s32.totalorder %s400_s12, 3 }
   0x4   : > { %p140_p2 = pnand %p380_p0, %p139_p1 }
   0x5   : > { %s165_s14 = smul.u32 (!%p140_p2), 7, %s376_s13  ;;  %v202_v0 = vlaneseq (!%p140_p2)  ;;  %v200_v2 = vld [vmem:[%s549_s1] sm:$0x7] (!%p140_p2) }
   0x6   : > { %143 = sbr.rel (%p140_p2) target bundleno = 39 (0x27), region = 32  ;;  %v238_v6 = vld [vmem:[%s550_s2] sm:$0x7] (!%p140_p2) }
   0x7   : > { %p166_p3 = scmp.lt.s32.totalorder (!%p140_p2), %s165_s14, 13  ;;  %v203_v1 = vshrl.u32 (!%p140_p2), %v202_v0, 7 }
   0x9   : > { %v204_v3 = vsub.s32 (!%p140_p2), 0, %v203_v1  ;;  %v208_v4 = vsub.s32 (!%p140_p2), 1, %v203_v1  ;;  %v212_v5 = vsub.s32 (!%p140_p2), 2, %v203_v1 }
   0xb   : > { %v439_v7 = vrot.slane (!%p140_p2), %v200_v2, %v204_v3  ;;  %v441_v8 = vrot.slane (!%p140_p2), %v200_v2, %v208_v4  ;;  %v443_v9 = vrot.slane (!%p140_p2), %v200_v2, %v212_v5  ;;  %v450_v10 = vrot.slane (!%p140_p2), %v238_v6, %v204_v3 }
   0xc   : > { %v452_v11 = vrot.slane (!%p140_p2), %v238_v6, %v208_v4  ;;  %v454_v12 = vrot.slane (!%p140_p2), %v238_v6, %v212_v5 }
   0xd   : > { %s553_s14 = smov (!%p166_p3, %s165_s14), 13 }
   0xe   : > { %s385_s19 = smul.u32 24, %s553_s14 }
  0x10   : > { %s448_s22 = scalar_lea.vmem %s548_s0, %s385_s19  ;;  %s477_s25 = scalar_lea.vmem %s551_s3, %s385_s19 }
  0x11   : > { %v179_v13 = vld [vmem:[%s448_s22] sm:$0xff]  ;;  %v180_v14 = vld [vmem:[%s448_s22 + $0x8] sm:$0xff]  ;;  %v181_v15 = vld [vmem:[%s448_s22 + $0x10] sm:$0xff] }
  0x12   : > { %v217_v16 = vmul.f32 %v439_v7, %v179_v13  ;;  %v218_v17 = vmul.f32 %v441_v8, %v180_v14  ;;  %v219_v18 = vmul.f32 %v443_v9, %v181_v15  ;;  %v182_v19 = vld [vmem:[%s448_s22 + $0x18] sm:$0xff]  ;;  %v183_v20 = vld [vmem:[%s448_s22 + $0x20] sm:$0xff]  ;;  %v184_v21 = vld [vmem:[%s448_s22 + $0x28] sm:$0xff] }
  0x13   : > { %v220_v22 = vmul.f32 %v439_v7, %v182_v19  ;;  %v221_v23 = vmul.f32 %v441_v8, %v183_v20  ;;  %v222_v24 = vmul.f32 %v443_v9, %v184_v21  ;;  %v185_v25 = vld [vmem:[%s448_s22 + $0x30] sm:$0xff]  ;;  %v186_v26 = vld [vmem:[%s448_s22 + $0x38] sm:$0xff]  ;;  %v187_v35 = vld [vmem:[%s448_s22 + $0x40] sm:$0xff] }
  0x14   : > { %v255_v27 = vadd.f32 %v450_v10, %v217_v16  ;;  %v256_v28 = vadd.f32 %v452_v11, %v218_v17  ;;  %v257_v29 = vadd.f32 %v454_v12, %v219_v18  ;;  %v223_v30 = vmul.f32 %v439_v7, %v185_v25  ;;  %v188_v36 = vld [vmem:[%s448_s22 + $0x48] sm:$0xff]  ;;  %v189_v37 = vld [vmem:[%s448_s22 + $0x50] sm:$0xff]  ;;  %v190_v42 = vld [vmem:[%s448_s22 + $0x58] sm:$0xff] }
  0x15   : > { %v258_v31 = vadd.f32 %v450_v10, %v220_v22  ;;  %v259_v32 = vadd.f32 %v452_v11, %v221_v23  ;;  %v260_v33 = vadd.f32 %v454_v12, %v222_v24  ;;  %v224_v34 = vmul.f32 %v441_v8, %v186_v26  ;;  %v191_v43 = vld [vmem:[%s448_s22 + $0x60] sm:$0xff]  ;;  %v192_v44 = vld [vmem:[%s448_s22 + $0x68] sm:$0xff]  ;;  %v193_v49 = vld [vmem:[%s448_s22 + $0x70] sm:$0xff] }
  0x16   : > { %v276_v38 = vmax.f32 %v255_v27, 0.0  ;;  %v277_v39 = vmax.f32 %v256_v28, 0.0  ;;  %v278_v40 = vmax.f32 %v257_v29, 0.0  ;;  %v261_v41 = vadd.f32 %v450_v10, %v223_v30  ;;  %v194_v54 = vld [vmem:[%s448_s22 + $0x78] sm:$0xff]  ;;  %v195_v3 = vld [vmem:[%s448_s22 + $0x80] sm:$0xff]  ;;  %v196_v4 = vld [vmem:[%s448_s22 + $0x88] sm:$0xff] }
  0x17   : > { %v279_v45 = vmax.f32 %v258_v31, 0.0  ;;  %v280_v46 = vmax.f32 %v259_v32, 0.0  ;;  %v281_v47 = vmax.f32 %v260_v33, 0.0  ;;  %v262_v48 = vadd.f32 %v452_v11, %v224_v34  ;;  %v197_v5 = vld [vmem:[%s448_s22 + $0x90] sm:$0xff]  ;;  %v198_v16 = vld [vmem:[%s448_s22 + $0x98] sm:$0xff]  ;;  %v199_v17 = vld [vmem:[%s448_s22 + $0xa0] sm:$0xff] }
  0x18   : > { %297 = vst [vmem:[%s477_s25] sm:$0xff] %v276_v38  ;;  %298 = vst [vmem:[%s477_s25 + $0x8] sm:$0xff] %v277_v39  ;;  %v282_v50 = vmax.f32 %v261_v41, 0.0  ;;  %v225_v51 = vmul.f32 %v443_v9, %v187_v35  ;;  %v226_v52 = vmul.f32 %v439_v7, %v188_v36  ;;  %v227_v53 = vmul.f32 %v441_v8, %v189_v37 }
  0x19   : > { %299 = vst [vmem:[%s477_s25 + $0x10] sm:$0xff] %v278_v40  ;;  %300 = vst [vmem:[%s477_s25 + $0x18] sm:$0xff] %v279_v45  ;;  %v283_v55 = vmax.f32 %v262_v48, 0.0  ;;  %v228_v56 = vmul.f32 %v443_v9, %v190_v42  ;;  %v229_v57 = vmul.f32 %v439_v7, %v191_v43  ;;  %v230_v58 = vmul.f32 %v441_v8, %v192_v44 }
  0x1a   : > { %301 = vst [vmem:[%s477_s25 + $0x20] sm:$0xff] %v280_v46  ;;  %302 = vst [vmem:[%s477_s25 + $0x28] sm:$0xff] %v281_v47  ;;  %v263_v59 = vadd.f32 %v454_v12, %v225_v51  ;;  %v264_v60 = vadd.f32 %v450_v10, %v226_v52  ;;  %v265_v61 = vadd.f32 %v452_v11, %v227_v53 }
  0x1b   : > { %303 = vst [vmem:[%s477_s25 + $0x30] sm:$0xff] %v282_v50  ;;  %v231_v62 = vmul.f32 %v443_v9, %v193_v49  ;;  %304 = vst [vmem:[%s477_s25 + $0x38] sm:$0xff] %v283_v55  ;;  %v266_v63 = vadd.f32 %v454_v12, %v228_v56  ;;  %v267_v0 = vadd.f32 %v450_v10, %v229_v57 }
  0x1c   : > { %v268_v1 = vadd.f32 %v452_v11, %v230_v58  ;;  %v232_v2 = vmul.f32 %v439_v7, %v194_v54  ;;  %v284_v6 = vmax.f32 %v263_v59, 0.0  ;;  %v285_v13 = vmax.f32 %v264_v60, 0.0 }
  0x1d   : > { %v286_v14 = vmax.f32 %v265_v61, 0.0  ;;  %v269_v15 = vadd.f32 %v454_v12, %v231_v62  ;;  %v287_v18 = vmax.f32 %v266_v63, 0.0  ;;  %v288_v19 = vmax.f32 %v267_v0, 0.0 }
  0x1e   : > { %v289_v20 = vmax.f32 %v268_v1, 0.0  ;;  %v270_v21 = vadd.f32 %v450_v10, %v232_v2  ;;  %305 = vst [vmem:[%s477_s25 + $0x40] sm:$0xff] %v284_v6  ;;  %306 = vst [vmem:[%s477_s25 + $0x48] sm:$0xff] %v285_v13  ;;  %v233_v23 = vmul.f32 %v441_v8, %v195_v3  ;;  %v234_v24 = vmul.f32 %v443_v9, %v196_v4 }
  0x1f   : > { %307 = vst [vmem:[%s477_s25 + $0x50] sm:$0xff] %v286_v14  ;;  %v290_v22 = vmax.f32 %v269_v15, 0.0  ;;  %v235_v25 = vmul.f32 %v439_v7, %v197_v5  ;;  %308 = vst [vmem:[%s477_s25 + $0x58] sm:$0xff] %v287_v18  ;;  %v236_v27 = vmul.f32 %v441_v8, %v198_v16  ;;  %v237_v28 = vmul.f32 %v443_v9, %v199_v17 }
  0x20   : > { %309 = vst [vmem:[%s477_s25 + $0x60] sm:$0xff] %v288_v19  ;;  %310 = vst [vmem:[%s477_s25 + $0x68] sm:$0xff] %v289_v20  ;;  %v291_v26 = vmax.f32 %v270_v21, 0.0  ;;  %v271_v29 = vadd.f32 %v452_v11, %v233_v23  ;;  %v272_v30 = vadd.f32 %v454_v12, %v234_v24 }
  0x21   : > { %311 = vst [vmem:[%s477_s25 + $0x70] sm:$0xff] %v290_v22  ;;  %v273_v7 = vadd.f32 %v450_v10, %v235_v25  ;;  %v274_v31 = vadd.f32 %v452_v11, %v236_v27  ;;  %v275_v32 = vadd.f32 %v454_v12, %v237_v28 }
  0x22   : > { %312 = vst [vmem:[%s477_s25 + $0x78] sm:$0xff] %v291_v26  ;;  %v292_v33 = vmax.f32 %v271_v29, 0.0  ;;  %v293_v34 = vmax.f32 %v272_v30, 0.0 }
  0x23   : > { %v294_v8 = vmax.f32 %v273_v7, 0.0  ;;  %v295_v35 = vmax.f32 %v274_v31, 0.0  ;;  %v296_v36 = vmax.f32 %v275_v32, 0.0 }
  0x24   : > { %313 = vst [vmem:[%s477_s25 + $0x80] sm:$0xff] %v292_v33  ;;  %314 = vst [vmem:[%s477_s25 + $0x88] sm:$0xff] %v293_v34 }
  0x25   : > { %315 = vst [vmem:[%s477_s25 + $0x90] sm:$0xff] %v294_v8  ;;  %316 = vst [vmem:[%s477_s25 + $0x98] sm:$0xff] %v295_v35 }
  0x26   : > { %317 = vst [vmem:[%s477_s25 + $0xa0] sm:$0xff] %v296_v36 }
  0x27 PF: > { %s13_s12 = sadd.s32 1, %s400_s12  }
  0x28   : > { %p10_p4 = scmp.ge.s32.totalorder %s13_s12, 4  }
  0x2a   :  { %12 = sbr.rel (!%p10_p4) target bundleno = 1 (0x1), region = 62 }

// kernel: inception_b_forward.11
= control target key start
LH: loop header
LB: loop body
LE: loop exit
PB: predicated region body
PF: predicated region fallthrough
CT: control target
= control target key end

     0   :  { %s2408_s6 = smov 0   ;;  %s6570_s0 = inlined_call_operand.vmem [shape: bf16[112,9,4], index: 0, kind: input, shape index: {}]   ;;  %s6571_s1 = inlined_call_operand.vmem [shape: f32[112,4], index: 1, kind: output, shape index: {}]  }
   0x1 LB: > { %s2371_s7 = sadd.s32 4294967295, %s2396_s6   ;;  %p2375_p0 = scmp.ge.s32.totalorder %s2396_s6, 1  ;;  %s2396_s6 = sphi %s2408_s6, %s11_s6  }
   0x2   : > { %p89_p1 = scmp.lt.s32.totalorder %s2396_s6, 3 }
   0x4   : > { %p90_p2 = pnand %p2375_p0, %p89_p1 }
   0x6   : > { %93 = sbr.rel (%p90_p2) target bundleno = 561 (0x231), region = 24 }
   0xd   : > { %s110_s8 = smul.u32 56, %s2371_s7  ;;  %vm2196_vm0 = vcmask 1041409   ;;  %vm2199_vm1 = vcmask 1042434   ;;  %vm2202_vm2 = vcmask 1043459   ;;  %vm2205_vm3 = vcmask 1044484  }
   0xe   : > { %vm2208_vm4 = vcmask 1045509   ;;  %vm2211_vm5 = vcmask 1046534   ;;  %vm2214_vm6 = vcmask 1047559   ;;  %s6469_s13 = smul.u32 7, %s2371_s7  ;;  %vm2307_vm7 = vcmask 31744  }
   0xf   : > { %p111_p3 = scmp.lt.s32.totalorder %s110_s8, 111 }
  0x10   : > { %p118_p4 = scmp.lt.s32.totalorder %s6469_s13, 13 }
  0x11   : > { %s9329_s8 = smov (!%p111_p3, %s110_s8), 111 }
  0x12   : > { %s2381_s9 = sshll.u32 %s9329_s8, 3  ;;  %s9331_s13 = smov (!%p118_p4, %s6469_s13), 13 }
  0x13   : > { %s2421_s12 = scalar_lea.vmem %s6570_s0, %s2381_s9  ;;  %s2378_s14 = sshll.u32 %s9331_s13, 3 }
  0x14   : > { %v2424_v0 = vld [vmem:[%s2421_s12] sm:$0x1]  ;;  %v2427_v1 = vld [vmem:[%s2421_s12 + $0x8] sm:$0x1]  ;;  %v2430_v2 = vld [vmem:[%s2421_s12 + $0x10] sm:$0x1]  ;;  %s121_s17 = scalar_lea.vmem %s6571_s1, %s2378_s14 }
  0x15   : > { %7164 = vst [vmem:[#allocation2_spill] sm:$0xff] %v2424_v0  ;;  %7165 = vst [vmem:[#allocation3_spill] sm:$0xff] %v2427_v1  ;;  %v2433_v3 = vld [vmem:[%s2421_s12 + $0x18] sm:$0x1]  ;;  %v2436_v4 = vld [vmem:[%s2421_s12 + $0x20] sm:$0x1]  ;;  %v6583_v18 = vunpack.c.l.bf16 %v2424_v0  ;;  %v7218_v24 = vunpack.c.l.bf16 %v2427_v1 }
  0x16   : > { %7166 = vst [vmem:[#allocation4_spill] sm:$0xff] %v2430_v2  ;;  %7167 = vst [vmem:[#allocation5_spill] sm:$0xff] %v2433_v3  ;;  %v2439_v5 = vld [vmem:[%s2421_s12 + $0x28] sm:$0x1]  ;;  %v2442_v6 = vld [vmem:[%s2421_s12 + $0x30] sm:$0x1]  ;;  %v7221_v38 = vunpack.c.l.bf16 %v2436_v4 }
  0x17   : > { %7168 = vst [vmem:[#allocation6_spill] sm:$0xff] %v2436_v4  ;;  %7169 = vst [vmem:[#allocation7_spill] sm:$0xff] %v2439_v5  ;;  %v2445_v7 = vld [vmem:[%s2421_s12 + $0x38] sm:$0x1]  ;;  %v2448_v8 = vld [vmem:[%s2421_s12 + $0x40] sm:$0x1]  ;;  %v7222_v19 = vunpack.c.l.bf16 %v2439_v5 }
  0x18   : > { %7170 = vst [vmem:[#allocation8_spill] sm:$0xff] %v2442_v6  ;;  %7171 = vst [vmem:[#allocation9_spill] sm:$0xff] %v2445_v7  ;;  %v2451_v9 = vld [vmem:[%s2421_s12 + $0x48] sm:$0x1]  ;;  %v2454_v10 = vld [vmem:[%s2421_s12 + $0x50] sm:$0x1]  ;;  %v7224_v25 = vunpack.c.l.bf16 %v2445_v7 }
  0x19   : > { %7172 = vst [vmem:[#allocation10_spill] sm:$0xff] %v2448_v8  ;;  %7173 = vst [vmem:[#allocation11_spill] sm:$0xff] %v2451_v9  ;;  %v2457_v11 = vld [vmem:[%s2421_s12 + $0x58] sm:$0x1]  ;;  %v2460_v12 = vld [vmem:[%s2421_s12 + $0x60] sm:$0x1] }
  0x1a   : > { %7174 = vst [vmem:[#allocation12_spill] sm:$0xff] %v2454_v10  ;;  %7175 = vst [vmem:[#allocation13_spill] sm:$0xff] %v2457_v11  ;;  %v2463_v13 = vld [vmem:[%s2421_s12 + $0x68] sm:$0x1]  ;;  %v2466_v14 = vld [vmem:[%s2421_s12 + $0x70] sm:$0x1] }
  0x1b   : > { %7176 = vst [vmem:[#allocation14_spill] sm:$0xff] %v2460_v12  ;;  %7177 = vst [vmem:[#allocation15_spill] sm:$0xff] %v2463_v13  ;;  %v2469_v15 = vld [vmem:[%s2421_s12 + $0x78] sm:$0x1]  ;;  %v2472_v16 = vld [vmem:[%s2421_s12 + $0x80] sm:$0x1] }
  0x1c   : > { %7178 = vst [vmem:[#allocation16_spill] sm:$0xff] %v2466_v14  ;;  %7179 = vst [vmem:[#allocation17_spill] sm:$0xff] %v2469_v15  ;;  %v2475_v17 = vld [vmem:[%s2421_s12 + $0x88] sm:$0x1]  ;;  %v2481_v21 = vld [vmem:[%s2421_s12 + $0x90] sm:$0x1] }
  0x1d   : > { %7180 = vst [vmem:[#allocation18_spill] sm:$0xff] %v2472_v16  ;;  %7181 = vst [vmem:[#allocation19_spill] sm:$0xff] %v2475_v17  ;;  %v2484_v22 = vld [vmem:[%s2421_s12 + $0x98] sm:$0x1]  ;;  %v2487_v23 = vld [vmem:[%s2421_s12 + $0xa0] sm:$0x1] }
  0x1e   : > { %7182 = vst [vmem:[#allocation20_spill] sm:$0xff] %v2481_v21  ;;  %7183 = vst [vmem:[#allocation21_spill] sm:$0xff] %v2484_v22  ;;  %v2494_v28 = vld [vmem:[%s2421_s12 + $0xa8] sm:$0x1]  ;;  %v2497_v29 = vld [vmem:[%s2421_s12 + $0xb0] sm:$0x1] }
  0x1f   : > { %7184 = vst [vmem:[#allocation22_spill] sm:$0xff] %v2487_v23  ;;  %7185 = vst [vmem:[#allocation23_spill] sm:$0xff] %v2494_v28  ;;  %v2500_v30 = vld [vmem:[%s2421_s12 + $0xb8] sm:$0x1]  ;;  %v2507_v35 = vld [vmem:[%s2421_s12 + $0xc0] sm:$0x1] }
  0x20   : > { %7186 = vst [vmem:[#allocation24_spill] sm:$0xff] %v2497_v29  ;;  %7187 = vst [vmem:[#allocation25_spill] sm:$0xff] %v2500_v30  ;;  %v2510_v36 = vld [vmem:[%s2421_s12 + $0xc8] sm:$0x1]  ;;  %v2513_v37 = vld [vmem:[%s2421_s12 + $0xd0] sm:$0x1] }
  0x21   : > { %7188 = vst [vmem:[#allocation26_spill] sm:$0xff] %v2507_v35  ;;  %7189 = vst [vmem:[#allocation27_spill] sm:$0xff] %v2510_v36  ;;  %v2520_v42 = vld [vmem:[%s2421_s12 + $0xd8] sm:$0x1]  ;;  %v2523_v43 = vld [vmem:[%s2421_s12 + $0xe0] sm:$0x1] }
  0x22   : > { %7190 = vst [vmem:[#allocation28_spill] sm:$0xff] %v2513_v37  ;;  %7191 = vst [vmem:[#allocation29_spill] sm:$0xff] %v2520_v42  ;;  %v2526_v44 = vld [vmem:[%s2421_s12 + $0xe8] sm:$0x1]  ;;  %v2533_v49 = vld [vmem:[%s2421_s12 + $0xf0] sm:$0x1] }
  0x23   : > { %7192 = vst [vmem:[#allocation30_spill] sm:$0xff] %v2523_v43  ;;  %7193 = vst [vmem:[#allocation31_spill] sm:$0xff] %v2526_v44  ;;  %v2536_v50 = vld [vmem:[%s2421_s12 + $0xf8] sm:$0x1]  ;;  %v2539_v51 = vld [vmem:[%s2421_s12 + $0x100] sm:$0x1] }
  0x24   : > { %7194 = vst [vmem:[#allocation32_spill] sm:$0xff] %v2533_v49  ;;  %7195 = vst [vmem:[#allocation33_spill] sm:$0xff] %v2536_v50  ;;  %v2546_v56 = vld [vmem:[%s2421_s12 + $0x108] sm:$0x1]  ;;  %v2549_v57 = vld [vmem:[%s2421_s12 + $0x110] sm:$0x1] }
  0x25   : > { %7196 = vst [vmem:[#allocation34_spill] sm:$0xff] %v2539_v51  ;;  %7197 = vst [vmem:[#allocation35_spill] sm:$0xff] %v2546_v56  ;;  %v2552_v58 = vld [vmem:[%s2421_s12 + $0x118] sm:$0x1]  ;;  %v2559_v63 = vld [vmem:[%s2421_s12 + $0x120] sm:$0x1] }
  0x26   : > { %7198 = vst [vmem:[#allocation36_spill] sm:$0xff] %v2549_v57  ;;  %7199 = vst [vmem:[#allocation37_spill] sm:$0xff] %v2552_v58  ;;  %v2562_v55 = vld [vmem:[%s2421_s12 + $0x128] sm:$0x1]  ;;  %v2565_v54 = vld [vmem:[%s2421_s12 + $0x130] sm:$0x1] }
  0x27   : > { %7200 = vst [vmem:[#allocation38_spill] sm:$0xff] %v2559_v63  ;;  %7201 = vst [vmem:[#allocation39_spill] sm:$0xff] %v2565_v54  ;;  %v2572_v60 = vld [vmem:[%s2421_s12 + $0x138] sm:$0x1]  ;;  %v2575_v62 = vld [vmem:[%s2421_s12 + $0x140] sm:$0x1] }
  0x28   : > { %7202 = vst [vmem:[#allocation40_spill] sm:$0xff] %v2572_v60  ;;  %7203 = vst [vmem:[#allocation41_spill] sm:$0xff] %v2575_v62  ;;  %v2578_v48 = vld [vmem:[%s2421_s12 + $0x148] sm:$0x1]  ;;  %v2585_v52 = vld [vmem:[%s2421_s12 + $0x150] sm:$0x1] }
  0x29   : > { %7204 = vst [vmem:[#allocation42_spill] sm:$0xff] %v2585_v52  ;;  %v2588_v61 = vld [vmem:[%s2421_s12 + $0x158] sm:$0x1]  ;;  %v2591_v45 = vld [vmem:[%s2421_s12 + $0x160] sm:$0x1]  ;;  %v292_v32 = vrot.slane %v7218_v24, 1  ;;  %v7225_v24 = vunpack.c.l.bf16 %v2448_v8 }
  0x2a   : > { %7205 = vst [vmem:[#allocation43_spill] sm:$0xff] %v2588_v61  ;;  %7206 = vst [vmem:[#allocation44_spill] sm:$0xff] %v2591_v45  ;;  %v2598_v46 = vld [vmem:[%s2421_s12 + $0x168] sm:$0x1]  ;;  %v2601_v59 = vld [vmem:[%s2421_s12 + $0x170] sm:$0x1] }
  0x2b   : > { %7207 = vst [vmem:[#allocation45_spill] sm:$0xff] %v2598_v46  ;;  %7208 = vst [vmem:[#allocation46_spill] sm:$0xff] %v2601_v59  ;;  %v2604_v39 = vld [vmem:[%s2421_s12 + $0x178] sm:$0x1]  ;;  %v2611_v40 = vld [vmem:[%s2421_s12 + $0x180] sm:$0x1] }
  0x2c   : > { %7209 = vst [vmem:[#allocation47_spill] sm:$0xff] %v2604_v39  ;;  %7210 = vst [vmem:[#allocation48_spill] sm:$0xff] %v2611_v40  ;;  %v2614_v53 = vld [vmem:[%s2421_s12 + $0x188] sm:$0x1]  ;;  %v2617_v33 = vld [vmem:[%s2421_s12 + $0x190] sm:$0x1]  ;;  %v7220_v40 = vunpack.c.l.bf16 %v2433_v3 }
  0x2d   : > { %7211 = vst [vmem:[#allocation49_spill] sm:$0xff] %v2614_v53  ;;  %7212 = vst [vmem:[#allocation50_spill] sm:$0xff] %v2617_v33  ;;  %v2624_v27 = vld [vmem:[%s2421_s12 + $0x198] sm:$0x1]  ;;  %v2627_v41 = vld [vmem:[%s2421_s12 + $0x1a0] sm:$0x1]  ;;  %v7219_v33 = vunpack.c.l.bf16 %v2430_v2 }
  0x2e   : > { %7213 = vst [vmem:[#allocation51_spill] sm:$0xff] %v2624_v27  ;;  %7214 = vst [vmem:[#allocation52_spill] sm:$0xff] %v2627_v41  ;;  %v2630_v47 = vld [vmem:[%s2421_s12 + $0x1a8] sm:$0x1]  ;;  %v2637_v20 = vld [vmem:[%s2421_s12 + $0x1b0] sm:$0x1] }
  0x2f   : > { %7215 = vst [vmem:[#allocation53_spill] sm:$0xff] %v2630_v47  ;;  %7216 = vst [vmem:[#allocation54_spill] sm:$0xff] %v2637_v20  ;;  %v2640_v31 = vld [vmem:[%s2421_s12 + $0x1b8] sm:$0x1]  ;;  %v291_v59 = vrot.slane %v6583_v18, 1  ;;  %v293_v53 = vrot.slane %v7219_v33, 1  ;;  %v7223_v18 = vunpack.c.l.bf16 %v2442_v6  ;;  %v7226_v33 = vunpack.c.l.bf16 %v2451_v9 }
  0x30   : > { %7217 = vst [vmem:[#allocation55_spill] sm:$0xff] %v2640_v31  ;;  %v294_v34 = vrot.slane %v7220_v40, 1  ;;  %v295_v41 = vrot.slane %v7221_v38, 1  ;;  %v296_v0 = vrot.slane %v7222_v19, 1  ;;  %v298_v31 = vrot.slane %v7224_v25, 1 }
  0x31   : > { %v297_v26 = vrot.slane %v7223_v18, 1  ;;  %v299_v1 = vrot.slane %v7225_v24, 1  ;;  %v300_v2 = vrot.slane %v7226_v33, 1  ;;  %v7227_v40 = vunpack.c.l.bf16 %v2454_v10 }
  0x32   : > { %v7228_v38 = vunpack.c.l.bf16 %v2457_v11  ;;  %v7229_v19 = vunpack.c.l.bf16 %v2460_v12  ;;  %v7230_v18 = vunpack.c.l.bf16 %v2463_v13  ;;  %v7231_v25 = vunpack.c.l.bf16 %v2466_v14 }
  0x33   : > { %v301_v3 = vrot.slane %v7227_v40, 1  ;;  %v7232_v24 = vunpack.c.l.bf16 %v2469_v15  ;;  %v7233_v33 = vunpack.c.l.bf16 %v2472_v16  ;;  %v7234_v40 = vunpack.c.l.bf16 %v2475_v17 }
  0x34   : > { %v302_v4 = vrot.slane %v7228_v38, 1  ;;  %v303_v5 = vrot.slane %v7229_v19, 1  ;;  %v304_v6 = vrot.slane %v7230_v18, 1  ;;  %v305_v7 = vrot.slane %v7231_v25, 1 }
  0x35   : > { %v306_v8 = vrot.slane %v7232_v24, 1  ;;  %v307_v9 = vrot.slane %v7233_v33, 1  ;;  %v308_v10 = vrot.slane %v7234_v40, 1  ;;  %v7235_v38 = vunpack.c.l.bf16 %v2481_v21 }
  0x36   : > { %v7236_v19 = vunpack.c.l.bf16 %v2484_v22  ;;  %v7237_v18 = vunpack.c.l.bf16 %v2487_v23  ;;  %v7238_v25 = vunpack.c.l.bf16 %v2494_v28  ;;  %v7239_v24 = vunpack.c.l.bf16 %v2497_v29 }
  0x37   : > { %v309_v11 = vrot.slane %v7235_v38, 1  ;;  %v7240_v33 = vunpack.c.l.bf16 %v2500_v30  ;;  %v7241_v40 = vunpack.c.l.bf16 %v2507_v35  ;;  %v7242_v38 = vunpack.c.l.bf16 %v2510_v36 }
  0x38   : > { %v310_v12 = vrot.slane %v7236_v19, 1  ;;  %v311_v13 = vrot.slane %v7237_v18, 1  ;;  %v312_v14 = vrot.slane %v7238_v25, 1  ;;  %v313_v15 = vrot.slane %v7239_v24, 1 }
  0x39   : > { %v314_v16 = vrot.slane %v7240_v33, 1  ;;  %v315_v17 = vrot.slane %v7241_v40, 1  ;;  %v316_v21 = vrot.slane %v7242_v38, 1  ;;  %v7243_v19 = vunpack.c.l.bf16 %v2513_v37 }
  0x3a   : > { %v7244_v18 = vunpack.c.l.bf16 %v2520_v42  ;;  %v7245_v25 = vunpack.c.l.bf16 %v2523_v43  ;;  %v7246_v24 = vunpack.c.l.bf16 %v2526_v44  ;;  %v7247_v33 = vunpack.c.l.bf16 %v2533_v49 }
  0x3b   : > { %v317_v22 = vrot.slane %v7243_v19, 1  ;;  %v7248_v40 = vunpack.c.l.bf16 %v2536_v50  ;;  %v7249_v38 = vunpack.c.l.bf16 %v2539_v51  ;;  %v7250_v19 = vunpack.c.l.bf16 %v2546_v56 }
  0x3c   : > { %v318_v23 = vrot.slane %v7244_v18, 1  ;;  %v319_v28 = vrot.slane %v7245_v25, 1  ;;  %v320_v29 = vrot.slane %v7246_v24, 1  ;;  %v321_v30 = vrot.slane %v7247_v33, 1 }
  0x3d   : > { %v322_v35 = vrot.slane %v7248_v40, 1  ;;  %v323_v36 = vrot.slane %v7249_v38, 1  ;;  %v324_v37 = vrot.slane %v7250_v19, 1  ;;  %v7251_v18 = vunpack.c.l.bf16 %v2549_v57 }
  0x3e   : > { %v7252_v25 = vunpack.c.l.bf16 %v2552_v58  ;;  %v7253_v24 = vunpack.c.l.bf16 %v2559_v63  ;;  %v7254_v33 = vunpack.c.l.bf16 %v2562_v55  ;;  %v7255_v40 = vunpack.c.l.bf16 %v2565_v54 }
  0x3f   : > { %v325_v42 = vrot.slane %v7251_v18, 1  ;;  %v7256_v38 = vunpack.c.l.bf16 %v2572_v60  ;;  %v7257_v19 = vunpack.c.l.bf16 %v2575_v62  ;;  %v7258_v18 = vunpack.c.l.bf16 %v2578_v48  ;;  %v7265_v62 = vld [vmem:[#allocation46_spill] sm:$0xff] }
  0x40   : > { %v326_v43 = vrot.slane %v7252_v25, 1  ;;  %v327_v44 = vrot.slane %v7253_v24, 1  ;;  %v328_v49 = vrot.slane %v7254_v33, 1  ;;  %v329_v50 = vrot.slane %v7255_v40, 1 }
  0x41   : > { %v330_v51 = vrot.slane %v7256_v38, 1  ;;  %v331_v56 = vrot.slane %v7257_v19, 1  ;;  %v332_v57 = vrot.slane %v7258_v18, 1  ;;  %v7259_v25 = vunpack.c.l.bf16 %v2585_v52 }
  0x42   : > { %v7260_v24 = vunpack.c.l.bf16 %v2588_v61  ;;  %v7262_v33 = vunpack.c.l.bf16 %v2591_v45  ;;  %v7264_v40 = vunpack.c.l.bf16 %v2598_v46  ;;  %v7266_v19 = vunpack.c.l.bf16 %v7265_v62 }
  0x43   : > { %v333_v58 = vrot.slane %v7259_v25, 1  ;;  %v7268_v18 = vunpack.c.l.bf16 %v2604_v39  ;;  %v7269_v25 = vld [vmem:[#allocation48_spill] sm:$0xff]  ;;  %v7277_v62 = vunpack.c.l.bf16 %v2624_v27 }
  0x44   : > { %v2735_v63 = vrot.slane %v7260_v24, 1  ;;  %v2739_v54 = vrot.slane %v7262_v33, 1  ;;  %v2743_v38 = vrot.slane %v7264_v40, 1  ;;  %v2747_v60 = vrot.slane %v7266_v19, 1 }
  0x45   : > { %v2751_v52 = vrot.slane %v7268_v18, 1  ;;  %v7270_v61 = vunpack.c.l.bf16 %v7269_v25  ;;  %v2767_v19 = vrot.slane %v7277_v62, 1  ;;  %v7282_v25 = vunpack.c.l.bf16 %v2630_v47 }
  0x46   : > { %7261 = vst [vmem:[#allocation56_spill] sm:$0xff] %v2735_v63  ;;  %7263 = vst [vmem:[#allocation57_spill] sm:$0xff] %v2739_v54  ;;  %v7271_v63 = vld [vmem:[#allocation49_spill] sm:$0xff]  ;;  %v7274_v54 = vld [vmem:[#allocation50_spill] sm:$0xff] }
  0x47   : > { %7267 = vst [vmem:[#allocation58_spill] sm:$0xff] %v2747_v60  ;;  %v2755_v24 = vrot.slane %v7270_v61, 1  ;;  %v7272_v45 = vunpack.c.l.bf16 %v7271_v63  ;;  %v7275_v46 = vunpack.c.l.bf16 %v7274_v54  ;;  %7278 = vst [vmem:[#allocation61_spill] sm:$0xff] %v2767_v19  ;;  %v7279_v60 = vld [vmem:[#allocation52_spill] sm:$0xff]  ;;  %v2775_v61 = vrot.slane %v7282_v25, 1  ;;  %v7292_v19 = vld [vmem:[#allocation3_spill] sm:$0xff] }
  0x48   : > { %v7280_v39 = vunpack.c.l.bf16 %v7279_v60  ;;  %v7284_v63 = vunpack.c.l.bf16 %v2637_v20  ;;  %v7293_v60 = vunpack.c.l.bf16 %v7292_v19 }
  0x49   : > { %v2759_v33 = vrot.slane %v7272_v45, 1  ;;  %v2763_v40 = vrot.slane %v7275_v46, 1  ;;  %7283 = vst [vmem:[#allocation63_spill] sm:$0xff] %v2775_v61  ;;  %v7298_v61 = vld [vmem:[#allocation5_spill] sm:$0xff] }
  0x4a   : > { %v2771_v18 = vrot.slane %v7280_v39, 1  ;;  %v2779_v45 = vrot.slane %v7284_v63, 1  ;;  %v2791_v39 = vmax.f32 %v7293_v60, %v292_v32  ;;  %v7299_v20 = vunpack.c.l.bf16 %v7298_v61  ;;  %v7310_v60 = vld [vmem:[#allocation9_spill] sm:$0xff] }
  0x4b   : > { %7273 = vst [vmem:[#allocation59_spill] sm:$0xff] %v2759_v33  ;;  %7276 = vst [vmem:[#allocation60_spill] sm:$0xff] %v2763_v40  ;;  %v7286_v33 = vld [vmem:[#allocation55_spill] sm:$0xff]  ;;  %v7289_v40 = vld [vmem:[#allocation2_spill] sm:$0xff] }
  0x4c   : > { %7281 = vst [vmem:[#allocation62_spill] sm:$0xff] %v2771_v18  ;;  %7285 = vst [vmem:[#allocation64_spill] sm:$0xff] %v2779_v45  ;;  %v7287_v54 = vunpack.c.l.bf16 %v7286_v33  ;;  %v7290_v27 = vunpack.c.l.bf16 %v7289_v40  ;;  %v7295_v18 = vld [vmem:[#allocation4_spill] sm:$0xff]  ;;  %v2799_v63 = vmax.f32 %v7299_v20, %v294_v34  ;;  %v7301_v45 = vld [vmem:[#allocation6_spill] sm:$0xff] }
  0x4d   : > { %7294 = vst [vmem:[#allocation3_spill] sm:$0xff] %v2791_v39  ;;  %v7296_v47 = vunpack.c.l.bf16 %v7295_v18  ;;  %v7302_v33 = vunpack.c.l.bf16 %v7301_v45  ;;  %v7311_v18 = vunpack.c.l.bf16 %v7310_v60  ;;  %v7316_v34 = vld [vmem:[#allocation11_spill] sm:$0xff]  ;;  %v3231_v39 = vld [vmem:[%s2421_s12 + $0x1b8] sm:$0x2] }
  0x4e   : > { %v2783_v46 = vrot.slane %v7287_v54, 1  ;;  %v2787_v62 = vmax.f32 %v7290_v27, %v291_v59  ;;  %7300 = vst [vmem:[#allocation5_spill] sm:$0xff] %v2799_v63  ;;  %v7307_v59 = vld [vmem:[#allocation8_spill] sm:$0xff]  ;;  %v7317_v45 = vunpack.c.l.bf16 %v7316_v34  ;;  %7520 = vst [vmem:[#allocation113_spill] sm:$0xff] %v3231_v39 }
  0x4f   : > { %v2795_v25 = vmax.f32 %v7296_v47, %v293_v53  ;;  %v2803_v54 = vmax.f32 %v7302_v33, %v295_v41  ;;  %v7308_v19 = vunpack.c.l.bf16 %v7307_v59  ;;  %v2815_v47 = vmax.f32 %v7311_v18, %v298_v31  ;;  %v7313_v53 = vld [vmem:[#allocation10_spill] sm:$0xff]  ;;  %v7319_v33 = vld [vmem:[#allocation12_spill] sm:$0xff]  ;;  %v7328_v18 = vld [vmem:[#allocation15_spill] sm:$0xff] }
  0x50   : > { %7288 = vst [vmem:[#allocation65_spill] sm:$0xff] %v2783_v46  ;;  %7291 = vst [vmem:[#allocation2_spill] sm:$0xff] %v2787_v62  ;;  %v7304_v46 = vld [vmem:[#allocation7_spill] sm:$0xff]  ;;  %v7314_v61 = vunpack.c.l.bf16 %v7313_v53  ;;  %v2823_v41 = vmax.f32 %v7317_v45, %v300_v2  ;;  %v7329_v53 = vunpack.c.l.bf16 %v7328_v18  ;;  %v7334_v45 = vld [vmem:[#allocation17_spill] sm:$0xff] }
  0x51   : > { %7297 = vst [vmem:[#allocation4_spill] sm:$0xff] %v2795_v25  ;;  %7303 = vst [vmem:[#allocation6_spill] sm:$0xff] %v2803_v54  ;;  %v7305_v40 = vunpack.c.l.bf16 %v7304_v46  ;;  %v2811_v32 = vmax.f32 %v7308_v19, %v297_v26  ;;  %v7320_v46 = vunpack.c.l.bf16 %v7319_v33  ;;  %v7325_v19 = vld [vmem:[#allocation14_spill] sm:$0xff]  ;;  %v7335_v33 = vunpack.c.l.bf16 %v7334_v45  ;;  %v3224_v54 = vld [vmem:[%s2421_s12 + $0x1b0] sm:$0x2] }
  0x52   : > { %7312 = vst [vmem:[#allocation9_spill] sm:$0xff] %v2815_v47  ;;  %v2819_v20 = vmax.f32 %v7314_v61, %v299_v1  ;;  %7318 = vst [vmem:[#allocation11_spill] sm:$0xff] %v2823_v41  ;;  %v7326_v60 = vunpack.c.l.bf16 %v7325_v19  ;;  %v2839_v1 = vmax.f32 %v7329_v53, %v304_v6  ;;  %v7331_v61 = vld [vmem:[#allocation16_spill] sm:$0xff]  ;;  %v7346_v53 = vld [vmem:[#allocation21_spill] sm:$0xff] }
  0x53   : > { %v2807_v27 = vmax.f32 %v7305_v40, %v296_v0  ;;  %7309 = vst [vmem:[#allocation8_spill] sm:$0xff] %v2811_v32  ;;  %v2827_v0 = vmax.f32 %v7320_v46, %v301_v3  ;;  %v7322_v40 = vld [vmem:[#allocation13_spill] sm:$0xff]  ;;  %v7332_v34 = vunpack.c.l.bf16 %v7331_v61  ;;  %v2847_v3 = vmax.f32 %v7335_v33, %v306_v8  ;;  %v7337_v46 = vld [vmem:[#allocation18_spill] sm:$0xff]  ;;  %v7352_v33 = vld [vmem:[#allocation23_spill] sm:$0xff] }
  0x54   : > { %7315 = vst [vmem:[#allocation10_spill] sm:$0xff] %v2819_v20  ;;  %v7323_v59 = vunpack.c.l.bf16 %v7322_v40  ;;  %v2835_v31 = vmax.f32 %v7326_v60, %v303_v5  ;;  %7330 = vst [vmem:[#allocation15_spill] sm:$0xff] %v2839_v1  ;;  %v7338_v40 = vunpack.c.l.bf16 %v7337_v46  ;;  %v7343_v60 = vld [vmem:[#allocation20_spill] sm:$0xff]  ;;  %v7347_v61 = vunpack.c.l.bf16 %v7346_v53  ;;  %v3211_v20 = vld [vmem:[%s2421_s12 + $0x198] sm:$0x2] }
  0x55   : > { %7306 = vst [vmem:[#allocation7_spill] sm:$0xff] %v2807_v27  ;;  %7321 = vst [vmem:[#allocation12_spill] sm:$0xff] %v2827_v0  ;;  %v2843_v2 = vmax.f32 %v7332_v34, %v305_v7  ;;  %v7344_v18 = vunpack.c.l.bf16 %v7343_v60  ;;  %v7349_v34 = vld [vmem:[#allocation22_spill] sm:$0xff]  ;;  %v7353_v46 = vunpack.c.l.bf16 %v7352_v33  ;;  %v3221_v1 = vld [vmem:[%s2421_s12 + $0x1a8] sm:$0x2] }
  0x56   : > { %v2831_v26 = vmax.f32 %v7323_v59, %v302_v4  ;;  %7327 = vst [vmem:[#allocation14_spill] sm:$0xff] %v2835_v31  ;;  %7336 = vst [vmem:[#allocation17_spill] sm:$0xff] %v2847_v3  ;;  %v2851_v4 = vmax.f32 %v7338_v40, %v307_v9  ;;  %v7340_v59 = vld [vmem:[#allocation19_spill] sm:$0xff]  ;;  %v2863_v7 = vmax.f32 %v7347_v61, %v310_v12  ;;  %v7350_v45 = vunpack.c.l.bf16 %v7349_v34  ;;  %v7355_v40 = vld [vmem:[#allocation24_spill] sm:$0xff] }
  0x57   : > { %7333 = vst [vmem:[#allocation16_spill] sm:$0xff] %v2843_v2  ;;  %v7341_v19 = vunpack.c.l.bf16 %v7340_v59  ;;  %v2859_v6 = vmax.f32 %v7344_v18, %v309_v11  ;;  %v2871_v9 = vmax.f32 %v7353_v46, %v312_v14  ;;  %v7356_v59 = vunpack.c.l.bf16 %v7355_v40  ;;  %v7361_v18 = vld [vmem:[#allocation26_spill] sm:$0xff]  ;;  %v7364_v61 = vld [vmem:[#allocation27_spill] sm:$0xff]  ;;  %v7367_v14 = vld [vmem:[#allocation28_spill] sm:$0xff] }
  0x58   : > { %7324 = vst [vmem:[#allocation13_spill] sm:$0xff] %v2831_v26  ;;  %7339 = vst [vmem:[#allocation18_spill] sm:$0xff] %v2851_v4  ;;  %v2867_v8 = vmax.f32 %v7350_v45, %v311_v13  ;;  %v7362_v53 = vunpack.c.l.bf16 %v7361_v18  ;;  %v7365_v13 = vunpack.c.l.bf16 %v7364_v61  ;;  %v7368_v45 = vunpack.c.l.bf16 %v7367_v14  ;;  %v3185_v2 = vld [vmem:[%s2421_s12 + $0x168] sm:$0x2]  ;;  %v3192_v3 = vld [vmem:[%s2421_s12 + $0x170] sm:$0x2] }
  0x59   : > { %v2855_v5 = vmax.f32 %v7341_v19, %v308_v10  ;;  %7345 = vst [vmem:[#allocation20_spill] sm:$0xff] %v2859_v6  ;;  %7348 = vst [vmem:[#allocation21_spill] sm:$0xff] %v2863_v7  ;;  %v2875_v10 = vmax.f32 %v7356_v59, %v313_v15  ;;  %v7358_v19 = vld [vmem:[#allocation25_spill] sm:$0xff]  ;;  %v3198_v26 = vld [vmem:[%s2421_s12 + $0x180] sm:$0x2] }
  0x5a   : > { %7351 = vst [vmem:[#allocation22_spill] sm:$0xff] %v2867_v8  ;;  %7354 = vst [vmem:[#allocation23_spill] sm:$0xff] %v2871_v9  ;;  %v7359_v60 = vunpack.c.l.bf16 %v7358_v19  ;;  %v2883_v12 = vmax.f32 %v7362_v53, %v315_v17  ;;  %v2887_v34 = vmax.f32 %v7365_v13, %v316_v21  ;;  %v2891_v33 = vmax.f32 %v7368_v45, %v317_v22  ;;  %v7370_v15 = vld [vmem:[#allocation29_spill] sm:$0xff]  ;;  %v7376_v17 = vld [vmem:[#allocation31_spill] sm:$0xff] }
  0x5b   : > { %7342 = vst [vmem:[#allocation19_spill] sm:$0xff] %v2855_v5  ;;  %7357 = vst [vmem:[#allocation24_spill] sm:$0xff] %v2875_v10  ;;  %v7371_v46 = vunpack.c.l.bf16 %v7370_v15  ;;  %v7379_v53 = vld [vmem:[#allocation32_spill] sm:$0xff]  ;;  %v7382_v13 = vld [vmem:[#allocation33_spill] sm:$0xff] }
  0x5c   : > { %v2879_v11 = vmax.f32 %v7359_v60, %v314_v16  ;;  %7363 = vst [vmem:[#allocation26_spill] sm:$0xff] %v2883_v12  ;;  %7366 = vst [vmem:[#allocation27_spill] sm:$0xff] %v2887_v34  ;;  %v7373_v16 = vld [vmem:[#allocation30_spill] sm:$0xff]  ;;  %v7377_v60 = vunpack.c.l.bf16 %v7376_v17  ;;  %v7380_v21 = vunpack.c.l.bf16 %v7379_v53  ;;  %v7383_v14 = vunpack.c.l.bf16 %v7382_v13  ;;  %v7394_v17 = vld [vmem:[#allocation37_spill] sm:$0xff] }
  0x5d   : > { %7369 = vst [vmem:[#allocation28_spill] sm:$0xff] %v2891_v33  ;;  %v2895_v40 = vmax.f32 %v7371_v46, %v318_v23  ;;  %v7374_v59 = vunpack.c.l.bf16 %v7373_v16  ;;  %v7385_v45 = vld [vmem:[#allocation34_spill] sm:$0xff]  ;;  %v3133_v33 = vld [vmem:[%s2421_s12 + $0x108] sm:$0x2]  ;;  %v3159_v8 = vld [vmem:[%s2421_s12 + $0x138] sm:$0x2] }
  0x5e   : > { %7360 = vst [vmem:[#allocation25_spill] sm:$0xff] %v2879_v11  ;;  %v2903_v18 = vmax.f32 %v7377_v60, %v320_v29  ;;  %v2907_v61 = vmax.f32 %v7380_v21, %v321_v30  ;;  %v2911_v22 = vmax.f32 %v7383_v14, %v322_v35  ;;  %v7386_v23 = vunpack.c.l.bf16 %v7385_v45  ;;  %v7391_v29 = vld [vmem:[#allocation36_spill] sm:$0xff]  ;;  %v7397_v35 = vld [vmem:[#allocation38_spill] sm:$0xff]  ;;  %v7402_v45 = vld [vmem:[#allocation39_spill] sm:$0xff] }
  0x5f   : > { %7372 = vst [vmem:[#allocation29_spill] sm:$0xff] %v2895_v40  ;;  %v2899_v19 = vmax.f32 %v7374_v59, %v319_v28  ;;  %v7388_v28 = vld [vmem:[#allocation35_spill] sm:$0xff]  ;;  %v7392_v59 = vunpack.c.l.bf16 %v7391_v29  ;;  %v7395_v60 = vunpack.c.l.bf16 %v7394_v17  ;;  %v7398_v21 = vunpack.c.l.bf16 %v7397_v35  ;;  %v3130_v40 = vld [vmem:[%s2421_s12 + $0x100] sm:$0x2]  ;;  %7498 = vst [vmem:[#allocation91_spill] sm:$0xff] %v3133_v33 }
  0x60   : > { %7378 = vst [vmem:[#allocation31_spill] sm:$0xff] %v2903_v18  ;;  %7381 = vst [vmem:[#allocation32_spill] sm:$0xff] %v2907_v61  ;;  %v2915_v15 = vmax.f32 %v7386_v23, %v323_v36  ;;  %v7389_v46 = vunpack.c.l.bf16 %v7388_v28  ;;  %v7400_v36 = vunpack.c.l.bf16 %v2562_v55  ;;  %v2942_v28 = vld [vmem:[%s2421_s12] sm:$0x2]  ;;  %v3117_v61 = vld [vmem:[%s2421_s12 + $0xe8] sm:$0x2] }
  0x61   : > { %7375 = vst [vmem:[#allocation30_spill] sm:$0xff] %v2899_v19  ;;  %7384 = vst [vmem:[#allocation33_spill] sm:$0xff] %v2911_v22  ;;  %v2923_v30 = vmax.f32 %v7392_v59, %v325_v42  ;;  %v2927_v53 = vmax.f32 %v7395_v60, %v326_v43  ;;  %v2931_v13 = vmax.f32 %v7398_v21, %v327_v44  ;;  %v2945_v42 = vld [vmem:[%s2421_s12 + $0x8] sm:$0x2]  ;;  %v2948_v43 = vld [vmem:[%s2421_s12 + $0x10] sm:$0x2]  ;;  %v7521_v62 = vunpack.c.l.bf16 %v2942_v28 }
  0x62   : > { %7387 = vst [vmem:[#allocation34_spill] sm:$0xff] %v2915_v15  ;;  %v2919_v16 = vmax.f32 %v7389_v46, %v324_v37  ;;  %v2935_v14 = vmax.f32 %v7400_v36, %v328_v49  ;;  %v7403_v37 = vunpack.c.l.bf16 %v7402_v45  ;;  %7405 = vst [vmem:[#allocation67_spill] sm:$0xff] %v2942_v28  ;;  %v7408_v46 = vld [vmem:[#allocation40_spill] sm:$0xff]  ;;  %v7411_v49 = vld [vmem:[#allocation41_spill] sm:$0xff]  ;;  %v7523_v4 = vunpack.c.l.bf16 %v2945_v42 }
  0x63   : > { %7393 = vst [vmem:[#allocation36_spill] sm:$0xff] %v2923_v30  ;;  %7396 = vst [vmem:[#allocation37_spill] sm:$0xff] %v2927_v53  ;;  %v7409_v44 = vunpack.c.l.bf16 %v7408_v46  ;;  %v7412_v55 = vunpack.c.l.bf16 %v7411_v49  ;;  %v7416_v60 = vld [vmem:[#allocation42_spill] sm:$0xff]  ;;  %v2967_v36 = vld [vmem:[%s2421_s12 + $0x18] sm:$0x2]  ;;  %v7525_v25 = vunpack.c.l.bf16 %v2948_v43 }
  0x64   : > { %7390 = vst [vmem:[#allocation35_spill] sm:$0xff] %v2919_v16  ;;  %7399 = vst [vmem:[#allocation38_spill] sm:$0xff] %v2931_v13  ;;  %v2939_v23 = vmax.f32 %v7403_v37, %v329_v50  ;;  %v7414_v50 = vunpack.c.l.bf16 %v2578_v48  ;;  %v7417_v35 = vunpack.c.l.bf16 %v7416_v60  ;;  %v2970_v45 = vld [vmem:[%s2421_s12 + $0x20] sm:$0x2]  ;;  %v2976_v37 = vld [vmem:[%s2421_s12 + $0x30] sm:$0x2] }
  0x65   : > { %7401 = vst [vmem:[#allocation66_spill] sm:$0xff] %v2935_v14  ;;  %7406 = vst [vmem:[#allocation68_spill] sm:$0xff] %v2945_v42  ;;  %v2952_v29 = vmax.f32 %v7409_v44, %v330_v51  ;;  %v2956_v59 = vmax.f32 %v7412_v55, %v331_v56  ;;  %v2973_v51 = vld [vmem:[%s2421_s12 + $0x28] sm:$0x2]  ;;  %v7423_v56 = vld [vmem:[#allocation56_spill] sm:$0xff]  ;;  %v3256_v63 = vrot.slane %v7525_v25, 2  ;;  %v7529_v0 = vunpack.c.l.bf16 %v2970_v45 }
  0x66   : > { %7404 = vst [vmem:[#allocation39_spill] sm:$0xff] %v2939_v23  ;;  %7407 = vst [vmem:[#allocation69_spill] sm:$0xff] %v2948_v43  ;;  %v2960_v17 = vmax.f32 %v7414_v50, %v332_v57  ;;  %v2964_v21 = vmax.f32 %v7417_v35, %v333_v58  ;;  %v7424_v46 = vld [vmem:[#allocation43_spill] sm:$0xff]  ;;  %v7427_v44 = vld [vmem:[#allocation57_spill] sm:$0xff]  ;;  %v7531_v32 = vunpack.c.l.bf16 %v2973_v51  ;;  %v7533_v42 = vunpack.c.l.bf16 %v2976_v37 }
  0x67   : > { %7410 = vst [vmem:[#allocation40_spill] sm:$0xff] %v2952_v29  ;;  %7413 = vst [vmem:[#allocation41_spill] sm:$0xff] %v2956_v59  ;;  %v7425_v48 = vunpack.c.l.bf16 %v7424_v46  ;;  %v7428_v58 = vld [vmem:[#allocation44_spill] sm:$0xff]  ;;  %v7431_v50 = vld [vmem:[#allocation45_spill] sm:$0xff]  ;;  %v3264_v27 = vrot.slane %v7529_v0, 2 }
  0x68   : > { %7415 = vst [vmem:[#allocation70_spill] sm:$0xff] %v2960_v17  ;;  %7418 = vst [vmem:[#allocation42_spill] sm:$0xff] %v2964_v21  ;;  %v7429_v49 = vunpack.c.l.bf16 %v7428_v58  ;;  %v7432_v60 = vunpack.c.l.bf16 %v7431_v50  ;;  %v7434_v21 = vld [vmem:[#allocation58_spill] sm:$0xff]  ;;  %v2999_v23 = vld [vmem:[%s2421_s12 + $0x38] sm:$0x2] }
  0x69   : > { %7419 = vst [vmem:[#allocation71_spill] sm:$0xff] %v2967_v36  ;;  %7420 = vst [vmem:[#allocation72_spill] sm:$0xff] %v2970_v45  ;;  %v2981_v57 = vmax.f32 %v7425_v48, %v7423_v56  ;;  %v7435_v17 = vld [vmem:[#allocation46_spill] sm:$0xff]  ;;  %v3005_v46 = vld [vmem:[%s2421_s12 + $0x48] sm:$0x2]  ;;  %v7535_v43 = vunpack.c.l.bf16 %v2999_v23 }
  0x6a   : > { %7421 = vst [vmem:[#allocation73_spill] sm:$0xff] %v2973_v51  ;;  %7422 = vst [vmem:[#allocation74_spill] sm:$0xff] %v2976_v37  ;;  %v2986_v55 = vmax.f32 %v7429_v49, %v7427_v44  ;;  %v2991_v35 = vmax.f32 %v7432_v60, %v2743_v38  ;;  %v7436_v59 = vunpack.c.l.bf16 %v7435_v17  ;;  %v3002_v56 = vld [vmem:[%s2421_s12 + $0x40] sm:$0x2]  ;;  %v3008_v48 = vld [vmem:[%s2421_s12 + $0x50] sm:$0x2]  ;;  %v7539_v45 = vunpack.c.l.bf16 %v3005_v46 }
  0x6b   : > { %7426 = vst [vmem:[#allocation56_spill] sm:$0xff] %v2981_v57  ;;  %7438 = vst [vmem:[#allocation45_spill] sm:$0xff] %v2999_v23  ;;  %v7442_v44 = vld [vmem:[#allocation47_spill] sm:$0xff]  ;;  %v7449_v50 = vld [vmem:[#allocation49_spill] sm:$0xff]  ;;  %v3276_v25 = vrot.slane %v7535_v43, 2  ;;  %v7541_v51 = vunpack.c.l.bf16 %v3008_v48 }
  0x6c   : > { %7430 = vst [vmem:[#allocation43_spill] sm:$0xff] %v2986_v55  ;;  %7433 = vst [vmem:[#allocation57_spill] sm:$0xff] %v2991_v35  ;;  %v2996_v29 = vmax.f32 %v7436_v59, %v7434_v21  ;;  %v7443_v38 = vunpack.c.l.bf16 %v7442_v44  ;;  %v7445_v59 = vld [vmem:[#allocation48_spill] sm:$0xff]  ;;  %v7448_v49 = vld [vmem:[#allocation59_spill] sm:$0xff]  ;;  %v7450_v60 = vunpack.c.l.bf16 %v7449_v50  ;;  %v3284_v0 = vrot.slane %v7539_v45, 2 }
  0x6d   : > { %7439 = vst [vmem:[#allocation58_spill] sm:$0xff] %v3002_v56  ;;  %7440 = vst [vmem:[#allocation46_spill] sm:$0xff] %v3005_v46  ;;  %v7446_v17 = vunpack.c.l.bf16 %v7445_v59  ;;  %v7452_v35 = vld [vmem:[#allocation60_spill] sm:$0xff]  ;;  %v7453_v55 = vld [vmem:[#allocation50_spill] sm:$0xff] }
  0x6e   : > { %7437 = vst [vmem:[#allocation44_spill] sm:$0xff] %v2996_v29  ;;  %7441 = vst [vmem:[#allocation75_spill] sm:$0xff] %v3008_v48  ;;  %v3013_v58 = vmax.f32 %v7443_v38, %v2751_v52  ;;  %v3023_v29 = vmax.f32 %v7450_v60, %v7448_v49  ;;  %v7454_v57 = vunpack.c.l.bf16 %v7453_v55  ;;  %v3031_v52 = vld [vmem:[%s2421_s12 + $0x58] sm:$0x2]  ;;  %v3034_v44 = vld [vmem:[%s2421_s12 + $0x60] sm:$0x2] }
  0x6f   : > { %v3018_v21 = vmax.f32 %v7446_v17, %v2755_v24  ;;  %7456 = vst [vmem:[#allocation60_spill] sm:$0xff] %v3031_v52  ;;  %7457 = vst [vmem:[#allocation50_spill] sm:$0xff] %v3034_v44  ;;  %v3037_v24 = vld [vmem:[%s2421_s12 + $0x68] sm:$0x2]  ;;  %v3040_v38 = vld [vmem:[%s2421_s12 + $0x70] sm:$0x2]  ;;  %v7543_v37 = vunpack.c.l.bf16 %v3031_v52  ;;  %v7545_v23 = vunpack.c.l.bf16 %v3034_v44 }
  0x70   : > { %7444 = vst [vmem:[#allocation47_spill] sm:$0xff] %v3013_v58  ;;  %7451 = vst [vmem:[#allocation59_spill] sm:$0xff] %v3023_v29  ;;  %v3028_v14 = vmax.f32 %v7454_v57, %v7452_v35  ;;  %v7460_v59 = vld [vmem:[#allocation61_spill] sm:$0xff]  ;;  %v7461_v17 = vld [vmem:[#allocation51_spill] sm:$0xff]  ;;  %v7549_v46 = vunpack.c.l.bf16 %v3040_v38 }
  0x71   : > { %7447 = vst [vmem:[#allocation48_spill] sm:$0xff] %v3018_v21  ;;  %7458 = vst [vmem:[#allocation76_spill] sm:$0xff] %v3037_v24  ;;  %v7462_v49 = vunpack.c.l.bf16 %v7461_v17  ;;  %v7464_v60 = vld [vmem:[#allocation62_spill] sm:$0xff]  ;;  %v7465_v55 = vld [vmem:[#allocation52_spill] sm:$0xff]  ;;  %v3296_v43 = vrot.slane %v7545_v23, 2 }
  0x72   : > { %7455 = vst [vmem:[#allocation49_spill] sm:$0xff] %v3028_v14  ;;  %7459 = vst [vmem:[#allocation77_spill] sm:$0xff] %v3040_v38  ;;  %v7466_v29 = vunpack.c.l.bf16 %v7465_v55  ;;  %v7468_v35 = vld [vmem:[#allocation63_spill] sm:$0xff]  ;;  %v7469_v14 = vld [vmem:[#allocation53_spill] sm:$0xff]  ;;  %v3304_v45 = vrot.slane %v7549_v46, 2 }
  0x73   : > { %v3045_v50 = vmax.f32 %v7462_v49, %v7460_v59  ;;  %v7470_v21 = vunpack.c.l.bf16 %v7469_v14  ;;  %v7472_v13 = vld [vmem:[#allocation64_spill] sm:$0xff]  ;;  %v7473_v53 = vld [vmem:[#allocation54_spill] sm:$0xff]  ;;  %v3063_v59 = vld [vmem:[%s2421_s12 + $0x78] sm:$0x2]  ;;  %7494 = vst [vmem:[#allocation87_spill] sm:$0xff] %v3117_v61 }
  0x74   : > { %v3050_v57 = vmax.f32 %v7466_v29, %v7464_v60  ;;  %v7474_v30 = vunpack.c.l.bf16 %v7473_v53  ;;  %7476 = vst [vmem:[#allocation63_spill] sm:$0xff] %v3063_v59  ;;  %v3066_v17 = vld [vmem:[%s2421_s12 + $0x80] sm:$0x2]  ;;  %v3069_v49 = vld [vmem:[%s2421_s12 + $0x88] sm:$0x2]  ;;  %v7480_v60 = vld [vmem:[#allocation65_spill] sm:$0xff]  ;;  %v7551_v48 = vunpack.c.l.bf16 %v3063_v59 }
  0x75   : > { %7463 = vst [vmem:[#allocation61_spill] sm:$0xff] %v3045_v50  ;;  %v3055_v58 = vmax.f32 %v7470_v21, %v7468_v35  ;;  %7477 = vst [vmem:[#allocation53_spill] sm:$0xff] %v3066_v17  ;;  %v3072_v29 = vld [vmem:[%s2421_s12 + $0x90] sm:$0x2]  ;;  %v7481_v14 = vld [vmem:[#allocation55_spill] sm:$0xff]  ;;  %v7553_v52 = vunpack.c.l.bf16 %v3066_v17  ;;  %v7555_v44 = vunpack.c.l.bf16 %v3069_v49 }
  0x76   : > { %7467 = vst [vmem:[#allocation51_spill] sm:$0xff] %v3050_v57  ;;  %v3060_v16 = vmax.f32 %v7474_v30, %v7472_v13  ;;  %7478 = vst [vmem:[#allocation64_spill] sm:$0xff] %v3069_v49  ;;  %v7482_v55 = vunpack.c.l.bf16 %v7481_v14  ;;  %v3080_v35 = vld [vmem:[%s2421_s12 + $0x98] sm:$0x2]  ;;  %v3083_v30 = vld [vmem:[%s2421_s12 + $0xa0] sm:$0x2] }
  0x77   : > { %7471 = vst [vmem:[#allocation62_spill] sm:$0xff] %v3055_v58  ;;  %7479 = vst [vmem:[#allocation54_spill] sm:$0xff] %v3072_v29  ;;  %v3086_v53 = vld [vmem:[%s2421_s12 + $0xa8] sm:$0x2]  ;;  %v3089_v13 = vld [vmem:[%s2421_s12 + $0xb0] sm:$0x2]  ;;  %v7559_v38 = vunpack.c.l.bf16 %v3080_v35  ;;  %v7561_v59 = vunpack.c.l.bf16 %v3083_v30 }
  0x78   : > { %7475 = vst [vmem:[#allocation52_spill] sm:$0xff] %v3060_v16  ;;  %v3077_v21 = vmax.f32 %v7482_v55, %v7480_v60  ;;  %7484 = vst [vmem:[#allocation55_spill] sm:$0xff] %v3080_v35  ;;  %v3095_v60 = vld [vmem:[%s2421_s12 + $0xb8] sm:$0x2]  ;;  %v3098_v55 = vld [vmem:[%s2421_s12 + $0xc0] sm:$0x2]  ;;  %v7563_v17 = vunpack.c.l.bf16 %v3086_v53  ;;  %v7565_v49 = vunpack.c.l.bf16 %v3089_v13 }
  0x79   : > { %7485 = vst [vmem:[#allocation78_spill] sm:$0xff] %v3083_v30  ;;  %7486 = vst [vmem:[#allocation79_spill] sm:$0xff] %v3086_v53  ;;  %v3104_v57 = vld [vmem:[%s2421_s12 + $0xd0] sm:$0x2]  ;;  %v3111_v14 = vld [vmem:[%s2421_s12 + $0xd8] sm:$0x2]  ;;  %v7569_v35 = vunpack.c.l.bf16 %v3098_v55 }
  0x7a   : > { %7483 = vst [vmem:[#allocation65_spill] sm:$0xff] %v3077_v21  ;;  %7487 = vst [vmem:[#allocation80_spill] sm:$0xff] %v3089_v13  ;;  %v3101_v21 = vld [vmem:[%s2421_s12 + $0xc8] sm:$0x2]  ;;  %v3114_v22 = vld [vmem:[%s2421_s12 + $0xe0] sm:$0x2]  ;;  %v7573_v53 = vunpack.c.l.bf16 %v3104_v57  ;;  %v7575_v13 = vunpack.c.l.bf16 %v3111_v14 }
  0x7b   : > { %7488 = vst [vmem:[#allocation81_spill] sm:$0xff] %v3095_v60  ;;  %7489 = vst [vmem:[#allocation82_spill] sm:$0xff] %v3098_v55  ;;  %v3120_v18 = vld [vmem:[%s2421_s12 + $0xf0] sm:$0x2]  ;;  %v3127_v16 = vld [vmem:[%s2421_s12 + $0xf8] sm:$0x2]  ;;  %v7571_v30 = vunpack.c.l.bf16 %v3101_v21  ;;  %v7579_v55 = vunpack.c.l.bf16 %v3117_v61 }
  0x7c   : > { %7490 = vst [vmem:[#allocation83_spill] sm:$0xff] %v3101_v21  ;;  %7491 = vst [vmem:[#allocation84_spill] sm:$0xff] %v3104_v57  ;;  %v3140_v50 = vld [vmem:[%s2421_s12 + $0x110] sm:$0x2]  ;;  %v3143_v58 = vld [vmem:[%s2421_s12 + $0x118] sm:$0x2]  ;;  %v7581_v21 = vunpack.c.l.bf16 %v3120_v18  ;;  %v7583_v57 = vunpack.c.l.bf16 %v3127_v16 }
  0x7d   : > { %7492 = vst [vmem:[#allocation85_spill] sm:$0xff] %v3111_v14  ;;  %7493 = vst [vmem:[#allocation86_spill] sm:$0xff] %v3114_v22  ;;  %v3146_v11 = vld [vmem:[%s2421_s12 + $0x120] sm:$0x2]  ;;  %v3153_v12 = vld [vmem:[%s2421_s12 + $0x128] sm:$0x2]  ;;  %v7585_v14 = vunpack.c.l.bf16 %v3130_v40  ;;  %v7589_v61 = vunpack.c.l.bf16 %v3140_v50 }
  0x7e   : > { %7495 = vst [vmem:[#allocation88_spill] sm:$0xff] %v3120_v18  ;;  %7496 = vst [vmem:[#allocation89_spill] sm:$0xff] %v3127_v16  ;;  %v3156_v15 = vld [vmem:[%s2421_s12 + $0x130] sm:$0x2]  ;;  %v3166_v9 = vld [vmem:[%s2421_s12 + $0x140] sm:$0x2]  ;;  %v7591_v18 = vunpack.c.l.bf16 %v3143_v58  ;;  %v7593_v16 = vunpack.c.l.bf16 %v3146_v11 }
  0x7f   : > { %7497 = vst [vmem:[#allocation90_spill] sm:$0xff] %v3130_v40  ;;  %7499 = vst [vmem:[#allocation92_spill] sm:$0xff] %v3140_v50  ;;  %v3169_v19 = vld [vmem:[%s2421_s12 + $0x148] sm:$0x2]  ;;  %v3172_v5 = vld [vmem:[%s2421_s12 + $0x150] sm:$0x2]  ;;  %v7595_v40 = vunpack.c.l.bf16 %v3153_v12  ;;  %v7600_v50 = vunpack.c.l.bf16 %v3159_v8 }
  0x80   : > { %7500 = vst [vmem:[#allocation93_spill] sm:$0xff] %v3143_v58  ;;  %7501 = vst [vmem:[#allocation94_spill] sm:$0xff] %v3146_v11  ;;  %v3179_v6 = vld [vmem:[%s2421_s12 + $0x158] sm:$0x2]  ;;  %v3182_v34 = vld [vmem:[%s2421_s12 + $0x160] sm:$0x2]  ;;  %v7602_v58 = vunpack.c.l.bf16 %v3166_v9  ;;  %v7604_v11 = vunpack.c.l.bf16 %v3169_v19 }
  0x81   : > { %7502 = vst [vmem:[#allocation95_spill] sm:$0xff] %v3153_v12  ;;  %7503 = vst [vmem:[#allocation96_spill] sm:$0xff] %v3156_v15  ;;  %v3195_v10 = vld [vmem:[%s2421_s12 + $0x178] sm:$0x2]  ;;  %v3205_v31 = vld [vmem:[%s2421_s12 + $0x188] sm:$0x2] }
  0x82   : > { %7504 = vst [vmem:[#allocation97_spill] sm:$0xff] %v3159_v8  ;;  %7505 = vst [vmem:[#allocation98_spill] sm:$0xff] %v3166_v9  ;;  %v3208_v7 = vld [vmem:[%s2421_s12 + $0x190] sm:$0x2]  ;;  %v3218_v41 = vld [vmem:[%s2421_s12 + $0x1a0] sm:$0x2]  ;;  %v7611_v8 = vunpack.c.l.bf16 %v3182_v34  ;;  %v7613_v9 = vunpack.c.l.bf16 %v3185_v2 }
  0x83   : > { %7506 = vst [vmem:[#allocation99_spill] sm:$0xff] %v3169_v19  ;;  %7507 = vst [vmem:[#allocation100_spill] sm:$0xff] %v3172_v5  ;;  %v3252_v15 = vrot.slane %v7523_v4, 2  ;;  %v7527_v5 = vunpack.c.l.bf16 %v2967_v36  ;;  %v3272_v4 = vrot.slane %v7533_v42, 2  ;;  %v7537_v36 = vunpack.c.l.bf16 %v3002_v56 }
  0x84   : > { %7508 = vst [vmem:[#allocation101_spill] sm:$0xff] %v3179_v6  ;;  %7509 = vst [vmem:[#allocation102_spill] sm:$0xff] %v3182_v34  ;;  %v3292_v42 = vrot.slane %v7543_v37, 2  ;;  %v7547_v56 = vunpack.c.l.bf16 %v3037_v24  ;;  %v3312_v37 = vrot.slane %v7553_v52, 2  ;;  %v3316_v23 = vrot.slane %v7555_v44, 2 }
  0x85   : > { %7510 = vst [vmem:[#allocation103_spill] sm:$0xff] %v3185_v2  ;;  %7511 = vst [vmem:[#allocation104_spill] sm:$0xff] %v3192_v3  ;;  %v3248_v3 = vrot.slane %v7521_v62, 2  ;;  %v3260_v47 = vrot.slane %v7527_v5, 2  ;;  %v3268_v62 = vrot.slane %v7531_v32, 2  ;;  %v3280_v5 = vrot.slane %v7537_v36, 2 }
  0x86   : > { %7512 = vst [vmem:[#allocation105_spill] sm:$0xff] %v3195_v10  ;;  %7513 = vst [vmem:[#allocation106_spill] sm:$0xff] %v3198_v26  ;;  %v3288_v32 = vrot.slane %v7541_v51, 2  ;;  %v3300_v36 = vrot.slane %v7547_v56, 2  ;;  %v3308_v51 = vrot.slane %v7551_v48, 2  ;;  %v7557_v24 = vunpack.c.l.bf16 %v3072_v29 }
  0x87   : > { %7514 = vst [vmem:[#allocation107_spill] sm:$0xff] %v3205_v31  ;;  %7515 = vst [vmem:[#allocation108_spill] sm:$0xff] %v3208_v7  ;;  %v3324_v46 = vrot.slane %v7559_v38, 2  ;;  %v3328_v48 = vrot.slane %v7561_v59, 2  ;;  %v3332_v52 = vrot.slane %v7563_v17, 2  ;;  %v3336_v44 = vrot.slane %v7565_v49, 2 }
  0x88   : > { %7516 = vst [vmem:[#allocation109_spill] sm:$0xff] %v3211_v20  ;;  %7517 = vst [vmem:[#allocation110_spill] sm:$0xff] %v3218_v41  ;;  %v3320_v56 = vrot.slane %v7557_v24, 2  ;;  %v7567_v29 = vunpack.c.l.bf16 %v3095_v60  ;;  %v3344_v38 = vrot.slane %v7569_v35, 2  ;;  %v3348_v59 = vrot.slane %v7571_v30, 2  ;;  %v7597_v28 = vld [vmem:[#allocation96_spill] sm:$0xff] }
  0x89   : > { %7518 = vst [vmem:[#allocation111_spill] sm:$0xff] %v3221_v1  ;;  %7519 = vst [vmem:[#allocation112_spill] sm:$0xff] %v3224_v54  ;;  %v3352_v17 = vrot.slane %v7573_v53, 2  ;;  %v3356_v49 = vrot.slane %v7575_v13, 2  ;;  %v7577_v60 = vunpack.c.l.bf16 %v3114_v22  ;;  %v3364_v35 = vrot.slane %v7579_v55, 2 }
  0x8a   : > { %7522 = vst [vmem:[#allocation114_spill] sm:$0xff] %v3248_v3  ;;  %7524 = vst [vmem:[#allocation115_spill] sm:$0xff] %v3252_v15  ;;  %v3340_v24 = vrot.slane %v7567_v29, 2  ;;  %v3368_v30 = vrot.slane %v7581_v21, 2  ;;  %v3372_v53 = vrot.slane %v7583_v57, 2  ;;  %v3376_v13 = vrot.slane %v7585_v14, 2 }
  0x8b   : > { %7526 = vst [vmem:[#allocation116_spill] sm:$0xff] %v3256_v63  ;;  %7528 = vst [vmem:[#allocation117_spill] sm:$0xff] %v3260_v47  ;;  %v3360_v29 = vrot.slane %v7577_v60, 2  ;;  %v7587_v22 = vunpack.c.l.bf16 %v3133_v33  ;;  %v3384_v55 = vrot.slane %v7589_v61, 2  ;;  %v3388_v21 = vrot.slane %v7591_v18, 2 }
  0x8c   : > { %7530 = vst [vmem:[#allocation118_spill] sm:$0xff] %v3264_v27  ;;  %7532 = vst [vmem:[#allocation119_spill] sm:$0xff] %v3268_v62  ;;  %v3392_v57 = vrot.slane %v7593_v16, 2  ;;  %v3396_v14 = vrot.slane %v7595_v40, 2  ;;  %v7598_v33 = vunpack.c.l.bf16 %v7597_v28  ;;  %v3404_v61 = vrot.slane %v7600_v50, 2 }
  0x8d   : > { %7534 = vst [vmem:[#allocation120_spill] sm:$0xff] %v3272_v4  ;;  %7536 = vst [vmem:[#allocation121_spill] sm:$0xff] %v3276_v25  ;;  %v3380_v60 = vrot.slane %v7587_v22, 2  ;;  %v3408_v18 = vrot.slane %v7602_v58, 2  ;;  %v3412_v16 = vrot.slane %v7604_v11, 2  ;;  %v7609_v28 = vunpack.c.l.bf16 %v3179_v6 }
  0x8e   : > { %7538 = vst [vmem:[#allocation122_spill] sm:$0xff] %v3280_v5  ;;  %7540 = vst [vmem:[#allocation123_spill] sm:$0xff] %v3284_v0  ;;  %v3400_v22 = vrot.slane %v7598_v33, 2  ;;  %v3424_v50 = vrot.slane %v7611_v8, 2  ;;  %v3428_v58 = vrot.slane %v7613_v9, 2  ;;  %v7620_v6 = vunpack.c.l.bf16 %v3198_v26 }
  0x8f   : > { %7542 = vst [vmem:[#allocation124_spill] sm:$0xff] %v3288_v32  ;;  %7544 = vst [vmem:[#allocation125_spill] sm:$0xff] %v3292_v42  ;;  %v3420_v33 = vrot.slane %v7609_v28, 2  ;;  %v7622_v34 = vunpack.c.l.bf16 %v3205_v31  ;;  %v7624_v2 = vunpack.c.l.bf16 %v3208_v7  ;;  %v7630_v26 = vunpack.c.l.bf16 %v3221_v1 }
  0x90   : > { %7546 = vst [vmem:[#allocation126_spill] sm:$0xff] %v3296_v43  ;;  %7548 = vst [vmem:[#allocation127_spill] sm:$0xff] %v3300_v36  ;;  %v3440_v28 = vrot.slane %v7620_v6, 2  ;;  %v7632_v31 = vunpack.c.l.bf16 %v3224_v54  ;;  %v7634_v7 = vunpack.c.l.bf16 %v3231_v39  ;;  %v7640_v54 = vld [vmem:[#allocation6_spill] sm:$0xff] }
  0x91   : > { %7550 = vst [vmem:[#allocation128_spill] sm:$0xff] %v3304_v45  ;;  %7552 = vst [vmem:[#allocation129_spill] sm:$0xff] %v3308_v51  ;;  %v3444_v8 = vrot.slane %v7622_v34, 2  ;;  %v3448_v9 = vrot.slane %v7624_v2, 2  ;;  %v3460_v6 = vrot.slane %v7630_v26, 2  ;;  %v7639_v26 = vld [vmem:[#allocation5_spill] sm:$0xff] }
  0x92   : > { %7554 = vst [vmem:[#allocation130_spill] sm:$0xff] %v3312_v37  ;;  %7556 = vst [vmem:[#allocation131_spill] sm:$0xff] %v3316_v23  ;;  %v3464_v34 = vrot.slane %v7632_v31, 2  ;;  %v3468_v2 = vrot.slane %v7634_v7, 2  ;;  %v7702_v45 = vld [vmem:[#allocation69_spill] sm:$0xff] }
  0x93   : > { %7558 = vst [vmem:[#allocation132_spill] sm:$0xff] %v3320_v56  ;;  %7560 = vst [vmem:[#allocation133_spill] sm:$0xff] %v3324_v46  ;;  %v7710_v56 = vld [vmem:[#allocation74_spill] sm:$0xff] }
  0x94   : > { %7562 = vst [vmem:[#allocation134_spill] sm:$0xff] %v3328_v48  ;;  %7564 = vst [vmem:[#allocation135_spill] sm:$0xff] %v3332_v52 }
  0x95   : > { %7566 = vst [vmem:[#allocation136_spill] sm:$0xff] %v3336_v44  ;;  %7568 = vst [vmem:[#allocation137_spill] sm:$0xff] %v3340_v24 }
  0x96   : > { %7570 = vst [vmem:[#allocation138_spill] sm:$0xff] %v3344_v38  ;;  %7572 = vst [vmem:[#allocation139_spill] sm:$0xff] %v3348_v59 }
  0x97   : > { %7574 = vst [vmem:[#allocation140_spill] sm:$0xff] %v3352_v17  ;;  %7576 = vst [vmem:[#allocation141_spill] sm:$0xff] %v3356_v49 }
  0x98   : > { %7578 = vst [vmem:[#allocation142_spill] sm:$0xff] %v3360_v29  ;;  %7580 = vst [vmem:[#allocation143_spill] sm:$0xff] %v3364_v35 }
  0x99   : > { %7582 = vst [vmem:[#allocation144_spill] sm:$0xff] %v3368_v30  ;;  %7584 = vst [vmem:[#allocation145_spill] sm:$0xff] %v3372_v53 }
  0x9a   : > { %7586 = vst [vmem:[#allocation146_spill] sm:$0xff] %v3376_v13  ;;  %7588 = vst [vmem:[#allocation147_spill] sm:$0xff] %v3380_v60 }
  0x9b   : > { %7590 = vst [vmem:[#allocation148_spill] sm:$0xff] %v3384_v55  ;;  %7592 = vst [vmem:[#allocation149_spill] sm:$0xff] %v3388_v21  ;;  %v7698_v55 = vld [vmem:[#allocation67_spill] sm:$0xff]  ;;  %v7700_v21 = vld [vmem:[#allocation68_spill] sm:$0xff] }
  0x9c   : > { %7594 = vst [vmem:[#allocation150_spill] sm:$0xff] %v3392_v57  ;;  %7596 = vst [vmem:[#allocation151_spill] sm:$0xff] %v3396_v14  ;;  %v7606_v57 = vld [vmem:[#allocation100_spill] sm:$0xff]  ;;  %v7704_v14 = vld [vmem:[#allocation71_spill] sm:$0xff] }
  0x9d   : > { %7599 = vst [vmem:[#allocation152_spill] sm:$0xff] %v3400_v22  ;;  %7601 = vst [vmem:[#allocation153_spill] sm:$0xff] %v3404_v61  ;;  %v7607_v12 = vunpack.c.l.bf16 %v7606_v57  ;;  %v7618_v57 = vunpack.c.l.bf16 %v3195_v10  ;;  %v7628_v10 = vunpack.c.l.bf16 %v3218_v41  ;;  %v7706_v22 = vld [vmem:[#allocation72_spill] sm:$0xff]  ;;  %v7708_v61 = vld [vmem:[#allocation73_spill] sm:$0xff] }
  0x9e   : > { %7603 = vst [vmem:[#allocation154_spill] sm:$0xff] %v3408_v18  ;;  %7605 = vst [vmem:[#allocation155_spill] sm:$0xff] %v3412_v16  ;;  %v7615_v18 = vld [vmem:[#allocation104_spill] sm:$0xff] }
  0x9f   : > { %v3416_v40 = vrot.slane %v7607_v12, 2  ;;  %7610 = vst [vmem:[#allocation157_spill] sm:$0xff] %v3420_v33  ;;  %7612 = vst [vmem:[#allocation158_spill] sm:$0xff] %v3424_v50  ;;  %v7616_v19 = vunpack.c.l.bf16 %v7615_v18  ;;  %v3436_v12 = vrot.slane %v7618_v57, 2  ;;  %v7626_v18 = vunpack.c.l.bf16 %v3211_v20  ;;  %v7636_v20 = vld [vmem:[#allocation2_spill] sm:$0xff] }
  0xa0   : > { %7614 = vst [vmem:[#allocation159_spill] sm:$0xff] %v3428_v58  ;;  %7621 = vst [vmem:[#allocation162_spill] sm:$0xff] %v3440_v28  ;;  %v3456_v57 = vrot.slane %v7628_v10, 2  ;;  %v7638_v10 = vld [vmem:[#allocation4_spill] sm:$0xff]  ;;  %v7701_v33 = vunpack.c.l.bf16 %v7700_v21  ;;  %v7703_v50 = vunpack.c.l.bf16 %v7702_v45  ;;  %v7705_v58 = vunpack.c.l.bf16 %v7704_v14  ;;  %v7714_v21 = vld [vmem:[#allocation58_spill] sm:$0xff] }
  0xa1   : > { %7608 = vst [vmem:[#allocation156_spill] sm:$0xff] %v3416_v40  ;;  %v3432_v11 = vrot.slane %v7616_v19, 2  ;;  %7619 = vst [vmem:[#allocation161_spill] sm:$0xff] %v3436_v12  ;;  %v3452_v19 = vrot.slane %v7626_v18, 2  ;;  %v7699_v40 = vunpack.c.l.bf16 %v7698_v55  ;;  %v7709_v12 = vunpack.c.l.bf16 %v7708_v61  ;;  %v7712_v55 = vld [vmem:[#allocation45_spill] sm:$0xff]  ;;  %v7716_v45 = vld [vmem:[#allocation46_spill] sm:$0xff] }
  0xa2   : > { %7623 = vst [vmem:[#allocation163_spill] sm:$0xff] %v3444_v8  ;;  %7625 = vst [vmem:[#allocation164_spill] sm:$0xff] %v3448_v9  ;;  %v796_v9 = vrot.slane %v7701_v33, 3  ;;  %v797_v35 = vrot.slane %v7703_v50, 3  ;;  %v798_v30 = vrot.slane %v7705_v58, 3  ;;  %v7711_v28 = vunpack.c.l.bf16 %v7710_v56  ;;  %v7718_v14 = vld [vmem:[#allocation75_spill] sm:$0xff] }
  0xa3   : > { %7617 = vst [vmem:[#allocation160_spill] sm:$0xff] %v3432_v11  ;;  %7627 = vst [vmem:[#allocation165_spill] sm:$0xff] %v3452_v19  ;;  %v7637_v19 = vld [vmem:[#allocation3_spill] sm:$0xff]  ;;  %v795_v8 = vrot.slane %v7699_v40, 3  ;;  %v7707_v11 = vunpack.c.l.bf16 %v7706_v22  ;;  %v800_v13 = vrot.slane %v7709_v12, 3  ;;  %v7713_v40 = vunpack.c.l.bf16 %v7712_v55  ;;  %v7720_v22 = vld [vmem:[#allocation60_spill] sm:$0xff] }
  0xa4   : > { %7629 = vst [vmem:[#allocation166_spill] sm:$0xff] %v3456_v57  ;;  %7631 = vst [vmem:[#allocation167_spill] sm:$0xff] %v3460_v6  ;;  %v801_v60 = vrot.slane %v7711_v28, 3  ;;  %v7715_v33 = vunpack.c.l.bf16 %v7714_v21  ;;  %v7717_v50 = vunpack.c.l.bf16 %v7716_v45  ;;  %v7719_v58 = vunpack.c.l.bf16 %v7718_v14  ;;  %v7722_v61 = vld [vmem:[#allocation50_spill] sm:$0xff]  ;;  %v7724_v56 = vld [vmem:[#allocation76_spill] sm:$0xff] }
  0xa5   : > { %7633 = vst [vmem:[#allocation168_spill] sm:$0xff] %v3464_v34  ;;  %7635 = vst [vmem:[#allocation169_spill] sm:$0xff] %v3468_v2  ;;  %v799_v6 = vrot.slane %v7707_v11, 3  ;;  %v802_v16 = vrot.slane %v7713_v40, 3  ;;  %v7721_v11 = vunpack.c.l.bf16 %v7720_v22  ;;  %v7723_v12 = vunpack.c.l.bf16 %v7722_v61  ;;  %v7726_v55 = vld [vmem:[#allocation77_spill] sm:$0xff]  ;;  %v7728_v21 = vld [vmem:[#allocation63_spill] sm:$0xff] }
  0xa6   : > { %v803_v53 = vrot.slane %v7715_v33, 3  ;;  %v804_v29 = vrot.slane %v7717_v50, 3  ;;  %v805_v49 = vrot.slane %v7719_v58, 3  ;;  %v7725_v28 = vunpack.c.l.bf16 %v7724_v56  ;;  %v7730_v45 = vld [vmem:[#allocation53_spill] sm:$0xff]  ;;  %v7732_v14 = vld [vmem:[#allocation64_spill] sm:$0xff]  ;;  %v7734_v22 = vld [vmem:[#allocation54_spill] sm:$0xff] }
  0xa7   : > { %v806_v17 = vrot.slane %v7721_v11, 3  ;;  %v807_v59 = vrot.slane %v7723_v12, 3  ;;  %v7727_v40 = vunpack.c.l.bf16 %v7726_v55  ;;  %v7729_v33 = vunpack.c.l.bf16 %v7728_v21  ;;  %v7736_v61 = vld [vmem:[#allocation55_spill] sm:$0xff]  ;;  %v7738_v56 = vld [vmem:[#allocation78_spill] sm:$0xff]  ;;  %v7742_v21 = vld [vmem:[#allocation80_spill] sm:$0xff] }
  0xa8   : > { %v808_v38 = vrot.slane %v7725_v28, 3  ;;  %v7731_v50 = vunpack.c.l.bf16 %v7730_v45  ;;  %v7733_v58 = vunpack.c.l.bf16 %v7732_v14  ;;  %v7735_v11 = vunpack.c.l.bf16 %v7734_v22  ;;  %v7740_v55 = vld [vmem:[#allocation79_spill] sm:$0xff]  ;;  %v7744_v45 = vld [vmem:[#allocation81_spill] sm:$0xff]  ;;  %v7746_v14 = vld [vmem:[#allocation82_spill] sm:$0xff] }
  0xa9   : > { %v809_v24 = vrot.slane %v7727_v40, 3  ;;  %v810_v44 = vrot.slane %v7729_v33, 3  ;;  %v7737_v12 = vunpack.c.l.bf16 %v7736_v61  ;;  %v7739_v28 = vunpack.c.l.bf16 %v7738_v56  ;;  %v7748_v22 = vld [vmem:[#allocation83_spill] sm:$0xff]  ;;  %v7750_v61 = vld [vmem:[#allocation84_spill] sm:$0xff]  ;;  %v7752_v56 = vld [vmem:[#allocation85_spill] sm:$0xff] }
  0xaa   : > { %v811_v52 = vrot.slane %v7731_v50, 3  ;;  %v812_v48 = vrot.slane %v7733_v58, 3  ;;  %v813_v46 = vrot.slane %v7735_v11, 3  ;;  %v7741_v40 = vunpack.c.l.bf16 %v7740_v55  ;;  %v7754_v55 = vld [vmem:[#allocation86_spill] sm:$0xff] }
  0xab   : > { %v814_v23 = vrot.slane %v7737_v12, 3  ;;  %v815_v37 = vrot.slane %v7739_v28, 3  ;;  %v7743_v33 = vunpack.c.l.bf16 %v7742_v21  ;;  %v7745_v50 = vunpack.c.l.bf16 %v7744_v45  ;;  %v7756_v21 = vld [vmem:[#allocation87_spill] sm:$0xff]  ;;  %v7758_v45 = vld [vmem:[#allocation88_spill] sm:$0xff] }
  0xac   : > { %v816_v51 = vrot.slane %v7741_v40, 3  ;;  %v7747_v58 = vunpack.c.l.bf16 %v7746_v14  ;;  %v7749_v11 = vunpack.c.l.bf16 %v7748_v22  ;;  %v7751_v12 = vunpack.c.l.bf16 %v7750_v61  ;;  %v7760_v14 = vld [vmem:[#allocation89_spill] sm:$0xff]  ;;  %v7762_v22 = vld [vmem:[#allocation90_spill] sm:$0xff]  ;;  %v7764_v61 = vld [vmem:[#allocation91_spill] sm:$0xff] }
  0xad   : > { %v817_v36 = vrot.slane %v7743_v33, 3  ;;  %v818_v43 = vrot.slane %v7745_v50, 3  ;;  %v7753_v28 = vunpack.c.l.bf16 %v7752_v56  ;;  %v7755_v40 = vunpack.c.l.bf16 %v7754_v55  ;;  %v7766_v56 = vld [vmem:[#allocation92_spill] sm:$0xff]  ;;  %v7768_v55 = vld [vmem:[#allocation93_spill] sm:$0xff] }
  0xae   : > { %v819_v42 = vrot.slane %v7747_v58, 3  ;;  %v820_v32 = vrot.slane %v7749_v11, 3  ;;  %v821_v0 = vrot.slane %v7751_v12, 3  ;;  %v7757_v33 = vunpack.c.l.bf16 %v7756_v21  ;;  %v7770_v21 = vld [vmem:[#allocation94_spill] sm:$0xff] }
  0xaf   : > { %v822_v5 = vrot.slane %v7753_v28, 3  ;;  %v823_v25 = vrot.slane %v7755_v40, 3  ;;  %v7759_v50 = vunpack.c.l.bf16 %v7758_v45  ;;  %v7761_v58 = vunpack.c.l.bf16 %v7760_v14  ;;  %v7772_v45 = vld [vmem:[#allocation95_spill] sm:$0xff]  ;;  %v7774_v14 = vld [vmem:[#allocation96_spill] sm:$0xff] }
  0xb0   : > { %v824_v4 = vrot.slane %v7757_v33, 3  ;;  %v7763_v11 = vunpack.c.l.bf16 %v7762_v22  ;;  %v7765_v12 = vunpack.c.l.bf16 %v7764_v61  ;;  %v7767_v28 = vunpack.c.l.bf16 %v7766_v56  ;;  %v7776_v22 = vld [vmem:[#allocation97_spill] sm:$0xff]  ;;  %v7778_v61 = vld [vmem:[#allocation98_spill] sm:$0xff]  ;;  %v7780_v56 = vld [vmem:[#allocation99_spill] sm:$0xff] }
  0xb1   : > { %v825_v62 = vrot.slane %v7759_v50, 3  ;;  %v826_v27 = vrot.slane %v7761_v58, 3  ;;  %v7769_v40 = vunpack.c.l.bf16 %v7768_v55  ;;  %v7771_v33 = vunpack.c.l.bf16 %v7770_v21  ;;  %v7782_v55 = vld [vmem:[#allocation100_spill] sm:$0xff]  ;;  %v7784_v21 = vld [vmem:[#allocation101_spill] sm:$0xff] }
  0xb2   : > { %v827_v47 = vrot.slane %v7763_v11, 3  ;;  %v828_v63 = vrot.slane %v7765_v12, 3  ;;  %v829_v15 = vrot.slane %v7767_v28, 3  ;;  %v7773_v50 = vunpack.c.l.bf16 %v7772_v45  ;;  %v7787_v45 = vld [vmem:[#allocation102_spill] sm:$0xff] }
  0xb3   : > { %v830_v3 = vrot.slane %v7769_v40, 3  ;;  %v831_v2 = vrot.slane %v7771_v33, 3  ;;  %v7775_v58 = vunpack.c.l.bf16 %v7774_v14  ;;  %v7777_v11 = vunpack.c.l.bf16 %v7776_v22 }
  0xb4   : > { %v832_v39 = vrot.slane %v7773_v50, 3  ;;  %v7779_v12 = vunpack.c.l.bf16 %v7778_v61  ;;  %v7781_v28 = vunpack.c.l.bf16 %v7780_v56  ;;  %v7783_v40 = vunpack.c.l.bf16 %v7782_v55  ;;  %v7793_v61 = vld [vmem:[#allocation104_spill] sm:$0xff]  ;;  %v7796_v56 = vld [vmem:[#allocation105_spill] sm:$0xff] }
  0xb5   : > { %v833_v31 = vrot.slane %v7775_v58, 3  ;;  %v834_v1 = vrot.slane %v7777_v11, 3  ;;  %v7785_v33 = vunpack.c.l.bf16 %v7784_v21  ;;  %v7788_v50 = vunpack.c.l.bf16 %v7787_v45  ;;  %v7790_v58 = vld [vmem:[#allocation103_spill] sm:$0xff] }
  0xb6   : > { %v835_v57 = vrot.slane %v7779_v12, 3  ;;  %v836_v41 = vrot.slane %v7781_v28, 3  ;;  %v837_v18 = vrot.slane %v7783_v40, 3  ;;  %v7791_v22 = vunpack.c.l.bf16 %v7790_v58  ;;  %v7799_v40 = vld [vmem:[#allocation106_spill] sm:$0xff] }
  0xb7   : > { %v3670_v7 = vrot.slane %v7785_v33, 3  ;;  %v3674_v14 = vrot.slane %v7788_v50, 3  ;;  %v7794_v12 = vunpack.c.l.bf16 %v7793_v61  ;;  %v7797_v28 = vunpack.c.l.bf16 %v7796_v56 }
  0xb8   : > { %v3678_v11 = vrot.slane %v7791_v22, 3  ;;  %v7800_v21 = vunpack.c.l.bf16 %v7799_v40 }
  0xb9   : > { %7786 = vst [vmem:[#allocation2_spill] sm:$0xff] %v3670_v7  ;;  %7789 = vst [vmem:[#allocation3_spill] sm:$0xff] %v3674_v14  ;;  %v3682_v34 = vrot.slane %v7794_v12, 3  ;;  %v3686_v55 = vrot.slane %v7797_v28, 3  ;;  %v7802_v7 = vld [vmem:[#allocation107_spill] sm:$0xff]  ;;  %v7805_v14 = vld [vmem:[#allocation108_spill] sm:$0xff] }
  0xba   : > { %7792 = vst [vmem:[#allocation4_spill] sm:$0xff] %v3678_v11  ;;  %v3690_v33 = vrot.slane %v7800_v21, 3  ;;  %v7803_v45 = vunpack.c.l.bf16 %v7802_v7  ;;  %v7806_v58 = vunpack.c.l.bf16 %v7805_v14  ;;  %v7807_v11 = vld [vmem:[#allocation109_spill] sm:$0xff] }
  0xbb   : > { %7795 = vst [vmem:[#allocation5_spill] sm:$0xff] %v3682_v34  ;;  %7798 = vst [vmem:[#allocation6_spill] sm:$0xff] %v3686_v55  ;;  %v7808_v61 = vunpack.c.l.bf16 %v7807_v11  ;;  %v7810_v34 = vld [vmem:[#allocation110_spill] sm:$0xff]  ;;  %v7813_v55 = vld [vmem:[#allocation111_spill] sm:$0xff] }
  0xbc   : > { %7801 = vst [vmem:[#allocation67_spill] sm:$0xff] %v3690_v33  ;;  %v3694_v50 = vrot.slane %v7803_v45, 3  ;;  %v3698_v22 = vrot.slane %v7806_v58, 3  ;;  %v7811_v56 = vunpack.c.l.bf16 %v7810_v34  ;;  %v7814_v40 = vunpack.c.l.bf16 %v7813_v55  ;;  %v7815_v33 = vld [vmem:[#allocation112_spill] sm:$0xff]  ;;  %v7820_v11 = vld [vmem:[#allocation114_spill] sm:$0xff]  ;;  %v7823_v34 = vld [vmem:[#allocation115_spill] sm:$0xff] }
  0xbd   : > { %v3702_v12 = vrot.slane %v7808_v61, 3  ;;  %v7816_v7 = vunpack.c.l.bf16 %v7815_v33  ;;  %v7821_v61 = vmax.f32 %v7636_v20, %v7820_v11  ;;  %v7826_v55 = vld [vmem:[#allocation116_spill] sm:$0xff]  ;;  %v7835_v11 = vld [vmem:[#allocation7_spill] sm:$0xff] }
  0xbe   : > { %7804 = vst [vmem:[#allocation68_spill] sm:$0xff] %v3694_v50  ;;  %v3706_v28 = vrot.slane %v7811_v56, 3  ;;  %v3710_v21 = vrot.slane %v7814_v40, 3  ;;  %v7817_v50 = vld [vmem:[#allocation113_spill] sm:$0xff]  ;;  %v7824_v56 = vmax.f32 %v7637_v19, %v7823_v34  ;;  %v7827_v40 = vmax.f32 %v7638_v10, %v7826_v55  ;;  %v7839_v34 = vld [vmem:[#allocation8_spill] sm:$0xff] }
  0xbf   : > { %7809 = vst [vmem:[#allocation69_spill] sm:$0xff] %v3702_v12  ;;  %v3714_v45 = vrot.slane %v7816_v7, 3  ;;  %v7818_v14 = vunpack.c.l.bf16 %v7817_v50  ;;  %v3723_v12 = vmax.f32 %v7821_v61, %v795_v8  ;;  %v7829_v7 = vld [vmem:[#allocation117_spill] sm:$0xff]  ;;  %v7836_v61 = vld [vmem:[#allocation119_spill] sm:$0xff] }
  0xc0   : > { %7812 = vst [vmem:[#allocation71_spill] sm:$0xff] %v3706_v28  ;;  %v3728_v28 = vmax.f32 %v7824_v56, %v796_v9  ;;  %v3733_v33 = vmax.f32 %v7827_v40, %v797_v35  ;;  %v7830_v50 = vmax.f32 %v7639_v26, %v7829_v7  ;;  %v7837_v19 = vmax.f32 %v7835_v11, %v7836_v61  ;;  %v7840_v56 = vld [vmem:[#allocation120_spill] sm:$0xff]  ;;  %v7843_v55 = vld [vmem:[#allocation9_spill] sm:$0xff]  ;;  %v7847_v7 = vld [vmem:[#allocation10_spill] sm:$0xff] }
  0xc1   : > { %v3718_v58 = vrot.slane %v7818_v14, 3  ;;  %7822 = vst [vmem:[#allocation73_spill] sm:$0xff] %v3723_v12  ;;  %v7841_v10 = vmax.f32 %v7839_v34, %v7840_v56  ;;  %v7844_v40 = vld [vmem:[#allocation121_spill] sm:$0xff]  ;;  %v7855_v61 = vld [vmem:[#allocation12_spill] sm:$0xff] }
  0xc2   : > { %7825 = vst [vmem:[#allocation74_spill] sm:$0xff] %v3728_v28  ;;  %7828 = vst [vmem:[#allocation45_spill] sm:$0xff] %v3733_v33  ;;  %v3738_v14 = vmax.f32 %v7830_v50, %v798_v30  ;;  %v3748_v9 = vmax.f32 %v7837_v19, %v800_v13  ;;  %v7845_v26 = vmax.f32 %v7843_v55, %v7844_v40  ;;  %v7848_v50 = vld [vmem:[#allocation122_spill] sm:$0xff]  ;;  %v7856_v19 = vld [vmem:[#allocation124_spill] sm:$0xff] }
  0xc3   : > { %7819 = vst [vmem:[#allocation72_spill] sm:$0xff] %v3718_v58  ;;  %v7832_v58 = vld [vmem:[#allocation118_spill] sm:$0xff]  ;;  %v3753_v35 = vmax.f32 %v7841_v10, %v801_v60  ;;  %v7857_v34 = vmax.f32 %v7855_v61, %v7856_v19  ;;  %v7859_v56 = vld [vmem:[#allocation13_spill] sm:$0xff] }
  0xc4   : > { %7831 = vst [vmem:[#allocation58_spill] sm:$0xff] %v3738_v14  ;;  %v7833_v20 = vmax.f32 %v7640_v54, %v7832_v58  ;;  %7838 = vst [vmem:[#allocation75_spill] sm:$0xff] %v3748_v9  ;;  %v3758_v30 = vmax.f32 %v7845_v26, %v802_v16  ;;  %v7849_v54 = vmax.f32 %v7847_v7, %v7848_v50  ;;  %v7851_v58 = vld [vmem:[#allocation11_spill] sm:$0xff]  ;;  %v7860_v10 = vld [vmem:[#allocation125_spill] sm:$0xff] }
  0xc5   : > { %7842 = vst [vmem:[#allocation60_spill] sm:$0xff] %v3753_v35  ;;  %v3773_v60 = vmax.f32 %v7857_v34, %v805_v49  ;;  %v7861_v55 = vmax.f32 %v7859_v56, %v7860_v10  ;;  %v7863_v40 = vld [vmem:[#allocation14_spill] sm:$0xff]  ;;  %v7867_v50 = vld [vmem:[#allocation15_spill] sm:$0xff]  ;;  %v7875_v19 = vld [vmem:[#allocation17_spill] sm:$0xff] }
  0xc6   : > { %v3743_v8 = vmax.f32 %v7833_v20, %v799_v6  ;;  %7846 = vst [vmem:[#allocation50_spill] sm:$0xff] %v3758_v30  ;;  %v3763_v6 = vmax.f32 %v7849_v54, %v803_v53  ;;  %v7852_v20 = vld [vmem:[#allocation123_spill] sm:$0xff]  ;;  %v7864_v26 = vld [vmem:[#allocation126_spill] sm:$0xff]  ;;  %v7876_v34 = vld [vmem:[#allocation129_spill] sm:$0xff] }
  0xc7   : > { %v7853_v11 = vmax.f32 %v7851_v58, %v7852_v20  ;;  %7858 = vst [vmem:[#allocation63_spill] sm:$0xff] %v3773_v60  ;;  %v3778_v16 = vmax.f32 %v7861_v55, %v806_v17  ;;  %v7865_v7 = vmax.f32 %v7863_v40, %v7864_v26  ;;  %v7868_v54 = vld [vmem:[#allocation127_spill] sm:$0xff]  ;;  %v7871_v20 = vld [vmem:[#allocation16_spill] sm:$0xff]  ;;  %v7877_v56 = vmax.f32 %v7875_v19, %v7876_v34  ;;  %v7879_v10 = vld [vmem:[#allocation18_spill] sm:$0xff] }
  0xc8   : > { %7834 = vst [vmem:[#allocation46_spill] sm:$0xff] %v3743_v8  ;;  %7850 = vst [vmem:[#allocation76_spill] sm:$0xff] %v3763_v6  ;;  %v7869_v58 = vmax.f32 %v7867_v50, %v7868_v54  ;;  %v7880_v55 = vld [vmem:[#allocation130_spill] sm:$0xff]  ;;  %v7883_v26 = vld [vmem:[#allocation19_spill] sm:$0xff] }
  0xc9   : > { %v3768_v13 = vmax.f32 %v7853_v11, %v804_v29  ;;  %7862 = vst [vmem:[#allocation53_spill] sm:$0xff] %v3778_v16  ;;  %v3783_v53 = vmax.f32 %v7865_v7, %v807_v59  ;;  %v7872_v11 = vld [vmem:[#allocation128_spill] sm:$0xff]  ;;  %v3798_v17 = vmax.f32 %v7877_v56, %v810_v44  ;;  %v7881_v40 = vmax.f32 %v7879_v10, %v7880_v55  ;;  %v7884_v7 = vld [vmem:[#allocation131_spill] sm:$0xff]  ;;  %v7895_v34 = vld [vmem:[#allocation22_spill] sm:$0xff] }
  0xca   : > { %v3788_v29 = vmax.f32 %v7869_v58, %v808_v38  ;;  %v7873_v61 = vmax.f32 %v7871_v20, %v7872_v11  ;;  %v7885_v50 = vmax.f32 %v7883_v26, %v7884_v7  ;;  %v7887_v54 = vld [vmem:[#allocation20_spill] sm:$0xff]  ;;  %v7891_v11 = vld [vmem:[#allocation21_spill] sm:$0xff]  ;;  %v7896_v56 = vld [vmem:[#allocation134_spill] sm:$0xff] }
  0xcb   : > { %7854 = vst [vmem:[#allocation77_spill] sm:$0xff] %v3768_v13  ;;  %7866 = vst [vmem:[#allocation64_spill] sm:$0xff] %v3783_v53  ;;  %v3803_v59 = vmax.f32 %v7881_v40, %v811_v52  ;;  %v7888_v58 = vld [vmem:[#allocation132_spill] sm:$0xff]  ;;  %v7897_v10 = vmax.f32 %v7895_v34, %v7896_v56  ;;  %v7899_v55 = vld [vmem:[#allocation23_spill] sm:$0xff] }
  0xcc   : > { %7870 = vst [vmem:[#allocation54_spill] sm:$0xff] %v3788_v29  ;;  %v3793_v49 = vmax.f32 %v7873_v61, %v809_v24  ;;  %7878 = vst [vmem:[#allocation78_spill] sm:$0xff] %v3798_v17  ;;  %v3808_v38 = vmax.f32 %v7885_v50, %v812_v48  ;;  %v7889_v20 = vmax.f32 %v7887_v54, %v7888_v58  ;;  %v7892_v61 = vld [vmem:[#allocation133_spill] sm:$0xff]  ;;  %v7900_v40 = vld [vmem:[#allocation135_spill] sm:$0xff] }
  0xcd   : > { %7882 = vst [vmem:[#allocation79_spill] sm:$0xff] %v3803_v59  ;;  %v7893_v19 = vmax.f32 %v7891_v11, %v7892_v61  ;;  %v3823_v52 = vmax.f32 %v7897_v10, %v815_v37  ;;  %v7901_v26 = vmax.f32 %v7899_v55, %v7900_v40  ;;  %v7903_v7 = vld [vmem:[#allocation24_spill] sm:$0xff]  ;;  %v7907_v58 = vld [vmem:[#allocation25_spill] sm:$0xff]  ;;  %v7911_v61 = vld [vmem:[#allocation26_spill] sm:$0xff] }
  0xce   : > { %7874 = vst [vmem:[#allocation55_spill] sm:$0xff] %v3793_v49  ;;  %7886 = vst [vmem:[#allocation80_spill] sm:$0xff] %v3808_v38  ;;  %v3813_v24 = vmax.f32 %v7889_v20, %v813_v46  ;;  %v7904_v50 = vld [vmem:[#allocation136_spill] sm:$0xff]  ;;  %v7908_v20 = vld [vmem:[#allocation137_spill] sm:$0xff] }
  0xcf   : > { %v3818_v44 = vmax.f32 %v7893_v19, %v814_v23  ;;  %7898 = vst [vmem:[#allocation83_spill] sm:$0xff] %v3823_v52  ;;  %v3828_v48 = vmax.f32 %v7901_v26, %v816_v51  ;;  %v7905_v54 = vmax.f32 %v7903_v7, %v7904_v50  ;;  %v7909_v11 = vmax.f32 %v7907_v58, %v7908_v20  ;;  %v7912_v19 = vld [vmem:[#allocation138_spill] sm:$0xff]  ;;  %v7915_v56 = vld [vmem:[#allocation27_spill] sm:$0xff]  ;;  %v7919_v40 = vld [vmem:[#allocation28_spill] sm:$0xff] }
  0xd0   : > { %7890 = vst [vmem:[#allocation81_spill] sm:$0xff] %v3813_v24  ;;  %v7913_v34 = vmax.f32 %v7911_v61, %v7912_v19  ;;  %v7916_v10 = vld [vmem:[#allocation139_spill] sm:$0xff]  ;;  %v7924_v50 = vld [vmem:[#allocation141_spill] sm:$0xff]  ;;  %v7927_v20 = vld [vmem:[#allocation30_spill] sm:$0xff] }
  0xd1   : > { %7894 = vst [vmem:[#allocation82_spill] sm:$0xff] %v3818_v44  ;;  %7902 = vst [vmem:[#allocation84_spill] sm:$0xff] %v3828_v48  ;;  %v3833_v46 = vmax.f32 %v7905_v54, %v817_v36  ;;  %v3838_v23 = vmax.f32 %v7909_v11, %v818_v43  ;;  %v7917_v51 = vmax.f32 %v7915_v56, %v7916_v10  ;;  %v7920_v36 = vld [vmem:[#allocation140_spill] sm:$0xff]  ;;  %v7923_v43 = vld [vmem:[#allocation29_spill] sm:$0xff] }
  0xd2   : > { %v3843_v37 = vmax.f32 %v7913_v34, %v819_v42  ;;  %v7921_v26 = vmax.f32 %v7919_v40, %v7920_v36  ;;  %v7925_v54 = vmax.f32 %v7923_v43, %v7924_v50  ;;  %v7928_v42 = vld [vmem:[#allocation142_spill] sm:$0xff]  ;;  %v7931_v19 = vld [vmem:[#allocation31_spill] sm:$0xff]  ;;  %v7935_v10 = vld [vmem:[#allocation32_spill] sm:$0xff] }
  0xd3   : > { %7906 = vst [vmem:[#allocation85_spill] sm:$0xff] %v3833_v46  ;;  %7910 = vst [vmem:[#allocation86_spill] sm:$0xff] %v3838_v23  ;;  %v3848_v55 = vmax.f32 %v7917_v51, %v820_v32  ;;  %v7929_v11 = vmax.f32 %v7927_v20, %v7928_v42  ;;  %v7932_v34 = vld [vmem:[#allocation143_spill] sm:$0xff]  ;;  %v7936_v51 = vld [vmem:[#allocation144_spill] sm:$0xff] }
  0xd4   : > { %7914 = vst [vmem:[#allocation87_spill] sm:$0xff] %v3843_v37  ;;  %v3853_v7 = vmax.f32 %v7921_v26, %v821_v0  ;;  %v3858_v58 = vmax.f32 %v7925_v54, %v822_v5  ;;  %v7933_v32 = vmax.f32 %v7931_v19, %v7932_v34  ;;  %v7937_v40 = vmax.f32 %v7935_v10, %v7936_v51  ;;  %v7939_v36 = vld [vmem:[#allocation33_spill] sm:$0xff]  ;;  %v7943_v50 = vld [vmem:[#allocation34_spill] sm:$0xff]  ;;  %v7947_v42 = vld [vmem:[#allocation35_spill] sm:$0xff] }
  0xd5   : > { %7918 = vst [vmem:[#allocation88_spill] sm:$0xff] %v3848_v55  ;;  %v3863_v61 = vmax.f32 %v7929_v11, %v823_v25  ;;  %v7940_v26 = vld [vmem:[#allocation145_spill] sm:$0xff]  ;;  %v7944_v54 = vld [vmem:[#allocation146_spill] sm:$0xff]  ;;  %v7952_v34 = vld [vmem:[#allocation148_spill] sm:$0xff] }
  0xd6   : > { %7922 = vst [vmem:[#allocation89_spill] sm:$0xff] %v3853_v7  ;;  %7926 = vst [vmem:[#allocation90_spill] sm:$0xff] %v3858_v58  ;;  %v3868_v56 = vmax.f32 %v7933_v32, %v824_v4  ;;  %v3873_v0 = vmax.f32 %v7937_v40, %v825_v62  ;;  %v7941_v43 = vmax.f32 %v7939_v36, %v7940_v26  ;;  %v7948_v4 = vld [vmem:[#allocation147_spill] sm:$0xff]  ;;  %v7951_v62 = vld [vmem:[#allocation36_spill] sm:$0xff] }
  0xd7   : > { %7930 = vst [vmem:[#allocation91_spill] sm:$0xff] %v3863_v61  ;;  %v7945_v25 = vmax.f32 %v7943_v50, %v7944_v54  ;;  %v7949_v11 = vmax.f32 %v7947_v42, %v7948_v4  ;;  %v7953_v32 = vmax.f32 %v7951_v62, %v7952_v34  ;;  %v7956_v51 = vld [vmem:[#allocation149_spill] sm:$0xff]  ;;  %v7959_v26 = vld [vmem:[#allocation38_spill] sm:$0xff]  ;;  %v7967_v4 = vld [vmem:[#allocation39_spill] sm:$0xff] }
  0xd8   : > { %7934 = vst [vmem:[#allocation92_spill] sm:$0xff] %v3868_v56  ;;  %7938 = vst [vmem:[#allocation93_spill] sm:$0xff] %v3873_v0  ;;  %v3878_v5 = vmax.f32 %v7941_v43, %v826_v27  ;;  %v7955_v27 = vld [vmem:[#allocation37_spill] sm:$0xff]  ;;  %v7963_v54 = vld [vmem:[#allocation66_spill] sm:$0xff] }
  0xd9   : > { %v3883_v20 = vmax.f32 %v7945_v25, %v827_v47  ;;  %v3888_v19 = vmax.f32 %v7949_v11, %v828_v63  ;;  %v3893_v10 = vmax.f32 %v7953_v32, %v829_v15  ;;  %v7957_v40 = vmax.f32 %v7955_v27, %v7956_v51  ;;  %v7960_v47 = vld [vmem:[#allocation150_spill] sm:$0xff]  ;;  %v7964_v25 = vld [vmem:[#allocation151_spill] sm:$0xff]  ;;  %v7968_v11 = vld [vmem:[#allocation152_spill] sm:$0xff] }
  0xda   : > { %7942 = vst [vmem:[#allocation94_spill] sm:$0xff] %v3878_v5  ;;  %v7961_v43 = vmax.f32 %v7959_v26, %v7960_v47  ;;  %v7965_v63 = vmax.f32 %v7963_v54, %v7964_v25  ;;  %v7969_v62 = vmax.f32 %v7967_v4, %v7968_v11  ;;  %v3916_v34 = vld [vmem:[%s2421_s12] sm:$0x4]  ;;  %v3922_v32 = vld [vmem:[%s2421_s12 + $0x10] sm:$0x4]  ;;  %v7975_v27 = vld [vmem:[#allocation153_spill] sm:$0xff] }
  0xdb   : > { %7946 = vst [vmem:[#allocation95_spill] sm:$0xff] %v3883_v20  ;;  %7950 = vst [vmem:[#allocation96_spill] sm:$0xff] %v3888_v19  ;;  %v3898_v36 = vmax.f32 %v7957_v40, %v830_v3  ;;  %v3919_v3 = vld [vmem:[%s2421_s12 + $0x8] sm:$0x4]  ;;  %v7978_v40 = vld [vmem:[#allocation41_spill] sm:$0xff]  ;;  %v8105_v12 = vunpack.c.l.bf16 %v3916_v34  ;;  %v8109_v33 = vunpack.c.l.bf16 %v3922_v32 }
  0xdc   : > { %7954 = vst [vmem:[#allocation97_spill] sm:$0xff] %v3893_v10  ;;  %v3903_v50 = vmax.f32 %v7961_v43, %v831_v2  ;;  %v3908_v42 = vmax.f32 %v7965_v63, %v832_v39  ;;  %v3913_v15 = vmax.f32 %v7969_v62, %v833_v31  ;;  %7971 = vst [vmem:[#allocation102_spill] sm:$0xff] %v3916_v34  ;;  %v7974_v2 = vld [vmem:[#allocation40_spill] sm:$0xff]  ;;  %v7979_v26 = vld [vmem:[#allocation154_spill] sm:$0xff]  ;;  %v8107_v59 = vunpack.c.l.bf16 %v3919_v3 }
  0xdd   : > { %7958 = vst [vmem:[#allocation98_spill] sm:$0xff] %v3898_v36  ;;  %7972 = vst [vmem:[#allocation103_spill] sm:$0xff] %v3919_v3  ;;  %v7976_v51 = vmax.f32 %v7974_v2, %v7975_v27  ;;  %v7980_v47 = vmax.f32 %v7978_v40, %v7979_v26  ;;  %v7982_v43 = vld [vmem:[#allocation70_spill] sm:$0xff]  ;;  %v7983_v54 = vld [vmem:[#allocation155_spill] sm:$0xff]  ;;  %v4247_v14 = vrot.slane %v8109_v33, 4 }
  0xde   : > { %7962 = vst [vmem:[#allocation99_spill] sm:$0xff] %v3903_v50  ;;  %7966 = vst [vmem:[#allocation100_spill] sm:$0xff] %v3908_v42  ;;  %v7984_v25 = vmax.f32 %v7982_v43, %v7983_v54  ;;  %v7986_v4 = vld [vmem:[#allocation42_spill] sm:$0xff]  ;;  %v7987_v11 = vld [vmem:[#allocation156_spill] sm:$0xff] }
  0xdf   : > { %7970 = vst [vmem:[#allocation101_spill] sm:$0xff] %v3913_v15  ;;  %7973 = vst [vmem:[#allocation104_spill] sm:$0xff] %v3922_v32  ;;  %v3927_v39 = vmax.f32 %v7976_v51, %v834_v1  ;;  %v3932_v31 = vmax.f32 %v7980_v47, %v835_v57  ;;  %v7988_v62 = vmax.f32 %v7986_v4, %v7987_v11  ;;  %v3945_v42 = vld [vmem:[%s2421_s12 + $0x18] sm:$0x4]  ;;  %v3948_v1 = vld [vmem:[%s2421_s12 + $0x20] sm:$0x4] }
  0xe0   : > { %v3937_v63 = vmax.f32 %v7984_v25, %v836_v41  ;;  %7990 = vst [vmem:[#allocation109_spill] sm:$0xff] %v3945_v42  ;;  %7991 = vst [vmem:[#allocation110_spill] sm:$0xff] %v3948_v1  ;;  %v3951_v2 = vld [vmem:[%s2421_s12 + $0x28] sm:$0x4]  ;;  %v3954_v57 = vld [vmem:[%s2421_s12 + $0x30] sm:$0x4]  ;;  %v8113_v60 = vunpack.c.l.bf16 %v3948_v1 }
  0xe1   : > { %7977 = vst [vmem:[#allocation105_spill] sm:$0xff] %v3927_v39  ;;  %7981 = vst [vmem:[#allocation106_spill] sm:$0xff] %v3932_v31  ;;  %v3942_v15 = vmax.f32 %v7988_v62, %v837_v18  ;;  %v7994_v27 = vld [vmem:[#allocation2_spill] sm:$0xff]  ;;  %v7995_v51 = vld [vmem:[#allocation56_spill] sm:$0xff]  ;;  %v8115_v35 = vunpack.c.l.bf16 %v3951_v2  ;;  %v8117_v3 = vunpack.c.l.bf16 %v3954_v57 }
  0xe2   : > { %7985 = vst [vmem:[#allocation107_spill] sm:$0xff] %v3937_v63  ;;  %7992 = vst [vmem:[#allocation111_spill] sm:$0xff] %v3951_v2  ;;  %v7996_v41 = vld [vmem:[#allocation157_spill] sm:$0xff]  ;;  %v7999_v18 = vld [vmem:[#allocation3_spill] sm:$0xff]  ;;  %v4255_v9 = vrot.slane %v8113_v60, 4 }
  0xe3   : > { %7989 = vst [vmem:[#allocation108_spill] sm:$0xff] %v3942_v15  ;;  %7993 = vst [vmem:[#allocation112_spill] sm:$0xff] %v3954_v57  ;;  %v7997_v40 = vmax.f32 %v7995_v51, %v7996_v41  ;;  %v8000_v47 = vld [vmem:[#allocation43_spill] sm:$0xff]  ;;  %v8001_v43 = vld [vmem:[#allocation158_spill] sm:$0xff] }
  0xe4   : > { %v8002_v54 = vmax.f32 %v8000_v47, %v8001_v43  ;;  %v8004_v4 = vld [vmem:[#allocation4_spill] sm:$0xff]  ;;  %v8005_v11 = vld [vmem:[#allocation57_spill] sm:$0xff]  ;;  %v8006_v62 = vld [vmem:[#allocation159_spill] sm:$0xff]  ;;  %8110 = vst [vmem:[#allocation36_spill] sm:$0xff] %v4247_v14 }
  0xe5   : > { %v3960_v26 = vmax.f32 %v7997_v40, %v7994_v27  ;;  %v8007_v15 = vmax.f32 %v8005_v11, %v8006_v62  ;;  %v8009_v31 = vld [vmem:[#allocation5_spill] sm:$0xff]  ;;  %v8010_v39 = vld [vmem:[#allocation44_spill] sm:$0xff]  ;;  %v3984_v41 = vld [vmem:[%s2421_s12 + $0x40] sm:$0x4]  ;;  %8114 = vst [vmem:[#allocation37_spill] sm:$0xff] %v4255_v9 }
  0xe6   : > { %v3966_v25 = vmax.f32 %v8002_v54, %v7999_v18  ;;  %v8011_v50 = vld [vmem:[#allocation160_spill] sm:$0xff]  ;;  %v3981_v27 = vld [vmem:[%s2421_s12 + $0x38] sm:$0x4]  ;;  %8015 = vst [vmem:[#allocation118_spill] sm:$0xff] %v3984_v41  ;;  %v3987_v40 = vld [vmem:[%s2421_s12 + $0x48] sm:$0x4] }
  0xe7   : > { %7998 = vst [vmem:[#allocation113_spill] sm:$0xff] %v3960_v26  ;;  %v3972_v63 = vmax.f32 %v8007_v15, %v8004_v4  ;;  %v8012_v36 = vmax.f32 %v8010_v39, %v8011_v50  ;;  %8014 = vst [vmem:[#allocation117_spill] sm:$0xff] %v3981_v27  ;;  %v3990_v18 = vld [vmem:[%s2421_s12 + $0x50] sm:$0x4]  ;;  %v8018_v47 = vld [vmem:[#allocation6_spill] sm:$0xff]  ;;  %v8119_v32 = vunpack.c.l.bf16 %v3981_v27  ;;  %v8123_v1 = vunpack.c.l.bf16 %v3987_v40 }
  0xe8   : > { %8003 = vst [vmem:[#allocation114_spill] sm:$0xff] %v3966_v25  ;;  %8016 = vst [vmem:[#allocation7_spill] sm:$0xff] %v3987_v40  ;;  %v8019_v15 = vld [vmem:[#allocation47_spill] sm:$0xff]  ;;  %v8020_v43 = vld [vmem:[#allocation161_spill] sm:$0xff]  ;;  %v8125_v2 = vunpack.c.l.bf16 %v3990_v18 }
  0xe9   : > { %8008 = vst [vmem:[#allocation115_spill] sm:$0xff] %v3972_v63  ;;  %v3978_v51 = vmax.f32 %v8012_v36, %v8009_v31  ;;  %8017 = vst [vmem:[#allocation119_spill] sm:$0xff] %v3990_v18  ;;  %v8021_v54 = vmax.f32 %v8019_v15, %v8020_v43  ;;  %v8023_v36 = vld [vmem:[#allocation67_spill] sm:$0xff]  ;;  %v8024_v50 = vld [vmem:[#allocation48_spill] sm:$0xff]  ;;  %v4267_v33 = vrot.slane %v8119_v32, 4  ;;  %v4275_v60 = vrot.slane %v8123_v1, 4 }
  0xea   : > { %v8025_v39 = vld [vmem:[#allocation162_spill] sm:$0xff]  ;;  %v8028_v62 = vld [vmem:[#allocation68_spill] sm:$0xff]  ;;  %v8030_v63 = vld [vmem:[#allocation163_spill] sm:$0xff] }
  0xeb   : > { %8013 = vst [vmem:[#allocation116_spill] sm:$0xff] %v3978_v51  ;;  %v3996_v4 = vmax.f32 %v8021_v54, %v8018_v47  ;;  %v8026_v31 = vmax.f32 %v8024_v50, %v8025_v39  ;;  %v8029_v51 = vld [vmem:[#allocation59_spill] sm:$0xff]  ;;  %v8033_v10 = vld [vmem:[#allocation49_spill] sm:$0xff]  ;;  %v8034_v19 = vld [vmem:[#allocation164_spill] sm:$0xff] }
  0xec   : > { %v8031_v25 = vmax.f32 %v8029_v51, %v8030_v63  ;;  %v8035_v15 = vmax.f32 %v8033_v10, %v8034_v19  ;;  %v4017_v43 = vld [vmem:[%s2421_s12 + $0x58] sm:$0x4]  ;;  %v4020_v54 = vld [vmem:[%s2421_s12 + $0x60] sm:$0x4]  ;;  %v4026_v50 = vld [vmem:[%s2421_s12 + $0x70] sm:$0x4] }
  0xed   : > { %8022 = vst [vmem:[#allocation8_spill] sm:$0xff] %v3996_v4  ;;  %v4002_v11 = vmax.f32 %v8026_v31, %v8023_v36  ;;  %8037 = vst [vmem:[#allocation10_spill] sm:$0xff] %v4017_v43  ;;  %v4023_v36 = vld [vmem:[%s2421_s12 + $0x68] sm:$0x4]  ;;  %v8041_v63 = vld [vmem:[#allocation69_spill] sm:$0xff]  ;;  %v8127_v57 = vunpack.c.l.bf16 %v4017_v43  ;;  %v8129_v27 = vunpack.c.l.bf16 %v4020_v54  ;;  %v8133_v40 = vunpack.c.l.bf16 %v4026_v50 }
  0xee   : > { %v4008_v26 = vmax.f32 %v8031_v25, %v8028_v62  ;;  %v4014_v47 = vmax.f32 %v8035_v15, %v3698_v22  ;;  %8038 = vst [vmem:[#allocation122_spill] sm:$0xff] %v4020_v54  ;;  %8039 = vst [vmem:[#allocation11_spill] sm:$0xff] %v4023_v36  ;;  %v8042_v25 = vld [vmem:[#allocation61_spill] sm:$0xff]  ;;  %v8046_v19 = vld [vmem:[#allocation71_spill] sm:$0xff] }
  0xef   : > { %8027 = vst [vmem:[#allocation120_spill] sm:$0xff] %v4002_v11  ;;  %8040 = vst [vmem:[#allocation123_spill] sm:$0xff] %v4026_v50  ;;  %v8043_v51 = vld [vmem:[#allocation165_spill] sm:$0xff]  ;;  %v8047_v10 = vld [vmem:[#allocation51_spill] sm:$0xff]  ;;  %v4287_v32 = vrot.slane %v8129_v27, 4  ;;  %v4295_v1 = vrot.slane %v8133_v40, 4 }
  0xf0   : > { %8032 = vst [vmem:[#allocation9_spill] sm:$0xff] %v4008_v26  ;;  %8036 = vst [vmem:[#allocation121_spill] sm:$0xff] %v4014_v47  ;;  %v8044_v39 = vmax.f32 %v8042_v25, %v8043_v51  ;;  %v8048_v22 = vld [vmem:[#allocation166_spill] sm:$0xff]  ;;  %v8052_v26 = vld [vmem:[#allocation167_spill] sm:$0xff] }
  0xf1   : > { %v8049_v62 = vmax.f32 %v8047_v10, %v8048_v22  ;;  %v8051_v47 = vld [vmem:[#allocation62_spill] sm:$0xff]  ;;  %v8055_v20 = vld [vmem:[#allocation52_spill] sm:$0xff]  ;;  %v4053_v51 = vld [vmem:[%s2421_s12 + $0x78] sm:$0x4]  ;;  %8120 = vst [vmem:[#allocation150_spill] sm:$0xff] %v4267_v33 }
  0xf2   : > { %v4032_v31 = vmax.f32 %v8044_v39, %v8041_v63  ;;  %v8053_v11 = vmax.f32 %v8051_v47, %v8052_v26  ;;  %v8056_v5 = vld [vmem:[#allocation168_spill] sm:$0xff]  ;;  %8059 = vst [vmem:[#allocation14_spill] sm:$0xff] %v4053_v51  ;;  %v4056_v39 = vld [vmem:[%s2421_s12 + $0x80] sm:$0x4]  ;;  %v8064_v47 = vld [vmem:[#allocation65_spill] sm:$0xff]  ;;  %v8135_v18 = vunpack.c.l.bf16 %v4053_v51 }
  0xf3   : > { %v4038_v15 = vmax.f32 %v8049_v62, %v8046_v19  ;;  %v8057_v25 = vmax.f32 %v8055_v20, %v8056_v5  ;;  %8060 = vst [vmem:[#allocation126_spill] sm:$0xff] %v4056_v39  ;;  %v4059_v19 = vld [vmem:[%s2421_s12 + $0x88] sm:$0x4]  ;;  %v4062_v10 = vld [vmem:[%s2421_s12 + $0x90] sm:$0x4]  ;;  %8124 = vst [vmem:[#allocation151_spill] sm:$0xff] %v4275_v60  ;;  %v8137_v43 = vunpack.c.l.bf16 %v4056_v39 }
  0xf4   : > { %8045 = vst [vmem:[#allocation12_spill] sm:$0xff] %v4032_v31  ;;  %v4044_v4 = vmax.f32 %v8053_v11, %v3710_v21  ;;  %8061 = vst [vmem:[#allocation15_spill] sm:$0xff] %v4059_v19  ;;  %v8063_v26 = vld [vmem:[#allocation72_spill] sm:$0xff]  ;;  %v8065_v21 = vld [vmem:[#allocation169_spill] sm:$0xff]  ;;  %v8139_v54 = vunpack.c.l.bf16 %v4059_v19 }
  0xf5   : > { %8050 = vst [vmem:[#allocation124_spill] sm:$0xff] %v4038_v15  ;;  %v4050_v63 = vmax.f32 %v8057_v25, %v3714_v45  ;;  %8062 = vst [vmem:[#allocation127_spill] sm:$0xff] %v4062_v10  ;;  %v8066_v11 = vmax.f32 %v8064_v47, %v8065_v21  ;;  %v4071_v5 = vld [vmem:[%s2421_s12 + $0x98] sm:$0x4]  ;;  %v4074_v45 = vld [vmem:[%s2421_s12 + $0xa0] sm:$0x4] }
  0xf6   : > { %8054 = vst [vmem:[#allocation13_spill] sm:$0xff] %v4044_v4  ;;  %8068 = vst [vmem:[#allocation128_spill] sm:$0xff] %v4071_v5  ;;  %v4077_v20 = vld [vmem:[%s2421_s12 + $0xa8] sm:$0x4]  ;;  %v4080_v62 = vld [vmem:[%s2421_s12 + $0xb0] sm:$0x4]  ;;  %v8143_v50 = vunpack.c.l.bf16 %v4071_v5  ;;  %v8145_v51 = vunpack.c.l.bf16 %v4074_v45 }
  0xf7   : > { %8058 = vst [vmem:[#allocation125_spill] sm:$0xff] %v4050_v63  ;;  %v4068_v22 = vmax.f32 %v8066_v11, %v8063_v26  ;;  %8069 = vst [vmem:[#allocation17_spill] sm:$0xff] %v4074_v45  ;;  %v4086_v26 = vld [vmem:[%s2421_s12 + $0xb8] sm:$0x4]  ;;  %v4089_v21 = vld [vmem:[%s2421_s12 + $0xc0] sm:$0x4]  ;;  %v8147_v39 = vunpack.c.l.bf16 %v4077_v20  ;;  %v8149_v19 = vunpack.c.l.bf16 %v4080_v62 }
  0xf8   : > { %8070 = vst [vmem:[#allocation129_spill] sm:$0xff] %v4077_v20  ;;  %8071 = vst [vmem:[#allocation18_spill] sm:$0xff] %v4080_v62  ;;  %v4092_v11 = vld [vmem:[%s2421_s12 + $0xc8] sm:$0x4]  ;;  %v4102_v47 = vld [vmem:[%s2421_s12 + $0xd8] sm:$0x4]  ;;  %v8153_v5 = vunpack.c.l.bf16 %v4089_v21 }
  0xf9   : > { %8067 = vst [vmem:[#allocation16_spill] sm:$0xff] %v4068_v22  ;;  %8072 = vst [vmem:[#allocation130_spill] sm:$0xff] %v4086_v26  ;;  %v4095_v22 = vld [vmem:[%s2421_s12 + $0xd0] sm:$0x4]  ;;  %v4105_v31 = vld [vmem:[%s2421_s12 + $0xe0] sm:$0x4]  ;;  %v8155_v45 = vunpack.c.l.bf16 %v4092_v11  ;;  %v8159_v62 = vunpack.c.l.bf16 %v4102_v47 }
  0xfa   : > { %8073 = vst [vmem:[#allocation19_spill] sm:$0xff] %v4089_v21  ;;  %8074 = vst [vmem:[#allocation131_spill] sm:$0xff] %v4092_v11  ;;  %v4108_v0 = vld [vmem:[%s2421_s12 + $0xe8] sm:$0x4]  ;;  %v4111_v56 = vld [vmem:[%s2421_s12 + $0xf0] sm:$0x4]  ;;  %v8157_v20 = vunpack.c.l.bf16 %v4095_v22 }
  0xfb   : > { %8075 = vst [vmem:[#allocation20_spill] sm:$0xff] %v4095_v22  ;;  %8076 = vst [vmem:[#allocation132_spill] sm:$0xff] %v4102_v47  ;;  %v4118_v25 = vld [vmem:[%s2421_s12 + $0xf8] sm:$0x4]  ;;  %v4121_v58 = vld [vmem:[%s2421_s12 + $0x100] sm:$0x4]  ;;  %v8163_v21 = vunpack.c.l.bf16 %v4108_v0  ;;  %v8165_v11 = vunpack.c.l.bf16 %v4111_v56 }
  0xfc   : > { %8077 = vst [vmem:[#allocation21_spill] sm:$0xff] %v4105_v31  ;;  %8078 = vst [vmem:[#allocation133_spill] sm:$0xff] %v4108_v0  ;;  %v4124_v7 = vld [vmem:[%s2421_s12 + $0x108] sm:$0x4]  ;;  %v4131_v4 = vld [vmem:[%s2421_s12 + $0x110] sm:$0x4]  ;;  %v8167_v22 = vunpack.c.l.bf16 %v4118_v25  ;;  %v8169_v47 = vunpack.c.l.bf16 %v4121_v58 }
  0xfd   : > { %8079 = vst [vmem:[#allocation22_spill] sm:$0xff] %v4111_v56  ;;  %8080 = vst [vmem:[#allocation134_spill] sm:$0xff] %v4118_v25  ;;  %v4134_v63 = vld [vmem:[%s2421_s12 + $0x118] sm:$0x4]  ;;  %v4137_v23 = vld [vmem:[%s2421_s12 + $0x120] sm:$0x4]  ;;  %v8173_v0 = vunpack.c.l.bf16 %v4131_v4 }
  0xfe   : > { %8081 = vst [vmem:[#allocation23_spill] sm:$0xff] %v4121_v58  ;;  %8082 = vst [vmem:[#allocation135_spill] sm:$0xff] %v4124_v7  ;;  %v4144_v37 = vld [vmem:[%s2421_s12 + $0x128] sm:$0x4]  ;;  %v4147_v15 = vld [vmem:[%s2421_s12 + $0x130] sm:$0x4]  ;;  %v8175_v56 = vunpack.c.l.bf16 %v4134_v63  ;;  %v8177_v25 = vunpack.c.l.bf16 %v4137_v23 }
  0xff   : > { %8083 = vst [vmem:[#allocation24_spill] sm:$0xff] %v4131_v4  ;;  %8084 = vst [vmem:[#allocation136_spill] sm:$0xff] %v4134_v63  ;;  %v4150_v52 = vld [vmem:[%s2421_s12 + $0x138] sm:$0x4]  ;;  %v4157_v48 = vld [vmem:[%s2421_s12 + $0x140] sm:$0x4]  ;;  %v8179_v58 = vunpack.c.l.bf16 %v4144_v37 }
 0x100   : > { %8085 = vst [vmem:[#allocation25_spill] sm:$0xff] %v4137_v23  ;;  %8086 = vst [vmem:[#allocation137_spill] sm:$0xff] %v4144_v37  ;;  %v4160_v61 = vld [vmem:[%s2421_s12 + $0x148] sm:$0x4]  ;;  %v4163_v38 = vld [vmem:[%s2421_s12 + $0x150] sm:$0x4]  ;;  %v8184_v4 = vunpack.c.l.bf16 %v4150_v52  ;;  %v8186_v63 = vunpack.c.l.bf16 %v4157_v48 }
 0x101   : > { %8087 = vst [vmem:[#allocation26_spill] sm:$0xff] %v4147_v15  ;;  %8088 = vst [vmem:[#allocation138_spill] sm:$0xff] %v4150_v52  ;;  %v4170_v24 = vld [vmem:[%s2421_s12 + $0x158] sm:$0x4]  ;;  %v4173_v55 = vld [vmem:[%s2421_s12 + $0x160] sm:$0x4]  ;;  %v8188_v23 = vunpack.c.l.bf16 %v4160_v61 }
 0x102   : > { %8089 = vst [vmem:[#allocation27_spill] sm:$0xff] %v4157_v48  ;;  %8090 = vst [vmem:[#allocation139_spill] sm:$0xff] %v4160_v61  ;;  %v4176_v49 = vld [vmem:[%s2421_s12 + $0x168] sm:$0x4]  ;;  %v4183_v17 = vld [vmem:[%s2421_s12 + $0x170] sm:$0x4]  ;;  %v8195_v52 = vunpack.c.l.bf16 %v4173_v55 }
 0x103   : > { %8091 = vst [vmem:[#allocation28_spill] sm:$0xff] %v4163_v38  ;;  %8092 = vst [vmem:[#allocation140_spill] sm:$0xff] %v4170_v24  ;;  %v4186_v46 = vld [vmem:[%s2421_s12 + $0x178] sm:$0x4]  ;;  %v4189_v16 = vld [vmem:[%s2421_s12 + $0x180] sm:$0x4]  ;;  %v8111_v38 = vunpack.c.l.bf16 %v3945_v42  ;;  %v8121_v42 = vunpack.c.l.bf16 %v3984_v41  ;;  %v8131_v41 = vunpack.c.l.bf16 %v4023_v36  ;;  %v8141_v36 = vunpack.c.l.bf16 %v4062_v10 }
 0x104   : > { %8093 = vst [vmem:[#allocation29_spill] sm:$0xff] %v4173_v55  ;;  %8094 = vst [vmem:[#allocation141_spill] sm:$0xff] %v4176_v49  ;;  %v4196_v53 = vld [vmem:[%s2421_s12 + $0x188] sm:$0x4]  ;;  %v4199_v44 = vld [vmem:[%s2421_s12 + $0x190] sm:$0x4]  ;;  %v8151_v10 = vunpack.c.l.bf16 %v4086_v26  ;;  %v8161_v26 = vunpack.c.l.bf16 %v4105_v31  ;;  %v8171_v31 = vunpack.c.l.bf16 %v4124_v7  ;;  %v8197_v48 = vunpack.c.l.bf16 %v4176_v49 }
 0x105   : > { %8095 = vst [vmem:[#allocation30_spill] sm:$0xff] %v4183_v17  ;;  %8096 = vst [vmem:[#allocation142_spill] sm:$0xff] %v4186_v46  ;;  %v4202_v6 = vld [vmem:[%s2421_s12 + $0x198] sm:$0x4]  ;;  %v4209_v13 = vld [vmem:[%s2421_s12 + $0x1a0] sm:$0x4]  ;;  %v8206_v55 = vunpack.c.l.bf16 %v4196_v53  ;;  %v8208_v49 = vunpack.c.l.bf16 %v4199_v44 }
 0x106   : > { %8097 = vst [vmem:[#allocation31_spill] sm:$0xff] %v4189_v16  ;;  %8098 = vst [vmem:[#allocation143_spill] sm:$0xff] %v4196_v53  ;;  %v4212_v29 = vld [vmem:[%s2421_s12 + $0x1a8] sm:$0x4]  ;;  %v4215_v8 = vld [vmem:[%s2421_s12 + $0x1b0] sm:$0x4] }
 0x107   : > { %8099 = vst [vmem:[#allocation32_spill] sm:$0xff] %v4199_v44  ;;  %8100 = vst [vmem:[#allocation144_spill] sm:$0xff] %v4202_v6  ;;  %v4222_v28 = vld [vmem:[%s2421_s12 + $0x1b8] sm:$0x4]  ;;  %v4239_v17 = vrot.slane %v8105_v12, 4  ;;  %v4243_v15 = vrot.slane %v8107_v59, 4  ;;  %v8216_v53 = vunpack.c.l.bf16 %v4215_v8 }
 0x108   : > { %8101 = vst [vmem:[#allocation33_spill] sm:$0xff] %v4209_v13  ;;  %8102 = vst [vmem:[#allocation145_spill] sm:$0xff] %v4212_v29  ;;  %v4251_v30 = vrot.slane %v8111_v38, 4  ;;  %v4259_v12 = vrot.slane %v8115_v35, 4  ;;  %v4263_v59 = vrot.slane %v8117_v3, 4  ;;  %v4271_v38 = vrot.slane %v8121_v42, 4 }
 0x109   : > { %8103 = vst [vmem:[#allocation34_spill] sm:$0xff] %v4215_v8  ;;  %8104 = vst [vmem:[#allocation146_spill] sm:$0xff] %v4222_v28  ;;  %v4279_v35 = vrot.slane %v8125_v2, 4  ;;  %v4283_v3 = vrot.slane %v8127_v57, 4  ;;  %v4291_v42 = vrot.slane %v8131_v41, 4  ;;  %v4299_v2 = vrot.slane %v8135_v18, 4 }
 0x10a   : > { %8106 = vst [vmem:[#allocation35_spill] sm:$0xff] %v4239_v17  ;;  %8108 = vst [vmem:[#allocation147_spill] sm:$0xff] %v4243_v15  ;;  %v4303_v57 = vrot.slane %v8137_v43, 4  ;;  %v4307_v27 = vrot.slane %v8139_v54, 4  ;;  %v4311_v41 = vrot.slane %v8141_v36, 4  ;;  %v4315_v40 = vrot.slane %v8143_v50, 4 }
 0x10b   : > { %8112 = vst [vmem:[#allocation148_spill] sm:$0xff] %v4251_v30  ;;  %8116 = vst [vmem:[#allocation149_spill] sm:$0xff] %v4259_v12  ;;  %v4319_v18 = vrot.slane %v8145_v51, 4  ;;  %v4323_v43 = vrot.slane %v8147_v39, 4  ;;  %v4327_v54 = vrot.slane %v8149_v19, 4  ;;  %v4331_v36 = vrot.slane %v8151_v10, 4 }
 0x10c   : > { %8118 = vst [vmem:[#allocation38_spill] sm:$0xff] %v4263_v59  ;;  %8122 = vst [vmem:[#allocation66_spill] sm:$0xff] %v4271_v38  ;;  %v4335_v50 = vrot.slane %v8153_v5, 4  ;;  %v4339_v51 = vrot.slane %v8155_v45, 4  ;;  %v4343_v39 = vrot.slane %v8157_v20, 4  ;;  %v4347_v19 = vrot.slane %v8159_v62, 4 }
 0x10d   : > { %8126 = vst [vmem:[#allocation39_spill] sm:$0xff] %v4279_v35  ;;  %8128 = vst [vmem:[#allocation152_spill] sm:$0xff] %v4283_v3  ;;  %v4351_v10 = vrot.slane %v8161_v26, 4  ;;  %v4355_v5 = vrot.slane %v8163_v21, 4  ;;  %v4359_v45 = vrot.slane %v8165_v11, 4  ;;  %v4363_v20 = vrot.slane %v8167_v22, 4 }
 0x10e   : > { %8130 = vst [vmem:[#allocation40_spill] sm:$0xff] %v4287_v32  ;;  %8132 = vst [vmem:[#allocation153_spill] sm:$0xff] %v4291_v42  ;;  %v4367_v62 = vrot.slane %v8169_v47, 4  ;;  %v4371_v26 = vrot.slane %v8171_v31, 4  ;;  %v4375_v21 = vrot.slane %v8173_v0, 4  ;;  %v4379_v11 = vrot.slane %v8175_v56, 4 }
 0x10f   : > { %8134 = vst [vmem:[#allocation41_spill] sm:$0xff] %v4295_v1  ;;  %8136 = vst [vmem:[#allocation154_spill] sm:$0xff] %v4299_v2  ;;  %v4383_v22 = vrot.slane %v8177_v25, 4  ;;  %v4387_v47 = vrot.slane %v8179_v58, 4  ;;  %v8181_v34 = vld [vmem:[#allocation26_spill] sm:$0xff]  ;;  %v4395_v0 = vrot.slane %v8184_v4, 4  ;;  %v8218_v44 = vunpack.c.l.bf16 %v4222_v28 }
 0x110   : > { %8138 = vst [vmem:[#allocation70_spill] sm:$0xff] %v4303_v57  ;;  %8140 = vst [vmem:[#allocation155_spill] sm:$0xff] %v4307_v27  ;;  %v8182_v7 = vunpack.c.l.bf16 %v8181_v34  ;;  %v4399_v56 = vrot.slane %v8186_v63, 4  ;;  %v4403_v25 = vrot.slane %v8188_v23, 4  ;;  %v8193_v34 = vunpack.c.l.bf16 %v4170_v24  ;;  %v8224_v8 = vld [vmem:[#allocation46_spill] sm:$0xff]  ;;  %v8286_v1 = vld [vmem:[#allocation104_spill] sm:$0xff] }
 0x111   : > { %8142 = vst [vmem:[#allocation42_spill] sm:$0xff] %v4311_v41  ;;  %8144 = vst [vmem:[#allocation156_spill] sm:$0xff] %v4315_v40  ;;  %v4415_v4 = vrot.slane %v8195_v52, 4  ;;  %v4419_v63 = vrot.slane %v8197_v48, 4  ;;  %v8204_v24 = vunpack.c.l.bf16 %v4189_v16  ;;  %v4435_v52 = vrot.slane %v8206_v55, 4  ;;  %v8294_v41 = vld [vmem:[#allocation112_spill] sm:$0xff] }
 0x112   : > { %8146 = vst [vmem:[#allocation2_spill] sm:$0xff] %v4319_v18  ;;  %8148 = vst [vmem:[#allocation56_spill] sm:$0xff] %v4323_v43  ;;  %v4391_v31 = vrot.slane %v8182_v7, 4  ;;  %v4411_v7 = vrot.slane %v8193_v34, 4  ;;  %v4439_v48 = vrot.slane %v8208_v49, 4  ;;  %v8214_v16 = vunpack.c.l.bf16 %v4212_v29 }
 0x113   : > { %8150 = vst [vmem:[#allocation157_spill] sm:$0xff] %v4327_v54  ;;  %8152 = vst [vmem:[#allocation3_spill] sm:$0xff] %v4331_v36  ;;  %v4431_v34 = vrot.slane %v8204_v24, 4  ;;  %v4455_v55 = vrot.slane %v8216_v53, 4  ;;  %v4459_v49 = vrot.slane %v8218_v44, 4 }
 0x114   : > { %8154 = vst [vmem:[#allocation43_spill] sm:$0xff] %v4335_v50  ;;  %8156 = vst [vmem:[#allocation158_spill] sm:$0xff] %v4339_v51  ;;  %v4451_v24 = vrot.slane %v8214_v16, 4  ;;  %v8223_v16 = vld [vmem:[#allocation58_spill] sm:$0xff] }
 0x115   : > { %8158 = vst [vmem:[#allocation4_spill] sm:$0xff] %v4343_v39  ;;  %8160 = vst [vmem:[#allocation57_spill] sm:$0xff] %v4347_v19 }
 0x116   : > { %8162 = vst [vmem:[#allocation159_spill] sm:$0xff] %v4351_v10  ;;  %8164 = vst [vmem:[#allocation5_spill] sm:$0xff] %v4355_v5 }
 0x117   : > { %8166 = vst [vmem:[#allocation44_spill] sm:$0xff] %v4359_v45  ;;  %8168 = vst [vmem:[#allocation160_spill] sm:$0xff] %v4363_v20 }
 0x118   : > { %8170 = vst [vmem:[#allocation6_spill] sm:$0xff] %v4367_v62  ;;  %8172 = vst [vmem:[#allocation47_spill] sm:$0xff] %v4371_v26 }
 0x119   : > { %8174 = vst [vmem:[#allocation161_spill] sm:$0xff] %v4375_v21  ;;  %8176 = vst [vmem:[#allocation67_spill] sm:$0xff] %v4379_v11  ;;  %v8282_v21 = vld [vmem:[#allocation102_spill] sm:$0xff]  ;;  %v8284_v11 = vld [vmem:[#allocation103_spill] sm:$0xff] }
 0x11a   : > { %8178 = vst [vmem:[#allocation48_spill] sm:$0xff] %v4383_v22  ;;  %8180 = vst [vmem:[#allocation162_spill] sm:$0xff] %v4387_v47  ;;  %v8190_v22 = vld [vmem:[#allocation28_spill] sm:$0xff]  ;;  %v8288_v47 = vld [vmem:[#allocation109_spill] sm:$0xff] }
 0x11b   : > { %8183 = vst [vmem:[#allocation68_spill] sm:$0xff] %v4391_v31  ;;  %8185 = vst [vmem:[#allocation59_spill] sm:$0xff] %v4395_v0  ;;  %v8191_v37 = vunpack.c.l.bf16 %v8190_v22  ;;  %v8202_v22 = vunpack.c.l.bf16 %v4186_v46  ;;  %v8212_v46 = vunpack.c.l.bf16 %v4209_v13  ;;  %v8290_v31 = vld [vmem:[#allocation110_spill] sm:$0xff]  ;;  %v8292_v0 = vld [vmem:[#allocation111_spill] sm:$0xff] }
 0x11c   : > { %8187 = vst [vmem:[#allocation163_spill] sm:$0xff] %v4399_v56  ;;  %8189 = vst [vmem:[#allocation49_spill] sm:$0xff] %v4403_v25  ;;  %v8199_v56 = vld [vmem:[#allocation30_spill] sm:$0xff] }
 0x11d   : > { %v4407_v58 = vrot.slane %v8191_v37, 4  ;;  %8194 = vst [vmem:[#allocation69_spill] sm:$0xff] %v4411_v7  ;;  %8196 = vst [vmem:[#allocation61_spill] sm:$0xff] %v4415_v4  ;;  %v8200_v61 = vunpack.c.l.bf16 %v8199_v56  ;;  %v4427_v37 = vrot.slane %v8202_v22, 4  ;;  %v8210_v56 = vunpack.c.l.bf16 %v4202_v6  ;;  %v8220_v6 = vld [vmem:[#allocation73_spill] sm:$0xff] }
 0x11e   : > { %8198 = vst [vmem:[#allocation165_spill] sm:$0xff] %v4419_v63  ;;  %8205 = vst [vmem:[#allocation166_spill] sm:$0xff] %v4431_v34  ;;  %v4447_v22 = vrot.slane %v8212_v46, 4  ;;  %v8222_v46 = vld [vmem:[#allocation45_spill] sm:$0xff]  ;;  %v8285_v7 = vunpack.c.l.bf16 %v8284_v11  ;;  %v8287_v4 = vunpack.c.l.bf16 %v8286_v1  ;;  %v8289_v63 = vunpack.c.l.bf16 %v8288_v47  ;;  %v8298_v11 = vld [vmem:[#allocation118_spill] sm:$0xff] }
 0x11f   : > { %8192 = vst [vmem:[#allocation164_spill] sm:$0xff] %v4407_v58  ;;  %v4423_v23 = vrot.slane %v8200_v61, 4  ;;  %8203 = vst [vmem:[#allocation51_spill] sm:$0xff] %v4427_v37  ;;  %v4443_v61 = vrot.slane %v8210_v56, 4  ;;  %v8283_v58 = vunpack.c.l.bf16 %v8282_v21  ;;  %v8293_v37 = vunpack.c.l.bf16 %v8292_v0  ;;  %v8296_v21 = vld [vmem:[#allocation117_spill] sm:$0xff]  ;;  %v8300_v1 = vld [vmem:[#allocation7_spill] sm:$0xff] }
 0x120   : > { %8207 = vst [vmem:[#allocation62_spill] sm:$0xff] %v4435_v52  ;;  %8209 = vst [vmem:[#allocation167_spill] sm:$0xff] %v4439_v48  ;;  %v1300_v48 = vrot.slane %v8285_v7, 5  ;;  %v1301_v5 = vrot.slane %v8287_v4, 5  ;;  %v1302_v45 = vrot.slane %v8289_v63, 5  ;;  %v8295_v34 = vunpack.c.l.bf16 %v8294_v41  ;;  %v8302_v47 = vld [vmem:[#allocation119_spill] sm:$0xff] }
 0x121   : > { %8201 = vst [vmem:[#allocation71_spill] sm:$0xff] %v4423_v23  ;;  %8211 = vst [vmem:[#allocation52_spill] sm:$0xff] %v4443_v61  ;;  %v8221_v61 = vld [vmem:[#allocation74_spill] sm:$0xff]  ;;  %v1299_v52 = vrot.slane %v8283_v58, 5  ;;  %v8291_v23 = vunpack.c.l.bf16 %v8290_v31  ;;  %v1304_v62 = vrot.slane %v8293_v37, 5  ;;  %v8297_v58 = vunpack.c.l.bf16 %v8296_v21  ;;  %v8308_v41 = vld [vmem:[#allocation11_spill] sm:$0xff] }
 0x122   : > { %8213 = vst [vmem:[#allocation168_spill] sm:$0xff] %v4447_v22  ;;  %8215 = vst [vmem:[#allocation72_spill] sm:$0xff] %v4451_v24  ;;  %v1305_v26 = vrot.slane %v8295_v34, 5  ;;  %v8299_v7 = vunpack.c.l.bf16 %v8298_v11  ;;  %v8301_v4 = vunpack.c.l.bf16 %v8300_v1  ;;  %v8303_v63 = vunpack.c.l.bf16 %v8302_v47  ;;  %v8304_v31 = vld [vmem:[#allocation10_spill] sm:$0xff]  ;;  %v8310_v21 = vld [vmem:[#allocation123_spill] sm:$0xff] }
 0x123   : > { %8217 = vst [vmem:[#allocation65_spill] sm:$0xff] %v4455_v55  ;;  %8219 = vst [vmem:[#allocation169_spill] sm:$0xff] %v4459_v49  ;;  %v1303_v24 = vrot.slane %v8291_v23, 5  ;;  %v1306_v25 = vrot.slane %v8297_v58, 5  ;;  %v8305_v23 = vunpack.c.l.bf16 %v8304_v31  ;;  %v8306_v0 = vld [vmem:[#allocation122_spill] sm:$0xff]  ;;  %v8309_v34 = vunpack.c.l.bf16 %v8308_v41  ;;  %v8316_v47 = vld [vmem:[#allocation15_spill] sm:$0xff] }
 0x124   : > { %v1307_v20 = vrot.slane %v8299_v7, 5  ;;  %v1308_v10 = vrot.slane %v8301_v4, 5  ;;  %v1309_v19 = vrot.slane %v8303_v63, 5  ;;  %v8307_v37 = vunpack.c.l.bf16 %v8306_v0  ;;  %v8312_v11 = vld [vmem:[#allocation14_spill] sm:$0xff]  ;;  %v8318_v31 = vld [vmem:[#allocation127_spill] sm:$0xff]  ;;  %v8320_v0 = vld [vmem:[#allocation128_spill] sm:$0xff] }
 0x125   : > { %v1310_v39 = vrot.slane %v8305_v23, 5  ;;  %v1312_v50 = vrot.slane %v8309_v34, 5  ;;  %v8311_v58 = vunpack.c.l.bf16 %v8310_v21  ;;  %v8313_v7 = vunpack.c.l.bf16 %v8312_v11  ;;  %v8314_v1 = vld [vmem:[#allocation126_spill] sm:$0xff]  ;;  %v8322_v41 = vld [vmem:[#allocation17_spill] sm:$0xff] }
 0x126   : > { %v1311_v51 = vrot.slane %v8307_v37, 5  ;;  %v8315_v4 = vunpack.c.l.bf16 %v8314_v1  ;;  %v8317_v63 = vunpack.c.l.bf16 %v8316_v47  ;;  %v8319_v23 = vunpack.c.l.bf16 %v8318_v31  ;;  %v8324_v21 = vld [vmem:[#allocation129_spill] sm:$0xff]  ;;  %v8326_v11 = vld [vmem:[#allocation18_spill] sm:$0xff]  ;;  %v8330_v47 = vld [vmem:[#allocation19_spill] sm:$0xff] }
 0x127   : > { %v1313_v36 = vrot.slane %v8311_v58, 5  ;;  %v1314_v54 = vrot.slane %v8313_v7, 5  ;;  %v8321_v37 = vunpack.c.l.bf16 %v8320_v0  ;;  %v8323_v34 = vunpack.c.l.bf16 %v8322_v41  ;;  %v8328_v1 = vld [vmem:[#allocation130_spill] sm:$0xff]  ;;  %v8332_v31 = vld [vmem:[#allocation131_spill] sm:$0xff]  ;;  %v8334_v0 = vld [vmem:[#allocation20_spill] sm:$0xff] }
 0x128   : > { %v1315_v43 = vrot.slane %v8315_v4, 5  ;;  %v1316_v18 = vrot.slane %v8317_v63, 5  ;;  %v1317_v40 = vrot.slane %v8319_v23, 5  ;;  %v8325_v58 = vunpack.c.l.bf16 %v8324_v21  ;;  %v8336_v41 = vld [vmem:[#allocation132_spill] sm:$0xff]  ;;  %v8338_v21 = vld [vmem:[#allocation21_spill] sm:$0xff] }
 0x129   : > { %v1318_v27 = vrot.slane %v8321_v37, 5  ;;  %v1319_v57 = vrot.slane %v8323_v34, 5  ;;  %v8327_v7 = vunpack.c.l.bf16 %v8326_v11  ;;  %v8329_v4 = vunpack.c.l.bf16 %v8328_v1  ;;  %v8340_v11 = vld [vmem:[#allocation133_spill] sm:$0xff]  ;;  %v8342_v1 = vld [vmem:[#allocation22_spill] sm:$0xff] }
 0x12a   : > { %v1320_v2 = vrot.slane %v8325_v58, 5  ;;  %v8331_v63 = vunpack.c.l.bf16 %v8330_v47  ;;  %v8333_v23 = vunpack.c.l.bf16 %v8332_v31  ;;  %v8335_v37 = vunpack.c.l.bf16 %v8334_v0  ;;  %v8344_v47 = vld [vmem:[#allocation134_spill] sm:$0xff]  ;;  %v8346_v31 = vld [vmem:[#allocation23_spill] sm:$0xff] }
 0x12b   : > { %v1321_v42 = vrot.slane %v8327_v7, 5  ;;  %v1322_v32 = vrot.slane %v8329_v4, 5  ;;  %v8337_v34 = vunpack.c.l.bf16 %v8336_v41  ;;  %v8339_v58 = vunpack.c.l.bf16 %v8338_v21  ;;  %v8348_v0 = vld [vmem:[#allocation135_spill] sm:$0xff]  ;;  %v8350_v41 = vld [vmem:[#allocation24_spill] sm:$0xff] }
 0x12c   : > { %v1323_v3 = vrot.slane %v8331_v63, 5  ;;  %v1324_v35 = vrot.slane %v8333_v23, 5  ;;  %v1325_v60 = vrot.slane %v8335_v37, 5  ;;  %v8341_v7 = vunpack.c.l.bf16 %v8340_v11  ;;  %v8352_v21 = vld [vmem:[#allocation136_spill] sm:$0xff]  ;;  %v8354_v11 = vld [vmem:[#allocation25_spill] sm:$0xff] }
 0x12d   : > { %v1326_v38 = vrot.slane %v8337_v34, 5  ;;  %v1327_v33 = vrot.slane %v8339_v58, 5  ;;  %v8343_v4 = vunpack.c.l.bf16 %v8342_v1  ;;  %v8345_v63 = vunpack.c.l.bf16 %v8344_v47  ;;  %v8356_v1 = vld [vmem:[#allocation137_spill] sm:$0xff]  ;;  %v8358_v47 = vld [vmem:[#allocation26_spill] sm:$0xff] }
 0x12e   : > { %v1328_v59 = vrot.slane %v8341_v7, 5  ;;  %v8347_v23 = vunpack.c.l.bf16 %v8346_v31  ;;  %v8349_v37 = vunpack.c.l.bf16 %v8348_v0  ;;  %v8351_v34 = vunpack.c.l.bf16 %v8350_v41  ;;  %v8360_v31 = vld [vmem:[#allocation138_spill] sm:$0xff]  ;;  %v8362_v0 = vld [vmem:[#allocation27_spill] sm:$0xff] }
 0x12f   : > { %v1329_v12 = vrot.slane %v8343_v4, 5  ;;  %v1330_v9 = vrot.slane %v8345_v63, 5  ;;  %v8353_v58 = vunpack.c.l.bf16 %v8352_v21  ;;  %v8355_v7 = vunpack.c.l.bf16 %v8354_v11  ;;  %v8364_v41 = vld [vmem:[#allocation139_spill] sm:$0xff]  ;;  %v8366_v21 = vld [vmem:[#allocation28_spill] sm:$0xff] }
 0x130   : > { %v1331_v30 = vrot.slane %v8347_v23, 5  ;;  %v1332_v14 = vrot.slane %v8349_v37, 5  ;;  %v1333_v15 = vrot.slane %v8351_v34, 5  ;;  %v8357_v4 = vunpack.c.l.bf16 %v8356_v1  ;;  %v8368_v11 = vld [vmem:[#allocation140_spill] sm:$0xff]  ;;  %v8371_v1 = vld [vmem:[#allocation29_spill] sm:$0xff] }
 0x131   : > { %v1334_v17 = vrot.slane %v8353_v58, 5  ;;  %v1335_v49 = vrot.slane %v8355_v7, 5  ;;  %v8359_v63 = vunpack.c.l.bf16 %v8358_v47  ;;  %v8361_v23 = vunpack.c.l.bf16 %v8360_v31 }
 0x132   : > { %v1336_v28 = vrot.slane %v8357_v4, 5  ;;  %v8363_v37 = vunpack.c.l.bf16 %v8362_v0  ;;  %v8365_v34 = vunpack.c.l.bf16 %v8364_v41  ;;  %v8367_v58 = vunpack.c.l.bf16 %v8366_v21  ;;  %v8377_v0 = vld [vmem:[#allocation30_spill] sm:$0xff] }
 0x133   : > { %v1337_v53 = vrot.slane %v8359_v63, 5  ;;  %v1338_v29 = vrot.slane %v8361_v23, 5  ;;  %v8369_v7 = vunpack.c.l.bf16 %v8368_v11  ;;  %v8372_v4 = vunpack.c.l.bf16 %v8371_v1  ;;  %v8374_v63 = vld [vmem:[#allocation141_spill] sm:$0xff]  ;;  %v8380_v41 = vld [vmem:[#allocation142_spill] sm:$0xff] }
 0x134   : > { %v1339_v22 = vrot.slane %v8363_v37, 5  ;;  %v1340_v13 = vrot.slane %v8365_v34, 5  ;;  %v1341_v56 = vrot.slane %v8367_v58, 5  ;;  %v8375_v31 = vunpack.c.l.bf16 %v8374_v63  ;;  %v8383_v58 = vld [vmem:[#allocation31_spill] sm:$0xff] }
 0x135   : > { %v4661_v44 = vrot.slane %v8369_v7, 5  ;;  %v4665_v47 = vrot.slane %v8372_v4, 5  ;;  %v8378_v37 = vunpack.c.l.bf16 %v8377_v0  ;;  %v8381_v34 = vunpack.c.l.bf16 %v8380_v41 }
 0x136   : > { %v4669_v23 = vrot.slane %v8375_v31, 5  ;;  %v8384_v11 = vunpack.c.l.bf16 %v8383_v58 }
 0x137   : > { %8370 = vst [vmem:[#allocation73_spill] sm:$0xff] %v4661_v44  ;;  %8373 = vst [vmem:[#allocation74_spill] sm:$0xff] %v4665_v47  ;;  %v4673_v55 = vrot.slane %v8378_v37, 5  ;;  %v4677_v21 = vrot.slane %v8381_v34, 5  ;;  %v8386_v44 = vld [vmem:[#allocation143_spill] sm:$0xff]  ;;  %v8389_v47 = vld [vmem:[#allocation32_spill] sm:$0xff] }
 0x138   : > { %8376 = vst [vmem:[#allocation45_spill] sm:$0xff] %v4669_v23  ;;  %v4681_v7 = vrot.slane %v8384_v11, 5  ;;  %v8387_v1 = vunpack.c.l.bf16 %v8386_v44  ;;  %v8390_v63 = vunpack.c.l.bf16 %v8389_v47  ;;  %v8391_v23 = vld [vmem:[#allocation144_spill] sm:$0xff] }
 0x139   : > { %8379 = vst [vmem:[#allocation58_spill] sm:$0xff] %v4673_v55  ;;  %8382 = vst [vmem:[#allocation46_spill] sm:$0xff] %v4677_v21  ;;  %v8392_v0 = vunpack.c.l.bf16 %v8391_v23  ;;  %v8394_v55 = vld [vmem:[#allocation33_spill] sm:$0xff]  ;;  %v8404_v23 = vld [vmem:[#allocation35_spill] sm:$0xff] }
 0x13a   : > { %8385 = vst [vmem:[#allocation102_spill] sm:$0xff] %v4681_v7  ;;  %v4685_v4 = vrot.slane %v8387_v1, 5  ;;  %v4689_v31 = vrot.slane %v8390_v63, 5  ;;  %v8395_v41 = vunpack.c.l.bf16 %v8394_v55  ;;  %v8397_v21 = vld [vmem:[#allocation145_spill] sm:$0xff]  ;;  %v8399_v7 = vld [vmem:[#allocation34_spill] sm:$0xff]  ;;  %v8407_v55 = vld [vmem:[#allocation147_spill] sm:$0xff] }
 0x13b   : > { %v4693_v37 = vrot.slane %v8392_v0, 5  ;;  %v8398_v58 = vunpack.c.l.bf16 %v8397_v21  ;;  %v8400_v44 = vunpack.c.l.bf16 %v8399_v7  ;;  %v8405_v0 = vmax.f32 %v8220_v6, %v8404_v23  ;;  %v8410_v21 = vld [vmem:[#allocation36_spill] sm:$0xff]  ;;  %v8419_v23 = vld [vmem:[#allocation75_spill] sm:$0xff] }
 0x13c   : > { %8388 = vst [vmem:[#allocation103_spill] sm:$0xff] %v4685_v4  ;;  %v4697_v34 = vrot.slane %v8395_v41, 5  ;;  %v8401_v4 = vld [vmem:[#allocation146_spill] sm:$0xff]  ;;  %v8408_v41 = vmax.f32 %v8221_v61, %v8407_v55  ;;  %v8423_v55 = vld [vmem:[#allocation60_spill] sm:$0xff] }
 0x13d   : > { %8393 = vst [vmem:[#allocation104_spill] sm:$0xff] %v4693_v37  ;;  %v4701_v11 = vrot.slane %v8398_v58, 5  ;;  %v4705_v1 = vrot.slane %v8400_v44, 5  ;;  %v8402_v47 = vunpack.c.l.bf16 %v8401_v4  ;;  %v4714_v37 = vmax.f32 %v8405_v0, %v1299_v52  ;;  %v8413_v44 = vld [vmem:[#allocation148_spill] sm:$0xff]  ;;  %v8420_v0 = vld [vmem:[#allocation149_spill] sm:$0xff] }
 0x13e   : > { %8396 = vst [vmem:[#allocation109_spill] sm:$0xff] %v4697_v34  ;;  %v4719_v34 = vmax.f32 %v8408_v41, %v1300_v48  ;;  %v8411_v58 = vmax.f32 %v8222_v46, %v8410_v21  ;;  %v8414_v4 = vmax.f32 %v8223_v16, %v8413_v44  ;;  %v8421_v61 = vmax.f32 %v8419_v23, %v8420_v0  ;;  %v8424_v41 = vld [vmem:[#allocation38_spill] sm:$0xff]  ;;  %v8431_v44 = vld [vmem:[#allocation76_spill] sm:$0xff]  ;;  %v8439_v0 = vld [vmem:[#allocation63_spill] sm:$0xff] }
 0x13f   : > { %v4709_v63 = vrot.slane %v8402_v47, 5  ;;  %8406 = vst [vmem:[#allocation111_spill] sm:$0xff] %v4714_v37  ;;  %v8425_v46 = vmax.f32 %v8423_v55, %v8424_v41  ;;  %v8427_v21 = vld [vmem:[#allocation50_spill] sm:$0xff]  ;;  %v8443_v41 = vld [vmem:[#allocation53_spill] sm:$0xff] }
 0x140   : > { %8409 = vst [vmem:[#allocation112_spill] sm:$0xff] %v4719_v34  ;;  %v4724_v7 = vmax.f32 %v8411_v58, %v1301_v5  ;;  %v4729_v47 = vmax.f32 %v8414_v4, %v1302_v45  ;;  %v4739_v48 = vmax.f32 %v8421_v61, %v1304_v62  ;;  %v8428_v58 = vld [vmem:[#allocation150_spill] sm:$0xff]  ;;  %v8440_v61 = vld [vmem:[#allocation39_spill] sm:$0xff]  ;;  %v5213_v34 = vld [vmem:[%s2421_s12 + $0x1b8] sm:$0x8] }
 0x141   : > { %8403 = vst [vmem:[#allocation110_spill] sm:$0xff] %v4709_v63  ;;  %v8416_v63 = vld [vmem:[#allocation37_spill] sm:$0xff]  ;;  %v4744_v5 = vmax.f32 %v8425_v46, %v1305_v26  ;;  %v8429_v16 = vmax.f32 %v8427_v21, %v8428_v58  ;;  %v8432_v4 = vld [vmem:[#allocation66_spill] sm:$0xff]  ;;  %v8441_v55 = vmax.f32 %v8439_v0, %v8440_v61  ;;  %v8444_v46 = vld [vmem:[#allocation152_spill] sm:$0xff] }
 0x142   : > { %8412 = vst [vmem:[#allocation117_spill] sm:$0xff] %v4724_v7  ;;  %8415 = vst [vmem:[#allocation118_spill] sm:$0xff] %v4729_v47  ;;  %v8417_v6 = vmax.f32 %v8224_v8, %v8416_v63  ;;  %v8433_v8 = vmax.f32 %v8431_v44, %v8432_v4  ;;  %v8435_v63 = vld [vmem:[#allocation77_spill] sm:$0xff]  ;;  %v8445_v21 = vmax.f32 %v8443_v41, %v8444_v46  ;;  %v8447_v58 = vld [vmem:[#allocation64_spill] sm:$0xff] }
 0x143   : > { %8422 = vst [vmem:[#allocation119_spill] sm:$0xff] %v4739_v48  ;;  %8426 = vst [vmem:[#allocation10_spill] sm:$0xff] %v4744_v5  ;;  %v4749_v45 = vmax.f32 %v8429_v16, %v1306_v25  ;;  %v4764_v26 = vmax.f32 %v8441_v55, %v1309_v19  ;;  %v8448_v16 = vld [vmem:[#allocation40_spill] sm:$0xff]  ;;  %v8451_v4 = vld [vmem:[#allocation54_spill] sm:$0xff] }
 0x144   : > { %v4734_v52 = vmax.f32 %v8417_v6, %v1303_v24  ;;  %v4754_v24 = vmax.f32 %v8433_v8, %v1307_v20  ;;  %v8436_v6 = vld [vmem:[#allocation151_spill] sm:$0xff]  ;;  %v4769_v25 = vmax.f32 %v8445_v21, %v1310_v39  ;;  %v8449_v44 = vmax.f32 %v8447_v58, %v8448_v16  ;;  %v8452_v8 = vld [vmem:[#allocation153_spill] sm:$0xff]  ;;  %v8459_v61 = vld [vmem:[#allocation78_spill] sm:$0xff] }
 0x145   : > { %8430 = vst [vmem:[#allocation122_spill] sm:$0xff] %v4749_v45  ;;  %v8437_v23 = vmax.f32 %v8435_v63, %v8436_v6  ;;  %8442 = vst [vmem:[#allocation14_spill] sm:$0xff] %v4764_v26  ;;  %v8453_v63 = vmax.f32 %v8451_v4, %v8452_v8  ;;  %v8455_v6 = vld [vmem:[#allocation55_spill] sm:$0xff]  ;;  %v8460_v55 = vld [vmem:[#allocation154_spill] sm:$0xff] }
 0x146   : > { %8418 = vst [vmem:[#allocation7_spill] sm:$0xff] %v4734_v52  ;;  %8434 = vst [vmem:[#allocation11_spill] sm:$0xff] %v4754_v24  ;;  %v4774_v20 = vmax.f32 %v8449_v44, %v1311_v51  ;;  %v8461_v41 = vmax.f32 %v8459_v61, %v8460_v55  ;;  %v8463_v46 = vld [vmem:[#allocation79_spill] sm:$0xff]  ;;  %v8464_v21 = vld [vmem:[#allocation70_spill] sm:$0xff] }
 0x147   : > { %v4759_v62 = vmax.f32 %v8437_v23, %v1308_v10  ;;  %8446 = vst [vmem:[#allocation126_spill] sm:$0xff] %v4769_v25  ;;  %v4779_v10 = vmax.f32 %v8453_v63, %v1312_v50  ;;  %v8456_v23 = vld [vmem:[#allocation41_spill] sm:$0xff]  ;;  %v8465_v58 = vmax.f32 %v8463_v46, %v8464_v21  ;;  %v8467_v16 = vld [vmem:[#allocation80_spill] sm:$0xff]  ;;  %v8468_v44 = vld [vmem:[#allocation155_spill] sm:$0xff] }
 0x148   : > { %8450 = vst [vmem:[#allocation15_spill] sm:$0xff] %v4774_v20  ;;  %v8457_v0 = vmax.f32 %v8455_v6, %v8456_v23  ;;  %v4789_v39 = vmax.f32 %v8461_v41, %v1314_v54  ;;  %v8469_v4 = vmax.f32 %v8467_v16, %v8468_v44  ;;  %v8471_v8 = vld [vmem:[#allocation81_spill] sm:$0xff]  ;;  %v8472_v63 = vld [vmem:[#allocation42_spill] sm:$0xff]  ;;  %v8479_v55 = vld [vmem:[#allocation83_spill] sm:$0xff] }
 0x149   : > { %8438 = vst [vmem:[#allocation123_spill] sm:$0xff] %v4759_v62  ;;  %8454 = vst [vmem:[#allocation127_spill] sm:$0xff] %v4779_v10  ;;  %v4794_v51 = vmax.f32 %v8465_v58, %v1315_v43  ;;  %v8473_v6 = vmax.f32 %v8471_v8, %v8472_v63  ;;  %v8475_v23 = vld [vmem:[#allocation82_spill] sm:$0xff]  ;;  %v8483_v21 = vld [vmem:[#allocation84_spill] sm:$0xff] }
 0x14a   : > { %v4784_v19 = vmax.f32 %v8457_v0, %v1313_v36  ;;  %8462 = vst [vmem:[#allocation17_spill] sm:$0xff] %v4789_v39  ;;  %v4799_v50 = vmax.f32 %v8469_v4, %v1316_v18  ;;  %v8476_v0 = vld [vmem:[#allocation156_spill] sm:$0xff]  ;;  %v8480_v41 = vld [vmem:[#allocation2_spill] sm:$0xff]  ;;  %v8487_v44 = vld [vmem:[#allocation85_spill] sm:$0xff] }
 0x14b   : > { %8466 = vst [vmem:[#allocation129_spill] sm:$0xff] %v4794_v51  ;;  %v4804_v36 = vmax.f32 %v8473_v6, %v1317_v40  ;;  %v8477_v61 = vmax.f32 %v8475_v23, %v8476_v0  ;;  %v8481_v46 = vmax.f32 %v8479_v55, %v8480_v41  ;;  %v8484_v58 = vld [vmem:[#allocation56_spill] sm:$0xff]  ;;  %v8488_v4 = vld [vmem:[#allocation157_spill] sm:$0xff]  ;;  %v8491_v63 = vld [vmem:[#allocation86_spill] sm:$0xff] }
 0x14c   : > { %8458 = vst [vmem:[#allocation128_spill] sm:$0xff] %v4784_v19  ;;  %8470 = vst [vmem:[#allocation18_spill] sm:$0xff] %v4799_v50  ;;  %v8485_v16 = vmax.f32 %v8483_v21, %v8484_v58  ;;  %v8489_v8 = vmax.f32 %v8487_v44, %v8488_v4  ;;  %v8492_v6 = vld [vmem:[#allocation3_spill] sm:$0xff]  ;;  %v8499_v41 = vld [vmem:[#allocation88_spill] sm:$0xff] }
 0x14d   : > { %8474 = vst [vmem:[#allocation130_spill] sm:$0xff] %v4804_v36  ;;  %v4809_v54 = vmax.f32 %v8477_v61, %v1318_v27  ;;  %v4814_v43 = vmax.f32 %v8481_v46, %v1319_v57  ;;  %v8493_v23 = vmax.f32 %v8491_v63, %v8492_v6  ;;  %v8495_v0 = vld [vmem:[#allocation87_spill] sm:$0xff]  ;;  %v8500_v46 = vld [vmem:[#allocation158_spill] sm:$0xff]  ;;  %v8503_v58 = vld [vmem:[#allocation89_spill] sm:$0xff] }
 0x14e   : > { %v4819_v18 = vmax.f32 %v8485_v16, %v1320_v2  ;;  %v4824_v40 = vmax.f32 %v8489_v8, %v1321_v42  ;;  %v8496_v61 = vld [vmem:[#allocation43_spill] sm:$0xff]  ;;  %v8501_v2 = vmax.f32 %v8499_v41, %v8500_v46  ;;  %v8504_v42 = vld [vmem:[#allocation4_spill] sm:$0xff]  ;;  %v8508_v4 = vld [vmem:[#allocation57_spill] sm:$0xff] }
 0x14f   : > { %8478 = vst [vmem:[#allocation19_spill] sm:$0xff] %v4809_v54  ;;  %8482 = vst [vmem:[#allocation131_spill] sm:$0xff] %v4814_v43  ;;  %v4829_v27 = vmax.f32 %v8493_v23, %v1322_v32  ;;  %v8497_v55 = vmax.f32 %v8495_v0, %v8496_v61  ;;  %v8505_v16 = vmax.f32 %v8503_v58, %v8504_v42  ;;  %v8507_v32 = vld [vmem:[#allocation90_spill] sm:$0xff]  ;;  %v8511_v6 = vld [vmem:[#allocation91_spill] sm:$0xff] }
 0x150   : > { %8486 = vst [vmem:[#allocation20_spill] sm:$0xff] %v4819_v18  ;;  %8490 = vst [vmem:[#allocation132_spill] sm:$0xff] %v4824_v40  ;;  %v4839_v21 = vmax.f32 %v8501_v2, %v1324_v35  ;;  %v8509_v8 = vmax.f32 %v8507_v32, %v8508_v4  ;;  %v8515_v61 = vld [vmem:[#allocation92_spill] sm:$0xff]  ;;  %v8519_v46 = vld [vmem:[#allocation93_spill] sm:$0xff] }
 0x151   : > { %8494 = vst [vmem:[#allocation21_spill] sm:$0xff] %v4829_v27  ;;  %v4834_v57 = vmax.f32 %v8497_v55, %v1323_v3  ;;  %v4844_v44 = vmax.f32 %v8505_v16, %v1325_v60  ;;  %v8512_v3 = vld [vmem:[#allocation159_spill] sm:$0xff]  ;;  %v8516_v55 = vld [vmem:[#allocation5_spill] sm:$0xff]  ;;  %v8520_v2 = vld [vmem:[#allocation44_spill] sm:$0xff] }
 0x152   : > { %8502 = vst [vmem:[#allocation22_spill] sm:$0xff] %v4839_v21  ;;  %v4849_v63 = vmax.f32 %v8509_v8, %v1326_v38  ;;  %v8513_v23 = vmax.f32 %v8511_v6, %v8512_v3  ;;  %v8517_v35 = vmax.f32 %v8515_v61, %v8516_v55  ;;  %v8521_v58 = vmax.f32 %v8519_v46, %v8520_v2  ;;  %v8523_v42 = vld [vmem:[#allocation94_spill] sm:$0xff]  ;;  %v8524_v16 = vld [vmem:[#allocation160_spill] sm:$0xff]  ;;  %v8527_v4 = vld [vmem:[#allocation95_spill] sm:$0xff] }
 0x153   : > { %8498 = vst [vmem:[#allocation133_spill] sm:$0xff] %v4834_v57  ;;  %8506 = vst [vmem:[#allocation134_spill] sm:$0xff] %v4844_v44  ;;  %v8525_v32 = vmax.f32 %v8523_v42, %v8524_v16  ;;  %v8528_v8 = vld [vmem:[#allocation6_spill] sm:$0xff]  ;;  %v8531_v3 = vld [vmem:[#allocation96_spill] sm:$0xff] }
 0x154   : > { %8510 = vst [vmem:[#allocation23_spill] sm:$0xff] %v4849_v63  ;;  %v4854_v0 = vmax.f32 %v8513_v23, %v1327_v33  ;;  %v4859_v41 = vmax.f32 %v8517_v35, %v1328_v59  ;;  %v4864_v60 = vmax.f32 %v8521_v58, %v1329_v12  ;;  %v8529_v33 = vmax.f32 %v8527_v4, %v8528_v8  ;;  %v8532_v59 = vld [vmem:[#allocation47_spill] sm:$0xff]  ;;  %v8535_v12 = vld [vmem:[#allocation97_spill] sm:$0xff]  ;;  %v8547_v8 = vld [vmem:[#allocation100_spill] sm:$0xff] }
 0x155   : > { %v4869_v38 = vmax.f32 %v8525_v32, %v1330_v9  ;;  %v8533_v23 = vmax.f32 %v8531_v3, %v8532_v59  ;;  %v8536_v55 = vld [vmem:[#allocation161_spill] sm:$0xff]  ;;  %v8539_v9 = vld [vmem:[#allocation98_spill] sm:$0xff]  ;;  %v8540_v2 = vld [vmem:[#allocation67_spill] sm:$0xff]  ;;  %8688 = vst [vmem:[#allocation6_spill] sm:$0xff] %v5213_v34 }
 0x156   : > { %8514 = vst [vmem:[#allocation135_spill] sm:$0xff] %v4854_v0  ;;  %8518 = vst [vmem:[#allocation24_spill] sm:$0xff] %v4859_v41  ;;  %v4874_v6 = vmax.f32 %v8529_v33, %v1331_v30  ;;  %v8537_v35 = vmax.f32 %v8535_v12, %v8536_v55  ;;  %v8541_v58 = vmax.f32 %v8539_v9, %v8540_v2  ;;  %v8543_v16 = vld [vmem:[#allocation99_spill] sm:$0xff]  ;;  %v8544_v30 = vld [vmem:[#allocation48_spill] sm:$0xff] }
 0x157   : > { %8522 = vst [vmem:[#allocation136_spill] sm:$0xff] %v4864_v60  ;;  %8526 = vst [vmem:[#allocation25_spill] sm:$0xff] %v4869_v38  ;;  %v4879_v61 = vmax.f32 %v8533_v23, %v1332_v14  ;;  %v8545_v32 = vmax.f32 %v8543_v16, %v8544_v30  ;;  %v8548_v33 = vld [vmem:[#allocation162_spill] sm:$0xff]  ;;  %v8551_v59 = vld [vmem:[#allocation101_spill] sm:$0xff] }
 0x158   : > { %8530 = vst [vmem:[#allocation137_spill] sm:$0xff] %v4874_v6  ;;  %v4884_v46 = vmax.f32 %v8537_v35, %v1333_v15  ;;  %v4889_v42 = vmax.f32 %v8541_v58, %v1334_v17  ;;  %v8549_v14 = vmax.f32 %v8547_v8, %v8548_v33  ;;  %v8552_v23 = vld [vmem:[#allocation68_spill] sm:$0xff]  ;;  %v4907_v55 = vld [vmem:[%s2421_s12] sm:$0x8]  ;;  %v4910_v17 = vld [vmem:[%s2421_s12 + $0x8] sm:$0x8] }
 0x159   : > { %8534 = vst [vmem:[#allocation26_spill] sm:$0xff] %v4879_v61  ;;  %v4894_v4 = vmax.f32 %v8545_v32, %v1335_v49  ;;  %v8553_v12 = vmax.f32 %v8551_v59, %v8552_v23  ;;  %8555 = vst [vmem:[#allocation29_spill] sm:$0xff] %v4907_v55  ;;  %v4913_v35 = vld [vmem:[%s2421_s12 + $0x10] sm:$0x8]  ;;  %v8558_v49 = vld [vmem:[#allocation105_spill] sm:$0xff]  ;;  %v8689_v37 = vunpack.c.l.bf16 %v4907_v55  ;;  %v8691_v51 = vunpack.c.l.bf16 %v4910_v17 }
 0x15a   : > { %8538 = vst [vmem:[#allocation138_spill] sm:$0xff] %v4884_v46  ;;  %8542 = vst [vmem:[#allocation27_spill] sm:$0xff] %v4889_v42  ;;  %v4899_v3 = vmax.f32 %v8549_v14, %v1336_v28  ;;  %v8559_v9 = vld [vmem:[#allocation59_spill] sm:$0xff]  ;;  %v8562_v58 = vld [vmem:[#allocation106_spill] sm:$0xff]  ;;  %v8693_v7 = vunpack.c.l.bf16 %v4913_v35 }
 0x15b   : > { %8546 = vst [vmem:[#allocation139_spill] sm:$0xff] %v4894_v4  ;;  %v4904_v15 = vmax.f32 %v8553_v12, %v1337_v53  ;;  %8556 = vst [vmem:[#allocation141_spill] sm:$0xff] %v4910_v17  ;;  %v8560_v2 = vmax.f32 %v8558_v49, %v8559_v9  ;;  %v8563_v16 = vld [vmem:[#allocation163_spill] sm:$0xff]  ;;  %v8567_v8 = vld [vmem:[#allocation49_spill] sm:$0xff] }
 0x15c   : > { %8550 = vst [vmem:[#allocation28_spill] sm:$0xff] %v4899_v3  ;;  %8557 = vst [vmem:[#allocation30_spill] sm:$0xff] %v4913_v35  ;;  %v8564_v30 = vmax.f32 %v8562_v58, %v8563_v16  ;;  %v8566_v32 = vld [vmem:[#allocation107_spill] sm:$0xff]  ;;  %v8570_v59 = vld [vmem:[#allocation108_spill] sm:$0xff]  ;;  %v5238_v47 = vrot.slane %v8693_v7, 6 }
 0x15d   : > { %8554 = vst [vmem:[#allocation140_spill] sm:$0xff] %v4904_v15  ;;  %v4918_v28 = vmax.f32 %v8560_v2, %v1338_v29  ;;  %v8568_v33 = vmax.f32 %v8566_v32, %v8567_v8  ;;  %v8571_v23 = vld [vmem:[#allocation164_spill] sm:$0xff]  ;;  %v4936_v3 = vld [vmem:[%s2421_s12 + $0x18] sm:$0x8]  ;;  %v4939_v29 = vld [vmem:[%s2421_s12 + $0x20] sm:$0x8] }
 0x15e   : > { %v4923_v53 = vmax.f32 %v8564_v30, %v1339_v22  ;;  %v8572_v12 = vmax.f32 %v8570_v59, %v8571_v23  ;;  %8574 = vst [vmem:[#allocation144_spill] sm:$0xff] %v4936_v3  ;;  %8575 = vst [vmem:[#allocation33_spill] sm:$0xff] %v4939_v29  ;;  %v4942_v49 = vld [vmem:[%s2421_s12 + $0x28] sm:$0x8]  ;;  %v4945_v22 = vld [vmem:[%s2421_s12 + $0x30] sm:$0x8]  ;;  %v8697_v26 = vunpack.c.l.bf16 %v4939_v29 }
 0x15f   : > { %8561 = vst [vmem:[#allocation142_spill] sm:$0xff] %v4918_v28  ;;  %v4928_v14 = vmax.f32 %v8568_v33, %v1340_v13  ;;  %8576 = vst [vmem:[#allocation145_spill] sm:$0xff] %v4942_v49  ;;  %v8578_v9 = vld [vmem:[#allocation73_spill] sm:$0xff]  ;;  %v8584_v30 = vld [vmem:[#allocation114_spill] sm:$0xff]  ;;  %v8699_v5 = vunpack.c.l.bf16 %v4942_v49  ;;  %v8701_v17 = vunpack.c.l.bf16 %v4945_v22 }
 0x160   : > { %8565 = vst [vmem:[#allocation31_spill] sm:$0xff] %v4923_v53  ;;  %v4933_v15 = vmax.f32 %v8572_v12, %v1341_v56  ;;  %8577 = vst [vmem:[#allocation34_spill] sm:$0xff] %v4945_v22  ;;  %v8579_v2 = vld [vmem:[#allocation113_spill] sm:$0xff]  ;;  %v8583_v56 = vld [vmem:[#allocation74_spill] sm:$0xff]  ;;  %v5246_v48 = vrot.slane %v8697_v26, 6 }
 0x161   : > { %8569 = vst [vmem:[#allocation143_spill] sm:$0xff] %v4928_v14  ;;  %v8580_v13 = vld [vmem:[#allocation69_spill] sm:$0xff]  ;;  %v8589_v23 = vld [vmem:[#allocation115_spill] sm:$0xff]  ;;  %v8593_v53 = vld [vmem:[#allocation58_spill] sm:$0xff] }
 0x162   : > { %8573 = vst [vmem:[#allocation32_spill] sm:$0xff] %v4933_v15  ;;  %v8581_v58 = vmax.f32 %v8579_v2, %v8580_v13  ;;  %v8585_v32 = vld [vmem:[#allocation61_spill] sm:$0xff]  ;;  %v8594_v28 = vld [vmem:[#allocation116_spill] sm:$0xff]  ;;  %v8595_v4 = vld [vmem:[#allocation71_spill] sm:$0xff] }
 0x163   : > { %v8586_v8 = vmax.f32 %v8584_v30, %v8585_v32  ;;  %v8588_v59 = vld [vmem:[#allocation45_spill] sm:$0xff]  ;;  %v8596_v42 = vmax.f32 %v8594_v28, %v8595_v4  ;;  %v4975_v13 = vld [vmem:[%s2421_s12 + $0x40] sm:$0x8]  ;;  %v8604_v32 = vld [vmem:[#allocation51_spill] sm:$0xff]  ;;  %8694 = vst [vmem:[#allocation97_spill] sm:$0xff] %v5238_v47 }
 0x164   : > { %v4951_v16 = vmax.f32 %v8581_v58, %v8578_v9  ;;  %v8590_v12 = vld [vmem:[#allocation165_spill] sm:$0xff]  ;;  %8599 = vst [vmem:[#allocation37_spill] sm:$0xff] %v4975_v13  ;;  %v4978_v58 = vld [vmem:[%s2421_s12 + $0x48] sm:$0x8]  ;;  %v8602_v30 = vld [vmem:[#allocation46_spill] sm:$0xff] }
 0x165   : > { %v4957_v33 = vmax.f32 %v8586_v8, %v8583_v56  ;;  %v8591_v15 = vmax.f32 %v8589_v23, %v8590_v12  ;;  %v4969_v2 = vmax.f32 %v8596_v42, %v8593_v53  ;;  %v4972_v9 = vld [vmem:[%s2421_s12 + $0x38] sm:$0x8]  ;;  %8600 = vst [vmem:[#allocation75_spill] sm:$0xff] %v4978_v58  ;;  %v4981_v56 = vld [vmem:[%s2421_s12 + $0x50] sm:$0x8]  ;;  %v8607_v42 = vld [vmem:[#allocation102_spill] sm:$0xff]  ;;  %v8707_v29 = vunpack.c.l.bf16 %v4978_v58 }
 0x166   : > { %8582 = vst [vmem:[#allocation146_spill] sm:$0xff] %v4951_v16  ;;  %8598 = vst [vmem:[#allocation148_spill] sm:$0xff] %v4972_v9  ;;  %v8608_v4 = vld [vmem:[#allocation120_spill] sm:$0xff]  ;;  %v8609_v28 = vld [vmem:[#allocation166_spill] sm:$0xff]  ;;  %v8703_v35 = vunpack.c.l.bf16 %v4972_v9  ;;  %v8709_v49 = vunpack.c.l.bf16 %v4981_v56 }
 0x167   : > { %8587 = vst [vmem:[#allocation35_spill] sm:$0xff] %v4957_v33  ;;  %v4963_v14 = vmax.f32 %v8591_v15, %v8588_v59  ;;  %8597 = vst [vmem:[#allocation36_spill] sm:$0xff] %v4969_v2  ;;  %v8603_v15 = vld [vmem:[#allocation8_spill] sm:$0xff]  ;;  %v8610_v53 = vmax.f32 %v8608_v4, %v8609_v28  ;;  %v8612_v12 = vld [vmem:[#allocation103_spill] sm:$0xff]  ;;  %v5266_v26 = vrot.slane %v8707_v29, 6 }
 0x168   : > { %8601 = vst [vmem:[#allocation149_spill] sm:$0xff] %v4981_v56  ;;  %v8605_v8 = vmax.f32 %v8603_v15, %v8604_v32  ;;  %v8613_v2 = vld [vmem:[#allocation9_spill] sm:$0xff]  ;;  %v8618_v61 = vld [vmem:[#allocation167_spill] sm:$0xff]  ;;  %v5017_v4 = vld [vmem:[%s2421_s12 + $0x70] sm:$0x8]  ;;  %v5258_v7 = vrot.slane %v8703_v35, 6 }
 0x169   : > { %8592 = vst [vmem:[#allocation147_spill] sm:$0xff] %v4963_v14  ;;  %v4993_v23 = vmax.f32 %v8610_v53, %v8607_v42  ;;  %v8614_v14 = vld [vmem:[#allocation62_spill] sm:$0xff]  ;;  %v8617_v46 = vld [vmem:[#allocation121_spill] sm:$0xff]  ;;  %v5014_v42 = vld [vmem:[%s2421_s12 + $0x68] sm:$0x8]  ;;  %v8717_v58 = vunpack.c.l.bf16 %v5017_v4 }
 0x16a   : > { %v4987_v59 = vmax.f32 %v8605_v8, %v8602_v30  ;;  %v8615_v33 = vmax.f32 %v8613_v2, %v8614_v14  ;;  %v8619_v15 = vmax.f32 %v8617_v46, %v8618_v61  ;;  %v5008_v32 = vld [vmem:[%s2421_s12 + $0x58] sm:$0x8]  ;;  %v5011_v8 = vld [vmem:[%s2421_s12 + $0x60] sm:$0x8]  ;;  %8623 = vst [vmem:[#allocation77_spill] sm:$0xff] %v5014_v42  ;;  %8624 = vst [vmem:[#allocation151_spill] sm:$0xff] %v5017_v4 }
 0x16b   : > { %8611 = vst [vmem:[#allocation38_spill] sm:$0xff] %v4993_v23  ;;  %8621 = vst [vmem:[#allocation76_spill] sm:$0xff] %v5008_v32  ;;  %v8625_v14 = vld [vmem:[#allocation104_spill] sm:$0xff]  ;;  %v8630_v61 = vld [vmem:[#allocation109_spill] sm:$0xff]  ;;  %v8711_v22 = vunpack.c.l.bf16 %v5008_v32  ;;  %v8713_v9 = vunpack.c.l.bf16 %v5011_v8  ;;  %v5286_v29 = vrot.slane %v8717_v58, 6 }
 0x16c   : > { %8606 = vst [vmem:[#allocation60_spill] sm:$0xff] %v4987_v59  ;;  %v4999_v16 = vmax.f32 %v8615_v33, %v8612_v12  ;;  %v5005_v30 = vmax.f32 %v8619_v15, %v4689_v31  ;;  %8622 = vst [vmem:[#allocation66_spill] sm:$0xff] %v5011_v8  ;;  %v8626_v33 = vld [vmem:[#allocation12_spill] sm:$0xff]  ;;  %v8639_v6 = vld [vmem:[#allocation125_spill] sm:$0xff] }
 0x16d   : > { %v8627_v2 = vld [vmem:[#allocation52_spill] sm:$0xff]  ;;  %v8640_v38 = vld [vmem:[#allocation65_spill] sm:$0xff]  ;;  %v5099_v60 = vld [vmem:[%s2421_s12 + $0xe8] sm:$0x8]  ;;  %8698 = vst [vmem:[#allocation98_spill] sm:$0xff] %v5246_v48  ;;  %v5278_v35 = vrot.slane %v8713_v9, 6 }
 0x16e   : > { %8616 = vst [vmem:[#allocation50_spill] sm:$0xff] %v4999_v16  ;;  %8620 = vst [vmem:[#allocation150_spill] sm:$0xff] %v5005_v30  ;;  %v8628_v28 = vmax.f32 %v8626_v33, %v8627_v2  ;;  %v8631_v46 = vld [vmem:[#allocation124_spill] sm:$0xff]  ;;  %v8635_v30 = vld [vmem:[#allocation13_spill] sm:$0xff]  ;;  %v8641_v33 = vmax.f32 %v8639_v6, %v8640_v38 }
 0x16f   : > { %v8632_v31 = vld [vmem:[#allocation168_spill] sm:$0xff]  ;;  %v5044_v2 = vld [vmem:[%s2421_s12 + $0x78] sm:$0x8]  ;;  %v5068_v6 = vld [vmem:[%s2421_s12 + $0xa8] sm:$0x8]  ;;  %8662 = vst [vmem:[#allocation156_spill] sm:$0xff] %v5099_v60 }
 0x170   : > { %v5023_v53 = vmax.f32 %v8628_v28, %v8625_v14  ;;  %v8633_v12 = vmax.f32 %v8631_v46, %v8632_v31  ;;  %v8636_v16 = vld [vmem:[#allocation72_spill] sm:$0xff]  ;;  %v5041_v14 = vmax.f32 %v8641_v33, %v4705_v1  ;;  %8643 = vst [vmem:[#allocation64_spill] sm:$0xff] %v5044_v2  ;;  %v5047_v28 = vld [vmem:[%s2421_s12 + $0x80] sm:$0x8]  ;;  %v5062_v38 = vld [vmem:[%s2421_s12 + $0x98] sm:$0x8]  ;;  %v8719_v56 = vunpack.c.l.bf16 %v5044_v2 }
 0x171   : > { %v8637_v23 = vmax.f32 %v8635_v30, %v8636_v16  ;;  %8644 = vst [vmem:[#allocation40_spill] sm:$0xff] %v5047_v28  ;;  %v5053_v46 = vld [vmem:[%s2421_s12 + $0x90] sm:$0x8]  ;;  %v8647_v16 = vld [vmem:[#allocation110_spill] sm:$0xff]  ;;  %8652 = vst [vmem:[#allocation41_spill] sm:$0xff] %v5062_v38  ;;  %v8721_v32 = vunpack.c.l.bf16 %v5047_v28  ;;  %v8727_v4 = vunpack.c.l.bf16 %v5062_v38  ;;  %v8731_v28 = vunpack.c.l.bf16 %v5068_v6 }
 0x172   : > { %8629 = vst [vmem:[#allocation63_spill] sm:$0xff] %v5023_v53  ;;  %v5029_v15 = vmax.f32 %v8633_v12, %v8630_v61  ;;  %8642 = vst [vmem:[#allocation152_spill] sm:$0xff] %v5041_v14  ;;  %v5050_v61 = vld [vmem:[%s2421_s12 + $0x88] sm:$0x8]  ;;  %v8648_v30 = vld [vmem:[#allocation16_spill] sm:$0xff] }
 0x173   : > { %v5035_v59 = vmax.f32 %v8637_v23, %v4701_v11  ;;  %8645 = vst [vmem:[#allocation54_spill] sm:$0xff] %v5050_v61  ;;  %8646 = vst [vmem:[#allocation153_spill] sm:$0xff] %v5053_v46  ;;  %v8649_v11 = vld [vmem:[#allocation169_spill] sm:$0xff]  ;;  %v5065_v1 = vld [vmem:[%s2421_s12 + $0xa0] sm:$0x8]  ;;  %v8723_v8 = vunpack.c.l.bf16 %v5050_v61  ;;  %v5306_v58 = vrot.slane %v8727_v4, 6 }
 0x174   : > { %8634 = vst [vmem:[#allocation39_spill] sm:$0xff] %v5029_v15  ;;  %v8650_v23 = vmax.f32 %v8648_v30, %v8649_v11  ;;  %8653 = vst [vmem:[#allocation78_spill] sm:$0xff] %v5065_v1  ;;  %v5071_v12 = vld [vmem:[%s2421_s12 + $0xb0] sm:$0x8]  ;;  %v5080_v11 = vld [vmem:[%s2421_s12 + $0xc0] sm:$0x8]  ;;  %v8729_v2 = vunpack.c.l.bf16 %v5065_v1 }
 0x175   : > { %8638 = vst [vmem:[#allocation53_spill] sm:$0xff] %v5035_v59  ;;  %8654 = vst [vmem:[#allocation154_spill] sm:$0xff] %v5068_v6  ;;  %v5093_v30 = vld [vmem:[%s2421_s12 + $0xd8] sm:$0x8]  ;;  %v5096_v53 = vld [vmem:[%s2421_s12 + $0xe0] sm:$0x8]  ;;  %v8733_v61 = vunpack.c.l.bf16 %v5071_v12  ;;  %v8737_v38 = vunpack.c.l.bf16 %v5080_v11 }
 0x176   : > { %v5059_v31 = vmax.f32 %v8650_v23, %v8647_v16  ;;  %8655 = vst [vmem:[#allocation79_spill] sm:$0xff] %v5071_v12  ;;  %v5077_v16 = vld [vmem:[%s2421_s12 + $0xb8] sm:$0x8]  ;;  %8657 = vst [vmem:[#allocation80_spill] sm:$0xff] %v5080_v11  ;;  %v5083_v23 = vld [vmem:[%s2421_s12 + $0xc8] sm:$0x8]  ;;  %v8743_v12 = vunpack.c.l.bf16 %v5093_v30  ;;  %v8747_v11 = vunpack.c.l.bf16 %v5099_v60 }
 0x177   : > { %8656 = vst [vmem:[#allocation70_spill] sm:$0xff] %v5077_v16  ;;  %8658 = vst [vmem:[#allocation155_spill] sm:$0xff] %v5083_v23  ;;  %v5102_v41 = vld [vmem:[%s2421_s12 + $0xf0] sm:$0x8]  ;;  %v5109_v33 = vld [vmem:[%s2421_s12 + $0xf8] sm:$0x8]  ;;  %v8739_v1 = vunpack.c.l.bf16 %v5083_v23 }
 0x178   : > { %8651 = vst [vmem:[#allocation55_spill] sm:$0xff] %v5059_v31  ;;  %v5086_v31 = vld [vmem:[%s2421_s12 + $0xd0] sm:$0x8]  ;;  %8660 = vst [vmem:[#allocation42_spill] sm:$0xff] %v5093_v30  ;;  %v5112_v63 = vld [vmem:[%s2421_s12 + $0x100] sm:$0x8]  ;;  %v8749_v23 = vunpack.c.l.bf16 %v5102_v41 }
 0x179   : > { %8659 = vst [vmem:[#allocation81_spill] sm:$0xff] %v5086_v31  ;;  %8661 = vst [vmem:[#allocation82_spill] sm:$0xff] %v5096_v53  ;;  %v5115_v44 = vld [vmem:[%s2421_s12 + $0x108] sm:$0x8]  ;;  %v5122_v59 = vld [vmem:[%s2421_s12 + $0x110] sm:$0x8]  ;;  %v8741_v6 = vunpack.c.l.bf16 %v5086_v31  ;;  %v8751_v31 = vunpack.c.l.bf16 %v5109_v33  ;;  %v8753_v30 = vunpack.c.l.bf16 %v5112_v63 }
 0x17a   : > { %8663 = vst [vmem:[#allocation83_spill] sm:$0xff] %v5102_v41  ;;  %8664 = vst [vmem:[#allocation2_spill] sm:$0xff] %v5109_v33  ;;  %v5125_v14 = vld [vmem:[%s2421_s12 + $0x118] sm:$0x8]  ;;  %v5128_v27 = vld [vmem:[%s2421_s12 + $0x120] sm:$0x8]  ;;  %v8757_v60 = vunpack.c.l.bf16 %v5122_v59 }
 0x17b   : > { %8665 = vst [vmem:[#allocation84_spill] sm:$0xff] %v5112_v63  ;;  %8666 = vst [vmem:[#allocation56_spill] sm:$0xff] %v5115_v44  ;;  %v5135_v57 = vld [vmem:[%s2421_s12 + $0x128] sm:$0x8]  ;;  %v5138_v15 = vld [vmem:[%s2421_s12 + $0x130] sm:$0x8]  ;;  %v8759_v41 = vunpack.c.l.bf16 %v5125_v14  ;;  %v8761_v33 = vunpack.c.l.bf16 %v5128_v27 }
 0x17c   : > { %8667 = vst [vmem:[#allocation85_spill] sm:$0xff] %v5122_v59  ;;  %8668 = vst [vmem:[#allocation157_spill] sm:$0xff] %v5125_v14  ;;  %v5141_v43 = vld [vmem:[%s2421_s12 + $0x138] sm:$0x8]  ;;  %v5148_v18 = vld [vmem:[%s2421_s12 + $0x140] sm:$0x8]  ;;  %v8763_v63 = vunpack.c.l.bf16 %v5135_v57 }
 0x17d   : > { %8669 = vst [vmem:[#allocation86_spill] sm:$0xff] %v5128_v27  ;;  %8670 = vst [vmem:[#allocation3_spill] sm:$0xff] %v5135_v57  ;;  %v5151_v0 = vld [vmem:[%s2421_s12 + $0x148] sm:$0x8]  ;;  %v5154_v50 = vld [vmem:[%s2421_s12 + $0x150] sm:$0x8]  ;;  %v8768_v59 = vunpack.c.l.bf16 %v5141_v43  ;;  %v8770_v14 = vunpack.c.l.bf16 %v5148_v18 }
 0x17e   : > { %8671 = vst [vmem:[#allocation87_spill] sm:$0xff] %v5138_v15  ;;  %8672 = vst [vmem:[#allocation43_spill] sm:$0xff] %v5141_v43  ;;  %v5161_v36 = vld [vmem:[%s2421_s12 + $0x158] sm:$0x8]  ;;  %v5164_v21 = vld [vmem:[%s2421_s12 + $0x160] sm:$0x8]  ;;  %v8772_v27 = vunpack.c.l.bf16 %v5151_v0 }
 0x17f   : > { %8673 = vst [vmem:[#allocation88_spill] sm:$0xff] %v5148_v18  ;;  %8674 = vst [vmem:[#allocation158_spill] sm:$0xff] %v5151_v0  ;;  %v5167_v19 = vld [vmem:[%s2421_s12 + $0x168] sm:$0x8]  ;;  %v5174_v39 = vld [vmem:[%s2421_s12 + $0x170] sm:$0x8]  ;;  %v8779_v43 = vunpack.c.l.bf16 %v5164_v21 }
 0x180   : > { %8675 = vst [vmem:[#allocation89_spill] sm:$0xff] %v5154_v50  ;;  %8676 = vst [vmem:[#allocation4_spill] sm:$0xff] %v5161_v36  ;;  %v5177_v40 = vld [vmem:[%s2421_s12 + $0x178] sm:$0x8]  ;;  %v5180_v25 = vld [vmem:[%s2421_s12 + $0x180] sm:$0x8]  ;;  %v8695_v50 = vunpack.c.l.bf16 %v4936_v3  ;;  %v8705_v3 = vunpack.c.l.bf16 %v4975_v13  ;;  %v8715_v13 = vunpack.c.l.bf16 %v5014_v42  ;;  %v8725_v42 = vunpack.c.l.bf16 %v5053_v46 }
 0x181   : > { %8677 = vst [vmem:[#allocation90_spill] sm:$0xff] %v5164_v21  ;;  %8678 = vst [vmem:[#allocation57_spill] sm:$0xff] %v5167_v19  ;;  %v5187_v20 = vld [vmem:[%s2421_s12 + $0x188] sm:$0x8]  ;;  %v5190_v54 = vld [vmem:[%s2421_s12 + $0x190] sm:$0x8]  ;;  %v8735_v46 = vunpack.c.l.bf16 %v5077_v16  ;;  %v8745_v16 = vunpack.c.l.bf16 %v5096_v53  ;;  %v8755_v53 = vunpack.c.l.bf16 %v5115_v44  ;;  %v8781_v18 = vunpack.c.l.bf16 %v5167_v19 }
 0x182   : > { %8679 = vst [vmem:[#allocation91_spill] sm:$0xff] %v5174_v39  ;;  %8680 = vst [vmem:[#allocation159_spill] sm:$0xff] %v5177_v40  ;;  %v5193_v24 = vld [vmem:[%s2421_s12 + $0x198] sm:$0x8]  ;;  %v5200_v62 = vld [vmem:[%s2421_s12 + $0x1a0] sm:$0x8]  ;;  %v8790_v21 = vunpack.c.l.bf16 %v5187_v20  ;;  %v8792_v19 = vunpack.c.l.bf16 %v5190_v54 }
 0x183   : > { %8681 = vst [vmem:[#allocation92_spill] sm:$0xff] %v5180_v25  ;;  %8682 = vst [vmem:[#allocation5_spill] sm:$0xff] %v5187_v20  ;;  %v5203_v10 = vld [vmem:[%s2421_s12 + $0x1a8] sm:$0x8]  ;;  %v5206_v52 = vld [vmem:[%s2421_s12 + $0x1b0] sm:$0x8] }
 0x184   : > { %8683 = vst [vmem:[#allocation93_spill] sm:$0xff] %v5190_v54  ;;  %8684 = vst [vmem:[#allocation44_spill] sm:$0xff] %v5193_v24  ;;  %v5230_v39 = vrot.slane %v8689_v37, 6  ;;  %v5234_v15 = vrot.slane %v8691_v51, 6  ;;  %v5242_v45 = vrot.slane %v8695_v50, 6  ;;  %v5250_v37 = vrot.slane %v8699_v5, 6 }
 0x185   : > { %8685 = vst [vmem:[#allocation94_spill] sm:$0xff] %v5200_v62  ;;  %8686 = vst [vmem:[#allocation160_spill] sm:$0xff] %v5203_v10  ;;  %v5254_v51 = vrot.slane %v8701_v17, 6  ;;  %v5262_v50 = vrot.slane %v8705_v3, 6  ;;  %v5270_v5 = vrot.slane %v8709_v49, 6  ;;  %v5274_v17 = vrot.slane %v8711_v22, 6 }
 0x186   : > { %8687 = vst [vmem:[#allocation95_spill] sm:$0xff] %v5206_v52  ;;  %8690 = vst [vmem:[#allocation96_spill] sm:$0xff] %v5230_v39  ;;  %v5282_v3 = vrot.slane %v8715_v13, 6  ;;  %v5290_v49 = vrot.slane %v8719_v56, 6  ;;  %v5294_v22 = vrot.slane %v8721_v32, 6  ;;  %v5298_v9 = vrot.slane %v8723_v8, 6 }
 0x187   : > { %8692 = vst [vmem:[#allocation47_spill] sm:$0xff] %v5234_v15  ;;  %8696 = vst [vmem:[#allocation161_spill] sm:$0xff] %v5242_v45  ;;  %v5302_v13 = vrot.slane %v8725_v42, 6  ;;  %v5310_v56 = vrot.slane %v8729_v2, 6  ;;  %v5314_v32 = vrot.slane %v8731_v28, 6  ;;  %v5318_v8 = vrot.slane %v8733_v61, 6 }
 0x188   : > { %8700 = vst [vmem:[#allocation67_spill] sm:$0xff] %v5250_v37  ;;  %8702 = vst [vmem:[#allocation99_spill] sm:$0xff] %v5254_v51  ;;  %v5322_v42 = vrot.slane %v8735_v46, 6  ;;  %v5326_v4 = vrot.slane %v8737_v38, 6  ;;  %v5330_v2 = vrot.slane %v8739_v1, 6  ;;  %v5334_v28 = vrot.slane %v8741_v6, 6 }
 0x189   : > { %8704 = vst [vmem:[#allocation48_spill] sm:$0xff] %v5258_v7  ;;  %8706 = vst [vmem:[#allocation100_spill] sm:$0xff] %v5262_v50  ;;  %v5338_v61 = vrot.slane %v8743_v12, 6  ;;  %v5342_v46 = vrot.slane %v8745_v16, 6  ;;  %v5346_v38 = vrot.slane %v8747_v11, 6  ;;  %v5350_v1 = vrot.slane %v8749_v23, 6 }
 0x18a   : > { %8708 = vst [vmem:[#allocation162_spill] sm:$0xff] %v5266_v26  ;;  %8710 = vst [vmem:[#allocation101_spill] sm:$0xff] %v5270_v5  ;;  %v5354_v6 = vrot.slane %v8751_v31, 6  ;;  %v5358_v12 = vrot.slane %v8753_v30, 6  ;;  %v5362_v16 = vrot.slane %v8755_v53, 6  ;;  %v5366_v11 = vrot.slane %v8757_v60, 6 }
 0x18b   : > { %8712 = vst [vmem:[#allocation68_spill] sm:$0xff] %v5274_v17  ;;  %8714 = vst [vmem:[#allocation105_spill] sm:$0xff] %v5278_v35  ;;  %v5370_v23 = vrot.slane %v8759_v41, 6  ;;  %v5374_v31 = vrot.slane %v8761_v33, 6  ;;  %v5378_v30 = vrot.slane %v8763_v63, 6  ;;  %v8765_v55 = vld [vmem:[#allocation87_spill] sm:$0xff]  ;;  %v8800_v20 = vunpack.c.l.bf16 %v5206_v52 }
 0x18c   : > { %8716 = vst [vmem:[#allocation59_spill] sm:$0xff] %v5282_v3  ;;  %8718 = vst [vmem:[#allocation106_spill] sm:$0xff] %v5286_v29  ;;  %v8766_v44 = vunpack.c.l.bf16 %v8765_v55  ;;  %v5386_v60 = vrot.slane %v8768_v59, 6  ;;  %v5390_v41 = vrot.slane %v8770_v14, 6  ;;  %v5394_v33 = vrot.slane %v8772_v27, 6  ;;  %v8870_v29 = vld [vmem:[#allocation30_spill] sm:$0xff] }
 0x18d   : > { %8720 = vst [vmem:[#allocation163_spill] sm:$0xff] %v5290_v49  ;;  %8722 = vst [vmem:[#allocation107_spill] sm:$0xff] %v5294_v22  ;;  %v8777_v55 = vunpack.c.l.bf16 %v5161_v36  ;;  %v5406_v59 = vrot.slane %v8779_v43, 6  ;;  %v5410_v14 = vrot.slane %v8781_v18, 6  ;;  %v8788_v36 = vunpack.c.l.bf16 %v5180_v25 }
 0x18e   : > { %8724 = vst [vmem:[#allocation49_spill] sm:$0xff] %v5298_v9  ;;  %8726 = vst [vmem:[#allocation108_spill] sm:$0xff] %v5302_v13  ;;  %v5382_v53 = vrot.slane %v8766_v44, 6  ;;  %v5426_v43 = vrot.slane %v8790_v21, 6  ;;  %v5430_v18 = vrot.slane %v8792_v19, 6  ;;  %v8798_v25 = vunpack.c.l.bf16 %v5203_v10  ;;  %v8878_v13 = vld [vmem:[#allocation34_spill] sm:$0xff] }
 0x18f   : > { %8728 = vst [vmem:[#allocation164_spill] sm:$0xff] %v5306_v58  ;;  %8730 = vst [vmem:[#allocation73_spill] sm:$0xff] %v5310_v56  ;;  %v5402_v44 = vrot.slane %v8777_v55, 6  ;;  %v5422_v55 = vrot.slane %v8788_v36, 6  ;;  %v5446_v21 = vrot.slane %v8800_v20, 6  ;;  %v8802_v54 = vunpack.c.l.bf16 %v5213_v34 }
 0x190   : > { %8732 = vst [vmem:[#allocation113_spill] sm:$0xff] %v5314_v32  ;;  %8734 = vst [vmem:[#allocation69_spill] sm:$0xff] %v5318_v8  ;;  %v5442_v36 = vrot.slane %v8798_v25, 6 }
 0x191   : > { %8736 = vst [vmem:[#allocation74_spill] sm:$0xff] %v5322_v42  ;;  %8738 = vst [vmem:[#allocation114_spill] sm:$0xff] %v5326_v4  ;;  %v5450_v19 = vrot.slane %v8802_v54, 6 }
 0x192   : > { %8740 = vst [vmem:[#allocation61_spill] sm:$0xff] %v5330_v2  ;;  %8742 = vst [vmem:[#allocation45_spill] sm:$0xff] %v5334_v28 }
 0x193   : > { %8744 = vst [vmem:[#allocation115_spill] sm:$0xff] %v5338_v61  ;;  %8746 = vst [vmem:[#allocation165_spill] sm:$0xff] %v5342_v46 }
 0x194   : > { %8748 = vst [vmem:[#allocation58_spill] sm:$0xff] %v5346_v38  ;;  %8750 = vst [vmem:[#allocation116_spill] sm:$0xff] %v5350_v1 }
 0x195   : > { %8752 = vst [vmem:[#allocation71_spill] sm:$0xff] %v5354_v6  ;;  %8754 = vst [vmem:[#allocation46_spill] sm:$0xff] %v5358_v12 }
 0x196   : > { %8756 = vst [vmem:[#allocation8_spill] sm:$0xff] %v5362_v16  ;;  %8758 = vst [vmem:[#allocation51_spill] sm:$0xff] %v5366_v11  ;;  %v8866_v11 = vld [vmem:[#allocation29_spill] sm:$0xff] }
 0x197   : > { %8760 = vst [vmem:[#allocation102_spill] sm:$0xff] %v5370_v23  ;;  %8762 = vst [vmem:[#allocation120_spill] sm:$0xff] %v5374_v31  ;;  %v8774_v31 = vld [vmem:[#allocation89_spill] sm:$0xff] }
 0x198   : > { %8764 = vst [vmem:[#allocation166_spill] sm:$0xff] %v5378_v30  ;;  %8767 = vst [vmem:[#allocation103_spill] sm:$0xff] %v5382_v53  ;;  %v8775_v57 = vunpack.c.l.bf16 %v8774_v31  ;;  %v8786_v31 = vunpack.c.l.bf16 %v5177_v40  ;;  %v8796_v40 = vunpack.c.l.bf16 %v5200_v62  ;;  %v8868_v23 = vld [vmem:[#allocation141_spill] sm:$0xff]  ;;  %v8872_v30 = vld [vmem:[#allocation144_spill] sm:$0xff] }
 0x199   : > { %8769 = vst [vmem:[#allocation9_spill] sm:$0xff] %v5386_v60  ;;  %8771 = vst [vmem:[#allocation62_spill] sm:$0xff] %v5390_v41  ;;  %v8783_v41 = vld [vmem:[#allocation91_spill] sm:$0xff]  ;;  %v8874_v53 = vld [vmem:[#allocation33_spill] sm:$0xff] }
 0x19a   : > { %8773 = vst [vmem:[#allocation121_spill] sm:$0xff] %v5394_v33  ;;  %v5398_v63 = vrot.slane %v8775_v57, 6  ;;  %8778 = vst [vmem:[#allocation104_spill] sm:$0xff] %v5402_v44  ;;  %v8784_v0 = vunpack.c.l.bf16 %v8783_v41  ;;  %v5418_v57 = vrot.slane %v8786_v31, 6  ;;  %v8794_v41 = vunpack.c.l.bf16 %v5193_v24  ;;  %v8804_v24 = vld [vmem:[#allocation111_spill] sm:$0xff]  ;;  %v8876_v60 = vld [vmem:[#allocation145_spill] sm:$0xff] }
 0x19b   : > { %8780 = vst [vmem:[#allocation12_spill] sm:$0xff] %v5406_v59  ;;  %8782 = vst [vmem:[#allocation52_spill] sm:$0xff] %v5410_v14  ;;  %v5438_v31 = vrot.slane %v8796_v40, 6  ;;  %v8869_v44 = vunpack.c.l.bf16 %v8868_v23  ;;  %v8871_v59 = vunpack.c.l.bf16 %v8870_v29  ;;  %v8873_v14 = vunpack.c.l.bf16 %v8872_v30  ;;  %v8882_v23 = vld [vmem:[#allocation37_spill] sm:$0xff]  ;;  %v8884_v29 = vld [vmem:[#allocation75_spill] sm:$0xff] }
 0x19c   : > { %8776 = vst [vmem:[#allocation167_spill] sm:$0xff] %v5398_v63  ;;  %v5414_v27 = vrot.slane %v8784_v0, 6  ;;  %8787 = vst [vmem:[#allocation124_spill] sm:$0xff] %v5418_v57  ;;  %v5434_v0 = vrot.slane %v8794_v41, 6  ;;  %v8867_v63 = vunpack.c.l.bf16 %v8866_v11  ;;  %v8877_v57 = vunpack.c.l.bf16 %v8876_v60  ;;  %v8880_v11 = vld [vmem:[#allocation148_spill] sm:$0xff]  ;;  %v8886_v30 = vld [vmem:[#allocation149_spill] sm:$0xff] }
 0x19d   : > { %8789 = vst [vmem:[#allocation168_spill] sm:$0xff] %v5422_v55  ;;  %8791 = vst [vmem:[#allocation13_spill] sm:$0xff] %v5426_v43  ;;  %v1805_v38 = vrot.slane %v8871_v59, 7  ;;  %v1806_v1 = vrot.slane %v8873_v14, 7  ;;  %v8879_v55 = vunpack.c.l.bf16 %v8878_v13  ;;  %v8885_v59 = vunpack.c.l.bf16 %v8884_v29  ;;  %v8890_v60 = vld [vmem:[#allocation66_spill] sm:$0xff]  ;;  %v8892_v13 = vld [vmem:[#allocation77_spill] sm:$0xff] }
 0x19e   : > { %8785 = vst [vmem:[#allocation109_spill] sm:$0xff] %v5414_v27  ;;  %8793 = vst [vmem:[#allocation72_spill] sm:$0xff] %v5430_v18  ;;  %v1803_v43 = vrot.slane %v8867_v63, 7  ;;  %v1804_v18 = vrot.slane %v8869_v44, 7  ;;  %v8875_v27 = vunpack.c.l.bf16 %v8874_v53  ;;  %v1808_v12 = vrot.slane %v8877_v57, 7  ;;  %v8888_v53 = vld [vmem:[#allocation76_spill] sm:$0xff] }
 0x19f   : > { %8795 = vst [vmem:[#allocation125_spill] sm:$0xff] %v5434_v0  ;;  %8797 = vst [vmem:[#allocation65_spill] sm:$0xff] %v5438_v31  ;;  %v1809_v16 = vrot.slane %v8879_v55, 7  ;;  %v8881_v63 = vunpack.c.l.bf16 %v8880_v11  ;;  %v8883_v44 = vunpack.c.l.bf16 %v8882_v23  ;;  %v1812_v46 = vrot.slane %v8885_v59, 7  ;;  %v8894_v11 = vld [vmem:[#allocation151_spill] sm:$0xff]  ;;  %v8896_v23 = vld [vmem:[#allocation64_spill] sm:$0xff] }
 0x1a0   : > { %8799 = vst [vmem:[#allocation110_spill] sm:$0xff] %v5442_v36  ;;  %8801 = vst [vmem:[#allocation16_spill] sm:$0xff] %v5446_v21  ;;  %v1807_v36 = vrot.slane %v8875_v27, 7  ;;  %v8887_v14 = vunpack.c.l.bf16 %v8886_v30  ;;  %v8889_v27 = vunpack.c.l.bf16 %v8888_v53  ;;  %v8891_v57 = vunpack.c.l.bf16 %v8890_v60  ;;  %v8898_v29 = vld [vmem:[#allocation40_spill] sm:$0xff]  ;;  %v8900_v30 = vld [vmem:[#allocation54_spill] sm:$0xff] }
 0x1a1   : > { %8803 = vst [vmem:[#allocation169_spill] sm:$0xff] %v5450_v19  ;;  %v1810_v33 = vrot.slane %v8881_v63, 7  ;;  %v1811_v6 = vrot.slane %v8883_v44, 7  ;;  %v8893_v55 = vunpack.c.l.bf16 %v8892_v13  ;;  %v8895_v63 = vunpack.c.l.bf16 %v8894_v11  ;;  %v8902_v53 = vld [vmem:[#allocation153_spill] sm:$0xff]  ;;  %v8906_v13 = vld [vmem:[#allocation78_spill] sm:$0xff] }
 0x1a2   : > { %v1813_v61 = vrot.slane %v8887_v14, 7  ;;  %v1814_v28 = vrot.slane %v8889_v27, 7  ;;  %v1815_v2 = vrot.slane %v8891_v57, 7  ;;  %v8897_v44 = vunpack.c.l.bf16 %v8896_v23  ;;  %v8904_v60 = vld [vmem:[#allocation41_spill] sm:$0xff]  ;;  %v8908_v11 = vld [vmem:[#allocation154_spill] sm:$0xff]  ;;  %v8910_v23 = vld [vmem:[#allocation79_spill] sm:$0xff] }
 0x1a3   : > { %v1816_v4 = vrot.slane %v8893_v55, 7  ;;  %v1817_v42 = vrot.slane %v8895_v63, 7  ;;  %v8899_v59 = vunpack.c.l.bf16 %v8898_v29  ;;  %v8901_v14 = vunpack.c.l.bf16 %v8900_v30  ;;  %v8912_v29 = vld [vmem:[#allocation70_spill] sm:$0xff]  ;;  %v8914_v30 = vld [vmem:[#allocation80_spill] sm:$0xff] }
 0x1a4   : > { %v1818_v8 = vrot.slane %v8897_v44, 7  ;;  %v8903_v27 = vunpack.c.l.bf16 %v8902_v53  ;;  %v8905_v57 = vunpack.c.l.bf16 %v8904_v60  ;;  %v8907_v55 = vunpack.c.l.bf16 %v8906_v13  ;;  %v8916_v53 = vld [vmem:[#allocation155_spill] sm:$0xff]  ;;  %v8918_v60 = vld [vmem:[#allocation81_spill] sm:$0xff]  ;;  %v8920_v13 = vld [vmem:[#allocation42_spill] sm:$0xff] }
 0x1a5   : > { %v1819_v32 = vrot.slane %v8899_v59, 7  ;;  %v1820_v56 = vrot.slane %v8901_v14, 7  ;;  %v8909_v63 = vunpack.c.l.bf16 %v8908_v11  ;;  %v8911_v44 = vunpack.c.l.bf16 %v8910_v23  ;;  %v8922_v11 = vld [vmem:[#allocation82_spill] sm:$0xff]  ;;  %v8924_v23 = vld [vmem:[#allocation156_spill] sm:$0xff] }
 0x1a6   : > { %v1821_v58 = vrot.slane %v8903_v27, 7  ;;  %v1822_v9 = vrot.slane %v8905_v57, 7  ;;  %v1823_v22 = vrot.slane %v8907_v55, 7  ;;  %v8913_v59 = vunpack.c.l.bf16 %v8912_v29  ;;  %v8926_v29 = vld [vmem:[#allocation83_spill] sm:$0xff] }
 0x1a7   : > { %v1824_v49 = vrot.slane %v8909_v63, 7  ;;  %v1825_v3 = vrot.slane %v8911_v44, 7  ;;  %v8915_v14 = vunpack.c.l.bf16 %v8914_v30  ;;  %v8917_v27 = vunpack.c.l.bf16 %v8916_v53  ;;  %v8928_v30 = vld [vmem:[#allocation2_spill] sm:$0xff]  ;;  %v8930_v53 = vld [vmem:[#allocation84_spill] sm:$0xff] }
 0x1a8   : > { %v1826_v35 = vrot.slane %v8913_v59, 7  ;;  %v8919_v57 = vunpack.c.l.bf16 %v8918_v60  ;;  %v8921_v55 = vunpack.c.l.bf16 %v8920_v13  ;;  %v8923_v63 = vunpack.c.l.bf16 %v8922_v11  ;;  %v8932_v60 = vld [vmem:[#allocation56_spill] sm:$0xff]  ;;  %v8934_v13 = vld [vmem:[#allocation85_spill] sm:$0xff] }
 0x1a9   : > { %v1827_v17 = vrot.slane %v8915_v14, 7  ;;  %v1828_v5 = vrot.slane %v8917_v27, 7  ;;  %v8925_v44 = vunpack.c.l.bf16 %v8924_v23  ;;  %v8927_v59 = vunpack.c.l.bf16 %v8926_v29  ;;  %v8936_v11 = vld [vmem:[#allocation157_spill] sm:$0xff]  ;;  %v8938_v23 = vld [vmem:[#allocation86_spill] sm:$0xff]  ;;  %v8940_v29 = vld [vmem:[#allocation3_spill] sm:$0xff] }
 0x1aa   : > { %v1829_v26 = vrot.slane %v8919_v57, 7  ;;  %v1830_v50 = vrot.slane %v8921_v55, 7  ;;  %v1831_v7 = vrot.slane %v8923_v63, 7  ;;  %v8929_v14 = vunpack.c.l.bf16 %v8928_v30  ;;  %v8942_v30 = vld [vmem:[#allocation87_spill] sm:$0xff] }
 0x1ab   : > { %v1832_v51 = vrot.slane %v8925_v44, 7  ;;  %v1833_v37 = vrot.slane %v8927_v59, 7  ;;  %v8931_v27 = vunpack.c.l.bf16 %v8930_v53  ;;  %v8933_v57 = vunpack.c.l.bf16 %v8932_v60  ;;  %v8944_v53 = vld [vmem:[#allocation43_spill] sm:$0xff]  ;;  %v8946_v60 = vld [vmem:[#allocation88_spill] sm:$0xff] }
 0x1ac   : > { %v1834_v48 = vrot.slane %v8929_v14, 7  ;;  %v8935_v55 = vunpack.c.l.bf16 %v8934_v13  ;;  %v8937_v63 = vunpack.c.l.bf16 %v8936_v11  ;;  %v8939_v44 = vunpack.c.l.bf16 %v8938_v23  ;;  %v8948_v13 = vld [vmem:[#allocation158_spill] sm:$0xff]  ;;  %v8950_v11 = vld [vmem:[#allocation89_spill] sm:$0xff]  ;;  %v8952_v23 = vld [vmem:[#allocation4_spill] sm:$0xff] }
 0x1ad   : > { %v1835_v45 = vrot.slane %v8931_v27, 7  ;;  %v1836_v47 = vrot.slane %v8933_v57, 7  ;;  %v8941_v59 = vunpack.c.l.bf16 %v8940_v29  ;;  %v8943_v14 = vunpack.c.l.bf16 %v8942_v30  ;;  %v8954_v29 = vld [vmem:[#allocation90_spill] sm:$0xff]  ;;  %v8956_v30 = vld [vmem:[#allocation57_spill] sm:$0xff] }
 0x1ae   : > { %v1837_v15 = vrot.slane %v8935_v55, 7  ;;  %v1838_v39 = vrot.slane %v8937_v63, 7  ;;  %v1839_v19 = vrot.slane %v8939_v44, 7  ;;  %v8945_v27 = vunpack.c.l.bf16 %v8944_v53  ;;  %v8958_v53 = vld [vmem:[#allocation91_spill] sm:$0xff] }
 0x1af   : > { %v1840_v34 = vrot.slane %v8941_v59, 7  ;;  %v1841_v20 = vrot.slane %v8943_v14, 7  ;;  %v8947_v57 = vunpack.c.l.bf16 %v8946_v60  ;;  %v8949_v55 = vunpack.c.l.bf16 %v8948_v13  ;;  %v8960_v60 = vld [vmem:[#allocation159_spill] sm:$0xff]  ;;  %v8963_v13 = vld [vmem:[#allocation92_spill] sm:$0xff] }
 0x1b0   : > { %v1842_v10 = vrot.slane %v8945_v27, 7  ;;  %v8951_v63 = vunpack.c.l.bf16 %v8950_v11  ;;  %v8953_v44 = vunpack.c.l.bf16 %v8952_v23  ;;  %v8955_v59 = vunpack.c.l.bf16 %v8954_v29  ;;  %v8969_v29 = vld [vmem:[#allocation93_spill] sm:$0xff] }
 0x1b1   : > { %v1843_v31 = vrot.slane %v8947_v57, 7  ;;  %v1844_v62 = vrot.slane %v8949_v55, 7  ;;  %v8957_v14 = vunpack.c.l.bf16 %v8956_v30  ;;  %v8959_v27 = vunpack.c.l.bf16 %v8958_v53  ;;  %v8972_v30 = vld [vmem:[#allocation44_spill] sm:$0xff] }
 0x1b2   : > { %v1845_v41 = vrot.slane %v8951_v63, 7  ;;  %v1846_v54 = vrot.slane %v8953_v44, 7  ;;  %v1847_v21 = vrot.slane %v8955_v59, 7  ;;  %v8961_v57 = vunpack.c.l.bf16 %v8960_v60  ;;  %v8966_v63 = vld [vmem:[#allocation5_spill] sm:$0xff] }
 0x1b3   : > { %v1848_v52 = vrot.slane %v8957_v14, 7  ;;  %v1849_v25 = vrot.slane %v8959_v27, 7  ;;  %v8964_v55 = vunpack.c.l.bf16 %v8963_v13  ;;  %v8967_v23 = vunpack.c.l.bf16 %v8966_v63  ;;  %v8975_v27 = vld [vmem:[#allocation94_spill] sm:$0xff] }
 0x1b4   : > { %v5660_v40 = vrot.slane %v8961_v57, 7  ;;  %v8970_v59 = vunpack.c.l.bf16 %v8969_v29  ;;  %v8973_v14 = vunpack.c.l.bf16 %v8972_v30  ;;  %v8976_v60 = vunpack.c.l.bf16 %v8975_v27  ;;  %v8987_v30 = vld [vmem:[#allocation96_spill] sm:$0xff] }
 0x1b5   : > { %v5664_v11 = vrot.slane %v8964_v55, 7  ;;  %v5668_v44 = vrot.slane %v8967_v23, 7  ;;  %v8990_v27 = vld [vmem:[#allocation112_spill] sm:$0xff] }
 0x1b6   : > { %8962 = vst [vmem:[#allocation111_spill] sm:$0xff] %v5660_v40  ;;  %v5672_v0 = vrot.slane %v8970_v59, 7  ;;  %v5676_v53 = vrot.slane %v8973_v14, 7  ;;  %v5680_v57 = vrot.slane %v8976_v60, 7  ;;  %v8978_v40 = vld [vmem:[#allocation160_spill] sm:$0xff]  ;;  %v8988_v14 = vmax.f32 %v8804_v24, %v8987_v30  ;;  %v8991_v60 = vld [vmem:[#allocation47_spill] sm:$0xff] }
 0x1b7   : > { %8965 = vst [vmem:[#allocation29_spill] sm:$0xff] %v5664_v11  ;;  %8968 = vst [vmem:[#allocation141_spill] sm:$0xff] %v5668_v44  ;;  %v8979_v13 = vunpack.c.l.bf16 %v8978_v40  ;;  %v8981_v11 = vld [vmem:[#allocation95_spill] sm:$0xff]  ;;  %v8984_v44 = vld [vmem:[#allocation6_spill] sm:$0xff] }
 0x1b8   : > { %8971 = vst [vmem:[#allocation30_spill] sm:$0xff] %v5672_v0  ;;  %8974 = vst [vmem:[#allocation144_spill] sm:$0xff] %v5676_v53  ;;  %v8982_v63 = vunpack.c.l.bf16 %v8981_v11  ;;  %v8985_v29 = vunpack.c.l.bf16 %v8984_v44  ;;  %v5697_v53 = vmax.f32 %v8988_v14, %v1803_v43  ;;  %v8993_v40 = vld [vmem:[#allocation117_spill] sm:$0xff]  ;;  %v9000_v24 = vld [vmem:[#allocation98_spill] sm:$0xff] }
 0x1b9   : > { %8977 = vst [vmem:[#allocation33_spill] sm:$0xff] %v5680_v57  ;;  %v5684_v55 = vrot.slane %v8979_v13, 7  ;;  %v8992_v57 = vmax.f32 %v8990_v27, %v8991_v60  ;;  %v8994_v13 = vld [vmem:[#allocation97_spill] sm:$0xff]  ;;  %v9002_v14 = vld [vmem:[#allocation119_spill] sm:$0xff] }
 0x1ba   : > { %v5688_v23 = vrot.slane %v8982_v63, 7  ;;  %v5692_v59 = vrot.slane %v8985_v29, 7  ;;  %8989 = vst [vmem:[#allocation37_spill] sm:$0xff] %v5697_v53  ;;  %v8996_v63 = vld [vmem:[#allocation118_spill] sm:$0xff]  ;;  %v9003_v53 = vld [vmem:[#allocation67_spill] sm:$0xff] }
 0x1bb   : > { %8980 = vst [vmem:[#allocation145_spill] sm:$0xff] %v5684_v55  ;;  %v5702_v0 = vmax.f32 %v8992_v57, %v1804_v18  ;;  %v8995_v55 = vmax.f32 %v8993_v40, %v8994_v13  ;;  %v9004_v27 = vmax.f32 %v9002_v14, %v9003_v53  ;;  %v9005_v57 = vld [vmem:[#allocation10_spill] sm:$0xff]  ;;  %v9006_v60 = vld [vmem:[#allocation99_spill] sm:$0xff]  ;;  %v9009_v13 = vld [vmem:[#allocation48_spill] sm:$0xff] }
 0x1bc   : > { %8983 = vst [vmem:[#allocation34_spill] sm:$0xff] %v5688_v23  ;;  %8986 = vst [vmem:[#allocation148_spill] sm:$0xff] %v5692_v59  ;;  %v8997_v23 = vld [vmem:[#allocation161_spill] sm:$0xff]  ;;  %v8999_v59 = vld [vmem:[#allocation7_spill] sm:$0xff]  ;;  %v9007_v40 = vmax.f32 %v9005_v57, %v9006_v60 }
 0x1bd   : > { %v5707_v11 = vmax.f32 %v8995_v55, %v1805_v38  ;;  %v8998_v44 = vmax.f32 %v8996_v63, %v8997_v23  ;;  %v9001_v30 = vmax.f32 %v8999_v59, %v9000_v24  ;;  %v5722_v18 = vmax.f32 %v9004_v27, %v1808_v12  ;;  %v9008_v55 = vld [vmem:[#allocation122_spill] sm:$0xff]  ;;  %v9011_v63 = vld [vmem:[#allocation11_spill] sm:$0xff]  ;;  %v9018_v27 = vld [vmem:[#allocation101_spill] sm:$0xff] }
 0x1be   : > { %v5727_v38 = vmax.f32 %v9007_v40, %v1809_v16  ;;  %v9010_v23 = vmax.f32 %v9008_v55, %v9009_v13  ;;  %v9014_v24 = vld [vmem:[#allocation123_spill] sm:$0xff]  ;;  %v9017_v14 = vld [vmem:[#allocation14_spill] sm:$0xff]  ;;  %v9021_v40 = vld [vmem:[#allocation68_spill] sm:$0xff] }
 0x1bf   : > { %v5712_v29 = vmax.f32 %v8998_v44, %v1806_v1  ;;  %v5717_v43 = vmax.f32 %v9001_v30, %v1807_v36  ;;  %v9012_v44 = vld [vmem:[#allocation100_spill] sm:$0xff]  ;;  %v9015_v30 = vld [vmem:[#allocation162_spill] sm:$0xff]  ;;  %v9019_v57 = vmax.f32 %v9017_v14, %v9018_v27  ;;  %v9023_v13 = vld [vmem:[#allocation15_spill] sm:$0xff] }
 0x1c0   : > { %v5732_v1 = vmax.f32 %v9010_v23, %v1810_v33  ;;  %v9013_v59 = vmax.f32 %v9011_v63, %v9012_v44  ;;  %v9016_v53 = vmax.f32 %v9014_v24, %v9015_v30  ;;  %v9020_v60 = vld [vmem:[#allocation126_spill] sm:$0xff]  ;;  %v9024_v23 = vld [vmem:[#allocation105_spill] sm:$0xff]  ;;  %v9026_v44 = vld [vmem:[#allocation127_spill] sm:$0xff] }
 0x1c1   : > { %v5747_v16 = vmax.f32 %v9019_v57, %v1813_v61  ;;  %v9022_v55 = vmax.f32 %v9020_v60, %v9021_v40  ;;  %v9025_v63 = vmax.f32 %v9023_v13, %v9024_v23  ;;  %v9029_v30 = vld [vmem:[#allocation128_spill] sm:$0xff]  ;;  %v9032_v27 = vld [vmem:[#allocation17_spill] sm:$0xff]  ;;  %v9033_v57 = vld [vmem:[#allocation163_spill] sm:$0xff] }
 0x1c2   : > { %v5737_v36 = vmax.f32 %v9013_v59, %v1811_v6  ;;  %v5742_v12 = vmax.f32 %v9016_v53, %v1812_v46  ;;  %v9027_v59 = vld [vmem:[#allocation59_spill] sm:$0xff]  ;;  %v9030_v53 = vld [vmem:[#allocation106_spill] sm:$0xff]  ;;  %v9034_v60 = vmax.f32 %v9032_v27, %v9033_v57  ;;  %v9035_v40 = vld [vmem:[#allocation129_spill] sm:$0xff] }
 0x1c3   : > { %v5752_v33 = vmax.f32 %v9022_v55, %v1814_v28  ;;  %v5757_v6 = vmax.f32 %v9025_v63, %v1815_v2  ;;  %v9028_v24 = vmax.f32 %v9026_v44, %v9027_v59  ;;  %v9031_v14 = vmax.f32 %v9029_v30, %v9030_v53  ;;  %v9036_v55 = vld [vmem:[#allocation107_spill] sm:$0xff]  ;;  %v9039_v23 = vld [vmem:[#allocation18_spill] sm:$0xff]  ;;  %v9040_v63 = vld [vmem:[#allocation49_spill] sm:$0xff] }
 0x1c4   : > { %v5772_v28 = vmax.f32 %v9034_v60, %v1818_v8  ;;  %v9037_v13 = vmax.f32 %v9035_v40, %v9036_v55  ;;  %v9041_v44 = vmax.f32 %v9039_v23, %v9040_v63  ;;  %v9043_v59 = vld [vmem:[#allocation130_spill] sm:$0xff]  ;;  %v9047_v53 = vld [vmem:[#allocation19_spill] sm:$0xff]  ;;  %v9052_v60 = vld [vmem:[#allocation73_spill] sm:$0xff] }
 0x1c5   : > { %v5762_v46 = vmax.f32 %v9028_v24, %v1816_v4  ;;  %v5767_v61 = vmax.f32 %v9031_v14, %v1817_v42  ;;  %v9044_v24 = vld [vmem:[#allocation108_spill] sm:$0xff]  ;;  %v9051_v57 = vld [vmem:[#allocation131_spill] sm:$0xff] }
 0x1c6   : > { %v5777_v2 = vmax.f32 %v9037_v13, %v1819_v32  ;;  %v5782_v4 = vmax.f32 %v9041_v44, %v1820_v56  ;;  %v9045_v30 = vmax.f32 %v9043_v59, %v9044_v24  ;;  %v9048_v14 = vld [vmem:[#allocation164_spill] sm:$0xff]  ;;  %v9053_v40 = vmax.f32 %v9051_v57, %v9052_v60  ;;  %v9056_v13 = vld [vmem:[#allocation113_spill] sm:$0xff]  ;;  %v9071_v60 = vld [vmem:[#allocation22_spill] sm:$0xff] }
 0x1c7   : > { %v9049_v27 = vmax.f32 %v9047_v53, %v9048_v14  ;;  %v9055_v55 = vld [vmem:[#allocation20_spill] sm:$0xff]  ;;  %v9060_v44 = vld [vmem:[#allocation69_spill] sm:$0xff] }
 0x1c8   : > { %9038 = vst [vmem:[#allocation75_spill] sm:$0xff] %v5777_v2  ;;  %9042 = vst [vmem:[#allocation149_spill] sm:$0xff] %v5782_v4  ;;  %v5787_v42 = vmax.f32 %v9045_v30, %v1821_v58  ;;  %v5797_v32 = vmax.f32 %v9053_v40, %v1823_v22  ;;  %v9057_v23 = vmax.f32 %v9055_v55, %v9056_v13  ;;  %v9059_v63 = vld [vmem:[#allocation132_spill] sm:$0xff]  ;;  %v9063_v24 = vld [vmem:[#allocation21_spill] sm:$0xff] }
 0x1c9   : > { %v5792_v8 = vmax.f32 %v9049_v27, %v1822_v9  ;;  %v9061_v59 = vmax.f32 %v9059_v63, %v9060_v44  ;;  %v9064_v30 = vld [vmem:[#allocation74_spill] sm:$0xff]  ;;  %v9067_v14 = vld [vmem:[#allocation133_spill] sm:$0xff]  ;;  %v9079_v44 = vld [vmem:[#allocation23_spill] sm:$0xff] }
 0x1ca   : > { %9046 = vst [vmem:[#allocation76_spill] sm:$0xff] %v5787_v42  ;;  %9054 = vst [vmem:[#allocation77_spill] sm:$0xff] %v5797_v32  ;;  %v5802_v56 = vmax.f32 %v9057_v23, %v1824_v49  ;;  %v9065_v53 = vmax.f32 %v9063_v24, %v9064_v30  ;;  %v9068_v27 = vld [vmem:[#allocation114_spill] sm:$0xff]  ;;  %v9072_v40 = vld [vmem:[#allocation61_spill] sm:$0xff] }
 0x1cb   : > { %9050 = vst [vmem:[#allocation66_spill] sm:$0xff] %v5792_v8  ;;  %v5807_v58 = vmax.f32 %v9061_v59, %v1825_v3  ;;  %v9069_v57 = vmax.f32 %v9067_v14, %v9068_v27  ;;  %v9073_v49 = vmax.f32 %v9071_v60, %v9072_v40  ;;  %v9075_v13 = vld [vmem:[#allocation134_spill] sm:$0xff]  ;;  %v9076_v3 = vld [vmem:[#allocation45_spill] sm:$0xff]  ;;  %v9083_v30 = vld [vmem:[#allocation135_spill] sm:$0xff] }
 0x1cc   : > { %9058 = vst [vmem:[#allocation151_spill] sm:$0xff] %v5802_v56  ;;  %v5812_v9 = vmax.f32 %v9065_v53, %v1826_v35  ;;  %v9077_v23 = vmax.f32 %v9075_v13, %v9076_v3  ;;  %v9080_v35 = vld [vmem:[#allocation115_spill] sm:$0xff]  ;;  %v9084_v53 = vld [vmem:[#allocation165_spill] sm:$0xff]  ;;  %v9087_v27 = vld [vmem:[#allocation24_spill] sm:$0xff] }
 0x1cd   : > { %9062 = vst [vmem:[#allocation64_spill] sm:$0xff] %v5807_v58  ;;  %v5817_v22 = vmax.f32 %v9069_v57, %v1827_v17  ;;  %v5822_v55 = vmax.f32 %v9073_v49, %v1828_v5  ;;  %v9081_v59 = vmax.f32 %v9079_v44, %v9080_v35  ;;  %v9085_v17 = vmax.f32 %v9083_v30, %v9084_v53  ;;  %v9088_v57 = vld [vmem:[#allocation58_spill] sm:$0xff]  ;;  %v9091_v40 = vld [vmem:[#allocation136_spill] sm:$0xff]  ;;  %v9095_v3 = vld [vmem:[#allocation25_spill] sm:$0xff] }
 0x1ce   : > { %9066 = vst [vmem:[#allocation40_spill] sm:$0xff] %v5812_v9  ;;  %v5827_v63 = vmax.f32 %v9077_v23, %v1829_v26  ;;  %v9089_v60 = vmax.f32 %v9087_v27, %v9088_v57  ;;  %v9092_v49 = vld [vmem:[#allocation116_spill] sm:$0xff]  ;;  %v9096_v23 = vld [vmem:[#allocation71_spill] sm:$0xff]  ;;  %v9099_v35 = vld [vmem:[#allocation137_spill] sm:$0xff] }
 0x1cf   : > { %9070 = vst [vmem:[#allocation54_spill] sm:$0xff] %v5817_v22  ;;  %9074 = vst [vmem:[#allocation153_spill] sm:$0xff] %v5822_v55  ;;  %v5832_v24 = vmax.f32 %v9081_v59, %v1830_v50  ;;  %v5837_v14 = vmax.f32 %v9085_v17, %v1831_v7  ;;  %v9093_v13 = vmax.f32 %v9091_v40, %v9092_v49  ;;  %v9100_v7 = vld [vmem:[#allocation46_spill] sm:$0xff]  ;;  %v9104_v53 = vld [vmem:[#allocation8_spill] sm:$0xff] }
 0x1d0   : > { %9078 = vst [vmem:[#allocation41_spill] sm:$0xff] %v5827_v63  ;;  %v5842_v5 = vmax.f32 %v9089_v60, %v1832_v51  ;;  %v9097_v50 = vmax.f32 %v9095_v3, %v9096_v23  ;;  %v9101_v59 = vmax.f32 %v9099_v35, %v9100_v7  ;;  %v9103_v51 = vld [vmem:[#allocation26_spill] sm:$0xff]  ;;  %v9111_v49 = vld [vmem:[#allocation27_spill] sm:$0xff]  ;;  %v9119_v7 = vld [vmem:[#allocation28_spill] sm:$0xff] }
 0x1d1   : > { %9082 = vst [vmem:[#allocation78_spill] sm:$0xff] %v5832_v24  ;;  %9086 = vst [vmem:[#allocation154_spill] sm:$0xff] %v5837_v14  ;;  %v5847_v26 = vmax.f32 %v9093_v13, %v1833_v37  ;;  %v9105_v17 = vmax.f32 %v9103_v51, %v9104_v53  ;;  %v9107_v57 = vld [vmem:[#allocation138_spill] sm:$0xff]  ;;  %v9108_v37 = vld [vmem:[#allocation51_spill] sm:$0xff] }
 0x1d2   : > { %9090 = vst [vmem:[#allocation79_spill] sm:$0xff] %v5842_v5  ;;  %v5852_v44 = vmax.f32 %v9097_v50, %v1834_v48  ;;  %v5857_v30 = vmax.f32 %v9101_v59, %v1835_v45  ;;  %v9109_v60 = vmax.f32 %v9107_v57, %v9108_v37  ;;  %v9112_v13 = vld [vmem:[#allocation102_spill] sm:$0xff]  ;;  %v9115_v23 = vld [vmem:[#allocation139_spill] sm:$0xff]  ;;  %v9116_v50 = vld [vmem:[#allocation120_spill] sm:$0xff] }
 0x1d3   : > { %9094 = vst [vmem:[#allocation70_spill] sm:$0xff] %v5847_v26  ;;  %v5862_v27 = vmax.f32 %v9105_v17, %v1836_v47  ;;  %v9113_v48 = vmax.f32 %v9111_v49, %v9112_v13  ;;  %v9117_v35 = vmax.f32 %v9115_v23, %v9116_v50  ;;  %v9120_v59 = vld [vmem:[#allocation166_spill] sm:$0xff]  ;;  %v9123_v53 = vld [vmem:[#allocation140_spill] sm:$0xff]  ;;  %v9124_v17 = vld [vmem:[#allocation103_spill] sm:$0xff] }
 0x1d4   : > { %9098 = vst [vmem:[#allocation80_spill] sm:$0xff] %v5852_v44  ;;  %9102 = vst [vmem:[#allocation155_spill] sm:$0xff] %v5857_v30  ;;  %v5867_v40 = vmax.f32 %v9109_v60, %v1837_v15  ;;  %v9121_v51 = vmax.f32 %v9119_v7, %v9120_v59  ;;  %v9125_v15 = vmax.f32 %v9123_v53, %v9124_v17  ;;  %v5893_v37 = vld [vmem:[%s2421_s12 + $0x14] sm:$0x1]  ;;  %v9128_v60 = vld [vmem:[#allocation9_spill] sm:$0xff] }
 0x1d5   : > { %9106 = vst [vmem:[#allocation81_spill] sm:$0xff] %v5862_v27  ;;  %v5872_v3 = vmax.f32 %v9113_v48, %v1838_v39  ;;  %v5877_v45 = vmax.f32 %v9117_v35, %v1839_v19  ;;  %v5890_v39 = vld [vmem:[%s2421_s12 + $0xc] sm:$0x1]  ;;  %v9127_v19 = vld [vmem:[#allocation142_spill] sm:$0xff]  ;;  %v9136_v35 = vld [vmem:[#allocation121_spill] sm:$0xff] }
 0x1d6   : > { %9110 = vst [vmem:[#allocation42_spill] sm:$0xff] %v5867_v40  ;;  %v5882_v47 = vmax.f32 %v9121_v51, %v1840_v34  ;;  %v5887_v57 = vmax.f32 %v9125_v15, %v1841_v20  ;;  %v9129_v49 = vmax.f32 %v9127_v19, %v9128_v60  ;;  %v9131_v34 = vld [vmem:[#allocation31_spill] sm:$0xff]  ;;  %v9132_v48 = vld [vmem:[#allocation62_spill] sm:$0xff]  ;;  %v9139_v51 = vld [vmem:[#allocation32_spill] sm:$0xff] }
 0x1d7   : > { %9114 = vst [vmem:[#allocation82_spill] sm:$0xff] %v5872_v3  ;;  %9118 = vst [vmem:[#allocation156_spill] sm:$0xff] %v5877_v45  ;;  %v9133_v23 = vmax.f32 %v9131_v34, %v9132_v48  ;;  %v9135_v20 = vld [vmem:[#allocation143_spill] sm:$0xff]  ;;  %v5916_v19 = vld [vmem:[%s2421_s12 + $0x4] sm:$0x1] }
 0x1d8   : > { %9122 = vst [vmem:[#allocation83_spill] sm:$0xff] %v5882_v47  ;;  %9126 = vst [vmem:[#allocation2_spill] sm:$0xff] %v5887_v57  ;;  %v5898_v13 = vmax.f32 %v9129_v49, %v1842_v10  ;;  %v9137_v7 = vmax.f32 %v9135_v20, %v9136_v35  ;;  %v9140_v53 = vld [vmem:[#allocation167_spill] sm:$0xff]  ;;  %v5919_v10 = vld [vmem:[%s2421_s12 + $0x1c] sm:$0x1] }
 0x1d9   : > { %v5903_v50 = vmax.f32 %v9133_v23, %v1843_v31  ;;  %v9141_v17 = vmax.f32 %v9139_v51, %v9140_v53  ;;  %v5922_v60 = vld [vmem:[%s2421_s12 + $0x24] sm:$0x1]  ;;  %v9144_v31 = vld [vmem:[#allocation104_spill] sm:$0xff]  ;;  %v6078_v44 = vld [vmem:[%s2421_s12 + $0xec] sm:$0x1] }
 0x1da   : > { %9130 = vst [vmem:[#allocation84_spill] sm:$0xff] %v5898_v13  ;;  %v5908_v59 = vmax.f32 %v9137_v7, %v1844_v62  ;;  %v9143_v49 = vld [vmem:[#allocation146_spill] sm:$0xff]  ;;  %v9147_v62 = vld [vmem:[#allocation35_spill] sm:$0xff]  ;;  %v9148_v23 = vld [vmem:[#allocation12_spill] sm:$0xff] }
 0x1db   : > { %9134 = vst [vmem:[#allocation56_spill] sm:$0xff] %v5903_v50  ;;  %v5913_v15 = vmax.f32 %v9141_v17, %v1845_v41  ;;  %v9145_v34 = vmax.f32 %v9143_v49, %v9144_v31  ;;  %v9149_v20 = vmax.f32 %v9147_v62, %v9148_v23  ;;  %v9151_v41 = vld [vmem:[#allocation147_spill] sm:$0xff]  ;;  %v9152_v7 = vld [vmem:[#allocation52_spill] sm:$0xff]  ;;  %v5951_v31 = vld [vmem:[%s2421_s12 + $0x3c] sm:$0x1] }
 0x1dc   : > { %9138 = vst [vmem:[#allocation85_spill] sm:$0xff] %v5908_v59  ;;  %v9153_v51 = vmax.f32 %v9151_v41, %v9152_v7  ;;  %v9155_v17 = vld [vmem:[#allocation36_spill] sm:$0xff]  ;;  %v5945_v49 = vld [vmem:[%s2421_s12 + $0x2c] sm:$0x1]  ;;  %v9165_v41 = vld [vmem:[#allocation38_spill] sm:$0xff] }
 0x1dd   : > { %9142 = vst [vmem:[#allocation157_spill] sm:$0xff] %v5913_v15  ;;  %v5927_v48 = vmax.f32 %v9145_v34, %v1846_v54  ;;  %v5932_v35 = vmax.f32 %v9149_v20, %v1847_v21  ;;  %v9156_v15 = vld [vmem:[#allocation109_spill] sm:$0xff]  ;;  %v5948_v54 = vld [vmem:[%s2421_s12 + $0x34] sm:$0x1]  ;;  %v5954_v21 = vld [vmem:[%s2421_s12 + $0x44] sm:$0x1] }
 0x1de   : > { %v5937_v53 = vmax.f32 %v9153_v51, %v1848_v52  ;;  %v9157_v59 = vmax.f32 %v9155_v17, %v9156_v15  ;;  %v5957_v34 = vld [vmem:[%s2421_s12 + $0x4c] sm:$0x1]  ;;  %v5960_v52 = vld [vmem:[%s2421_s12 + $0x54] sm:$0x1]  ;;  %v9164_v20 = vld [vmem:[#allocation29_spill] sm:$0xff]  ;;  %9216 = vst [vmem:[#allocation118_spill] sm:$0xff] %v6078_v44 }
 0x1df   : > { %9146 = vst [vmem:[#allocation86_spill] sm:$0xff] %v5927_v48  ;;  %9150 = vst [vmem:[#allocation3_spill] sm:$0xff] %v5932_v35  ;;  %v9159_v62 = vld [vmem:[#allocation111_spill] sm:$0xff]  ;;  %v9160_v15 = vld [vmem:[#allocation60_spill] sm:$0xff] }
 0x1e0   : > { %9154 = vst [vmem:[#allocation87_spill] sm:$0xff] %v5937_v53  ;;  %v5942_v50 = vmax.f32 %v9157_v59, %v1849_v25  ;;  %v9161_v25 = vld [vmem:[#allocation124_spill] sm:$0xff]  ;;  %v9170_v53 = vld [vmem:[#allocation50_spill] sm:$0xff]  ;;  %v9171_v35 = vld [vmem:[#allocation13_spill] sm:$0xff] }
 0x1e1   : > { %v9162_v59 = vmax.f32 %v9160_v15, %v9161_v25  ;;  %v9166_v7 = vld [vmem:[#allocation168_spill] sm:$0xff]  ;;  %v9172_v48 = vmax.f32 %v9170_v53, %v9171_v35  ;;  %v9174_v57 = vld [vmem:[#allocation30_spill] sm:$0xff]  ;;  %v5987_v25 = vld [vmem:[%s2421_s12 + $0x5c] sm:$0x1] }
 0x1e2   : > { %9158 = vst [vmem:[#allocation43_spill] sm:$0xff] %v5942_v50  ;;  %v9167_v51 = vmax.f32 %v9165_v41, %v9166_v7  ;;  %v9169_v50 = vld [vmem:[#allocation141_spill] sm:$0xff]  ;;  %v9175_v47 = vld [vmem:[#allocation150_spill] sm:$0xff]  ;;  %v9176_v45 = vld [vmem:[#allocation72_spill] sm:$0xff] }
 0x1e3   : > { %v5966_v23 = vmax.f32 %v9162_v59, %v9159_v62  ;;  %v5978_v13 = vmax.f32 %v9172_v48, %v9169_v50  ;;  %v9177_v15 = vmax.f32 %v9175_v47, %v9176_v45  ;;  %v5990_v59 = vld [vmem:[%s2421_s12 + $0x64] sm:$0x1]  ;;  %v9179_v41 = vld [vmem:[#allocation144_spill] sm:$0xff]  ;;  %v9180_v35 = vld [vmem:[#allocation63_spill] sm:$0xff] }
 0x1e4   : > { %v5972_v17 = vmax.f32 %v9167_v51, %v9164_v20  ;;  %v5993_v20 = vld [vmem:[%s2421_s12 + $0x6c] sm:$0x1]  ;;  %v9181_v53 = vld [vmem:[#allocation125_spill] sm:$0xff]  ;;  %v9194_v3 = vld [vmem:[#allocation34_spill] sm:$0xff] }
 0x1e5   : > { %9163 = vst [vmem:[#allocation88_spill] sm:$0xff] %v5966_v23  ;;  %9173 = vst [vmem:[#allocation89_spill] sm:$0xff] %v5978_v13  ;;  %v5984_v62 = vmax.f32 %v9177_v15, %v9174_v57  ;;  %v9182_v50 = vmax.f32 %v9180_v35, %v9181_v53  ;;  %v9184_v7 = vld [vmem:[#allocation33_spill] sm:$0xff]  ;;  %v9185_v51 = vld [vmem:[#allocation39_spill] sm:$0xff] }
 0x1e6   : > { %9168 = vst [vmem:[#allocation158_spill] sm:$0xff] %v5972_v17  ;;  %v9186_v45 = vld [vmem:[#allocation65_spill] sm:$0xff]  ;;  %v9191_v13 = vld [vmem:[#allocation110_spill] sm:$0xff]  ;;  %v9195_v40 = vld [vmem:[#allocation152_spill] sm:$0xff] }
 0x1e7   : > { %9178 = vst [vmem:[#allocation4_spill] sm:$0xff] %v5984_v62  ;;  %v5999_v48 = vmax.f32 %v9182_v50, %v9179_v41  ;;  %v9187_v47 = vmax.f32 %v9185_v51, %v9186_v45  ;;  %v9189_v15 = vld [vmem:[#allocation145_spill] sm:$0xff]  ;;  %v9196_v27 = vld [vmem:[#allocation16_spill] sm:$0xff]  ;;  %v6026_v50 = vld [vmem:[%s2421_s12 + $0x84] sm:$0x1] }
 0x1e8   : > { %v9190_v62 = vld [vmem:[#allocation53_spill] sm:$0xff]  ;;  %v9197_v30 = vmax.f32 %v9195_v40, %v9196_v27  ;;  %v6020_v35 = vld [vmem:[%s2421_s12 + $0x74] sm:$0x1]  ;;  %v6044_v40 = vld [vmem:[%s2421_s12 + $0xa4] sm:$0x1] }
 0x1e9   : > { %9183 = vst [vmem:[#allocation90_spill] sm:$0xff] %v5999_v48  ;;  %v6005_v57 = vmax.f32 %v9187_v47, %v9184_v7  ;;  %v9192_v17 = vmax.f32 %v9190_v62, %v9191_v13  ;;  %v6023_v53 = vld [vmem:[%s2421_s12 + $0x7c] sm:$0x1]  ;;  %v6029_v7 = vld [vmem:[%s2421_s12 + $0x8c] sm:$0x1]  ;;  %9207 = vst [vmem:[#allocation94_spill] sm:$0xff] %v6044_v40 }
 0x1ea   : > { %v6017_v41 = vmax.f32 %v9197_v30, %v9194_v3  ;;  %9199 = vst [vmem:[#allocation92_spill] sm:$0xff] %v6029_v7  ;;  %v6032_v13 = vld [vmem:[%s2421_s12 + $0x94] sm:$0x1]  ;;  %v9202_v62 = vld [vmem:[#allocation55_spill] sm:$0xff]  ;;  %v9203_v51 = vld [vmem:[#allocation169_spill] sm:$0xff] }
 0x1eb   : > { %9188 = vst [vmem:[#allocation57_spill] sm:$0xff] %v6005_v57  ;;  %v6011_v23 = vmax.f32 %v9192_v17, %v9189_v15  ;;  %9200 = vst [vmem:[#allocation5_spill] sm:$0xff] %v6032_v13  ;;  %v9201_v17 = vld [vmem:[#allocation148_spill] sm:$0xff]  ;;  %v9204_v45 = vmax.f32 %v9202_v62, %v9203_v51  ;;  %v6041_v30 = vld [vmem:[%s2421_s12 + $0x9c] sm:$0x1] }
 0x1ec   : > { %9198 = vst [vmem:[#allocation159_spill] sm:$0xff] %v6017_v41  ;;  %9206 = vst [vmem:[#allocation44_spill] sm:$0xff] %v6041_v30  ;;  %v6047_v3 = vld [vmem:[%s2421_s12 + $0xac] sm:$0x1]  ;;  %v6050_v47 = vld [vmem:[%s2421_s12 + $0xb4] sm:$0x1] }
 0x1ed   : > { %9193 = vst [vmem:[#allocation91_spill] sm:$0xff] %v6011_v23  ;;  %v6038_v27 = vmax.f32 %v9204_v45, %v9201_v17  ;;  %9208 = vst [vmem:[#allocation160_spill] sm:$0xff] %v6047_v3  ;;  %v6056_v17 = vld [vmem:[%s2421_s12 + $0xbc] sm:$0x1]  ;;  %v6059_v51 = vld [vmem:[%s2421_s12 + $0xc4] sm:$0x1] }
 0x1ee   : > { %9209 = vst [vmem:[#allocation95_spill] sm:$0xff] %v6050_v47  ;;  %9210 = vst [vmem:[#allocation6_spill] sm:$0xff] %v6056_v17  ;;  %v6062_v45 = vld [vmem:[%s2421_s12 + $0xcc] sm:$0x1]  ;;  %v6072_v62 = vld [vmem:[%s2421_s12 + $0xdc] sm:$0x1] }
 0x1ef   : > { %9205 = vst [vmem:[#allocation93_spill] sm:$0xff] %v6038_v27  ;;  %9211 = vst [vmem:[#allocation96_spill] sm:$0xff] %v6059_v51  ;;  %v6065_v27 = vld [vmem:[%s2421_s12 + $0xd4] sm:$0x1]  ;;  %v6075_v48 = vld [vmem:[%s2421_s12 + $0xe4] sm:$0x1] }
 0x1f0   : > { %9212 = vst [vmem:[#allocation112_spill] sm:$0xff] %v6062_v45  ;;  %9213 = vst [vmem:[#allocation47_spill] sm:$0xff] %v6065_v27  ;;  %v6081_v26 = vld [vmem:[%s2421_s12 + $0xf4] sm:$0x1]  ;;  %v6088_v15 = vld [vmem:[%s2421_s12 + $0xfc] sm:$0x1] }
 0x1f1   : > { %9214 = vst [vmem:[#allocation117_spill] sm:$0xff] %v6072_v62  ;;  %9215 = vst [vmem:[#allocation97_spill] sm:$0xff] %v6075_v48  ;;  %v6091_v14 = vld [vmem:[%s2421_s12 + $0x104] sm:$0x1]  ;;  %v6094_v24 = vld [vmem:[%s2421_s12 + $0x10c] sm:$0x1] }
 0x1f2   : > { %9217 = vst [vmem:[#allocation161_spill] sm:$0xff] %v6081_v26  ;;  %9218 = vst [vmem:[#allocation7_spill] sm:$0xff] %v6088_v15  ;;  %v6101_v23 = vld [vmem:[%s2421_s12 + $0x114] sm:$0x1]  ;;  %v6104_v41 = vld [vmem:[%s2421_s12 + $0x11c] sm:$0x1] }
 0x1f3   : > { %9219 = vst [vmem:[#allocation98_spill] sm:$0xff] %v6091_v14  ;;  %9220 = vst [vmem:[#allocation119_spill] sm:$0xff] %v6094_v24  ;;  %v6107_v22 = vld [vmem:[%s2421_s12 + $0x124] sm:$0x1]  ;;  %v6114_v55 = vld [vmem:[%s2421_s12 + $0x12c] sm:$0x1]  ;;  %v2062_v44 = vunpack.c.l.bf16 %v6104_v41 }
 0x1f4   : > { %9221 = vst [vmem:[#allocation67_spill] sm:$0xff] %v6101_v23  ;;  %v6117_v57 = vld [vmem:[%s2421_s12 + $0x134] sm:$0x1]  ;;  %v6120_v56 = vld [vmem:[%s2421_s12 + $0x13c] sm:$0x1]  ;;  %v2063_v48 = vunpack.c.l.bf16 %v6107_v22  ;;  %v2064_v62 = vunpack.c.l.bf16 %v6114_v55 }
 0x1f5   : > { %v6127_v58 = vld [vmem:[%s2421_s12 + $0x144] sm:$0x1]  ;;  %v6130_v5 = vld [vmem:[%s2421_s12 + $0x14c] sm:$0x1]  ;;  %v6133_v42 = vld [vmem:[%s2421_s12 + $0x154] sm:$0x1]  ;;  %v2065_v45 = vunpack.c.l.bf16 %v6117_v57  ;;  %v2066_v13 = vunpack.c.l.bf16 %v6120_v56 }
 0x1f6   : > { %v6140_v8 = vld [vmem:[%s2421_s12 + $0x15c] sm:$0x1]  ;;  %v6143_v63 = vld [vmem:[%s2421_s12 + $0x164] sm:$0x1]  ;;  %v6146_v47 = vld [vmem:[%s2421_s12 + $0x16c] sm:$0x1]  ;;  %v2067_v23 = vunpack.c.l.bf16 %v6127_v58  ;;  %v2068_v14 = vunpack.c.l.bf16 %v6130_v5  ;;  %v2069_v41 = vunpack.c.l.bf16 %v6133_v42 }
 0x1f7   : > { %v6153_v4 = vld [vmem:[%s2421_s12 + $0x174] sm:$0x1]  ;;  %v6156_v9 = vld [vmem:[%s2421_s12 + $0x17c] sm:$0x1]  ;;  %v6159_v27 = vld [vmem:[%s2421_s12 + $0x184] sm:$0x1]  ;;  %v2070_v22 = vunpack.c.l.bf16 %v6140_v8  ;;  %v2071_v55 = vunpack.c.l.bf16 %v6143_v63  ;;  %v2072_v57 = vunpack.c.l.bf16 %v6146_v47 }
 0x1f8   : > { %v6166_v40 = vld [vmem:[%s2421_s12 + $0x18c] sm:$0x1]  ;;  %v6169_v32 = vld [vmem:[%s2421_s12 + $0x194] sm:$0x1]  ;;  %v6172_v26 = vld [vmem:[%s2421_s12 + $0x19c] sm:$0x1]  ;;  %v2073_v17 = vunpack.c.l.bf16 %v6153_v4  ;;  %v2074_v30 = vunpack.c.l.bf16 %v6156_v9  ;;  %v2075_v56 = vunpack.c.l.bf16 %v6159_v27  ;;  %v9222_v4 = vunpack.c.l.bf16 %v5916_v19 }
 0x1f9   : > { %v6179_v51 = vld [vmem:[%s2421_s12 + $0x1a4] sm:$0x1]  ;;  %v6182_v3 = vld [vmem:[%s2421_s12 + $0x1ac] sm:$0x1]  ;;  %v6185_v24 = vld [vmem:[%s2421_s12 + $0x1b4] sm:$0x1]  ;;  %v2076_v58 = vunpack.c.l.bf16 %v6166_v40  ;;  %v2077_v5 = vunpack.c.l.bf16 %v6169_v32  ;;  %v2078_v42 = vunpack.c.l.bf16 %v6172_v26  ;;  %v9224_v27 = vunpack.c.l.bf16 %v5890_v39 }
 0x1fa   : > { %v6192_v15 = vld [vmem:[%s2421_s12 + $0x1bc] sm:$0x1]  ;;  %v2079_v7 = vunpack.c.l.bf16 %v6179_v51  ;;  %v2080_v8 = vunpack.c.l.bf16 %v6182_v3  ;;  %v2081_v63 = vunpack.c.l.bf16 %v6185_v24  ;;  %v9225_v32 = vunpack.c.l.bf16 %v5893_v37  ;;  %v9241_v51 = vld [vmem:[#allocation92_spill] sm:$0xff] }
 0x1fb   : > { %v2082_v47 = vunpack.c.l.bf16 %v6192_v15  ;;  %v9223_v2 = vld [vmem:[#allocation37_spill] sm:$0xff]  ;;  %v6215_v40 = vmax.f32 %v5702_v0, %v9224_v27  ;;  %v9226_v3 = vunpack.c.l.bf16 %v5919_v10  ;;  %v9227_v19 = vunpack.c.l.bf16 %v5922_v60  ;;  %v9240_v15 = vld [vmem:[#allocation75_spill] sm:$0xff] }
 0x1fc   : > { %v6210_v9 = vmax.f32 %v9223_v2, %v9222_v4  ;;  %v6220_v26 = vmax.f32 %v5707_v11, %v9225_v32  ;;  %v9228_v39 = vunpack.c.l.bf16 %v5945_v49  ;;  %v9229_v37 = vunpack.c.l.bf16 %v5948_v54  ;;  %v9243_v4 = vld [vmem:[#allocation149_spill] sm:$0xff]  ;;  %v9246_v32 = vld [vmem:[#allocation76_spill] sm:$0xff] }
 0x1fd   : > { %v6225_v24 = vmax.f32 %v5712_v29, %v9226_v3  ;;  %v6230_v2 = vmax.f32 %v5717_v43, %v9227_v19  ;;  %v9230_v10 = vunpack.c.l.bf16 %v5951_v31  ;;  %v9231_v60 = vunpack.c.l.bf16 %v5954_v21  ;;  %v9244_v27 = vld [vmem:[#allocation5_spill] sm:$0xff]  ;;  %v9247_v3 = vld [vmem:[#allocation44_spill] sm:$0xff]  ;;  %v9249_v19 = vld [vmem:[#allocation66_spill] sm:$0xff] }
 0x1fe   : > { %v6235_v0 = vmax.f32 %v5722_v18, %v9228_v39  ;;  %v6240_v11 = vmax.f32 %v5727_v38, %v9229_v37  ;;  %v9232_v49 = vunpack.c.l.bf16 %v5957_v34  ;;  %v9233_v54 = vunpack.c.l.bf16 %v5960_v52  ;;  %v9250_v39 = vld [vmem:[#allocation94_spill] sm:$0xff]  ;;  %v9252_v37 = vld [vmem:[#allocation77_spill] sm:$0xff] }
 0x1ff   : > { %v6245_v29 = vmax.f32 %v5732_v1, %v9230_v10  ;;  %v6250_v43 = vmax.f32 %v5737_v36, %v9231_v60  ;;  %v9234_v31 = vunpack.c.l.bf16 %v5987_v25  ;;  %v9235_v21 = vunpack.c.l.bf16 %v5990_v59  ;;  %v9253_v60 = vld [vmem:[#allocation160_spill] sm:$0xff] }
 0x200   : > { %v6255_v18 = vmax.f32 %v5742_v12, %v9232_v49  ;;  %v6260_v38 = vmax.f32 %v5747_v16, %v9233_v54  ;;  %v9236_v34 = vunpack.c.l.bf16 %v5993_v20  ;;  %v9237_v52 = vunpack.c.l.bf16 %v6020_v35  ;;  %v9255_v54 = vld [vmem:[#allocation151_spill] sm:$0xff] }
 0x201   : > { %v6265_v1 = vmax.f32 %v5752_v33, %v9234_v31  ;;  %v6270_v36 = vmax.f32 %v5757_v6, %v9235_v21  ;;  %v9238_v25 = vunpack.c.l.bf16 %v6023_v53  ;;  %v9239_v59 = vunpack.c.l.bf16 %v6026_v50  ;;  %v9256_v21 = vld [vmem:[#allocation95_spill] sm:$0xff] }
 0x202   : > { %v6275_v12 = vmax.f32 %v5762_v46, %v9236_v34  ;;  %v6280_v16 = vmax.f32 %v5767_v61, %v9237_v52  ;;  %v9242_v20 = vunpack.c.l.bf16 %v9241_v51  ;;  %v9245_v35 = vunpack.c.l.bf16 %v9244_v27  ;;  %v9258_v52 = vld [vmem:[#allocation64_spill] sm:$0xff] }
 0x203   : > { %v6285_v33 = vmax.f32 %v5772_v28, %v9238_v25  ;;  %v6290_v6 = vmax.f32 %v9240_v15, %v9239_v59  ;;  %v9248_v53 = vunpack.c.l.bf16 %v9247_v3  ;;  %v9251_v50 = vunpack.c.l.bf16 %v9250_v39  ;;  %v9259_v59 = vld [vmem:[#allocation6_spill] sm:$0xff]  ;;  %v9261_v51 = vld [vmem:[#allocation40_spill] sm:$0xff] }
 0x204   : > { %v6295_v46 = vmax.f32 %v9243_v4, %v9242_v20  ;;  %v6300_v61 = vmax.f32 %v9246_v32, %v9245_v35  ;;  %v9254_v49 = vunpack.c.l.bf16 %v9253_v60  ;;  %v9257_v34 = vunpack.c.l.bf16 %v9256_v21  ;;  %v9262_v4 = vld [vmem:[#allocation96_spill] sm:$0xff]  ;;  %v9264_v35 = vld [vmem:[#allocation54_spill] sm:$0xff]  ;;  %v9271_v60 = vld [vmem:[#allocation41_spill] sm:$0xff] }
 0x205   : > { %v6305_v28 = vmax.f32 %v9249_v19, %v9248_v53  ;;  %v6310_v10 = vmax.f32 %v9252_v37, %v9251_v50  ;;  %v9260_v15 = vunpack.c.l.bf16 %v9259_v59  ;;  %v9263_v27 = vunpack.c.l.bf16 %v9262_v4  ;;  %v9266_v3 = vld [vmem:[#allocation112_spill] sm:$0xff]  ;;  %v9268_v19 = vld [vmem:[#allocation153_spill] sm:$0xff]  ;;  %v9269_v50 = vld [vmem:[#allocation47_spill] sm:$0xff] }
 0x206   : > { %v6315_v31 = vmax.f32 %v9255_v54, %v9254_v49  ;;  %v6320_v25 = vmax.f32 %v9258_v52, %v9257_v34  ;;  %v9267_v53 = vunpack.c.l.bf16 %v9266_v3  ;;  %v9270_v37 = vunpack.c.l.bf16 %v9269_v50  ;;  %v9273_v54 = vld [vmem:[#allocation117_spill] sm:$0xff]  ;;  %v9275_v34 = vld [vmem:[#allocation78_spill] sm:$0xff]  ;;  %v9283_v3 = vld [vmem:[#allocation79_spill] sm:$0xff] }
 0x207   : > { %v6325_v20 = vmax.f32 %v9261_v51, %v9260_v15  ;;  %v6330_v32 = vmax.f32 %v9264_v35, %v9263_v27  ;;  %v9274_v21 = vunpack.c.l.bf16 %v9273_v54  ;;  %v9277_v59 = vld [vmem:[#allocation97_spill] sm:$0xff]  ;;  %v9279_v51 = vld [vmem:[#allocation154_spill] sm:$0xff] }
 0x208   : > { %v6335_v39 = vmax.f32 %v9268_v19, %v9267_v53  ;;  %v6340_v49 = vmax.f32 %v9271_v60, %v9270_v37  ;;  %v9278_v15 = vunpack.c.l.bf16 %v9277_v59  ;;  %v9281_v27 = vld [vmem:[#allocation118_spill] sm:$0xff]  ;;  %v9285_v19 = vld [vmem:[#allocation161_spill] sm:$0xff]  ;;  %v9288_v60 = vld [vmem:[#allocation7_spill] sm:$0xff] }
 0x209   : > { %9265 = vst [vmem:[#allocation10_spill] sm:$0xff] %v6330_v32  ;;  %v6345_v52 = vmax.f32 %v9275_v34, %v9274_v21  ;;  %v9282_v35 = vunpack.c.l.bf16 %v9281_v27  ;;  %v9286_v50 = vunpack.c.l.bf16 %v9285_v19  ;;  %v9287_v32 = vld [vmem:[#allocation70_spill] sm:$0xff]  ;;  %v9289_v54 = vunpack.c.l.bf16 %v9288_v60 }
 0x20a   : > { %9272 = vst [vmem:[#allocation99_spill] sm:$0xff] %v6340_v49  ;;  %v6350_v4 = vmax.f32 %v9279_v51, %v9278_v15  ;;  %v9290_v49 = vld [vmem:[#allocation80_spill] sm:$0xff]  ;;  %v9292_v34 = vld [vmem:[#allocation98_spill] sm:$0xff]  ;;  %v9295_v51 = vld [vmem:[#allocation119_spill] sm:$0xff] }
 0x20b   : > { %9276 = vst [vmem:[#allocation122_spill] sm:$0xff] %v6345_v52  ;;  %v6355_v53 = vmax.f32 %v9283_v3, %v9282_v35  ;;  %v6360_v37 = vmax.f32 %v9287_v32, %v9286_v50  ;;  %v6365_v21 = vmax.f32 %v9290_v49, %v9289_v54  ;;  %v9293_v59 = vunpack.c.l.bf16 %v9292_v34  ;;  %v9294_v52 = vld [vmem:[#allocation155_spill] sm:$0xff]  ;;  %v9301_v50 = vld [vmem:[#allocation82_spill] sm:$0xff]  ;;  %v9302_v49 = vld [vmem:[#allocation156_spill] sm:$0xff] }
 0x20c   : > { %9280 = vst [vmem:[#allocation48_spill] sm:$0xff] %v6350_v4  ;;  %v9296_v27 = vunpack.c.l.bf16 %v9295_v51  ;;  %v9297_v4 = vld [vmem:[#allocation81_spill] sm:$0xff]  ;;  %v9298_v3 = vld [vmem:[#allocation67_spill] sm:$0xff]  ;;  %v6383_v60 = vmax.f32 %v9301_v50, %v2062_v44  ;;  %v6386_v54 = vmax.f32 %v9302_v49, %v2063_v48  ;;  %v9305_v51 = vld [vmem:[#allocation84_spill] sm:$0xff] }
 0x20d   : > { %9284 = vst [vmem:[#allocation11_spill] sm:$0xff] %v6355_v53  ;;  %9291 = vst [vmem:[#allocation100_spill] sm:$0xff] %v6365_v21  ;;  %v6370_v15 = vmax.f32 %v9294_v52, %v9293_v59  ;;  %v9299_v19 = vunpack.c.l.bf16 %v9298_v3  ;;  %v9300_v53 = vld [vmem:[#allocation42_spill] sm:$0xff]  ;;  %v9303_v34 = vld [vmem:[#allocation83_spill] sm:$0xff] }
 0x20e   : > { %v6375_v35 = vmax.f32 %v9297_v4, %v9296_v27  ;;  %v6389_v21 = vmax.f32 %v9303_v34, %v2064_v62  ;;  %v9304_v52 = vld [vmem:[#allocation2_spill] sm:$0xff]  ;;  %v6395_v4 = vmax.f32 %v9305_v51, %v2066_v13  ;;  %v9306_v27 = vld [vmem:[#allocation56_spill] sm:$0xff]  ;;  %v9308_v44 = vld [vmem:[#allocation157_spill] sm:$0xff] }
 0x20f   : > { %v6380_v32 = vmax.f32 %v9300_v53, %v9299_v19  ;;  %v6392_v59 = vmax.f32 %v9304_v52, %v2065_v45  ;;  %v6398_v3 = vmax.f32 %v9306_v27, %v2067_v23  ;;  %v9307_v53 = vld [vmem:[#allocation85_spill] sm:$0xff]  ;;  %v6404_v50 = vmax.f32 %v9308_v44, %v2069_v41  ;;  %v9309_v48 = vld [vmem:[#allocation86_spill] sm:$0xff]  ;;  %v9310_v62 = vld [vmem:[#allocation3_spill] sm:$0xff] }
 0x210   : > { %v6401_v19 = vmax.f32 %v9307_v53, %v2068_v14  ;;  %v6407_v49 = vmax.f32 %v9309_v48, %v2070_v22  ;;  %v6410_v34 = vmax.f32 %v9310_v62, %v2071_v55  ;;  %v9311_v45 = vld [vmem:[#allocation87_spill] sm:$0xff]  ;;  %v9313_v23 = vld [vmem:[#allocation88_spill] sm:$0xff]  ;;  %v9314_v14 = vld [vmem:[#allocation158_spill] sm:$0xff] }
 0x211   : > { %v6413_v52 = vmax.f32 %v9311_v45, %v2072_v57  ;;  %v9312_v13 = vld [vmem:[#allocation43_spill] sm:$0xff]  ;;  %v6419_v27 = vmax.f32 %v9313_v23, %v2074_v30  ;;  %v6422_v53 = vmax.f32 %v9314_v14, %v2075_v56  ;;  %v9315_v41 = vld [vmem:[#allocation89_spill] sm:$0xff]  ;;  %v9316_v22 = vld [vmem:[#allocation4_spill] sm:$0xff] }
 0x212   : > { %v6416_v51 = vmax.f32 %v9312_v13, %v2073_v17  ;;  %v6425_v44 = vmax.f32 %v9315_v41, %v2076_v58  ;;  %v6428_v48 = vmax.f32 %v9316_v22, %v2077_v5  ;;  %v9317_v55 = vld [vmem:[#allocation90_spill] sm:$0xff]  ;;  %v9318_v57 = vld [vmem:[#allocation57_spill] sm:$0xff]  ;;  %v9319_v17 = vld [vmem:[#allocation91_spill] sm:$0xff]  ;;  %v2195_v58 = vrot.slane %v6215_v40, 7 }
 0x213   : > { %v6431_v62 = vmax.f32 %v9317_v55, %v2078_v42  ;;  %v6434_v45 = vmax.f32 %v9318_v57, %v2079_v7  ;;  %v6437_v13 = vmax.f32 %v9319_v17, %v2080_v8  ;;  %v9320_v30 = vld [vmem:[#allocation159_spill] sm:$0xff]  ;;  %v9321_v56 = vld [vmem:[#allocation93_spill] sm:$0xff]  ;;  %v2198_v5 = vrot.slane %v6220_v26, 6 }
 0x214   : > { %v6440_v23 = vmax.f32 %v9320_v30, %v2081_v63  ;;  %v6443_v14 = vmax.f32 %v9321_v56, %v2082_v47  ;;  %v2201_v42 = vrot.slane %v6225_v24, 5  ;;  %v2204_v7 = vrot.slane %v6230_v2, 4 }
 0x215   : > { %v2197_v8 = vsel %vm2196_vm0, %v2195_v58, %v6210_v9  ;;  %v2207_v63 = vrot.slane %v6235_v0, 3  ;;  %v2210_v40 = vrot.slane %v6240_v11, 2  ;;  %v2213_v26 = vrot.slane %v6245_v29, 1 }
 0x216   : > { %v2200_v47 = vsel %vm2199_vm1, %v2198_v5, %v2197_v8  ;;  %v2216_v2 = vrot.slane %v6255_v18, 7  ;;  %v2218_v41 = vrot.slane %v6260_v38, 6  ;;  %v2220_v0 = vrot.slane %v6265_v1, 5 }
 0x217   : > { %v2203_v24 = vsel %vm2202_vm2, %v2201_v42, %v2200_v47  ;;  %v2222_v22 = vrot.slane %v6270_v36, 4  ;;  %v2224_v55 = vrot.slane %v6275_v12, 3  ;;  %v2226_v57 = vrot.slane %v6280_v16, 2 }
 0x218   : > { %v2206_v9 = vsel %vm2205_vm3, %v2204_v7, %v2203_v24  ;;  %v2217_v29 = vsel %vm2196_vm0, %v2216_v2, %v6250_v43  ;;  %v2228_v17 = vrot.slane %v6285_v33, 1  ;;  %v2230_v1 = vrot.slane %v6295_v46, 7 }
 0x219   : > { %v2209_v11 = vsel %vm2208_vm4, %v2207_v63, %v2206_v9  ;;  %v2219_v38 = vsel %vm2199_vm1, %v2218_v41, %v2217_v29  ;;  %v2232_v36 = vrot.slane %v6300_v61, 6  ;;  %v2234_v16 = vrot.slane %v6305_v28, 5  ;;  %v9326_v41 = vld [vmem:[#allocation11_spill] sm:$0xff] }
 0x21a   : > { %v2212_v18 = vsel %vm2211_vm5, %v2210_v40, %v2209_v11  ;;  %v2221_v43 = vsel %vm2202_vm2, %v2220_v0, %v2219_v38  ;;  %v2236_v33 = vrot.slane %v6310_v10, 4  ;;  %v2231_v56 = vsel %vm2196_vm0, %v2230_v1, %v6290_v6  ;;  %v9322_v6 = vld [vmem:[#allocation99_spill] sm:$0xff]  ;;  %v9324_v40 = vld [vmem:[#allocation10_spill] sm:$0xff]  ;;  %v9327_v11 = vld [vmem:[#allocation100_spill] sm:$0xff] }
 0x21b   : > { %v6476_v12 = vsel %vm2214_vm6, %v2213_v26, %v2212_v18  ;;  %v2223_v30 = vsel %vm2205_vm3, %v2222_v22, %v2221_v43  ;;  %v2238_v58 = vrot.slane %v6315_v31, 3  ;;  %v2240_v46 = vrot.slane %v6320_v25, 2  ;;  %v9323_v31 = vld [vmem:[#allocation122_spill] sm:$0xff]  ;;  %v9325_v26 = vld [vmem:[#allocation48_spill] sm:$0xff] }
 0x21c   : > { %v2225_v61 = vsel %vm2208_vm4, %v2224_v55, %v2223_v30  ;;  %v2233_v5 = vsel %vm2199_vm1, %v2232_v36, %v2231_v56  ;;  %v2242_v42 = vrot.slane %v6325_v20, 1  ;;  %v2244_v7 = vrot.slane %v6335_v39, 7  ;;  %2308 = vst.msk [vmem:[%s121_s17] sm:$0xff] %vm2307_vm7, %v6476_v12 }
 0x21d   : > { %v2227_v28 = vsel %vm2211_vm5, %v2226_v57, %v2225_v61  ;;  %v2235_v10 = vsel %vm2202_vm2, %v2234_v16, %v2233_v5  ;;  %v2246_v8 = vrot.slane %v9322_v6, 6  ;;  %v2248_v63 = vrot.slane %v9323_v31, 5 }
 0x21e   : > { %v2229_v25 = vsel %vm2214_vm6, %v2228_v17, %v2227_v28  ;;  %v2237_v47 = vsel %vm2205_vm3, %v2236_v33, %v2235_v10  ;;  %v2245_v20 = vsel %vm2196_vm0, %v2244_v7, %v9324_v40  ;;  %v2250_v39 = vrot.slane %v9325_v26, 4 }
 0x21f   : > { %v2239_v24 = vsel %vm2208_vm4, %v2238_v58, %v2237_v47  ;;  %v2247_v2 = vsel %vm2199_vm1, %v2246_v8, %v2245_v20  ;;  %v2252_v9 = vrot.slane %v9326_v41, 3  ;;  %v2254_v0 = vrot.slane %v6360_v37, 2  ;;  %2309 = vst.msk [vmem:[%s121_s17 + $0x8] sm:$0xff] %vm2307_vm7, %v2229_v25 }
 0x220   : > { %v2241_v22 = vsel %vm2211_vm5, %v2240_v46, %v2239_v24  ;;  %v2249_v55 = vsel %vm2202_vm2, %v2248_v63, %v2247_v2  ;;  %v2256_v29 = vrot.slane %v9327_v11, 1  ;;  %v2258_v57 = vrot.slane %v6375_v35, 7 }
 0x221   : > { %v2243_v17 = vsel %vm2214_vm6, %v2242_v42, %v2241_v22  ;;  %v2251_v18 = vsel %vm2205_vm3, %v2250_v39, %v2249_v55  ;;  %v2260_v38 = vrot.slane %v6380_v32, 6  ;;  %v2262_v37 = vrot.slane %v6383_v60, 5 }
 0x222   : > { %v2253_v1 = vsel %vm2208_vm4, %v2252_v9, %v2251_v18  ;;  %v2259_v36 = vsel %vm2196_vm0, %v2258_v57, %v6370_v15  ;;  %v2264_v43 = vrot.slane %v6386_v54, 4  ;;  %v2266_v35 = vrot.slane %v6389_v21, 3  ;;  %2310 = vst.msk [vmem:[%s121_s17 + $0x10] sm:$0xff] %vm2307_vm7, %v2243_v17 }
 0x223   : > { %v2255_v16 = vsel %vm2211_vm5, %v2254_v0, %v2253_v1  ;;  %v2261_v33 = vsel %vm2199_vm1, %v2260_v38, %v2259_v36  ;;  %v2268_v30 = vrot.slane %v6392_v59, 2  ;;  %v2270_v56 = vrot.slane %v6395_v4, 1 }
 0x224   : > { %v2257_v32 = vsel %vm2214_vm6, %v2256_v29, %v2255_v16  ;;  %v2263_v60 = vsel %vm2202_vm2, %v2262_v37, %v2261_v33  ;;  %v2272_v58 = vrot.slane %v6401_v19, 7  ;;  %v2274_v15 = vrot.slane %v6404_v50, 6 }
 0x225   : > { %v2265_v54 = vsel %vm2205_vm3, %v2264_v43, %v2263_v60  ;;  %v2276_v21 = vrot.slane %v6407_v49, 5  ;;  %v2278_v46 = vrot.slane %v6410_v34, 4  ;;  %v2280_v61 = vrot.slane %v6413_v52, 3  ;;  %2311 = vst.msk [vmem:[%s121_s17 + $0x18] sm:$0xff] %vm2307_vm7, %v2257_v32 }
 0x226   : > { %v2267_v59 = vsel %vm2208_vm4, %v2266_v35, %v2265_v54  ;;  %v2273_v4 = vsel %vm2196_vm0, %v2272_v58, %v6398_v3  ;;  %v2282_v5 = vrot.slane %v6416_v51, 2  ;;  %v2284_v19 = vrot.slane %v6419_v27, 1 }
 0x227   : > { %v2269_v50 = vsel %vm2211_vm5, %v2268_v30, %v2267_v59  ;;  %v2275_v42 = vsel %vm2199_vm1, %v2274_v15, %v2273_v4  ;;  %v2286_v7 = vrot.slane %v6425_v44, 7  ;;  %v2288_v49 = vrot.slane %v6428_v48, 6 }
 0x228   : > { %v2271_v34 = vsel %vm2214_vm6, %v2270_v56, %v2269_v50  ;;  %v2277_v3 = vsel %vm2202_vm2, %v2276_v21, %v2275_v42  ;;  %v2290_v52 = vrot.slane %v6431_v62, 5  ;;  %v2292_v51 = vrot.slane %v6434_v45, 4 }
 0x229   : > { %v2279_v27 = vsel %vm2205_vm3, %v2278_v46, %v2277_v3  ;;  %v2287_v28 = vsel %vm2196_vm0, %v2286_v7, %v6422_v53  ;;  %v2294_v44 = vrot.slane %v6437_v13, 3  ;;  %v2296_v6 = vrot.slane %v6440_v23, 2  ;;  %2312 = vst.msk [vmem:[%s121_s17 + $0x20] sm:$0xff] %vm2307_vm7, %v2271_v34 }
 0x22a   : > { %v2281_v48 = vsel %vm2208_vm4, %v2280_v61, %v2279_v27  ;;  %v2289_v10 = vsel %vm2199_vm1, %v2288_v49, %v2287_v28  ;;  %v2298_v45 = vrot.slane %v6443_v14, 1 }
 0x22b   : > { %v2283_v8 = vsel %vm2211_vm5, %v2282_v5, %v2281_v48  ;;  %v2291_v62 = vsel %vm2202_vm2, %v2290_v52, %v2289_v10 }
 0x22c   : > { %v2285_v53 = vsel %vm2214_vm6, %v2284_v19, %v2283_v8  ;;  %v2293_v13 = vsel %vm2205_vm3, %v2292_v51, %v2291_v62 }
 0x22d   : > { %v2295_v31 = vsel %vm2208_vm4, %v2294_v44, %v2293_v13  ;;  %2313 = vst.msk [vmem:[%s121_s17 + $0x28] sm:$0xff] %vm2307_vm7, %v2285_v53 }
 0x22e   : > { %v2297_v23 = vsel %vm2211_vm5, %v2296_v6, %v2295_v31 }
 0x22f   : > { %v2299_v63 = vsel %vm2214_vm6, %v2298_v45, %v2297_v23 }
 0x230   : > { %2314 = vst.msk [vmem:[%s121_s17 + $0x30] sm:$0xff] %vm2307_vm7, %v2299_v63 }
 0x231 PF: > { %s11_s6 = sadd.s32 1, %s2396_s6  }
 0x232   : > { %p8_p5 = scmp.ge.s32.totalorder %s11_s6, 4  }
 0x234   :  { %10 = sbr.rel (!%p8_p5) target bundleno = 1 (0x1), region = 54 }

</bundles_post_ra>
